<compile_context>
chip_gen: v6e
topology: v6e:2x2x1
jax: 0.10.0
libtpu: 0.0.40
codegen_flags: <defaults>
</compile_context>

<pallas_src>
import jax
import jax.numpy as jnp
from jax import lax
from jax.experimental import pallas as pl
from jax.experimental.pallas import tpu as pltpu


LANE = 128


def _round_up(x, m):
    return ((x + m - 1) // m) * m


# ----------------------------- Pallas kernels ------------------------------ #

def _input_proj_kernel(x_ref, w_f_ref, w_b_ref, b_f_ref, b_b_ref,
                       gf_ref, gb_ref):
    """Hoisted input projection for BOTH directions over ALL timesteps.

    x_ref:    (T*B, nIn)
    w_*_ref:  (nIn, 4*Hp)   gate-padded, pre-transposed input weights
    b_*_ref:  (1,   4*Hp)   gate-padded fused biases (b_ih + b_hh)
    g*_ref:   (T*B, 4*Hp)   per-timestep input contribution to the gates
    """
    x = x_ref[...]
    gf_ref[...] = (
        jnp.dot(x, w_f_ref[...], preferred_element_type=jnp.float32)
        + b_f_ref[...])
    gb_ref[...] = (
        jnp.dot(x, w_b_ref[...], preferred_element_type=jnp.float32)
        + b_b_ref[...])


def _bilstm_fused_kernel(gi_f_ref, gi_b_ref, w_hh_f_ref, w_hh_b_ref,
                         w_emb_f_ref, w_emb_b_ref, b_emb_ref, out_ref):
    """Fused bidirectional LSTM recurrence + output embedding (one invocation).

    gi_*_ref:    (T, B, 4*Hp)  precomputed input-gate contributions (incl. bias)
    w_hh_*_ref:  (Hp, 4*Hp)    gate-padded recurrent weights (pre-transposed)
    w_emb_*_ref: (Hp, nOutP)   per-direction half of the embedding weight
    b_emb_ref:   (1, 1, nOutP) embedding bias
    out_ref:     (T, B, nOutP) lane-dense (padded) output slab
    """
    T, B = gi_f_ref.shape[0], gi_f_ref.shape[1]
    Hp = w_hh_f_ref.shape[0]

    w_hh_f = w_hh_f_ref[...]
    w_hh_b = w_hh_b_ref[...]
    w_emb_f = w_emb_f_ref[...]
    w_emb_b = w_emb_b_ref[...]

    # Initialize output with the embedding bias; the loop accumulates each
    # direction's contribution into its rows.
    out_ref[...] = jnp.broadcast_to(b_emb_ref[...], out_ref.shape)

    def lstm_cell(gates, c):
        # Gate blocks are 128-lane aligned (Hp = 128*k): pure VPU + EUP work.
        i = jax.nn.sigmoid(gates[:, 0 * Hp:1 * Hp])
        f = jax.nn.sigmoid(gates[:, 1 * Hp:2 * Hp])
        g = jnp.tanh(gates[:, 2 * Hp:3 * Hp])
        o = jax.nn.sigmoid(gates[:, 3 * Hp:4 * Hp])
        c_new = f * c + i * g
        h_new = o * jnp.tanh(c_new)
        return h_new, c_new

    def step(s, carry):
        h_f, c_f, h_b, c_b = carry
        sb = T - 1 - s  # backward direction processes original time T-1-s

        gates_f = gi_f_ref[s] + jnp.dot(
            h_f, w_hh_f, preferred_element_type=jnp.float32)
        gates_b = gi_b_ref[sb] + jnp.dot(
            h_b, w_hh_b, preferred_element_type=jnp.float32)

        h_f, c_f = lstm_cell(gates_f, c_f)
        h_b, c_b = lstm_cell(gates_b, c_b)

        # Fused embedding: out[t] = b_emb + h_f[t] @ W_emb_f + h_b[t] @ W_emb_b
        out_ref[s] = out_ref[s] + jnp.dot(
            h_f, w_emb_f, preferred_element_type=jnp.float32)
        out_ref[sb] = out_ref[sb] + jnp.dot(
            h_b, w_emb_b, preferred_element_type=jnp.float32)

        return h_f, c_f, h_b, c_b

    zeros = jnp.zeros((B, Hp), jnp.float32)
    lax.fori_loop(0, T, step, (zeros, zeros, zeros, zeros), unroll=True)


# --------------------------- parameter preparation -------------------------- #

def _prep_direction(w_ih, w_hh, b_ih, b_hh, Hp):
    """Transpose + zero-pad one direction's LSTM weights to lane-aligned gates."""
    H4, nIn = w_ih.shape
    H = H4 // 4
    # (nIn, 4, H) -> pad each gate block to Hp lanes -> (nIn, 4*Hp)
    w_ih_p = jnp.pad(w_ih.T.reshape(nIn, 4, H),
                     ((0, 0), (0, 0), (0, Hp - H))).reshape(nIn, 4 * Hp)
    # (H, 4, H) -> pad rows to Hp and each gate block to Hp -> (Hp, 4*Hp)
    w_hh_p = jnp.pad(w_hh.T.reshape(H, 4, H),
                     ((0, Hp - H), (0, 0), (0, Hp - H))).reshape(Hp, 4 * Hp)
    b_p = jnp.pad((b_ih + b_hh).reshape(4, H),
                  ((0, 0), (0, Hp - H))).reshape(1, 4 * Hp)
    return w_ih_p, w_hh_p, b_p


def _prep_embedding(w_emb, b_emb, H, Hp, nOutP):
    """Split Linear(2H, nOut) into per-direction halves, pad to lane widths."""
    nOut = w_emb.shape[0]
    w_f = jnp.pad(w_emb[:, :H].T, ((0, Hp - H), (0, nOutP - nOut)))
    w_b = jnp.pad(w_emb[:, H:].T, ((0, Hp - H), (0, nOutP - nOut)))
    b = jnp.pad(b_emb, (0, nOutP - nOut)).reshape(1, 1, nOutP)
    return w_f, w_b, b


# ------------------------------ JAX wrapper -------------------------------- #

@jax.jit
def bidirectional_lstm(x, params):
    """Forward pass equivalent to the PyTorch BidirectionalLSTM module.

    x: (T, B, nIn) f32 (time-major, matching nn.LSTM batch_first=False).
    Returns (T, B, nOut) f32.
    """
    T, B, nIn = x.shape
    H = params["w_hh_f"].shape[1]
    nOut = params["w_emb"].shape[0]
    Hp = _round_up(H, LANE)
    nOutP = _round_up(nOut, LANE)
    H4p = 4 * Hp

    w_ih_f, w_hh_f, b_f = _prep_direction(
        params["w_ih_f"], params["w_hh_f"],
        params["b_ih_f"], params["b_hh_f"], Hp)
    w_ih_b, w_hh_b, b_b = _prep_direction(
        params["w_ih_b"], params["w_hh_b"],
        params["b_ih_b"], params["b_hh_b"], Hp)
    w_emb_f, w_emb_b, b_emb = _prep_embedding(
        params["w_emb"], params["b_emb"], H, Hp, nOutP)

    vmem = pl.BlockSpec(memory_space=pltpu.MemorySpace.VMEM)

    # 1) Hoisted input projection: one big matmul per direction, all timesteps.
    x2d = x.reshape(T * B, nIn)
    gi_f2d, gi_b2d = pl.pallas_call(
        _input_proj_kernel,
        out_shape=(jax.ShapeDtypeStruct((T * B, H4p), jnp.float32),
                   jax.ShapeDtypeStruct((T * B, H4p), jnp.float32)),
        in_specs=[vmem, vmem, vmem, vmem, vmem],
        out_specs=(vmem, vmem),
    )(x2d, w_ih_f, w_ih_b, b_f, b_b)
    gi_f = gi_f2d.reshape(T, B, H4p)
    gi_b = gi_b2d.reshape(T, B, H4p)

    # 2) Fused bidirectional recurrence + embedding, single kernel invocation
    #    (no per-timestep grid steps, no HBM concatenate between directions).
    out_p = pl.pallas_call(
        _bilstm_fused_kernel,
        out_shape=jax.ShapeDtypeStruct((T, B, nOutP), jnp.float32),
        in_specs=[vmem, vmem, vmem, vmem, vmem, vmem, vmem],
        out_specs=vmem,
    )(gi_f, gi_b, w_hh_f, w_hh_b, w_emb_f, w_emb_b, b_emb)

    # Slice the lane-dense slab back to the logical output width.
    return out_p[:, :, :nOut]


# ------------------------- pure-JAX reference check ------------------------- #

def _lstm_ref_dir(x, w_ih, w_hh, b_ih, b_hh, reverse):
    T, B, _ = x.shape
    H = w_hh.shape[1]
    xs = x[::-1] if reverse else x

    def step(carry, xt):
        h, c = carry
        gates = xt @ w_ih.T + h @ w_hh.T + b_ih + b_hh
        i = jax.nn.sigmoid(gates[:, 0 * H:1 * H])
        f = jax.nn.sigmoid(gates[:, 1 * H:2 * H])
        g = jnp.tanh(gates[:, 2 * H:3 * H])
        o = jax.nn.sigmoid(gates[:, 3 * H:4 * H])
        c_new = f * c + i * g
        h_new = o * jnp.tanh(c_new)
        return (h_new, c_new), h_new

    init = (jnp.zeros((B, H), jnp.float32), jnp.zeros((B, H), jnp.float32))
    _, hs = lax.scan(step, init, xs)
    return hs[::-1] if reverse else hs


def _reference(x, params):
    hf = _lstm_ref_dir(x, params["w_ih_f"], params["w_hh_f"],
                       params["b_ih_f"], params["b_hh_f"], False)
    hb = _lstm_ref_dir(x, params["w_ih_b"], params["w_hh_b"],
                       params["b_ih_b"], params["b_hh_b"], True)
    rec = jnp.concatenate([hf, hb], axis=-1)
    T, B, H2 = rec.shape
    out = rec.reshape(T * B, H2) @ params["w_emb"].T + params["b_emb"]
    return out.reshape(T, B, -1)


# ----------------------------------- main ----------------------------------- #

if __name__ == "__main__":
    T, B, nIn, nHidden, nOut = 8, 2, 16, 32, 8

    key = jax.random.PRNGKey(0)
    keys = jax.random.split(key, 12)
    k = 1.0 / jnp.sqrt(jnp.float32(nHidden))  # PyTorch default init scale

    def u(kk, shape):
        return jax.random.uniform(kk, shape, jnp.float32, minval=-k, maxval=k)

    params = {
        # forward direction
        "w_ih_f": u(keys[0], (4 * nHidden, nIn)),
        "w_hh_f": u(keys[1], (4 * nHidden, nHidden)),
        "b_ih_f": u(keys[2], (4 * nHidden,)),
        "b_hh_f": u(keys[3], (4 * nHidden,)),
        # backward direction
        "w_ih_b": u(keys[4], (4 * nHidden, nIn)),
        "w_hh_b": u(keys[5], (4 * nHidden, nHidden)),
        "b_ih_b": u(keys[6], (4 * nHidden,)),
        "b_hh_b": u(keys[7], (4 * nHidden,)),
        # embedding Linear(2H, nOut)
        "w_emb": u(keys[8], (nOut, 2 * nHidden)),
        "b_emb": u(keys[9], (nOut,)),
    }

    x = jax.random.normal(keys[10], (T, B, nIn), jnp.float32)

    out = bidirectional_lstm(x, params)
    out = jax.block_until_ready(out)
    assert out.shape == (T, B, nOut), out.shape

    ref = jax.block_until_ready(_reference(x, params))
    assert jnp.allclose(out, ref, atol=2e-4, rtol=2e-4), float(
        jnp.max(jnp.abs(out - ref)))

    print("KERNEL_OK")
</pallas_src>

<mosaic_0001>
module attributes {stable_mosaic.version = 11 : i64} {
  func.func @_input_proj_kernel(%arg0: memref<16x16xf32, #tpu.memory_space<vmem>>, %arg1: memref<16x512xf32, #tpu.memory_space<vmem>>, %arg2: memref<16x512xf32, #tpu.memory_space<vmem>>, %arg3: memref<1x512xf32, #tpu.memory_space<vmem>>, %arg4: memref<1x512xf32, #tpu.memory_space<vmem>>, %arg5: memref<16x512xf32, #tpu.memory_space<vmem>>, %arg6: memref<16x512xf32, #tpu.memory_space<vmem>>) attributes {dimension_semantics = [], scalar_prefetch = 0 : i64, scratch_operands = 0 : i64, tpu.core_type = #tpu.core_type<tc>} {
    %c0 = arith.constant 0 : index
    %c0_0 = arith.constant 0 : index
    %0 = vector.load %arg0[%c0, %c0_0] : memref<16x16xf32, #tpu.memory_space<vmem>>, vector<16x16xf32>
    %c0_1 = arith.constant 0 : index
    %c0_2 = arith.constant 0 : index
    %1 = vector.load %arg1[%c0_1, %c0_2] : memref<16x512xf32, #tpu.memory_space<vmem>>, vector<16x512xf32>
    %cst = arith.constant dense<0.000000e+00> : vector<16x512xf32>
    %2 = tpu.matmul %0, %1, %cst {dimension_numbers = #tpu.dot_dimension_numbers<[1], [0], [0], [1], [0, 0, 1, 1], [], []>} : vector<16x16xf32>, vector<16x512xf32>, vector<16x512xf32> -> vector<16x512xf32>
    %c0_3 = arith.constant 0 : index
    %c0_4 = arith.constant 0 : index
    %3 = vector.load %arg3[%c0_3, %c0_4] : memref<1x512xf32, #tpu.memory_space<vmem>>, vector<1x512xf32>
    %4 = vector.broadcast %3 : vector<1x512xf32> to vector<16x512xf32>
    %5 = arith.addf %2, %4 : vector<16x512xf32>
    %c0_5 = arith.constant 0 : index
    %c0_6 = arith.constant 0 : index
    %6 = vector.load %arg5[%c0_5, %c0_6] : memref<16x512xf32, #tpu.memory_space<vmem>>, vector<16x512xf32>
    tpu.vector_store %arg5[%c0_5, %c0_6], %5 {strides = array<i32>} : memref<16x512xf32, #tpu.memory_space<vmem>>, vector<16x512xf32>,
    %c0_7 = arith.constant 0 : index
    %c0_8 = arith.constant 0 : index
    %7 = vector.load %arg2[%c0_7, %c0_8] : memref<16x512xf32, #tpu.memory_space<vmem>>, vector<16x512xf32>
    %cst_9 = arith.constant dense<0.000000e+00> : vector<16x512xf32>
    %8 = tpu.matmul %0, %7, %cst_9 {dimension_numbers = #tpu.dot_dimension_numbers<[1], [0], [0], [1], [0, 0, 1, 1], [], []>} : vector<16x16xf32>, vector<16x512xf32>, vector<16x512xf32> -> vector<16x512xf32>
    %c0_10 = arith.constant 0 : index
    %c0_11 = arith.constant 0 : index
    %9 = vector.load %arg4[%c0_10, %c0_11] : memref<1x512xf32, #tpu.memory_space<vmem>>, vector<1x512xf32>
    %10 = vector.broadcast %9 : vector<1x512xf32> to vector<16x512xf32>
    %11 = arith.addf %8, %10 : vector<16x512xf32>
    %c0_12 = arith.constant 0 : index
    %c0_13 = arith.constant 0 : index
    %12 = vector.load %arg6[%c0_12, %c0_13] : memref<16x512xf32, #tpu.memory_space<vmem>>, vector<16x512xf32>
    tpu.vector_store %arg6[%c0_12, %c0_13], %11 {strides = array<i32>} : memref<16x512xf32, #tpu.memory_space<vmem>>, vector<16x512xf32>,
    return
  }
}

module attributes {stable_mosaic.version = 11 : i64} {
  func.func @_bilstm_fused_kernel(%arg0: memref<8x2x512xf32, #tpu.memory_space<vmem>>, %arg1: memref<8x2x512xf32, #tpu.memory_space<vmem>>, %arg2: memref<128x512xf32, #tpu.memory_space<vmem>>, %arg3: memref<128x512xf32, #tpu.memory_space<vmem>>, %arg4: memref<128x128xf32, #tpu.memory_space<vmem>>, %arg5: memref<128x128xf32, #tpu.memory_space<vmem>>, %arg6: memref<1x1x128xf32, #tpu.memory_space<vmem>>, %arg7: memref<8x2x128xf32, #tpu.memory_space<vmem>>) attributes {dimension_semantics = [], scalar_prefetch = 0 : i64, scratch_operands = 0 : i64, tpu.core_type = #tpu.core_type<tc>} {
    %c0 = arith.constant 0 : index
    %c0_0 = arith.constant 0 : index
    %0 = vector.load %arg2[%c0, %c0_0] : memref<128x512xf32, #tpu.memory_space<vmem>>, vector<128x512xf32>
    %c0_1 = arith.constant 0 : index
    %c0_2 = arith.constant 0 : index
    %1 = vector.load %arg3[%c0_1, %c0_2] : memref<128x512xf32, #tpu.memory_space<vmem>>, vector<128x512xf32>
    %c0_3 = arith.constant 0 : index
    %c0_4 = arith.constant 0 : index
    %2 = vector.load %arg4[%c0_3, %c0_4] : memref<128x128xf32, #tpu.memory_space<vmem>>, vector<128x128xf32>
    %c0_5 = arith.constant 0 : index
    %c0_6 = arith.constant 0 : index
    %3 = vector.load %arg5[%c0_5, %c0_6] : memref<128x128xf32, #tpu.memory_space<vmem>>, vector<128x128xf32>
    %c0_7 = arith.constant 0 : index
    %c0_8 = arith.constant 0 : index
    %c0_9 = arith.constant 0 : index
    %4 = vector.load %arg6[%c0_7, %c0_8, %c0_9] : memref<1x1x128xf32, #tpu.memory_space<vmem>>, vector<1x1x128xf32>
    %5 = vector.shape_cast %4 : vector<1x1x128xf32> to vector<1x1x128xf32>
    %6 = vector.broadcast %5 : vector<1x1x128xf32> to vector<8x2x128xf32>
    %c0_10 = arith.constant 0 : index
    %c0_11 = arith.constant 0 : index
    %c0_12 = arith.constant 0 : index
    %7 = vector.load %arg7[%c0_10, %c0_11, %c0_12] : memref<8x2x128xf32, #tpu.memory_space<vmem>>, vector<8x2x128xf32>
    tpu.vector_store %arg7[%c0_10, %c0_11, %c0_12], %6 {strides = array<i32>} : memref<8x2x128xf32, #tpu.memory_space<vmem>>, vector<8x2x128xf32>,
    %cst = arith.constant 0.000000e+00 : f32
    %8 = vector.broadcast %cst : f32 to vector<2x128xf32>
    %c0_i32 = arith.constant 0 : i32
    %c7_i32 = arith.constant 7 : i32
    %9 = arith.subi %c7_i32, %c0_i32 : i32
    %10 = arith.index_cast %c0_i32 : i32 to index
    %c0_13 = arith.constant 0 : index
    %c0_14 = arith.constant 0 : index
    %11 = vector.load %arg0[%10, %c0_13, %c0_14] : memref<8x2x512xf32, #tpu.memory_space<vmem>>, vector<1x2x512xf32>
    %12 = vector.shape_cast %11 : vector<1x2x512xf32> to vector<2x512xf32>
    %cst_15 = arith.constant dense<0.000000e+00> : vector<2x512xf32>
    %13 = tpu.matmul %8, %0, %cst_15 {dimension_numbers = #tpu.dot_dimension_numbers<[1], [0], [0], [1], [0, 0, 1, 1], [], []>} : vector<2x128xf32>, vector<128x512xf32>, vector<2x512xf32> -> vector<2x512xf32>
    %14 = arith.addf %12, %13 : vector<2x512xf32>
    %15 = arith.index_cast %9 : i32 to index
    %c0_16 = arith.constant 0 : index
    %c0_17 = arith.constant 0 : index
    %16 = vector.load %arg1[%15, %c0_16, %c0_17] : memref<8x2x512xf32, #tpu.memory_space<vmem>>, vector<1x2x512xf32>
    %17 = vector.shape_cast %16 : vector<1x2x512xf32> to vector<2x512xf32>
    %cst_18 = arith.constant dense<0.000000e+00> : vector<2x512xf32>
    %18 = tpu.matmul %8, %1, %cst_18 {dimension_numbers = #tpu.dot_dimension_numbers<[1], [0], [0], [1], [0, 0, 1, 1], [], []>} : vector<2x128xf32>, vector<128x512xf32>, vector<2x512xf32> -> vector<2x512xf32>
    %19 = arith.addf %17, %18 : vector<2x512xf32>
    %20 = vector.extract_strided_slice %14 {offsets = [0, 0], sizes = [2, 128], strides = [1, 1]} : vector<2x512xf32> to vector<2x128xf32>
    %21 = arith.negf %20 : vector<2x128xf32>
    %22 = math.exp %21 : vector<2x128xf32>
    %cst_19 = arith.constant 1.000000e+00 : f32
    %23 = vector.broadcast %cst_19 : f32 to vector<2x128xf32>
    %24 = arith.addf %23, %22 : vector<2x128xf32>
    %25 = arith.divf %23, %24 : vector<2x128xf32>
    %26 = vector.extract_strided_slice %14 {offsets = [0, 128], sizes = [2, 128], strides = [1, 1]} : vector<2x512xf32> to vector<2x128xf32>
    %27 = arith.negf %26 : vector<2x128xf32>
    %28 = math.exp %27 : vector<2x128xf32>
    %cst_20 = arith.constant 1.000000e+00 : f32
    %29 = vector.broadcast %cst_20 : f32 to vector<2x128xf32>
    %30 = arith.addf %29, %28 : vector<2x128xf32>
    %31 = arith.divf %29, %30 : vector<2x128xf32>
    %32 = vector.extract_strided_slice %14 {offsets = [0, 256], sizes = [2, 128], strides = [1, 1]} : vector<2x512xf32> to vector<2x128xf32>
    %33 = math.tanh %32 : vector<2x128xf32>
    %34 = vector.extract_strided_slice %14 {offsets = [0, 384], sizes = [2, 128], strides = [1, 1]} : vector<2x512xf32> to vector<2x128xf32>
    %35 = arith.negf %34 : vector<2x128xf32>
    %36 = math.exp %35 : vector<2x128xf32>
    %cst_21 = arith.constant 1.000000e+00 : f32
    %37 = vector.broadcast %cst_21 : f32 to vector<2x128xf32>
    %38 = arith.addf %37, %36 : vector<2x128xf32>
    %39 = arith.divf %37, %38 : vector<2x128xf32>
    %40 = arith.mulf %31, %8 : vector<2x128xf32>
    %41 = arith.mulf %25, %33 : vector<2x128xf32>
    %42 = arith.addf %40, %41 : vector<2x128xf32>
    %43 = math.tanh %42 : vector<2x128xf32>
    %44 = arith.mulf %39, %43 : vector<2x128xf32>
    %45 = vector.extract_strided_slice %19 {offsets = [0, 0], sizes = [2, 128], strides = [1, 1]} : vector<2x512xf32> to vector<2x128xf32>
    %46 = arith.negf %45 : vector<2x128xf32>
    %47 = math.exp %46 : vector<2x128xf32>
    %cst_22 = arith.constant 1.000000e+00 : f32
    %48 = vector.broadcast %cst_22 : f32 to vector<2x128xf32>
    %49 = arith.addf %48, %47 : vector<2x128xf32>
    %50 = arith.divf %48, %49 : vector<2x128xf32>
    %51 = vector.extract_strided_slice %19 {offsets = [0, 128], sizes = [2, 128], strides = [1, 1]} : vector<2x512xf32> to vector<2x128xf32>
    %52 = arith.negf %51 : vector<2x128xf32>
    %53 = math.exp %52 : vector<2x128xf32>
    %cst_23 = arith.constant 1.000000e+00 : f32
    %54 = vector.broadcast %cst_23 : f32 to vector<2x128xf32>
    %55 = arith.addf %54, %53 : vector<2x128xf32>
    %56 = arith.divf %54, %55 : vector<2x128xf32>
    %57 = vector.extract_strided_slice %19 {offsets = [0, 256], sizes = [2, 128], strides = [1, 1]} : vector<2x512xf32> to vector<2x128xf32>
    %58 = math.tanh %57 : vector<2x128xf32>
    %59 = vector.extract_strided_slice %19 {offsets = [0, 384], sizes = [2, 128], strides = [1, 1]} : vector<2x512xf32> to vector<2x128xf32>
    %60 = arith.negf %59 : vector<2x128xf32>
    %61 = math.exp %60 : vector<2x128xf32>
    %cst_24 = arith.constant 1.000000e+00 : f32
    %62 = vector.broadcast %cst_24 : f32 to vector<2x128xf32>
    %63 = arith.addf %62, %61 : vector<2x128xf32>
    %64 = arith.divf %62, %63 : vector<2x128xf32>
    %65 = arith.mulf %56, %8 : vector<2x128xf32>
    %66 = arith.mulf %50, %58 : vector<2x128xf32>
    %67 = arith.addf %65, %66 : vector<2x128xf32>
    %68 = math.tanh %67 : vector<2x128xf32>
    %69 = arith.mulf %64, %68 : vector<2x128xf32>
    %70 = arith.index_cast %c0_i32 : i32 to index
    %c0_25 = arith.constant 0 : index
    %c0_26 = arith.constant 0 : index
    %71 = vector.load %arg7[%70, %c0_25, %c0_26] : memref<8x2x128xf32, #tpu.memory_space<vmem>>, vector<1x2x128xf32>
    %72 = vector.shape_cast %71 : vector<1x2x128xf32> to vector<2x128xf32>
    %cst_27 = arith.constant dense<0.000000e+00> : vector<2x128xf32>
    %73 = tpu.matmul %44, %2, %cst_27 {dimension_numbers = #tpu.dot_dimension_numbers<[1], [0], [0], [1], [0, 0, 1, 1], [], []>} : vector<2x128xf32>, vector<128x128xf32>, vector<2x128xf32> -> vector<2x128xf32>
    %74 = arith.addf %72, %73 : vector<2x128xf32>
    %75 = arith.index_cast %c0_i32 : i32 to index
    %c0_28 = arith.constant 0 : index
    %c0_29 = arith.constant 0 : index
    %76 = vector.load %arg7[%75, %c0_28, %c0_29] : memref<8x2x128xf32, #tpu.memory_space<vmem>>, vector<1x2x128xf32>
    %77 = vector.shape_cast %76 : vector<1x2x128xf32> to vector<2x128xf32>
    %78 = vector.shape_cast %74 : vector<2x128xf32> to vector<1x2x128xf32>
    tpu.vector_store %arg7[%75, %c0_28, %c0_29], %78 {strides = array<i32>} : memref<8x2x128xf32, #tpu.memory_space<vmem>>, vector<1x2x128xf32>,
    %79 = arith.index_cast %9 : i32 to index
    %c0_30 = arith.constant 0 : index
    %c0_31 = arith.constant 0 : index
    %80 = vector.load %arg7[%79, %c0_30, %c0_31] : memref<8x2x128xf32, #tpu.memory_space<vmem>>, vector<1x2x128xf32>
    %81 = vector.shape_cast %80 : vector<1x2x128xf32> to vector<2x128xf32>
    %cst_32 = arith.constant dense<0.000000e+00> : vector<2x128xf32>
    %82 = tpu.matmul %69, %3, %cst_32 {dimension_numbers = #tpu.dot_dimension_numbers<[1], [0], [0], [1], [0, 0, 1, 1], [], []>} : vector<2x128xf32>, vector<128x128xf32>, vector<2x128xf32> -> vector<2x128xf32>
    %83 = arith.addf %81, %82 : vector<2x128xf32>
    %84 = arith.index_cast %9 : i32 to index
    %c0_33 = arith.constant 0 : index
    %c0_34 = arith.constant 0 : index
    %85 = vector.load %arg7[%84, %c0_33, %c0_34] : memref<8x2x128xf32, #tpu.memory_space<vmem>>, vector<1x2x128xf32>
    %86 = vector.shape_cast %85 : vector<1x2x128xf32> to vector<2x128xf32>
    %87 = vector.shape_cast %83 : vector<2x128xf32> to vector<1x2x128xf32>
    tpu.vector_store %arg7[%84, %c0_33, %c0_34], %87 {strides = array<i32>} : memref<8x2x128xf32, #tpu.memory_space<vmem>>, vector<1x2x128xf32>,
    %c1_i32 = arith.constant 1 : i32
    %c7_i32_35 = arith.constant 7 : i32
    %88 = arith.subi %c7_i32_35, %c1_i32 : i32
    %89 = arith.index_cast %c1_i32 : i32 to index
    %c0_36 = arith.constant 0 : index
    %c0_37 = arith.constant 0 : index
    %90 = vector.load %arg0[%89, %c0_36, %c0_37] : memref<8x2x512xf32, #tpu.memory_space<vmem>>, vector<1x2x512xf32>
    %91 = vector.shape_cast %90 : vector<1x2x512xf32> to vector<2x512xf32>
    %cst_38 = arith.constant dense<0.000000e+00> : vector<2x512xf32>
    %92 = tpu.matmul %44, %0, %cst_38 {dimension_numbers = #tpu.dot_dimension_numbers<[1], [0], [0], [1], [0, 0, 1, 1], [], []>} : vector<2x128xf32>, vector<128x512xf32>, vector<2x512xf32> -> vector<2x512xf32>
    %93 = arith.addf %91, %92 : vector<2x512xf32>
    %94 = arith.index_cast %88 : i32 to index
    %c0_39 = arith.constant 0 : index
    %c0_40 = arith.constant 0 : index
    %95 = vector.load %arg1[%94, %c0_39, %c0_40] : memref<8x2x512xf32, #tpu.memory_space<vmem>>, vector<1x2x512xf32>
    %96 = vector.shape_cast %95 : vector<1x2x512xf32> to vector<2x512xf32>
    %cst_41 = arith.constant dense<0.000000e+00> : vector<2x512xf32>
    %97 = tpu.matmul %69, %1, %cst_41 {dimension_numbers = #tpu.dot_dimension_numbers<[1], [0], [0], [1], [0, 0, 1, 1], [], []>} : vector<2x128xf32>, vector<128x512xf32>, vector<2x512xf32> -> vector<2x512xf32>
    %98 = arith.addf %96, %97 : vector<2x512xf32>
    %99 = vector.extract_strided_slice %93 {offsets = [0, 0], sizes = [2, 128], strides = [1, 1]} : vector<2x512xf32> to vector<2x128xf32>
    %100 = arith.negf %99 : vector<2x128xf32>
    %101 = math.exp %100 : vector<2x128xf32>
    %cst_42 = arith.constant 1.000000e+00 : f32
    %102 = vector.broadcast %cst_42 : f32 to vector<2x128xf32>
    %103 = arith.addf %102, %101 : vector<2x128xf32>
    %104 = arith.divf %102, %103 : vector<2x128xf32>
    %105 = vector.extract_strided_slice %93 {offsets = [0, 128], sizes = [2, 128], strides = [1, 1]} : vector<2x512xf32> to vector<2x128xf32>
    %106 = arith.negf %105 : vector<2x128xf32>
    %107 = math.exp %106 : vector<2x128xf32>
    %cst_43 = arith.constant 1.000000e+00 : f32
    %108 = vector.broadcast %cst_43 : f32 to vector<2x128xf32>
    %109 = arith.addf %108, %107 : vector<2x128xf32>
    %110 = arith.divf %108, %109 : vector<2x128xf32>
    %111 = vector.extract_strided_slice %93 {offsets = [0, 256], sizes = [2, 128], strides = [1, 1]} : vector<2x512xf32> to vector<2x128xf32>
    %112 = math.tanh %111 : vector<2x128xf32>
    %113 = vector.extract_strided_slice %93 {offsets = [0, 384], sizes = [2, 128], strides = [1, 1]} : vector<2x512xf32> to vector<2x128xf32>
    %114 = arith.negf %113 : vector<2x128xf32>
    %115 = math.exp %114 : vector<2x128xf32>
    %cst_44 = arith.constant 1.000000e+00 : f32
    %116 = vector.broadcast %cst_44 : f32 to vector<2x128xf32>
    %117 = arith.addf %116, %115 : vector<2x128xf32>
    %118 = arith.divf %116, %117 : vector<2x128xf32>
    %119 = arith.mulf %110, %42 : vector<2x128xf32>
    %120 = arith.mulf %104, %112 : vector<2x128xf32>
    %121 = arith.addf %119, %120 : vector<2x128xf32>
    %122 = math.tanh %121 : vector<2x128xf32>
    %123 = arith.mulf %118, %122 : vector<2x128xf32>
    %124 = vector.extract_strided_slice %98 {offsets = [0, 0], sizes = [2, 128], strides = [1, 1]} : vector<2x512xf32> to vector<2x128xf32>
    %125 = arith.negf %124 : vector<2x128xf32>
    %126 = math.exp %125 : vector<2x128xf32>
    %cst_45 = arith.constant 1.000000e+00 : f32
    %127 = vector.broadcast %cst_45 : f32 to vector<2x128xf32>
    %128 = arith.addf %127, %126 : vector<2x128xf32>
    %129 = arith.divf %127, %128 : vector<2x128xf32>
    %130 = vector.extract_strided_slice %98 {offsets = [0, 128], sizes = [2, 128], strides = [1, 1]} : vector<2x512xf32> to vector<2x128xf32>
    %131 = arith.negf %130 : vector<2x128xf32>
    %132 = math.exp %131 : vector<2x128xf32>
    %cst_46 = arith.constant 1.000000e+00 : f32
    %133 = vector.broadcast %cst_46 : f32 to vector<2x128xf32>
    %134 = arith.addf %133, %132 : vector<2x128xf32>
    %135 = arith.divf %133, %134 : vector<2x128xf32>
    %136 = vector.extract_strided_slice %98 {offsets = [0, 256], sizes = [2, 128], strides = [1, 1]} : vector<2x512xf32> to vector<2x128xf32>
    %137 = math.tanh %136 : vector<2x128xf32>
    %138 = vector.extract_strided_slice %98 {offsets = [0, 384], sizes = [2, 128], strides = [1, 1]} : vector<2x512xf32> to vector<2x128xf32>
    %139 = arith.negf %138 : vector<2x128xf32>
    %140 = math.exp %139 : vector<2x128xf32>
    %cst_47 = arith.constant 1.000000e+00 : f32
    %141 = vector.broadcast %cst_47 : f32 to vector<2x128xf32>
    %142 = arith.addf %141, %140 : vector<2x128xf32>
    %143 = arith.divf %141, %142 : vector<2x128xf32>
    %144 = arith.mulf %135, %67 : vector<2x128xf32>
    %145 = arith.mulf %129, %137 : vector<2x128xf32>
    %146 = arith.addf %144, %145 : vector<2x128xf32>
    %147 = math.tanh %146 : vector<2x128xf32>
    %148 = arith.mulf %143, %147 : vector<2x128xf32>
    %149 = arith.index_cast %c1_i32 : i32 to index
    %c0_48 = arith.constant 0 : index
    %c0_49 = arith.constant 0 : index
    %150 = vector.load %arg7[%149, %c0_48, %c0_49] : memref<8x2x128xf32, #tpu.memory_space<vmem>>, vector<1x2x128xf32>
    %151 = vector.shape_cast %150 : vector<1x2x128xf32> to vector<2x128xf32>
    %cst_50 = arith.constant dense<0.000000e+00> : vector<2x128xf32>
    %152 = tpu.matmul %123, %2, %cst_50 {dimension_numbers = #tpu.dot_dimension_numbers<[1], [0], [0], [1], [0, 0, 1, 1], [], []>} : vector<2x128xf32>, vector<128x128xf32>, vector<2x128xf32> -> vector<2x128xf32>
    %153 = arith.addf %151, %152 : vector<2x128xf32>
    %154 = arith.index_cast %c1_i32 : i32 to index
    %c0_51 = arith.constant 0 : index
    %c0_52 = arith.constant 0 : index
    %155 = vector.load %arg7[%154, %c0_51, %c0_52] : memref<8x2x128xf32, #tpu.memory_space<vmem>>, vector<1x2x128xf32>
    %156 = vector.shape_cast %155 : vector<1x2x128xf32> to vector<2x128xf32>
    %157 = vector.shape_cast %153 : vector<2x128xf32> to vector<1x2x128xf32>
    tpu.vector_store %arg7[%154, %c0_51, %c0_52], %157 {strides = array<i32>} : memref<8x2x128xf32, #tpu.memory_space<vmem>>, vector<1x2x128xf32>,
    %158 = arith.index_cast %88 : i32 to index
    %c0_53 = arith.constant 0 : index
    %c0_54 = arith.constant 0 : index
    %159 = vector.load %arg7[%158, %c0_53, %c0_54] : memref<8x2x128xf32, #tpu.memory_space<vmem>>, vector<1x2x128xf32>
    %160 = vector.shape_cast %159 : vector<1x2x128xf32> to vector<2x128xf32>
    %cst_55 = arith.constant dense<0.000000e+00> : vector<2x128xf32>
    %161 = tpu.matmul %148, %3, %cst_55 {dimension_numbers = #tpu.dot_dimension_numbers<[1], [0], [0], [1], [0, 0, 1, 1], [], []>} : vector<2x128xf32>, vector<128x128xf32>, vector<2x128xf32> -> vector<2x128xf32>
    %162 = arith.addf %160, %161 : vector<2x128xf32>
    %163 = arith.index_cast %88 : i32 to index
    %c0_56 = arith.constant 0 : index
    %c0_57 = arith.constant 0 : index
    %164 = vector.load %arg7[%163, %c0_56, %c0_57] : memref<8x2x128xf32, #tpu.memory_space<vmem>>, vector<1x2x128xf32>
    %165 = vector.shape_cast %164 : vector<1x2x128xf32> to vector<2x128xf32>
    %166 = vector.shape_cast %162 : vector<2x128xf32> to vector<1x2x128xf32>
    tpu.vector_store %arg7[%163, %c0_56, %c0_57], %166 {strides = array<i32>} : memref<8x2x128xf32, #tpu.memory_space<vmem>>, vector<1x2x128xf32>,
    %c2_i32 = arith.constant 2 : i32
    %c7_i32_58 = arith.constant 7 : i32
    %167 = arith.subi %c7_i32_58, %c2_i32 : i32
    %168 = arith.index_cast %c2_i32 : i32 to index
    %c0_59 = arith.constant 0 : index
    %c0_60 = arith.constant 0 : index
    %169 = vector.load %arg0[%168, %c0_59, %c0_60] : memref<8x2x512xf32, #tpu.memory_space<vmem>>, vector<1x2x512xf32>
    %170 = vector.shape_cast %169 : vector<1x2x512xf32> to vector<2x512xf32>
    %cst_61 = arith.constant dense<0.000000e+00> : vector<2x512xf32>
    %171 = tpu.matmul %123, %0, %cst_61 {dimension_numbers = #tpu.dot_dimension_numbers<[1], [0], [0], [1], [0, 0, 1, 1], [], []>} : vector<2x128xf32>, vector<128x512xf32>, vector<2x512xf32> -> vector<2x512xf32>
    %172 = arith.addf %170, %171 : vector<2x512xf32>
    %173 = arith.index_cast %167 : i32 to index
    %c0_62 = arith.constant 0 : index
    %c0_63 = arith.constant 0 : index
    %174 = vector.load %arg1[%173, %c0_62, %c0_63] : memref<8x2x512xf32, #tpu.memory_space<vmem>>, vector<1x2x512xf32>
    %175 = vector.shape_cast %174 : vector<1x2x512xf32> to vector<2x512xf32>
    %cst_64 = arith.constant dense<0.000000e+00> : vector<2x512xf32>
    %176 = tpu.matmul %148, %1, %cst_64 {dimension_numbers = #tpu.dot_dimension_numbers<[1], [0], [0], [1], [0, 0, 1, 1], [], []>} : vector<2x128xf32>, vector<128x512xf32>, vector<2x512xf32> -> vector<2x512xf32>
    %177 = arith.addf %175, %176 : vector<2x512xf32>
    %178 = vector.extract_strided_slice %172 {offsets = [0, 0], sizes = [2, 128], strides = [1, 1]} : vector<2x512xf32> to vector<2x128xf32>
    %179 = arith.negf %178 : vector<2x128xf32>
    %180 = math.exp %179 : vector<2x128xf32>
    %cst_65 = arith.constant 1.000000e+00 : f32
    %181 = vector.broadcast %cst_65 : f32 to vector<2x128xf32>
    %182 = arith.addf %181, %180 : vector<2x128xf32>
    %183 = arith.divf %181, %182 : vector<2x128xf32>
    %184 = vector.extract_strided_slice %172 {offsets = [0, 128], sizes = [2, 128], strides = [1, 1]} : vector<2x512xf32> to vector<2x128xf32>
    %185 = arith.negf %184 : vector<2x128xf32>
    %186 = math.exp %185 : vector<2x128xf32>
    %cst_66 = arith.constant 1.000000e+00 : f32
    %187 = vector.broadcast %cst_66 : f32 to vector<2x128xf32>
    %188 = arith.addf %187, %186 : vector<2x128xf32>
    %189 = arith.divf %187, %188 : vector<2x128xf32>
    %190 = vector.extract_strided_slice %172 {offsets = [0, 256], sizes = [2, 128], strides = [1, 1]} : vector<2x512xf32> to vector<2x128xf32>
    %191 = math.tanh %190 : vector<2x128xf32>
    %192 = vector.extract_strided_slice %172 {offsets = [0, 384], sizes = [2, 128], strides = [1, 1]} : vector<2x512xf32> to vector<2x128xf32>
    %193 = arith.negf %192 : vector<2x128xf32>
    %194 = math.exp %193 : vector<2x128xf32>
    %cst_67 = arith.constant 1.000000e+00 : f32
    %195 = vector.broadcast %cst_67 : f32 to vector<2x128xf32>
    %196 = arith.addf %195, %194 : vector<2x128xf32>
    %197 = arith.divf %195, %196 : vector<2x128xf32>
    %198 = arith.mulf %189, %121 : vector<2x128xf32>
    %199 = arith.mulf %183, %191 : vector<2x128xf32>
    %200 = arith.addf %198, %199 : vector<2x128xf32>
    %201 = math.tanh %200 : vector<2x128xf32>
    %202 = arith.mulf %197, %201 : vector<2x128xf32>
    %203 = vector.extract_strided_slice %177 {offsets = [0, 0], sizes = [2, 128], strides = [1, 1]} : vector<2x512xf32> to vector<2x128xf32>
    %204 = arith.negf %203 : vector<2x128xf32>
    %205 = math.exp %204 : vector<2x128xf32>
    %cst_68 = arith.constant 1.000000e+00 : f32
    %206 = vector.broadcast %cst_68 : f32 to vector<2x128xf32>
    %207 = arith.addf %206, %205 : vector<2x128xf32>
    %208 = arith.divf %206, %207 : vector<2x128xf32>
    %209 = vector.extract_strided_slice %177 {offsets = [0, 128], sizes = [2, 128], strides = [1, 1]} : vector<2x512xf32> to vector<2x128xf32>
    %210 = arith.negf %209 : vector<2x128xf32>
    %211 = math.exp %210 : vector<2x128xf32>
    %cst_69 = arith.constant 1.000000e+00 : f32
    %212 = vector.broadcast %cst_69 : f32 to vector<2x128xf32>
    %213 = arith.addf %212, %211 : vector<2x128xf32>
    %214 = arith.divf %212, %213 : vector<2x128xf32>
    %215 = vector.extract_strided_slice %177 {offsets = [0, 256], sizes = [2, 128], strides = [1, 1]} : vector<2x512xf32> to vector<2x128xf32>
    %216 = math.tanh %215 : vector<2x128xf32>
    %217 = vector.extract_strided_slice %177 {offsets = [0, 384], sizes = [2, 128], strides = [1, 1]} : vector<2x512xf32> to vector<2x128xf32>
    %218 = arith.negf %217 : vector<2x128xf32>
    %219 = math.exp %218 : vector<2x128xf32>
    %cst_70 = arith.constant 1.000000e+00 : f32
    %220 = vector.broadcast %cst_70 : f32 to vector<2x128xf32>
    %221 = arith.addf %220, %219 : vector<2x128xf32>
    %222 = arith.divf %220, %221 : vector<2x128xf32>
    %223 = arith.mulf %214, %146 : vector<2x128xf32>
    %224 = arith.mulf %208, %216 : vector<2x128xf32>
    %225 = arith.addf %223, %224 : vector<2x128xf32>
    %226 = math.tanh %225 : vector<2x128xf32>
    %227 = arith.mulf %222, %226 : vector<2x128xf32>
    %228 = arith.index_cast %c2_i32 : i32 to index
    %c0_71 = arith.constant 0 : index
    %c0_72 = arith.constant 0 : index
    %229 = vector.load %arg7[%228, %c0_71, %c0_72] : memref<8x2x128xf32, #tpu.memory_space<vmem>>, vector<1x2x128xf32>
    %230 = vector.shape_cast %229 : vector<1x2x128xf32> to vector<2x128xf32>
    %cst_73 = arith.constant dense<0.000000e+00> : vector<2x128xf32>
    %231 = tpu.matmul %202, %2, %cst_73 {dimension_numbers = #tpu.dot_dimension_numbers<[1], [0], [0], [1], [0, 0, 1, 1], [], []>} : vector<2x128xf32>, vector<128x128xf32>, vector<2x128xf32> -> vector<2x128xf32>
    %232 = arith.addf %230, %231 : vector<2x128xf32>
    %233 = arith.index_cast %c2_i32 : i32 to index
    %c0_74 = arith.constant 0 : index
    %c0_75 = arith.constant 0 : index
    %234 = vector.load %arg7[%233, %c0_74, %c0_75] : memref<8x2x128xf32, #tpu.memory_space<vmem>>, vector<1x2x128xf32>
    %235 = vector.shape_cast %234 : vector<1x2x128xf32> to vector<2x128xf32>
    %236 = vector.shape_cast %232 : vector<2x128xf32> to vector<1x2x128xf32>
    tpu.vector_store %arg7[%233, %c0_74, %c0_75], %236 {strides = array<i32>} : memref<8x2x128xf32, #tpu.memory_space<vmem>>, vector<1x2x128xf32>,
    %237 = arith.index_cast %167 : i32 to index
    %c0_76 = arith.constant 0 : index
    %c0_77 = arith.constant 0 : index
    %238 = vector.load %arg7[%237, %c0_76, %c0_77] : memref<8x2x128xf32, #tpu.memory_space<vmem>>, vector<1x2x128xf32>
    %239 = vector.shape_cast %238 : vector<1x2x128xf32> to vector<2x128xf32>
    %cst_78 = arith.constant dense<0.000000e+00> : vector<2x128xf32>
    %240 = tpu.matmul %227, %3, %cst_78 {dimension_numbers = #tpu.dot_dimension_numbers<[1], [0], [0], [1], [0, 0, 1, 1], [], []>} : vector<2x128xf32>, vector<128x128xf32>, vector<2x128xf32> -> vector<2x128xf32>
    %241 = arith.addf %239, %240 : vector<2x128xf32>
    %242 = arith.index_cast %167 : i32 to index
    %c0_79 = arith.constant 0 : index
    %c0_80 = arith.constant 0 : index
    %243 = vector.load %arg7[%242, %c0_79, %c0_80] : memref<8x2x128xf32, #tpu.memory_space<vmem>>, vector<1x2x128xf32>
    %244 = vector.shape_cast %243 : vector<1x2x128xf32> to vector<2x128xf32>
    %245 = vector.shape_cast %241 : vector<2x128xf32> to vector<1x2x128xf32>
    tpu.vector_store %arg7[%242, %c0_79, %c0_80], %245 {strides = array<i32>} : memref<8x2x128xf32, #tpu.memory_space<vmem>>, vector<1x2x128xf32>,
    %c3_i32 = arith.constant 3 : i32
    %c7_i32_81 = arith.constant 7 : i32
    %246 = arith.subi %c7_i32_81, %c3_i32 : i32
    %247 = arith.index_cast %c3_i32 : i32 to index
    %c0_82 = arith.constant 0 : index
    %c0_83 = arith.constant 0 : index
    %248 = vector.load %arg0[%247, %c0_82, %c0_83] : memref<8x2x512xf32, #tpu.memory_space<vmem>>, vector<1x2x512xf32>
    %249 = vector.shape_cast %248 : vector<1x2x512xf32> to vector<2x512xf32>
    %cst_84 = arith.constant dense<0.000000e+00> : vector<2x512xf32>
    %250 = tpu.matmul %202, %0, %cst_84 {dimension_numbers = #tpu.dot_dimension_numbers<[1], [0], [0], [1], [0, 0, 1, 1], [], []>} : vector<2x128xf32>, vector<128x512xf32>, vector<2x512xf32> -> vector<2x512xf32>
    %251 = arith.addf %249, %250 : vector<2x512xf32>
    %252 = arith.index_cast %246 : i32 to index
    %c0_85 = arith.constant 0 : index
    %c0_86 = arith.constant 0 : index
    %253 = vector.load %arg1[%252, %c0_85, %c0_86] : memref<8x2x512xf32, #tpu.memory_space<vmem>>, vector<1x2x512xf32>
    %254 = vector.shape_cast %253 : vector<1x2x512xf32> to vector<2x512xf32>
    %cst_87 = arith.constant dense<0.000000e+00> : vector<2x512xf32>
    %255 = tpu.matmul %227, %1, %cst_87 {dimension_numbers = #tpu.dot_dimension_numbers<[1], [0], [0], [1], [0, 0, 1, 1], [], []>} : vector<2x128xf32>, vector<128x512xf32>, vector<2x512xf32> -> vector<2x512xf32>
    %256 = arith.addf %254, %255 : vector<2x512xf32>
    %257 = vector.extract_strided_slice %251 {offsets = [0, 0], sizes = [2, 128], strides = [1, 1]} : vector<2x512xf32> to vector<2x128xf32>
    %258 = arith.negf %257 : vector<2x128xf32>
    %259 = math.exp %258 : vector<2x128xf32>
    %cst_88 = arith.constant 1.000000e+00 : f32
    %260 = vector.broadcast %cst_88 : f32 to vector<2x128xf32>
    %261 = arith.addf %260, %259 : vector<2x128xf32>
    %262 = arith.divf %260, %261 : vector<2x128xf32>
    %263 = vector.extract_strided_slice %251 {offsets = [0, 128], sizes = [2, 128], strides = [1, 1]} : vector<2x512xf32> to vector<2x128xf32>
    %264 = arith.negf %263 : vector<2x128xf32>
    %265 = math.exp %264 : vector<2x128xf32>
    %cst_89 = arith.constant 1.000000e+00 : f32
    %266 = vector.broadcast %cst_89 : f32 to vector<2x128xf32>
    %267 = arith.addf %266, %265 : vector<2x128xf32>
    %268 = arith.divf %266, %267 : vector<2x128xf32>
    %269 = vector.extract_strided_slice %251 {offsets = [0, 256], sizes = [2, 128], strides = [1, 1]} : vector<2x512xf32> to vector<2x128xf32>
    %270 = math.tanh %269 : vector<2x128xf32>
    %271 = vector.extract_strided_slice %251 {offsets = [0, 384], sizes = [2, 128], strides = [1, 1]} : vector<2x512xf32> to vector<2x128xf32>
    %272 = arith.negf %271 : vector<2x128xf32>
    %273 = math.exp %272 : vector<2x128xf32>
    %cst_90 = arith.constant 1.000000e+00 : f32
    %274 = vector.broadcast %cst_90 : f32 to vector<2x128xf32>
    %275 = arith.addf %274, %273 : vector<2x128xf32>
    %276 = arith.divf %274, %275 : vector<2x128xf32>
    %277 = arith.mulf %268, %200 : vector<2x128xf32>
    %278 = arith.mulf %262, %270 : vector<2x128xf32>
    %279 = arith.addf %277, %278 : vector<2x128xf32>
    %280 = math.tanh %279 : vector<2x128xf32>
    %281 = arith.mulf %276, %280 : vector<2x128xf32>
    %282 = vector.extract_strided_slice %256 {offsets = [0, 0], sizes = [2, 128], strides = [1, 1]} : vector<2x512xf32> to vector<2x128xf32>
    %283 = arith.negf %282 : vector<2x128xf32>
    %284 = math.exp %283 : vector<2x128xf32>
    %cst_91 = arith.constant 1.000000e+00 : f32
    %285 = vector.broadcast %cst_91 : f32 to vector<2x128xf32>
    %286 = arith.addf %285, %284 : vector<2x128xf32>
    %287 = arith.divf %285, %286 : vector<2x128xf32>
    %288 = vector.extract_strided_slice %256 {offsets = [0, 128], sizes = [2, 128], strides = [1, 1]} : vector<2x512xf32> to vector<2x128xf32>
    %289 = arith.negf %288 : vector<2x128xf32>
    %290 = math.exp %289 : vector<2x128xf32>
    %cst_92 = arith.constant 1.000000e+00 : f32
    %291 = vector.broadcast %cst_92 : f32 to vector<2x128xf32>
    %292 = arith.addf %291, %290 : vector<2x128xf32>
    %293 = arith.divf %291, %292 : vector<2x128xf32>
    %294 = vector.extract_strided_slice %256 {offsets = [0, 256], sizes = [2, 128], strides = [1, 1]} : vector<2x512xf32> to vector<2x128xf32>
    %295 = math.tanh %294 : vector<2x128xf32>
    %296 = vector.extract_strided_slice %256 {offsets = [0, 384], sizes = [2, 128], strides = [1, 1]} : vector<2x512xf32> to vector<2x128xf32>
    %297 = arith.negf %296 : vector<2x128xf32>
    %298 = math.exp %297 : vector<2x128xf32>
    %cst_93 = arith.constant 1.000000e+00 : f32
    %299 = vector.broadcast %cst_93 : f32 to vector<2x128xf32>
    %300 = arith.addf %299, %298 : vector<2x128xf32>
    %301 = arith.divf %299, %300 : vector<2x128xf32>
    %302 = arith.mulf %293, %225 : vector<2x128xf32>
    %303 = arith.mulf %287, %295 : vector<2x128xf32>
    %304 = arith.addf %302, %303 : vector<2x128xf32>
    %305 = math.tanh %304 : vector<2x128xf32>
    %306 = arith.mulf %301, %305 : vector<2x128xf32>
    %307 = arith.index_cast %c3_i32 : i32 to index
    %c0_94 = arith.constant 0 : index
    %c0_95 = arith.constant 0 : index
    %308 = vector.load %arg7[%307, %c0_94, %c0_95] : memref<8x2x128xf32, #tpu.memory_space<vmem>>, vector<1x2x128xf32>
    %309 = vector.shape_cast %308 : vector<1x2x128xf32> to vector<2x128xf32>
    %cst_96 = arith.constant dense<0.000000e+00> : vector<2x128xf32>
    %310 = tpu.matmul %281, %2, %cst_96 {dimension_numbers = #tpu.dot_dimension_numbers<[1], [0], [0], [1], [0, 0, 1, 1], [], []>} : vector<2x128xf32>, vector<128x128xf32>, vector<2x128xf32> -> vector<2x128xf32>
    %311 = arith.addf %309, %310 : vector<2x128xf32>
    %312 = arith.index_cast %c3_i32 : i32 to index
    %c0_97 = arith.constant 0 : index
    %c0_98 = arith.constant 0 : index
    %313 = vector.load %arg7[%312, %c0_97, %c0_98] : memref<8x2x128xf32, #tpu.memory_space<vmem>>, vector<1x2x128xf32>
    %314 = vector.shape_cast %313 : vector<1x2x128xf32> to vector<2x128xf32>
    %315 = vector.shape_cast %311 : vector<2x128xf32> to vector<1x2x128xf32>
    tpu.vector_store %arg7[%312, %c0_97, %c0_98], %315 {strides = array<i32>} : memref<8x2x128xf32, #tpu.memory_space<vmem>>, vector<1x2x128xf32>,
    %316 = arith.index_cast %246 : i32 to index
    %c0_99 = arith.constant 0 : index
    %c0_100 = arith.constant 0 : index
    %317 = vector.load %arg7[%316, %c0_99, %c0_100] : memref<8x2x128xf32, #tpu.memory_space<vmem>>, vector<1x2x128xf32>
    %318 = vector.shape_cast %317 : vector<1x2x128xf32> to vector<2x128xf32>
    %cst_101 = arith.constant dense<0.000000e+00> : vector<2x128xf32>
    %319 = tpu.matmul %306, %3, %cst_101 {dimension_numbers = #tpu.dot_dimension_numbers<[1], [0], [0], [1], [0, 0, 1, 1], [], []>} : vector<2x128xf32>, vector<128x128xf32>, vector<2x128xf32> -> vector<2x128xf32>
    %320 = arith.addf %318, %319 : vector<2x128xf32>
    %321 = arith.index_cast %246 : i32 to index
    %c0_102 = arith.constant 0 : index
    %c0_103 = arith.constant 0 : index
    %322 = vector.load %arg7[%321, %c0_102, %c0_103] : memref<8x2x128xf32, #tpu.memory_space<vmem>>, vector<1x2x128xf32>
    %323 = vector.shape_cast %322 : vector<1x2x128xf32> to vector<2x128xf32>
    %324 = vector.shape_cast %320 : vector<2x128xf32> to vector<1x2x128xf32>
    tpu.vector_store %arg7[%321, %c0_102, %c0_103], %324 {strides = array<i32>} : memref<8x2x128xf32, #tpu.memory_space<vmem>>, vector<1x2x128xf32>,
    %c4_i32 = arith.constant 4 : i32
    %c7_i32_104 = arith.constant 7 : i32
    %325 = arith.subi %c7_i32_104, %c4_i32 : i32
    %326 = arith.index_cast %c4_i32 : i32 to index
    %c0_105 = arith.constant 0 : index
    %c0_106 = arith.constant 0 : index
    %327 = vector.load %arg0[%326, %c0_105, %c0_106] : memref<8x2x512xf32, #tpu.memory_space<vmem>>, vector<1x2x512xf32>
    %328 = vector.shape_cast %327 : vector<1x2x512xf32> to vector<2x512xf32>
    %cst_107 = arith.constant dense<0.000000e+00> : vector<2x512xf32>
    %329 = tpu.matmul %281, %0, %cst_107 {dimension_numbers = #tpu.dot_dimension_numbers<[1], [0], [0], [1], [0, 0, 1, 1], [], []>} : vector<2x128xf32>, vector<128x512xf32>, vector<2x512xf32> -> vector<2x512xf32>
    %330 = arith.addf %328, %329 : vector<2x512xf32>
    %331 = arith.index_cast %325 : i32 to index
    %c0_108 = arith.constant 0 : index
    %c0_109 = arith.constant 0 : index
    %332 = vector.load %arg1[%331, %c0_108, %c0_109] : memref<8x2x512xf32, #tpu.memory_space<vmem>>, vector<1x2x512xf32>
    %333 = vector.shape_cast %332 : vector<1x2x512xf32> to vector<2x512xf32>
    %cst_110 = arith.constant dense<0.000000e+00> : vector<2x512xf32>
    %334 = tpu.matmul %306, %1, %cst_110 {dimension_numbers = #tpu.dot_dimension_numbers<[1], [0], [0], [1], [0, 0, 1, 1], [], []>} : vector<2x128xf32>, vector<128x512xf32>, vector<2x512xf32> -> vector<2x512xf32>
    %335 = arith.addf %333, %334 : vector<2x512xf32>
    %336 = vector.extract_strided_slice %330 {offsets = [0, 0], sizes = [2, 128], strides = [1, 1]} : vector<2x512xf32> to vector<2x128xf32>
    %337 = arith.negf %336 : vector<2x128xf32>
    %338 = math.exp %337 : vector<2x128xf32>
    %cst_111 = arith.constant 1.000000e+00 : f32
    %339 = vector.broadcast %cst_111 : f32 to vector<2x128xf32>
    %340 = arith.addf %339, %338 : vector<2x128xf32>
    %341 = arith.divf %339, %340 : vector<2x128xf32>
    %342 = vector.extract_strided_slice %330 {offsets = [0, 128], sizes = [2, 128], strides = [1, 1]} : vector<2x512xf32> to vector<2x128xf32>
    %343 = arith.negf %342 : vector<2x128xf32>
    %344 = math.exp %343 : vector<2x128xf32>
    %cst_112 = arith.constant 1.000000e+00 : f32
    %345 = vector.broadcast %cst_112 : f32 to vector<2x128xf32>
    %346 = arith.addf %345, %344 : vector<2x128xf32>
    %347 = arith.divf %345, %346 : vector<2x128xf32>
    %348 = vector.extract_strided_slice %330 {offsets = [0, 256], sizes = [2, 128], strides = [1, 1]} : vector<2x512xf32> to vector<2x128xf32>
    %349 = math.tanh %348 : vector<2x128xf32>
    %350 = vector.extract_strided_slice %330 {offsets = [0, 384], sizes = [2, 128], strides = [1, 1]} : vector<2x512xf32> to vector<2x128xf32>
    %351 = arith.negf %350 : vector<2x128xf32>
    %352 = math.exp %351 : vector<2x128xf32>
    %cst_113 = arith.constant 1.000000e+00 : f32
    %353 = vector.broadcast %cst_113 : f32 to vector<2x128xf32>
    %354 = arith.addf %353, %352 : vector<2x128xf32>
    %355 = arith.divf %353, %354 : vector<2x128xf32>
    %356 = arith.mulf %347, %279 : vector<2x128xf32>
    %357 = arith.mulf %341, %349 : vector<2x128xf32>
    %358 = arith.addf %356, %357 : vector<2x128xf32>
    %359 = math.tanh %358 : vector<2x128xf32>
    %360 = arith.mulf %355, %359 : vector<2x128xf32>
    %361 = vector.extract_strided_slice %335 {offsets = [0, 0], sizes = [2, 128], strides = [1, 1]} : vector<2x512xf32> to vector<2x128xf32>
    %362 = arith.negf %361 : vector<2x128xf32>
    %363 = math.exp %362 : vector<2x128xf32>
    %cst_114 = arith.constant 1.000000e+00 : f32
    %364 = vector.broadcast %cst_114 : f32 to vector<2x128xf32>
    %365 = arith.addf %364, %363 : vector<2x128xf32>
    %366 = arith.divf %364, %365 : vector<2x128xf32>
    %367 = vector.extract_strided_slice %335 {offsets = [0, 128], sizes = [2, 128], strides = [1, 1]} : vector<2x512xf32> to vector<2x128xf32>
    %368 = arith.negf %367 : vector<2x128xf32>
    %369 = math.exp %368 : vector<2x128xf32>
    %cst_115 = arith.constant 1.000000e+00 : f32
    %370 = vector.broadcast %cst_115 : f32 to vector<2x128xf32>
    %371 = arith.addf %370, %369 : vector<2x128xf32>
    %372 = arith.divf %370, %371 : vector<2x128xf32>
    %373 = vector.extract_strided_slice %335 {offsets = [0, 256], sizes = [2, 128], strides = [1, 1]} : vector<2x512xf32> to vector<2x128xf32>
    %374 = math.tanh %373 : vector<2x128xf32>
    %375 = vector.extract_strided_slice %335 {offsets = [0, 384], sizes = [2, 128], strides = [1, 1]} : vector<2x512xf32> to vector<2x128xf32>
    %376 = arith.negf %375 : vector<2x128xf32>
    %377 = math.exp %376 : vector<2x128xf32>
    %cst_116 = arith.constant 1.000000e+00 : f32
    %378 = vector.broadcast %cst_116 : f32 to vector<2x128xf32>
    %379 = arith.addf %378, %377 : vector<2x128xf32>
    %380 = arith.divf %378, %379 : vector<2x128xf32>
    %381 = arith.mulf %372, %304 : vector<2x128xf32>
    %382 = arith.mulf %366, %374 : vector<2x128xf32>
    %383 = arith.addf %381, %382 : vector<2x128xf32>
    %384 = math.tanh %383 : vector<2x128xf32>
    %385 = arith.mulf %380, %384 : vector<2x128xf32>
    %386 = arith.index_cast %c4_i32 : i32 to index
    %c0_117 = arith.constant 0 : index
    %c0_118 = arith.constant 0 : index
    %387 = vector.load %arg7[%386, %c0_117, %c0_118] : memref<8x2x128xf32, #tpu.memory_space<vmem>>, vector<1x2x128xf32>
    %388 = vector.shape_cast %387 : vector<1x2x128xf32> to vector<2x128xf32>
    %cst_119 = arith.constant dense<0.000000e+00> : vector<2x128xf32>
    %389 = tpu.matmul %360, %2, %cst_119 {dimension_numbers = #tpu.dot_dimension_numbers<[1], [0], [0], [1], [0, 0, 1, 1], [], []>} : vector<2x128xf32>, vector<128x128xf32>, vector<2x128xf32> -> vector<2x128xf32>
    %390 = arith.addf %388, %389 : vector<2x128xf32>
    %391 = arith.index_cast %c4_i32 : i32 to index
    %c0_120 = arith.constant 0 : index
    %c0_121 = arith.constant 0 : index
    %392 = vector.load %arg7[%391, %c0_120, %c0_121] : memref<8x2x128xf32, #tpu.memory_space<vmem>>, vector<1x2x128xf32>
    %393 = vector.shape_cast %392 : vector<1x2x128xf32> to vector<2x128xf32>
    %394 = vector.shape_cast %390 : vector<2x128xf32> to vector<1x2x128xf32>
    tpu.vector_store %arg7[%391, %c0_120, %c0_121], %394 {strides = array<i32>} : memref<8x2x128xf32, #tpu.memory_space<vmem>>, vector<1x2x128xf32>,
    %395 = arith.index_cast %325 : i32 to index
    %c0_122 = arith.constant 0 : index
    %c0_123 = arith.constant 0 : index
    %396 = vector.load %arg7[%395, %c0_122, %c0_123] : memref<8x2x128xf32, #tpu.memory_space<vmem>>, vector<1x2x128xf32>
    %397 = vector.shape_cast %396 : vector<1x2x128xf32> to vector<2x128xf32>
    %cst_124 = arith.constant dense<0.000000e+00> : vector<2x128xf32>
    %398 = tpu.matmul %385, %3, %cst_124 {dimension_numbers = #tpu.dot_dimension_numbers<[1], [0], [0], [1], [0, 0, 1, 1], [], []>} : vector<2x128xf32>, vector<128x128xf32>, vector<2x128xf32> -> vector<2x128xf32>
    %399 = arith.addf %397, %398 : vector<2x128xf32>
    %400 = arith.index_cast %325 : i32 to index
    %c0_125 = arith.constant 0 : index
    %c0_126 = arith.constant 0 : index
    %401 = vector.load %arg7[%400, %c0_125, %c0_126] : memref<8x2x128xf32, #tpu.memory_space<vmem>>, vector<1x2x128xf32>
    %402 = vector.shape_cast %401 : vector<1x2x128xf32> to vector<2x128xf32>
    %403 = vector.shape_cast %399 : vector<2x128xf32> to vector<1x2x128xf32>
    tpu.vector_store %arg7[%400, %c0_125, %c0_126], %403 {strides = array<i32>} : memref<8x2x128xf32, #tpu.memory_space<vmem>>, vector<1x2x128xf32>,
    %c5_i32 = arith.constant 5 : i32
    %c7_i32_127 = arith.constant 7 : i32
    %404 = arith.subi %c7_i32_127, %c5_i32 : i32
    %405 = arith.index_cast %c5_i32 : i32 to index
    %c0_128 = arith.constant 0 : index
    %c0_129 = arith.constant 0 : index
    %406 = vector.load %arg0[%405, %c0_128, %c0_129] : memref<8x2x512xf32, #tpu.memory_space<vmem>>, vector<1x2x512xf32>
    %407 = vector.shape_cast %406 : vector<1x2x512xf32> to vector<2x512xf32>
    %cst_130 = arith.constant dense<0.000000e+00> : vector<2x512xf32>
    %408 = tpu.matmul %360, %0, %cst_130 {dimension_numbers = #tpu.dot_dimension_numbers<[1], [0], [0], [1], [0, 0, 1, 1], [], []>} : vector<2x128xf32>, vector<128x512xf32>, vector<2x512xf32> -> vector<2x512xf32>
    %409 = arith.addf %407, %408 : vector<2x512xf32>
    %410 = arith.index_cast %404 : i32 to index
    %c0_131 = arith.constant 0 : index
    %c0_132 = arith.constant 0 : index
    %411 = vector.load %arg1[%410, %c0_131, %c0_132] : memref<8x2x512xf32, #tpu.memory_space<vmem>>, vector<1x2x512xf32>
    %412 = vector.shape_cast %411 : vector<1x2x512xf32> to vector<2x512xf32>
    %cst_133 = arith.constant dense<0.000000e+00> : vector<2x512xf32>
    %413 = tpu.matmul %385, %1, %cst_133 {dimension_numbers = #tpu.dot_dimension_numbers<[1], [0], [0], [1], [0, 0, 1, 1], [], []>} : vector<2x128xf32>, vector<128x512xf32>, vector<2x512xf32> -> vector<2x512xf32>
    %414 = arith.addf %412, %413 : vector<2x512xf32>
    %415 = vector.extract_strided_slice %409 {offsets = [0, 0], sizes = [2, 128], strides = [1, 1]} : vector<2x512xf32> to vector<2x128xf32>
    %416 = arith.negf %415 : vector<2x128xf32>
    %417 = math.exp %416 : vector<2x128xf32>
    %cst_134 = arith.constant 1.000000e+00 : f32
    %418 = vector.broadcast %cst_134 : f32 to vector<2x128xf32>
    %419 = arith.addf %418, %417 : vector<2x128xf32>
    %420 = arith.divf %418, %419 : vector<2x128xf32>
    %421 = vector.extract_strided_slice %409 {offsets = [0, 128], sizes = [2, 128], strides = [1, 1]} : vector<2x512xf32> to vector<2x128xf32>
    %422 = arith.negf %421 : vector<2x128xf32>
    %423 = math.exp %422 : vector<2x128xf32>
    %cst_135 = arith.constant 1.000000e+00 : f32
    %424 = vector.broadcast %cst_135 : f32 to vector<2x128xf32>
    %425 = arith.addf %424, %423 : vector<2x128xf32>
    %426 = arith.divf %424, %425 : vector<2x128xf32>
    %427 = vector.extract_strided_slice %409 {offsets = [0, 256], sizes = [2, 128], strides = [1, 1]} : vector<2x512xf32> to vector<2x128xf32>
    %428 = math.tanh %427 : vector<2x128xf32>
    %429 = vector.extract_strided_slice %409 {offsets = [0, 384], sizes = [2, 128], strides = [1, 1]} : vector<2x512xf32> to vector<2x128xf32>
    %430 = arith.negf %429 : vector<2x128xf32>
    %431 = math.exp %430 : vector<2x128xf32>
    %cst_136 = arith.constant 1.000000e+00 : f32
    %432 = vector.broadcast %cst_136 : f32 to vector<2x128xf32>
    %433 = arith.addf %432, %431 : vector<2x128xf32>
    %434 = arith.divf %432, %433 : vector<2x128xf32>
    %435 = arith.mulf %426, %358 : vector<2x128xf32>
    %436 = arith.mulf %420, %428 : vector<2x128xf32>
    %437 = arith.addf %435, %436 : vector<2x128xf32>
    %438 = math.tanh %437 : vector<2x128xf32>
    %439 = arith.mulf %434, %438 : vector<2x128xf32>
    %440 = vector.extract_strided_slice %414 {offsets = [0, 0], sizes = [2, 128], strides = [1, 1]} : vector<2x512xf32> to vector<2x128xf32>
    %441 = arith.negf %440 : vector<2x128xf32>
    %442 = math.exp %441 : vector<2x128xf32>
    %cst_137 = arith.constant 1.000000e+00 : f32
    %443 = vector.broadcast %cst_137 : f32 to vector<2x128xf32>
    %444 = arith.addf %443, %442 : vector<2x128xf32>
    %445 = arith.divf %443, %444 : vector<2x128xf32>
    %446 = vector.extract_strided_slice %414 {offsets = [0, 128], sizes = [2, 128], strides = [1, 1]} : vector<2x512xf32> to vector<2x128xf32>
    %447 = arith.negf %446 : vector<2x128xf32>
    %448 = math.exp %447 : vector<2x128xf32>
    %cst_138 = arith.constant 1.000000e+00 : f32
    %449 = vector.broadcast %cst_138 : f32 to vector<2x128xf32>
    %450 = arith.addf %449, %448 : vector<2x128xf32>
    %451 = arith.divf %449, %450 : vector<2x128xf32>
    %452 = vector.extract_strided_slice %414 {offsets = [0, 256], sizes = [2, 128], strides = [1, 1]} : vector<2x512xf32> to vector<2x128xf32>
    %453 = math.tanh %452 : vector<2x128xf32>
    %454 = vector.extract_strided_slice %414 {offsets = [0, 384], sizes = [2, 128], strides = [1, 1]} : vector<2x512xf32> to vector<2x128xf32>
    %455 = arith.negf %454 : vector<2x128xf32>
    %456 = math.exp %455 : vector<2x128xf32>
    %cst_139 = arith.constant 1.000000e+00 : f32
    %457 = vector.broadcast %cst_139 : f32 to vector<2x128xf32>
    %458 = arith.addf %457, %456 : vector<2x128xf32>
    %459 = arith.divf %457, %458 : vector<2x128xf32>
    %460 = arith.mulf %451, %383 : vector<2x128xf32>
    %461 = arith.mulf %445, %453 : vector<2x128xf32>
    %462 = arith.addf %460, %461 : vector<2x128xf32>
    %463 = math.tanh %462 : vector<2x128xf32>
    %464 = arith.mulf %459, %463 : vector<2x128xf32>
    %465 = arith.index_cast %c5_i32 : i32 to index
    %c0_140 = arith.constant 0 : index
    %c0_141 = arith.constant 0 : index
    %466 = vector.load %arg7[%465, %c0_140, %c0_141] : memref<8x2x128xf32, #tpu.memory_space<vmem>>, vector<1x2x128xf32>
    %467 = vector.shape_cast %466 : vector<1x2x128xf32> to vector<2x128xf32>
    %cst_142 = arith.constant dense<0.000000e+00> : vector<2x128xf32>
    %468 = tpu.matmul %439, %2, %cst_142 {dimension_numbers = #tpu.dot_dimension_numbers<[1], [0], [0], [1], [0, 0, 1, 1], [], []>} : vector<2x128xf32>, vector<128x128xf32>, vector<2x128xf32> -> vector<2x128xf32>
    %469 = arith.addf %467, %468 : vector<2x128xf32>
    %470 = arith.index_cast %c5_i32 : i32 to index
    %c0_143 = arith.constant 0 : index
    %c0_144 = arith.constant 0 : index
    %471 = vector.load %arg7[%470, %c0_143, %c0_144] : memref<8x2x128xf32, #tpu.memory_space<vmem>>, vector<1x2x128xf32>
    %472 = vector.shape_cast %471 : vector<1x2x128xf32> to vector<2x128xf32>
    %473 = vector.shape_cast %469 : vector<2x128xf32> to vector<1x2x128xf32>
    tpu.vector_store %arg7[%470, %c0_143, %c0_144], %473 {strides = array<i32>} : memref<8x2x128xf32, #tpu.memory_space<vmem>>, vector<1x2x128xf32>,
    %474 = arith.index_cast %404 : i32 to index
    %c0_145 = arith.constant 0 : index
    %c0_146 = arith.constant 0 : index
    %475 = vector.load %arg7[%474, %c0_145, %c0_146] : memref<8x2x128xf32, #tpu.memory_space<vmem>>, vector<1x2x128xf32>
    %476 = vector.shape_cast %475 : vector<1x2x128xf32> to vector<2x128xf32>
    %cst_147 = arith.constant dense<0.000000e+00> : vector<2x128xf32>
    %477 = tpu.matmul %464, %3, %cst_147 {dimension_numbers = #tpu.dot_dimension_numbers<[1], [0], [0], [1], [0, 0, 1, 1], [], []>} : vector<2x128xf32>, vector<128x128xf32>, vector<2x128xf32> -> vector<2x128xf32>
    %478 = arith.addf %476, %477 : vector<2x128xf32>
    %479 = arith.index_cast %404 : i32 to index
    %c0_148 = arith.constant 0 : index
    %c0_149 = arith.constant 0 : index
    %480 = vector.load %arg7[%479, %c0_148, %c0_149] : memref<8x2x128xf32, #tpu.memory_space<vmem>>, vector<1x2x128xf32>
    %481 = vector.shape_cast %480 : vector<1x2x128xf32> to vector<2x128xf32>
    %482 = vector.shape_cast %478 : vector<2x128xf32> to vector<1x2x128xf32>
    tpu.vector_store %arg7[%479, %c0_148, %c0_149], %482 {strides = array<i32>} : memref<8x2x128xf32, #tpu.memory_space<vmem>>, vector<1x2x128xf32>,
    %c6_i32 = arith.constant 6 : i32
    %c7_i32_150 = arith.constant 7 : i32
    %483 = arith.subi %c7_i32_150, %c6_i32 : i32
    %484 = arith.index_cast %c6_i32 : i32 to index
    %c0_151 = arith.constant 0 : index
    %c0_152 = arith.constant 0 : index
    %485 = vector.load %arg0[%484, %c0_151, %c0_152] : memref<8x2x512xf32, #tpu.memory_space<vmem>>, vector<1x2x512xf32>
    %486 = vector.shape_cast %485 : vector<1x2x512xf32> to vector<2x512xf32>
    %cst_153 = arith.constant dense<0.000000e+00> : vector<2x512xf32>
    %487 = tpu.matmul %439, %0, %cst_153 {dimension_numbers = #tpu.dot_dimension_numbers<[1], [0], [0], [1], [0, 0, 1, 1], [], []>} : vector<2x128xf32>, vector<128x512xf32>, vector<2x512xf32> -> vector<2x512xf32>
    %488 = arith.addf %486, %487 : vector<2x512xf32>
    %489 = arith.index_cast %483 : i32 to index
    %c0_154 = arith.constant 0 : index
    %c0_155 = arith.constant 0 : index
    %490 = vector.load %arg1[%489, %c0_154, %c0_155] : memref<8x2x512xf32, #tpu.memory_space<vmem>>, vector<1x2x512xf32>
    %491 = vector.shape_cast %490 : vector<1x2x512xf32> to vector<2x512xf32>
    %cst_156 = arith.constant dense<0.000000e+00> : vector<2x512xf32>
    %492 = tpu.matmul %464, %1, %cst_156 {dimension_numbers = #tpu.dot_dimension_numbers<[1], [0], [0], [1], [0, 0, 1, 1], [], []>} : vector<2x128xf32>, vector<128x512xf32>, vector<2x512xf32> -> vector<2x512xf32>
    %493 = arith.addf %491, %492 : vector<2x512xf32>
    %494 = vector.extract_strided_slice %488 {offsets = [0, 0], sizes = [2, 128], strides = [1, 1]} : vector<2x512xf32> to vector<2x128xf32>
    %495 = arith.negf %494 : vector<2x128xf32>
    %496 = math.exp %495 : vector<2x128xf32>
    %cst_157 = arith.constant 1.000000e+00 : f32
    %497 = vector.broadcast %cst_157 : f32 to vector<2x128xf32>
    %498 = arith.addf %497, %496 : vector<2x128xf32>
    %499 = arith.divf %497, %498 : vector<2x128xf32>
    %500 = vector.extract_strided_slice %488 {offsets = [0, 128], sizes = [2, 128], strides = [1, 1]} : vector<2x512xf32> to vector<2x128xf32>
    %501 = arith.negf %500 : vector<2x128xf32>
    %502 = math.exp %501 : vector<2x128xf32>
    %cst_158 = arith.constant 1.000000e+00 : f32
    %503 = vector.broadcast %cst_158 : f32 to vector<2x128xf32>
    %504 = arith.addf %503, %502 : vector<2x128xf32>
    %505 = arith.divf %503, %504 : vector<2x128xf32>
    %506 = vector.extract_strided_slice %488 {offsets = [0, 256], sizes = [2, 128], strides = [1, 1]} : vector<2x512xf32> to vector<2x128xf32>
    %507 = math.tanh %506 : vector<2x128xf32>
    %508 = vector.extract_strided_slice %488 {offsets = [0, 384], sizes = [2, 128], strides = [1, 1]} : vector<2x512xf32> to vector<2x128xf32>
    %509 = arith.negf %508 : vector<2x128xf32>
    %510 = math.exp %509 : vector<2x128xf32>
    %cst_159 = arith.constant 1.000000e+00 : f32
    %511 = vector.broadcast %cst_159 : f32 to vector<2x128xf32>
    %512 = arith.addf %511, %510 : vector<2x128xf32>
    %513 = arith.divf %511, %512 : vector<2x128xf32>
    %514 = arith.mulf %505, %437 : vector<2x128xf32>
    %515 = arith.mulf %499, %507 : vector<2x128xf32>
    %516 = arith.addf %514, %515 : vector<2x128xf32>
    %517 = math.tanh %516 : vector<2x128xf32>
    %518 = arith.mulf %513, %517 : vector<2x128xf32>
    %519 = vector.extract_strided_slice %493 {offsets = [0, 0], sizes = [2, 128], strides = [1, 1]} : vector<2x512xf32> to vector<2x128xf32>
    %520 = arith.negf %519 : vector<2x128xf32>
    %521 = math.exp %520 : vector<2x128xf32>
    %cst_160 = arith.constant 1.000000e+00 : f32
    %522 = vector.broadcast %cst_160 : f32 to vector<2x128xf32>
    %523 = arith.addf %522, %521 : vector<2x128xf32>
    %524 = arith.divf %522, %523 : vector<2x128xf32>
    %525 = vector.extract_strided_slice %493 {offsets = [0, 128], sizes = [2, 128], strides = [1, 1]} : vector<2x512xf32> to vector<2x128xf32>
    %526 = arith.negf %525 : vector<2x128xf32>
    %527 = math.exp %526 : vector<2x128xf32>
    %cst_161 = arith.constant 1.000000e+00 : f32
    %528 = vector.broadcast %cst_161 : f32 to vector<2x128xf32>
    %529 = arith.addf %528, %527 : vector<2x128xf32>
    %530 = arith.divf %528, %529 : vector<2x128xf32>
    %531 = vector.extract_strided_slice %493 {offsets = [0, 256], sizes = [2, 128], strides = [1, 1]} : vector<2x512xf32> to vector<2x128xf32>
    %532 = math.tanh %531 : vector<2x128xf32>
    %533 = vector.extract_strided_slice %493 {offsets = [0, 384], sizes = [2, 128], strides = [1, 1]} : vector<2x512xf32> to vector<2x128xf32>
    %534 = arith.negf %533 : vector<2x128xf32>
    %535 = math.exp %534 : vector<2x128xf32>
    %cst_162 = arith.constant 1.000000e+00 : f32
    %536 = vector.broadcast %cst_162 : f32 to vector<2x128xf32>
    %537 = arith.addf %536, %535 : vector<2x128xf32>
    %538 = arith.divf %536, %537 : vector<2x128xf32>
    %539 = arith.mulf %530, %462 : vector<2x128xf32>
    %540 = arith.mulf %524, %532 : vector<2x128xf32>
    %541 = arith.addf %539, %540 : vector<2x128xf32>
    %542 = math.tanh %541 : vector<2x128xf32>
    %543 = arith.mulf %538, %542 : vector<2x128xf32>
    %544 = arith.index_cast %c6_i32 : i32 to index
    %c0_163 = arith.constant 0 : index
    %c0_164 = arith.constant 0 : index
    %545 = vector.load %arg7[%544, %c0_163, %c0_164] : memref<8x2x128xf32, #tpu.memory_space<vmem>>, vector<1x2x128xf32>
    %546 = vector.shape_cast %545 : vector<1x2x128xf32> to vector<2x128xf32>
    %cst_165 = arith.constant dense<0.000000e+00> : vector<2x128xf32>
    %547 = tpu.matmul %518, %2, %cst_165 {dimension_numbers = #tpu.dot_dimension_numbers<[1], [0], [0], [1], [0, 0, 1, 1], [], []>} : vector<2x128xf32>, vector<128x128xf32>, vector<2x128xf32> -> vector<2x128xf32>
    %548 = arith.addf %546, %547 : vector<2x128xf32>
    %549 = arith.index_cast %c6_i32 : i32 to index
    %c0_166 = arith.constant 0 : index
    %c0_167 = arith.constant 0 : index
    %550 = vector.load %arg7[%549, %c0_166, %c0_167] : memref<8x2x128xf32, #tpu.memory_space<vmem>>, vector<1x2x128xf32>
    %551 = vector.shape_cast %550 : vector<1x2x128xf32> to vector<2x128xf32>
    %552 = vector.shape_cast %548 : vector<2x128xf32> to vector<1x2x128xf32>
    tpu.vector_store %arg7[%549, %c0_166, %c0_167], %552 {strides = array<i32>} : memref<8x2x128xf32, #tpu.memory_space<vmem>>, vector<1x2x128xf32>,
    %553 = arith.index_cast %483 : i32 to index
    %c0_168 = arith.constant 0 : index
    %c0_169 = arith.constant 0 : index
    %554 = vector.load %arg7[%553, %c0_168, %c0_169] : memref<8x2x128xf32, #tpu.memory_space<vmem>>, vector<1x2x128xf32>
    %555 = vector.shape_cast %554 : vector<1x2x128xf32> to vector<2x128xf32>
    %cst_170 = arith.constant dense<0.000000e+00> : vector<2x128xf32>
    %556 = tpu.matmul %543, %3, %cst_170 {dimension_numbers = #tpu.dot_dimension_numbers<[1], [0], [0], [1], [0, 0, 1, 1], [], []>} : vector<2x128xf32>, vector<128x128xf32>, vector<2x128xf32> -> vector<2x128xf32>
    %557 = arith.addf %555, %556 : vector<2x128xf32>
    %558 = arith.index_cast %483 : i32 to index
    %c0_171 = arith.constant 0 : index
    %c0_172 = arith.constant 0 : index
    %559 = vector.load %arg7[%558, %c0_171, %c0_172] : memref<8x2x128xf32, #tpu.memory_space<vmem>>, vector<1x2x128xf32>
    %560 = vector.shape_cast %559 : vector<1x2x128xf32> to vector<2x128xf32>
    %561 = vector.shape_cast %557 : vector<2x128xf32> to vector<1x2x128xf32>
    tpu.vector_store %arg7[%558, %c0_171, %c0_172], %561 {strides = array<i32>} : memref<8x2x128xf32, #tpu.memory_space<vmem>>, vector<1x2x128xf32>,
    %c7_i32_173 = arith.constant 7 : i32
    %c7_i32_174 = arith.constant 7 : i32
    %562 = arith.subi %c7_i32_174, %c7_i32_173 : i32
    %563 = arith.index_cast %c7_i32_173 : i32 to index
    %c0_175 = arith.constant 0 : index
    %c0_176 = arith.constant 0 : index
    %564 = vector.load %arg0[%563, %c0_175, %c0_176] : memref<8x2x512xf32, #tpu.memory_space<vmem>>, vector<1x2x512xf32>
    %565 = vector.shape_cast %564 : vector<1x2x512xf32> to vector<2x512xf32>
    %cst_177 = arith.constant dense<0.000000e+00> : vector<2x512xf32>
    %566 = tpu.matmul %518, %0, %cst_177 {dimension_numbers = #tpu.dot_dimension_numbers<[1], [0], [0], [1], [0, 0, 1, 1], [], []>} : vector<2x128xf32>, vector<128x512xf32>, vector<2x512xf32> -> vector<2x512xf32>
    %567 = arith.addf %565, %566 : vector<2x512xf32>
    %568 = arith.index_cast %562 : i32 to index
    %c0_178 = arith.constant 0 : index
    %c0_179 = arith.constant 0 : index
    %569 = vector.load %arg1[%568, %c0_178, %c0_179] : memref<8x2x512xf32, #tpu.memory_space<vmem>>, vector<1x2x512xf32>
    %570 = vector.shape_cast %569 : vector<1x2x512xf32> to vector<2x512xf32>
    %cst_180 = arith.constant dense<0.000000e+00> : vector<2x512xf32>
    %571 = tpu.matmul %543, %1, %cst_180 {dimension_numbers = #tpu.dot_dimension_numbers<[1], [0], [0], [1], [0, 0, 1, 1], [], []>} : vector<2x128xf32>, vector<128x512xf32>, vector<2x512xf32> -> vector<2x512xf32>
    %572 = arith.addf %570, %571 : vector<2x512xf32>
    %573 = vector.extract_strided_slice %567 {offsets = [0, 0], sizes = [2, 128], strides = [1, 1]} : vector<2x512xf32> to vector<2x128xf32>
    %574 = arith.negf %573 : vector<2x128xf32>
    %575 = math.exp %574 : vector<2x128xf32>
    %cst_181 = arith.constant 1.000000e+00 : f32
    %576 = vector.broadcast %cst_181 : f32 to vector<2x128xf32>
    %577 = arith.addf %576, %575 : vector<2x128xf32>
    %578 = arith.divf %576, %577 : vector<2x128xf32>
    %579 = vector.extract_strided_slice %567 {offsets = [0, 128], sizes = [2, 128], strides = [1, 1]} : vector<2x512xf32> to vector<2x128xf32>
    %580 = arith.negf %579 : vector<2x128xf32>
    %581 = math.exp %580 : vector<2x128xf32>
    %cst_182 = arith.constant 1.000000e+00 : f32
    %582 = vector.broadcast %cst_182 : f32 to vector<2x128xf32>
    %583 = arith.addf %582, %581 : vector<2x128xf32>
    %584 = arith.divf %582, %583 : vector<2x128xf32>
    %585 = vector.extract_strided_slice %567 {offsets = [0, 256], sizes = [2, 128], strides = [1, 1]} : vector<2x512xf32> to vector<2x128xf32>
    %586 = math.tanh %585 : vector<2x128xf32>
    %587 = vector.extract_strided_slice %567 {offsets = [0, 384], sizes = [2, 128], strides = [1, 1]} : vector<2x512xf32> to vector<2x128xf32>
    %588 = arith.negf %587 : vector<2x128xf32>
    %589 = math.exp %588 : vector<2x128xf32>
    %cst_183 = arith.constant 1.000000e+00 : f32
    %590 = vector.broadcast %cst_183 : f32 to vector<2x128xf32>
    %591 = arith.addf %590, %589 : vector<2x128xf32>
    %592 = arith.divf %590, %591 : vector<2x128xf32>
    %593 = arith.mulf %584, %516 : vector<2x128xf32>
    %594 = arith.mulf %578, %586 : vector<2x128xf32>
    %595 = arith.addf %593, %594 : vector<2x128xf32>
    %596 = math.tanh %595 : vector<2x128xf32>
    %597 = arith.mulf %592, %596 : vector<2x128xf32>
    %598 = vector.extract_strided_slice %572 {offsets = [0, 0], sizes = [2, 128], strides = [1, 1]} : vector<2x512xf32> to vector<2x128xf32>
    %599 = arith.negf %598 : vector<2x128xf32>
    %600 = math.exp %599 : vector<2x128xf32>
    %cst_184 = arith.constant 1.000000e+00 : f32
    %601 = vector.broadcast %cst_184 : f32 to vector<2x128xf32>
    %602 = arith.addf %601, %600 : vector<2x128xf32>
    %603 = arith.divf %601, %602 : vector<2x128xf32>
    %604 = vector.extract_strided_slice %572 {offsets = [0, 128], sizes = [2, 128], strides = [1, 1]} : vector<2x512xf32> to vector<2x128xf32>
    %605 = arith.negf %604 : vector<2x128xf32>
    %606 = math.exp %605 : vector<2x128xf32>
    %cst_185 = arith.constant 1.000000e+00 : f32
    %607 = vector.broadcast %cst_185 : f32 to vector<2x128xf32>
    %608 = arith.addf %607, %606 : vector<2x128xf32>
    %609 = arith.divf %607, %608 : vector<2x128xf32>
    %610 = vector.extract_strided_slice %572 {offsets = [0, 256], sizes = [2, 128], strides = [1, 1]} : vector<2x512xf32> to vector<2x128xf32>
    %611 = math.tanh %610 : vector<2x128xf32>
    %612 = vector.extract_strided_slice %572 {offsets = [0, 384], sizes = [2, 128], strides = [1, 1]} : vector<2x512xf32> to vector<2x128xf32>
    %613 = arith.negf %612 : vector<2x128xf32>
    %614 = math.exp %613 : vector<2x128xf32>
    %cst_186 = arith.constant 1.000000e+00 : f32
    %615 = vector.broadcast %cst_186 : f32 to vector<2x128xf32>
    %616 = arith.addf %615, %614 : vector<2x128xf32>
    %617 = arith.divf %615, %616 : vector<2x128xf32>
    %618 = arith.mulf %609, %541 : vector<2x128xf32>
    %619 = arith.mulf %603, %611 : vector<2x128xf32>
    %620 = arith.addf %618, %619 : vector<2x128xf32>
    %621 = math.tanh %620 : vector<2x128xf32>
    %622 = arith.mulf %617, %621 : vector<2x128xf32>
    %623 = arith.index_cast %c7_i32_173 : i32 to index
    %c0_187 = arith.constant 0 : index
    %c0_188 = arith.constant 0 : index
    %624 = vector.load %arg7[%623, %c0_187, %c0_188] : memref<8x2x128xf32, #tpu.memory_space<vmem>>, vector<1x2x128xf32>
    %625 = vector.shape_cast %624 : vector<1x2x128xf32> to vector<2x128xf32>
    %cst_189 = arith.constant dense<0.000000e+00> : vector<2x128xf32>
    %626 = tpu.matmul %597, %2, %cst_189 {dimension_numbers = #tpu.dot_dimension_numbers<[1], [0], [0], [1], [0, 0, 1, 1], [], []>} : vector<2x128xf32>, vector<128x128xf32>, vector<2x128xf32> -> vector<2x128xf32>
    %627 = arith.addf %625, %626 : vector<2x128xf32>
    %628 = arith.index_cast %c7_i32_173 : i32 to index
    %c0_190 = arith.constant 0 : index
    %c0_191 = arith.constant 0 : index
    %629 = vector.load %arg7[%628, %c0_190, %c0_191] : memref<8x2x128xf32, #tpu.memory_space<vmem>>, vector<1x2x128xf32>
    %630 = vector.shape_cast %629 : vector<1x2x128xf32> to vector<2x128xf32>
    %631 = vector.shape_cast %627 : vector<2x128xf32> to vector<1x2x128xf32>
    tpu.vector_store %arg7[%628, %c0_190, %c0_191], %631 {strides = array<i32>} : memref<8x2x128xf32, #tpu.memory_space<vmem>>, vector<1x2x128xf32>,
    %632 = arith.index_cast %562 : i32 to index
    %c0_192 = arith.constant 0 : index
    %c0_193 = arith.constant 0 : index
    %633 = vector.load %arg7[%632, %c0_192, %c0_193] : memref<8x2x128xf32, #tpu.memory_space<vmem>>, vector<1x2x128xf32>
    %634 = vector.shape_cast %633 : vector<1x2x128xf32> to vector<2x128xf32>
    %cst_194 = arith.constant dense<0.000000e+00> : vector<2x128xf32>
    %635 = tpu.matmul %622, %3, %cst_194 {dimension_numbers = #tpu.dot_dimension_numbers<[1], [0], [0], [1], [0, 0, 1, 1], [], []>} : vector<2x128xf32>, vector<128x128xf32>, vector<2x128xf32> -> vector<2x128xf32>
    %636 = arith.addf %634, %635 : vector<2x128xf32>
    %637 = arith.index_cast %562 : i32 to index
    %c0_195 = arith.constant 0 : index
    %c0_196 = arith.constant 0 : index
    %638 = vector.load %arg7[%637, %c0_195, %c0_196] : memref<8x2x128xf32, #tpu.memory_space<vmem>>, vector<1x2x128xf32>
    %639 = vector.shape_cast %638 : vector<1x2x128xf32> to vector<2x128xf32>
    %640 = vector.shape_cast %636 : vector<2x128xf32> to vector<1x2x128xf32>
    tpu.vector_store %arg7[%637, %c0_195, %c0_196], %640 {strides = array<i32>} : memref<8x2x128xf32, #tpu.memory_space<vmem>>, vector<1x2x128xf32>,
    %c8_i32 = arith.constant 8 : i32
    return
  }
}

</mosaic_0001>

<bundles_post_ra>
// kernel: bidirectional_lstm.2
= control target key start
LH: loop header
LB: loop body
LE: loop exit
PB: predicated region body
PF: predicated region fallthrough
CT: control target
= control target key end

     0   :  { %v432_v3 = vmov 0.0   ;;  %vm54_vm0 = vcmask 130048   ;;  %v34_v19 = vlaneseq  ;;  %s584_s1 = inlined_call_operand.vmem [shape: f32[16,512], index: 1, kind: input, shape index: {}]   ;;  %s585_s0 = inlined_call_operand.vmem [shape: f32[16,16], index: 0, kind: input, shape index: {}]   ;;  %s586_s2 = inlined_call_operand.vmem [shape: f32[16,512], index: 2, kind: input, shape index: {}]   ;;  %s587_s3 = inlined_call_operand.vmem [shape: f32[1,512], index: 3, kind: input, shape index: {}]   ;;  %s588_s4 = inlined_call_operand.vmem [shape: f32[1,512], index: 4, kind: input, shape index: {}]   ;;  %s589_s5 = inlined_call_operand.vmem [shape: f32[16,512], index: 5, kind: output, shape index: {0}]   ;;  %s590_s6 = inlined_call_operand.vmem [shape: f32[16,512], index: 6, kind: output, shape index: {1}]  }
   0x1   :  { %v29_v0 = vld [vmem:[%s584_s1 + $0x28] sm:$0xff]  ;;  %v31_v1 = vld [vmem:[%s584_s1 + $0x38] sm:$0xff]  ;;  %v28_v2 = vld [vmem:[%s584_s1 + $0x20] sm:$0xff]  ;;  %125 = vmatprep.mubr.f32.mxu0 %v432_v3  ;;  %202 = vmatprep.mubr.f32.mxu1 %v432_v3 }
   0x2   :  { %89 = vmatprep.subr.mxu0 %v29_v0  ;;  %166 = vmatprep.subr.mxu1 %v31_v1  ;;  %v30_v4 = vld [vmem:[%s584_s1 + $0x30] sm:$0xff]  ;;  %v25_v5 = vld [vmem:[%s584_s1 + $0x8] sm:$0xff]  ;;  %v27_v6 = vld [vmem:[%s584_s1 + $0x18] sm:$0xff]  ;;  %v35_v20 = vshrl.u32 %v34_v19, 7 }
   0x3   :  { %90 = vmatpush1.msra.mxu0 %v28_v2  ;;  %167 = vmatpush1.msra.mxu1 %v30_v4  ;;  %v24_v7 = vld [vmem:[%s584_s1] sm:$0xff]  ;;  %v26_v8 = vld [vmem:[%s584_s1 + $0x10] sm:$0xff]  ;;  %v228_v10 = vld [vmem:[%s586_s2 + $0x28] sm:$0xff] }
   0x4   :  { %v22_v9 = vld [vmem:[%s585_s0] sm:$0xff]  ;;  %91 = vmatprep.subr.mxu0 %v25_v5  ;;  %168 = vmatprep.subr.mxu1 %v27_v6  ;;  %v230_v11 = vld [vmem:[%s586_s2 + $0x38] sm:$0xff]  ;;  %v229_v13 = vld [vmem:[%s586_s2 + $0x30] sm:$0xff]  ;;  %v36_v21 = vsub.s32 0, %v35_v20  ;;  %v44_v22 = vsub.s32 2, %v35_v20  ;;  %v40_v24 = vsub.s32 1, %v35_v20 }
   0x5   :  { %92 = vmatpush1.msra.mxu0 %v24_v7  ;;  %169 = vmatpush1.msra.mxu1 %v26_v8  ;;  %v227_v12 = vld [vmem:[%s586_s2 + $0x20] sm:$0xff]  ;;  %v23_v14 = vld [vmem:[%s585_s0 + $0x8] sm:$0xff]  ;;  %v226_v16 = vld [vmem:[%s586_s2 + $0x18] sm:$0xff]  ;;  %v48_v25 = vsub.s32 3, %v35_v20 }
   0x6   :  { %423 = vmatmul.mubr.msk.f32.vlgmr.msra.gmra.mxu0 %vm54_vm0, %v22_v9  ;;  %425 = vmatmul.mubr.msk.f32.vlgmr.msra.gmra.mxu1 %vm54_vm0, %v22_v9  ;;  %v224_v15 = vld [vmem:[%s586_s2 + $0x8] sm:$0xff]  ;;  %v223_v17 = vld [vmem:[%s586_s2] sm:$0xff]  ;;  %v225_v18 = vld [vmem:[%s586_s2 + $0x10] sm:$0xff] }
   0x7   :  { %281 = vmatprep.subr.mxu0 %v228_v10  ;;  %358 = vmatprep.subr.mxu1 %v230_v11  ;;  %v32_v23 = vld [vmem:[%s587_s3] sm:$0xf] }
   0x8   :  { %282 = vmatpush1.msra.mxu0 %v227_v12  ;;  %359 = vmatpush1.msra.mxu1 %v229_v13  ;;  %v37_v26 = vrot.slane %v32_v23, %v36_v21  ;;  %v45_v27 = vrot.slane %v32_v23, %v44_v22  ;;  %v41_v28 = vrot.slane %v32_v23, %v40_v24  ;;  %v231_v36 = vld [vmem:[%s588_s4] sm:$0xf] }
   0x9   :  { %131 = vmatprep.mubr.f32.mxu0 %v432_v3  ;;  %208 = vmatprep.mubr.f32.mxu1 %v432_v3  ;;  %v49_v29 = vrot.slane %v32_v23, %v48_v25  ;;  %v236_v43 = vrot.slane %v231_v36, %v36_v21  ;;  %v244_v44 = vrot.slane %v231_v36, %v44_v22 }
   0xa   :  { %424 = vmatmul.mubr.msk.f32.gmra.mxu0 %vm54_vm0, %v23_v14  ;;  %426 = vmatmul.mubr.msk.f32.gmra.mxu1 %vm54_vm0, %v23_v14  ;;  %v240_v49 = vrot.slane %v231_v36, %v40_v24  ;;  %v248_v50 = vrot.slane %v231_v36, %v48_v25 }
   0xb   :  { %283 = vmatprep.subr.mxu0 %v224_v15  ;;  %360 = vmatprep.subr.mxu1 %v226_v16 }
   0xc   :  { %284 = vmatpush1.msra.mxu0 %v223_v17  ;;  %361 = vmatpush1.msra.mxu1 %v225_v18 }
   0xd   :  { %317 = vmatprep.mubr.f32.mxu0 %v432_v3  ;;  %394 = vmatprep.mubr.f32.mxu1 %v432_v3 }
   0xe   :  { %427 = vmatmul.mubr.msk.f32.vlgmr.msra.gmra.mxu0 %vm54_vm0, %v22_v9  ;;  %429 = vmatmul.mubr.msk.f32.vlgmr.msra.gmra.mxu1 %vm54_vm0, %v22_v9 }
   0xf   :  { %323 = vmatprep.mubr.f32.mxu0 %v432_v3  ;;  %400 = vmatprep.mubr.f32.mxu1 %v432_v3 }
  0x12   :  { %428 = vmatmul.mubr.msk.f32.gmra.mxu0 %vm54_vm0, %v23_v14  ;;  %430 = vmatmul.mubr.msk.f32.gmra.mxu1 %vm54_vm0, %v23_v14 }
  0xc6   :  { %v127_v30 = vpop.f32.mrf.mxu0  ;;  %v204_v31 = vpop.f32.mrf.mxu1 }
  0xc7   :  { %v128_v32 = vadd.f32 %v127_v30, %v37_v26  ;;  %v205_v33 = vadd.f32 %v204_v31, %v45_v27 }
  0xc8   :  { %v129_v34 = vpop.f32.mrf.mxu0  ;;  %v206_v35 = vpop.f32.mrf.mxu1 }
  0xc9   :  { %215 = vst [vmem:[%s589_s5] sm:$0xff] %v128_v32  ;;  %217 = vst [vmem:[%s589_s5 + $0x10] sm:$0xff] %v205_v33  ;;  %v130_v37 = vadd.f32 %v129_v34, %v41_v28  ;;  %v207_v38 = vadd.f32 %v206_v35, %v49_v29 }
  0xca   :  { %v133_v39 = vpop.f32.mrf.mxu0  ;;  %v210_v40 = vpop.f32.mrf.mxu1 }
  0xcb   :  { %216 = vst [vmem:[%s589_s5 + $0x8] sm:$0xff] %v130_v37  ;;  %218 = vst [vmem:[%s589_s5 + $0x18] sm:$0xff] %v207_v38  ;;  %v134_v41 = vadd.f32 %v133_v39, %v37_v26  ;;  %v211_v42 = vadd.f32 %v210_v40, %v45_v27 }
  0xcc   :  { %v135_v45 = vpop.f32.mrf.mxu0  ;;  %v212_v46 = vpop.f32.mrf.mxu1 }
  0xcd   :  { %219 = vst [vmem:[%s589_s5 + $0x20] sm:$0xff] %v134_v41  ;;  %221 = vst [vmem:[%s589_s5 + $0x30] sm:$0xff] %v211_v42  ;;  %v136_v47 = vadd.f32 %v135_v45, %v41_v28  ;;  %v213_v48 = vadd.f32 %v212_v46, %v49_v29 }
  0xce   :  { %v319_v51 = vpop.f32.mrf.mxu0  ;;  %v396_v52 = vpop.f32.mrf.mxu1 }
  0xcf   :  { %220 = vst [vmem:[%s589_s5 + $0x28] sm:$0xff] %v136_v47  ;;  %222 = vst [vmem:[%s589_s5 + $0x38] sm:$0xff] %v213_v48  ;;  %v320_v53 = vadd.f32 %v319_v51, %v236_v43  ;;  %v397_v54 = vadd.f32 %v396_v52, %v244_v44 }
  0xd0   :  { %v321_v55 = vpop.f32.mrf.mxu0  ;;  %v398_v56 = vpop.f32.mrf.mxu1 }
  0xd1   :  { %407 = vst [vmem:[%s590_s6] sm:$0xff] %v320_v53  ;;  %409 = vst [vmem:[%s590_s6 + $0x10] sm:$0xff] %v397_v54  ;;  %v322_v57 = vadd.f32 %v321_v55, %v240_v49  ;;  %v399_v58 = vadd.f32 %v398_v56, %v248_v50 }
  0xd2   :  { %v325_v59 = vpop.f32.mrf.mxu0  ;;  %v402_v60 = vpop.f32.mrf.mxu1 }
  0xd3   :  { %408 = vst [vmem:[%s590_s6 + $0x8] sm:$0xff] %v322_v57  ;;  %410 = vst [vmem:[%s590_s6 + $0x18] sm:$0xff] %v399_v58  ;;  %v326_v61 = vadd.f32 %v325_v59, %v236_v43  ;;  %v403_v62 = vadd.f32 %v402_v60, %v244_v44 }
  0xd4   :  { %v327_v63 = vpop.f32.mrf.mxu0  ;;  %v404_v0 = vpop.f32.mrf.mxu1 }
  0xd5   :  { %411 = vst [vmem:[%s590_s6 + $0x20] sm:$0xff] %v326_v61  ;;  %413 = vst [vmem:[%s590_s6 + $0x30] sm:$0xff] %v403_v62  ;;  %v328_v1 = vadd.f32 %v327_v63, %v240_v49  ;;  %v405_v2 = vadd.f32 %v404_v0, %v248_v50 }
  0xd7   :  { %412 = vst [vmem:[%s590_s6 + $0x28] sm:$0xff] %v328_v1  ;;  %414 = vst [vmem:[%s590_s6 + $0x38] sm:$0xff] %v405_v2 }

// kernel: bidirectional_lstm.3
= control target key start
LH: loop header
LB: loop body
LE: loop exit
PB: predicated region body
PF: predicated region fallthrough
CT: control target
= control target key end

     0   :  { %s11282_s0 = inlined_call_operand.vmem [shape: f32[8,2,512], index: 0, kind: input, shape index: {}]   ;;  %s11283_s1 = inlined_call_operand.vmem [shape: f32[8,2,512], index: 1, kind: input, shape index: {}]   ;;  %s11284_s2 = inlined_call_operand.vmem [shape: f32[128,512], index: 2, kind: input, shape index: {}]   ;;  %s11285_s3 = inlined_call_operand.vmem [shape: f32[128,512], index: 3, kind: input, shape index: {}]   ;;  %s11286_s4 = inlined_call_operand.vmem [shape: f32[128,128], index: 4, kind: input, shape index: {}]   ;;  %s11287_s5 = inlined_call_operand.vmem [shape: f32[128,128], index: 5, kind: input, shape index: {}]   ;;  %s11288_s6 = inlined_call_operand.vmem [shape: f32[1,1,128], index: 6, kind: input, shape index: {}]   ;;  %s11289_s7 = inlined_call_operand.hbm [shape: f32[8,2,128], index: 7, kind: output, shape index: {}]  }
   0x1   :  { %v6267_v0 = vld [vmem:[%s11284_s2 + $0x1e8] sm:$0xff]  ;;  %v6272_v1 = vld [vmem:[%s11284_s2 + $0x1f8] sm:$0xff]  ;;  %v6277_v2 = vld [vmem:[%s11284_s2 + $0x1e0] sm:$0xff] }
   0x2   :  { %203 = vmatprep.subr.mxu0 %v6267_v0  ;;  %274 = vmatprep.subr.mxu1 %v6272_v1  ;;  %v6284_v3 = vld [vmem:[%s11284_s2 + $0x1f0] sm:$0xff]  ;;  %v6289_v4 = vld [vmem:[%s11284_s2 + $0x1c8] sm:$0xff]  ;;  %v6294_v5 = vld [vmem:[%s11284_s2 + $0x1d8] sm:$0xff] }
   0x3   :  { %204 = vmatpush1.msra.mxu0 %v6277_v2  ;;  %275 = vmatpush1.msra.mxu1 %v6284_v3  ;;  %v6301_v6 = vld [vmem:[%s11284_s2 + $0x1c0] sm:$0xff]  ;;  %v6306_v7 = vld [vmem:[%s11284_s2 + $0x1d0] sm:$0xff]  ;;  %v6311_v8 = vld [vmem:[%s11284_s2 + $0x1a8] sm:$0xff] }
   0x4   :  { %205 = vmatprep.subr.mxu0 %v6289_v4  ;;  %276 = vmatprep.subr.mxu1 %v6294_v5  ;;  %v6318_v9 = vld [vmem:[%s11284_s2 + $0x1b8] sm:$0xff]  ;;  %v6323_v10 = vld [vmem:[%s11284_s2 + $0x1a0] sm:$0xff]  ;;  %v6328_v11 = vld [vmem:[%s11284_s2 + $0x1b0] sm:$0xff] }
   0x5   :  { %206 = vmatpush1.msra.mxu0 %v6301_v6  ;;  %277 = vmatpush1.msra.mxu1 %v6306_v7  ;;  %v6335_v12 = vld [vmem:[%s11284_s2 + $0x188] sm:$0xff]  ;;  %v6340_v13 = vld [vmem:[%s11284_s2 + $0x198] sm:$0xff]  ;;  %v6347_v14 = vld [vmem:[%s11284_s2 + $0x180] sm:$0xff] }
   0x6   :  { %207 = vmatprep.subr.mxu0 %v6311_v8  ;;  %278 = vmatprep.subr.mxu1 %v6318_v9  ;;  %v6352_v15 = vld [vmem:[%s11284_s2 + $0x190] sm:$0xff]  ;;  %v6359_v16 = vld [vmem:[%s11284_s2 + $0x168] sm:$0xff]  ;;  %v6364_v17 = vld [vmem:[%s11284_s2 + $0x178] sm:$0xff] }
   0x7   :  { %11759 = vst [vmem:[#allocation5_spill] sm:$0xff] %v6352_v15  ;;  %208 = vmatpush1.msra.mxu0 %v6323_v10  ;;  %279 = vmatpush1.msra.mxu1 %v6328_v11  ;;  %11760 = vst [vmem:[#allocation6_spill] sm:$0xff] %v6364_v17  ;;  %v6371_v18 = vld [vmem:[%s11284_s2 + $0x160] sm:$0xff]  ;;  %v6376_v19 = vld [vmem:[%s11284_s2 + $0x170] sm:$0xff] }
   0x8   :  { %209 = vmatprep.subr.mxu0 %v6335_v12  ;;  %280 = vmatprep.subr.mxu1 %v6340_v13  ;;  %11761 = vst [vmem:[#allocation7_spill] sm:$0xff] %v6376_v19  ;;  %v6383_v20 = vld [vmem:[%s11284_s2 + $0x148] sm:$0xff]  ;;  %v6388_v21 = vld [vmem:[%s11284_s2 + $0x158] sm:$0xff]  ;;  %v6395_v22 = vld [vmem:[%s11284_s2 + $0x140] sm:$0xff] }
   0x9   :  { %210 = vmatpush1.msra.mxu0 %v6347_v14  ;;  %281 = vmatpush1.msra.mxu1 %v6352_v15  ;;  %11762 = vst [vmem:[#allocation8_spill] sm:$0xff] %v6388_v21  ;;  %v6400_v23 = vld [vmem:[%s11284_s2 + $0x150] sm:$0xff]  ;;  %v6407_v24 = vld [vmem:[%s11284_s2 + $0x128] sm:$0xff]  ;;  %v6412_v25 = vld [vmem:[%s11284_s2 + $0x138] sm:$0xff] }
   0xa   :  { %211 = vmatprep.subr.mxu0 %v6359_v16  ;;  %282 = vmatprep.subr.mxu1 %v6364_v17  ;;  %11763 = vst [vmem:[#allocation9_spill] sm:$0xff] %v6400_v23  ;;  %11764 = vst [vmem:[#allocation10_spill] sm:$0xff] %v6412_v25  ;;  %v6419_v26 = vld [vmem:[%s11284_s2 + $0x120] sm:$0xff]  ;;  %v6424_v27 = vld [vmem:[%s11284_s2 + $0x130] sm:$0xff] }
   0xb   :  { %212 = vmatpush1.msra.mxu0 %v6371_v18  ;;  %283 = vmatpush1.msra.mxu1 %v6376_v19  ;;  %11765 = vst [vmem:[#allocation11_spill] sm:$0xff] %v6424_v27  ;;  %v6431_v28 = vld [vmem:[%s11284_s2 + $0x108] sm:$0xff]  ;;  %v6436_v29 = vld [vmem:[%s11284_s2 + $0x118] sm:$0xff]  ;;  %v6443_v30 = vld [vmem:[%s11284_s2 + $0x100] sm:$0xff] }
   0xc   :  { %213 = vmatprep.subr.mxu0 %v6383_v20  ;;  %284 = vmatprep.subr.mxu1 %v6388_v21  ;;  %11766 = vst [vmem:[#allocation12_spill] sm:$0xff] %v6436_v29  ;;  %v6448_v31 = vld [vmem:[%s11284_s2 + $0x110] sm:$0xff]  ;;  %v6455_v32 = vld [vmem:[%s11284_s2 + $0xe8] sm:$0xff]  ;;  %v6460_v33 = vld [vmem:[%s11284_s2 + $0xf8] sm:$0xff] }
   0xd   :  { %214 = vmatpush1.msra.mxu0 %v6395_v22  ;;  %285 = vmatpush1.msra.mxu1 %v6400_v23  ;;  %11767 = vst [vmem:[#allocation13_spill] sm:$0xff] %v6448_v31  ;;  %11768 = vst [vmem:[#allocation14_spill] sm:$0xff] %v6460_v33  ;;  %v6467_v34 = vld [vmem:[%s11284_s2 + $0xe0] sm:$0xff]  ;;  %v6472_v35 = vld [vmem:[%s11284_s2 + $0xf0] sm:$0xff] }
   0xe   :  { %215 = vmatprep.subr.mxu0 %v6407_v24  ;;  %286 = vmatprep.subr.mxu1 %v6412_v25  ;;  %11769 = vst [vmem:[#allocation15_spill] sm:$0xff] %v6472_v35  ;;  %v6479_v36 = vld [vmem:[%s11284_s2 + $0xc8] sm:$0xff]  ;;  %v6484_v37 = vld [vmem:[%s11284_s2 + $0xd8] sm:$0xff]  ;;  %v6491_v38 = vld [vmem:[%s11284_s2 + $0xc0] sm:$0xff] }
   0xf   :  { %216 = vmatpush1.msra.mxu0 %v6419_v26  ;;  %287 = vmatpush1.msra.mxu1 %v6424_v27  ;;  %11770 = vst [vmem:[#allocation16_spill] sm:$0xff] %v6484_v37  ;;  %v6496_v39 = vld [vmem:[%s11284_s2 + $0xd0] sm:$0xff]  ;;  %v6503_v40 = vld [vmem:[%s11284_s2 + $0xa8] sm:$0xff]  ;;  %v6508_v41 = vld [vmem:[%s11284_s2 + $0xb8] sm:$0xff] }
  0x10   :  { %217 = vmatprep.subr.mxu0 %v6431_v28  ;;  %288 = vmatprep.subr.mxu1 %v6436_v29  ;;  %11771 = vst [vmem:[#allocation17_spill] sm:$0xff] %v6496_v39  ;;  %11772 = vst [vmem:[#allocation18_spill] sm:$0xff] %v6508_v41  ;;  %v6515_v42 = vld [vmem:[%s11284_s2 + $0xa0] sm:$0xff]  ;;  %v6520_v43 = vld [vmem:[%s11284_s2 + $0xb0] sm:$0xff] }
  0x11   :  { %218 = vmatpush1.msra.mxu0 %v6443_v30  ;;  %289 = vmatpush1.msra.mxu1 %v6448_v31  ;;  %11773 = vst [vmem:[#allocation19_spill] sm:$0xff] %v6520_v43  ;;  %v6527_v44 = vld [vmem:[%s11284_s2 + $0x88] sm:$0xff]  ;;  %v6532_v45 = vld [vmem:[%s11284_s2 + $0x98] sm:$0xff]  ;;  %v6539_v46 = vld [vmem:[%s11284_s2 + $0x80] sm:$0xff] }
  0x12   :  { %219 = vmatprep.subr.mxu0 %v6455_v32  ;;  %290 = vmatprep.subr.mxu1 %v6460_v33  ;;  %11774 = vst [vmem:[#allocation20_spill] sm:$0xff] %v6532_v45  ;;  %v6544_v47 = vld [vmem:[%s11284_s2 + $0x90] sm:$0xff]  ;;  %v6551_v48 = vld [vmem:[%s11284_s2 + $0x68] sm:$0xff]  ;;  %v6556_v49 = vld [vmem:[%s11284_s2 + $0x78] sm:$0xff] }
  0x13   :  { %220 = vmatpush1.msra.mxu0 %v6467_v34  ;;  %291 = vmatpush1.msra.mxu1 %v6472_v35  ;;  %11775 = vst [vmem:[#allocation21_spill] sm:$0xff] %v6544_v47  ;;  %11776 = vst [vmem:[#allocation22_spill] sm:$0xff] %v6556_v49  ;;  %v6563_v50 = vld [vmem:[%s11284_s2 + $0x60] sm:$0xff]  ;;  %v6568_v51 = vld [vmem:[%s11284_s2 + $0x70] sm:$0xff] }
  0x14   :  { %221 = vmatprep.subr.mxu0 %v6479_v36  ;;  %292 = vmatprep.subr.mxu1 %v6484_v37  ;;  %11777 = vst [vmem:[#allocation23_spill] sm:$0xff] %v6568_v51  ;;  %v6575_v52 = vld [vmem:[%s11284_s2 + $0x48] sm:$0xff]  ;;  %v6580_v53 = vld [vmem:[%s11284_s2 + $0x58] sm:$0xff]  ;;  %v6587_v54 = vld [vmem:[%s11284_s2 + $0x40] sm:$0xff] }
  0x15   :  { %222 = vmatpush1.msra.mxu0 %v6491_v38  ;;  %293 = vmatpush1.msra.mxu1 %v6496_v39  ;;  %11778 = vst [vmem:[#allocation24_spill] sm:$0xff] %v6580_v53  ;;  %v6592_v55 = vld [vmem:[%s11284_s2 + $0x50] sm:$0xff]  ;;  %v6599_v56 = vld [vmem:[%s11284_s2 + $0x28] sm:$0xff]  ;;  %v6604_v57 = vld [vmem:[%s11284_s2 + $0x38] sm:$0xff] }
  0x16   :  { %223 = vmatprep.subr.mxu0 %v6503_v40  ;;  %294 = vmatprep.subr.mxu1 %v6508_v41  ;;  %11779 = vst [vmem:[#allocation25_spill] sm:$0xff] %v6592_v55  ;;  %11780 = vst [vmem:[#allocation26_spill] sm:$0xff] %v6604_v57  ;;  %v6611_v58 = vld [vmem:[%s11284_s2 + $0x20] sm:$0xff]  ;;  %v6616_v59 = vld [vmem:[%s11284_s2 + $0x30] sm:$0xff] }
  0x17   :  { %224 = vmatpush1.msra.mxu0 %v6515_v42  ;;  %295 = vmatpush1.msra.mxu1 %v6520_v43  ;;  %11781 = vst [vmem:[#allocation27_spill] sm:$0xff] %v6616_v59  ;;  %v6623_v60 = vld [vmem:[%s11284_s2 + $0x8] sm:$0xff]  ;;  %v6628_v61 = vld [vmem:[%s11284_s2 + $0x18] sm:$0xff]  ;;  %v6635_v62 = vld [vmem:[%s11284_s2] sm:$0xff] }
  0x18   :  { %225 = vmatprep.subr.mxu0 %v6527_v44  ;;  %296 = vmatprep.subr.mxu1 %v6532_v45  ;;  %11782 = vst [vmem:[#allocation28_spill] sm:$0xff] %v6628_v61  ;;  %v6642_v63 = vld [vmem:[%s11284_s2 + $0x10] sm:$0xff]  ;;  %v6711_v45 = vld [vmem:[%s11285_s3 + $0x1a0] sm:$0xff]  ;;  %v6723_v43 = vld [vmem:[%s11285_s3 + $0x188] sm:$0xff] }
  0x19   :  { %226 = vmatpush1.msra.mxu0 %v6539_v46  ;;  %297 = vmatpush1.msra.mxu1 %v6544_v47  ;;  %11783 = vst [vmem:[#allocation29_spill] sm:$0xff] %v6642_v63  ;;  %v6699_v47 = vld [vmem:[%s11285_s3 + $0x1a8] sm:$0xff]  ;;  %v6735_v41 = vld [vmem:[%s11285_s3 + $0x180] sm:$0xff] }
  0x1a   :  { %227 = vmatprep.subr.mxu0 %v6551_v48  ;;  %298 = vmatprep.subr.mxu1 %v6556_v49  ;;  %v6687_v49 = vld [vmem:[%s11285_s3 + $0x1c0] sm:$0xff]  ;;  %11791 = vst [vmem:[#allocation37_spill] sm:$0xff] %v6735_v41  ;;  %v6747_v39 = vld [vmem:[%s11285_s3 + $0x168] sm:$0xff] }
  0x1b   :  { %228 = vmatpush1.msra.mxu0 %v6563_v50  ;;  %299 = vmatpush1.msra.mxu1 %v6568_v51  ;;  %v6680_v51 = vld [vmem:[%s11285_s3 + $0x1d8] sm:$0xff]  ;;  %11793 = vst [vmem:[#allocation39_spill] sm:$0xff] %v6747_v39  ;;  %v6759_v37 = vld [vmem:[%s11285_s3 + $0x160] sm:$0xff]  ;;  %v6771_v35 = vld [vmem:[%s11285_s3 + $0x148] sm:$0xff] }
  0x1c   :  { %229 = vmatprep.subr.mxu0 %v6575_v52  ;;  %300 = vmatprep.subr.mxu1 %v6580_v53  ;;  %v6668_v53 = vld [vmem:[%s11285_s3 + $0x1f0] sm:$0xff]  ;;  %11786 = vst [vmem:[#allocation32_spill] sm:$0xff] %v6680_v51  ;;  %11795 = vst [vmem:[#allocation41_spill] sm:$0xff] %v6759_v37 }
  0x1d   :  { %230 = vmatpush1.msra.mxu0 %v6587_v54  ;;  %301 = vmatpush1.msra.mxu1 %v6592_v55  ;;  %v6651_v55 = vld [vmem:[%s11285_s3 + $0x1e8] sm:$0xff]  ;;  %11785 = vst [vmem:[#allocation31_spill] sm:$0xff] %v6668_v53  ;;  %11797 = vst [vmem:[#allocation43_spill] sm:$0xff] %v6771_v35 }
  0x1e   :  { %231 = vmatprep.subr.mxu0 %v6599_v56  ;;  %302 = vmatprep.subr.mxu1 %v6604_v57  ;;  %v11298_v57 = vmov 0.0  }
  0x1f   :  { %232 = vmatpush1.msra.mxu0 %v6611_v58  ;;  %303 = vmatpush1.msra.mxu1 %v6616_v59  ;;  %v6656_v59 = vld [vmem:[%s11285_s3 + $0x1f8] sm:$0xff] }
  0x20   :  { %233 = vmatprep.subr.mxu0 %v6623_v60  ;;  %304 = vmatprep.subr.mxu1 %v6628_v61  ;;  %11784 = vst [vmem:[#allocation30_spill] sm:$0xff] %v6656_v59  ;;  %v6663_v61 = vld [vmem:[%s11285_s3 + $0x1e0] sm:$0xff] }
  0x21   :  { %234 = vmatpush1.msra.mxu0 %v6635_v62  ;;  %267 = vmatprep.mubr.f32.mxu0 %v11298_v57 }
  0x22   :  { %305 = vmatpush1.msra.mxu1 %v6642_v63  ;;  %338 = vmatprep.mubr.f32.mxu1 %v11298_v57  ;;  %v6675_v63 = vld [vmem:[%s11285_s3 + $0x1c8] sm:$0xff] }
  0x23   :  { %268 = vmatmul.mubr.f32.vlgmr.msra.gmra.mxu0 %v11298_v57  ;;  %339 = vmatmul.mubr.f32.vlgmr.msra.gmra.mxu1 %v11298_v57  ;;  %v6692_v57 = vld [vmem:[%s11285_s3 + $0x1d0] sm:$0xff] }
  0x24   :  { %370 = vmatprep.subr.mxu0 %v6651_v55  ;;  %441 = vmatprep.subr.mxu1 %v6656_v59  ;;  %11787 = vst [vmem:[#allocation33_spill] sm:$0xff] %v6692_v57  ;;  %v6704_v59 = vld [vmem:[%s11285_s3 + $0x1b8] sm:$0xff] }
  0x25   :  { %371 = vmatpush1.msra.mxu0 %v6663_v61  ;;  %442 = vmatpush1.msra.mxu1 %v6668_v53  ;;  %11788 = vst [vmem:[#allocation34_spill] sm:$0xff] %v6704_v59  ;;  %v6716_v53 = vld [vmem:[%s11285_s3 + $0x1b0] sm:$0xff] }
  0x26   :  { %372 = vmatprep.subr.mxu0 %v6675_v63  ;;  %443 = vmatprep.subr.mxu1 %v6680_v51  ;;  %11789 = vst [vmem:[#allocation35_spill] sm:$0xff] %v6716_v53  ;;  %v6728_v51 = vld [vmem:[%s11285_s3 + $0x198] sm:$0xff] }
  0x27   :  { %373 = vmatpush1.msra.mxu0 %v6687_v49  ;;  %444 = vmatpush1.msra.mxu1 %v6692_v57  ;;  %11790 = vst [vmem:[#allocation36_spill] sm:$0xff] %v6728_v51  ;;  %v6740_v57 = vld [vmem:[%s11285_s3 + $0x190] sm:$0xff] }
  0x28   :  { %374 = vmatprep.subr.mxu0 %v6699_v47  ;;  %445 = vmatprep.subr.mxu1 %v6704_v59  ;;  %11792 = vst [vmem:[#allocation38_spill] sm:$0xff] %v6740_v57  ;;  %v6752_v59 = vld [vmem:[%s11285_s3 + $0x178] sm:$0xff] }
  0x29   :  { %375 = vmatpush1.msra.mxu0 %v6711_v45  ;;  %446 = vmatpush1.msra.mxu1 %v6716_v53  ;;  %11794 = vst [vmem:[#allocation40_spill] sm:$0xff] %v6752_v59  ;;  %v6764_v53 = vld [vmem:[%s11285_s3 + $0x170] sm:$0xff] }
  0x2a   :  { %376 = vmatprep.subr.mxu0 %v6723_v43  ;;  %447 = vmatprep.subr.mxu1 %v6728_v51  ;;  %11796 = vst [vmem:[#allocation42_spill] sm:$0xff] %v6764_v53  ;;  %v6776_v51 = vld [vmem:[%s11285_s3 + $0x158] sm:$0xff] }
  0x2b   :  { %377 = vmatpush1.msra.mxu0 %v6735_v41  ;;  %448 = vmatpush1.msra.mxu1 %v6740_v57  ;;  %11798 = vst [vmem:[#allocation44_spill] sm:$0xff] %v6776_v51 }
  0x2c   :  { %12 = vsyncpa [#allocation3], 0  ;;  %378 = vmatprep.subr.mxu0 %v6747_v39  ;;  %449 = vmatprep.subr.mxu1 %v6752_v59  ;;  %v6783_v33 = vld [vmem:[%s11285_s3 + $0x140] sm:$0xff]  ;;  %v6788_v57 = vld [vmem:[%s11285_s3 + $0x150] sm:$0xff]  ;;  %vm6219_vm0 = vmmov 0  }
  0x2d   :  { %11799 = vst [vmem:[#allocation45_spill] sm:$0xff] %v6783_v33  ;;  %11800 = vst [vmem:[#allocation46_spill] sm:$0xff] %v6788_v57  ;;  %379 = vmatpush1.msra.mxu0 %v6759_v37  ;;  %450 = vmatpush1.msra.mxu1 %v6764_v53  ;;  %v6795_v31 = vld [vmem:[%s11285_s3 + $0x128] sm:$0xff]  ;;  %v6800_v59 = vld [vmem:[%s11285_s3 + $0x138] sm:$0xff] }
  0x2e   :  { %11801 = vst [vmem:[#allocation47_spill] sm:$0xff] %v6795_v31  ;;  %11802 = vst [vmem:[#allocation48_spill] sm:$0xff] %v6800_v59  ;;  %380 = vmatprep.subr.mxu0 %v6771_v35  ;;  %451 = vmatprep.subr.mxu1 %v6776_v51  ;;  %v6807_v29 = vld [vmem:[%s11285_s3 + $0x120] sm:$0xff]  ;;  %v6812_v53 = vld [vmem:[%s11285_s3 + $0x130] sm:$0xff] }
  0x2f   :  { %11803 = vst [vmem:[#allocation49_spill] sm:$0xff] %v6807_v29  ;;  %11804 = vst [vmem:[#allocation50_spill] sm:$0xff] %v6812_v53  ;;  %381 = vmatpush1.msra.mxu0 %v6783_v33  ;;  %452 = vmatpush1.msra.mxu1 %v6788_v57  ;;  %v6819_v27 = vld [vmem:[%s11285_s3 + $0x108] sm:$0xff]  ;;  %v6824_v51 = vld [vmem:[%s11285_s3 + $0x118] sm:$0xff] }
  0x30   :  { %11805 = vst [vmem:[#allocation51_spill] sm:$0xff] %v6819_v27  ;;  %11806 = vst [vmem:[#allocation52_spill] sm:$0xff] %v6824_v51  ;;  %382 = vmatprep.subr.mxu0 %v6795_v31  ;;  %453 = vmatprep.subr.mxu1 %v6800_v59  ;;  %v6831_v25 = vld [vmem:[%s11285_s3 + $0x100] sm:$0xff]  ;;  %v6836_v57 = vld [vmem:[%s11285_s3 + $0x110] sm:$0xff] }
  0x31   :  { %11807 = vst [vmem:[#allocation53_spill] sm:$0xff] %v6831_v25  ;;  %11808 = vst [vmem:[#allocation54_spill] sm:$0xff] %v6836_v57  ;;  %383 = vmatpush1.msra.mxu0 %v6807_v29  ;;  %454 = vmatpush1.msra.mxu1 %v6812_v53  ;;  %v6843_v31 = vld [vmem:[%s11285_s3 + $0xe8] sm:$0xff]  ;;  %v6848_v59 = vld [vmem:[%s11285_s3 + $0xf8] sm:$0xff] }
  0x32   :  { %11809 = vst [vmem:[#allocation55_spill] sm:$0xff] %v6843_v31  ;;  %11810 = vst [vmem:[#allocation56_spill] sm:$0xff] %v6848_v59  ;;  %384 = vmatprep.subr.mxu0 %v6819_v27  ;;  %455 = vmatprep.subr.mxu1 %v6824_v51  ;;  %v6855_v29 = vld [vmem:[%s11285_s3 + $0xe0] sm:$0xff]  ;;  %v6860_v53 = vld [vmem:[%s11285_s3 + $0xf0] sm:$0xff] }
  0x33   :  { %11811 = vst [vmem:[#allocation57_spill] sm:$0xff] %v6855_v29  ;;  %11812 = vst [vmem:[#allocation58_spill] sm:$0xff] %v6860_v53  ;;  %385 = vmatpush1.msra.mxu0 %v6831_v25  ;;  %456 = vmatpush1.msra.mxu1 %v6836_v57  ;;  %v6867_v27 = vld [vmem:[%s11285_s3 + $0xc8] sm:$0xff]  ;;  %v6872_v51 = vld [vmem:[%s11285_s3 + $0xd8] sm:$0xff] }
  0x34   :  { %11813 = vst [vmem:[#allocation59_spill] sm:$0xff] %v6867_v27  ;;  %11814 = vst [vmem:[#allocation60_spill] sm:$0xff] %v6872_v51  ;;  %386 = vmatprep.subr.mxu0 %v6843_v31  ;;  %457 = vmatprep.subr.mxu1 %v6848_v59  ;;  %v6879_v25 = vld [vmem:[%s11285_s3 + $0xc0] sm:$0xff]  ;;  %v6884_v57 = vld [vmem:[%s11285_s3 + $0xd0] sm:$0xff] }
  0x35   :  { %11815 = vst [vmem:[#allocation61_spill] sm:$0xff] %v6879_v25  ;;  %11816 = vst [vmem:[#allocation62_spill] sm:$0xff] %v6884_v57  ;;  %387 = vmatpush1.msra.mxu0 %v6855_v29  ;;  %458 = vmatpush1.msra.mxu1 %v6860_v53  ;;  %v6891_v31 = vld [vmem:[%s11285_s3 + $0xa8] sm:$0xff]  ;;  %v6896_v59 = vld [vmem:[%s11285_s3 + $0xb8] sm:$0xff] }
  0x36   :  { %11817 = vst [vmem:[#allocation63_spill] sm:$0xff] %v6891_v31  ;;  %11818 = vst [vmem:[#allocation64_spill] sm:$0xff] %v6896_v59  ;;  %388 = vmatprep.subr.mxu0 %v6867_v27  ;;  %459 = vmatprep.subr.mxu1 %v6872_v51  ;;  %v6903_v29 = vld [vmem:[%s11285_s3 + $0xa0] sm:$0xff]  ;;  %v6908_v53 = vld [vmem:[%s11285_s3 + $0xb0] sm:$0xff] }
  0x37   :  { %11819 = vst [vmem:[#allocation65_spill] sm:$0xff] %v6903_v29  ;;  %11820 = vst [vmem:[#allocation66_spill] sm:$0xff] %v6908_v53  ;;  %389 = vmatpush1.msra.mxu0 %v6879_v25  ;;  %460 = vmatpush1.msra.mxu1 %v6884_v57  ;;  %v6915_v27 = vld [vmem:[%s11285_s3 + $0x88] sm:$0xff]  ;;  %v6920_v51 = vld [vmem:[%s11285_s3 + $0x98] sm:$0xff] }
  0x38   :  { %11821 = vst [vmem:[#allocation67_spill] sm:$0xff] %v6915_v27  ;;  %11822 = vst [vmem:[#allocation68_spill] sm:$0xff] %v6920_v51  ;;  %390 = vmatprep.subr.mxu0 %v6891_v31  ;;  %461 = vmatprep.subr.mxu1 %v6896_v59  ;;  %v6927_v25 = vld [vmem:[%s11285_s3 + $0x80] sm:$0xff]  ;;  %v6932_v57 = vld [vmem:[%s11285_s3 + $0x90] sm:$0xff] }
  0x39   :  { %11823 = vst [vmem:[#allocation69_spill] sm:$0xff] %v6927_v25  ;;  %11824 = vst [vmem:[#allocation70_spill] sm:$0xff] %v6932_v57  ;;  %391 = vmatpush1.msra.mxu0 %v6903_v29  ;;  %462 = vmatpush1.msra.mxu1 %v6908_v53  ;;  %v6939_v31 = vld [vmem:[%s11285_s3 + $0x68] sm:$0xff]  ;;  %v6944_v59 = vld [vmem:[%s11285_s3 + $0x78] sm:$0xff] }
  0x3a   :  { %11825 = vst [vmem:[#allocation71_spill] sm:$0xff] %v6939_v31  ;;  %11826 = vst [vmem:[#allocation72_spill] sm:$0xff] %v6944_v59  ;;  %392 = vmatprep.subr.mxu0 %v6915_v27  ;;  %463 = vmatprep.subr.mxu1 %v6920_v51  ;;  %v6951_v29 = vld [vmem:[%s11285_s3 + $0x60] sm:$0xff]  ;;  %v6956_v53 = vld [vmem:[%s11285_s3 + $0x70] sm:$0xff] }
  0x3b   :  { %11827 = vst [vmem:[#allocation73_spill] sm:$0xff] %v6951_v29  ;;  %11828 = vst [vmem:[#allocation74_spill] sm:$0xff] %v6956_v53  ;;  %393 = vmatpush1.msra.mxu0 %v6927_v25  ;;  %464 = vmatpush1.msra.mxu1 %v6932_v57  ;;  %v6963_v27 = vld [vmem:[%s11285_s3 + $0x48] sm:$0xff]  ;;  %v6968_v51 = vld [vmem:[%s11285_s3 + $0x58] sm:$0xff] }
  0x3c   :  { %11829 = vst [vmem:[#allocation75_spill] sm:$0xff] %v6963_v27  ;;  %11830 = vst [vmem:[#allocation76_spill] sm:$0xff] %v6968_v51  ;;  %394 = vmatprep.subr.mxu0 %v6939_v31  ;;  %465 = vmatprep.subr.mxu1 %v6944_v59  ;;  %v6975_v25 = vld [vmem:[%s11285_s3 + $0x40] sm:$0xff]  ;;  %v6980_v57 = vld [vmem:[%s11285_s3 + $0x50] sm:$0xff] }
  0x3d   :  { %11831 = vst [vmem:[#allocation77_spill] sm:$0xff] %v6975_v25  ;;  %11832 = vst [vmem:[#allocation78_spill] sm:$0xff] %v6980_v57  ;;  %395 = vmatpush1.msra.mxu0 %v6951_v29  ;;  %466 = vmatpush1.msra.mxu1 %v6956_v53  ;;  %v6987_v31 = vld [vmem:[%s11285_s3 + $0x28] sm:$0xff]  ;;  %v6992_v59 = vld [vmem:[%s11285_s3 + $0x38] sm:$0xff] }
  0x3e   :  { %11833 = vst [vmem:[#allocation79_spill] sm:$0xff] %v6987_v31  ;;  %11834 = vst [vmem:[#allocation80_spill] sm:$0xff] %v6992_v59  ;;  %396 = vmatprep.subr.mxu0 %v6963_v27  ;;  %467 = vmatprep.subr.mxu1 %v6968_v51  ;;  %v6999_v29 = vld [vmem:[%s11285_s3 + $0x20] sm:$0xff]  ;;  %v7004_v53 = vld [vmem:[%s11285_s3 + $0x30] sm:$0xff] }
  0x3f   :  { %11835 = vst [vmem:[#allocation81_spill] sm:$0xff] %v6999_v29  ;;  %11836 = vst [vmem:[#allocation82_spill] sm:$0xff] %v7004_v53  ;;  %397 = vmatpush1.msra.mxu0 %v6975_v25  ;;  %468 = vmatpush1.msra.mxu1 %v6980_v57  ;;  %v7011_v27 = vld [vmem:[%s11285_s3 + $0x8] sm:$0xff]  ;;  %v7016_v51 = vld [vmem:[%s11285_s3 + $0x18] sm:$0xff] }
  0x40   :  { %11837 = vst [vmem:[#allocation83_spill] sm:$0xff] %v7011_v27  ;;  %11838 = vst [vmem:[#allocation84_spill] sm:$0xff] %v7016_v51  ;;  %398 = vmatprep.subr.mxu0 %v6987_v31  ;;  %469 = vmatprep.subr.mxu1 %v6992_v59  ;;  %v7023_v25 = vld [vmem:[%s11285_s3] sm:$0xff]  ;;  %v7030_v57 = vld [vmem:[%s11285_s3 + $0x10] sm:$0xff]  ;;  %v11841_v59 = vmov 0.0  }
  0x41   :  { %11839 = vst [vmem:[#allocation85_spill] sm:$0xff] %v7023_v25  ;;  %399 = vmatpush1.msra.mxu0 %v6999_v29  ;;  %470 = vmatpush1.msra.mxu1 %v7004_v53  ;;  %11840 = vst [vmem:[#allocation86_spill] sm:$0xff] %v7030_v57  ;;  %v7059_v53 = vld [vmem:[%s11286_s4 + $0x68] sm:$0xff] }
  0x42   :  { %400 = vmatprep.subr.mxu0 %v7011_v27  ;;  %471 = vmatprep.subr.mxu1 %v7016_v51  ;;  %v7045_v51 = vld [vmem:[%s11286_s4 + $0x78] sm:$0xff]  ;;  %11844 = vst [vmem:[#allocation89_spill] sm:$0xff] %v7059_v53 }
  0x43   :  { %401 = vmatpush1.msra.mxu0 %v7023_v25  ;;  %434 = vmatprep.mubr.f32.mxu0 %v11841_v59  ;;  %11842 = vst [vmem:[#allocation87_spill] sm:$0xff] %v7045_v51  ;;  %v354_v25 = vlaneseq }
  0x44   :  { %472 = vmatpush1.msra.mxu1 %v7030_v57  ;;  %505 = vmatprep.mubr.f32.mxu1 %v11841_v59  ;;  %v7052_v57 = vld [vmem:[%s11286_s4 + $0x70] sm:$0xff] }
  0x45   :  { %435 = vmatmul.mubr.f32.vlgmr.msra.gmra.mxu0 %v11841_v59  ;;  %506 = vmatmul.mubr.f32.vlgmr.msra.gmra.mxu1 %v11841_v59  ;;  %11843 = vst [vmem:[#allocation88_spill] sm:$0xff] %v7052_v57  ;;  %v355_v29 = vshrl.u32 %v354_v25, 7 }
  0x46   :  { %4894 = vmatprep.subr.mxu0 %v11841_v59  ;;  %4929 = vmatprep.subr.mxu1 %v11841_v59 }
  0x47   :  { %4895 = vmatpush3.msra.mxu0 %v7045_v51  ;;  %v7066_v51 = vld [vmem:[%s11286_s4 + $0x60] sm:$0xff]  ;;  %4926 = vmatprep.mubr.msk.f32.mxu0 %vm6219_vm0, %v11841_v59 }
  0x48   :  { %4896 = vmatprep.subr.mxu0 %v11841_v59  ;;  %11845 = vst [vmem:[#allocation90_spill] sm:$0xff] %v7066_v51  ;;  %4961 = vmatprep.mubr.msk.f32.mxu1 %vm6219_vm0, %v11841_v59 }
  0x49   :  { %4897 = vmatpush3.msra.mxu0 %v7052_v57  ;;  %v7073_v57 = vld [vmem:[%s11286_s4 + $0x58] sm:$0xff] }
  0x4a   :  { %4898 = vmatprep.subr.mxu0 %v11841_v59  ;;  %11846 = vst [vmem:[#allocation91_spill] sm:$0xff] %v7073_v57 }
  0x4b   :  { %4899 = vmatpush3.msra.mxu0 %v7059_v53  ;;  %v7080_v53 = vld [vmem:[%s11286_s4 + $0x50] sm:$0xff] }
  0x4c   :  { %4900 = vmatprep.subr.mxu0 %v11841_v59  ;;  %11847 = vst [vmem:[#allocation92_spill] sm:$0xff] %v7080_v53 }
  0x4d   :  { %4901 = vmatpush3.msra.mxu0 %v7066_v51  ;;  %v7087_v51 = vld [vmem:[%s11286_s4 + $0x48] sm:$0xff] }
  0x4e   :  { %4902 = vmatprep.subr.mxu0 %v11841_v59  ;;  %11848 = vst [vmem:[#allocation93_spill] sm:$0xff] %v7087_v51 }
  0x4f   :  { %4903 = vmatpush3.msra.mxu0 %v7073_v57  ;;  %v7094_v57 = vld [vmem:[%s11286_s4 + $0x40] sm:$0xff] }
  0x50   :  { %4904 = vmatprep.subr.mxu0 %v11841_v59  ;;  %11849 = vst [vmem:[#allocation94_spill] sm:$0xff] %v7094_v57 }
  0x51   :  { %4905 = vmatpush3.msra.mxu0 %v7080_v53  ;;  %v7101_v53 = vld [vmem:[%s11286_s4 + $0x38] sm:$0xff] }
  0x52   :  { %4906 = vmatprep.subr.mxu0 %v11841_v59  ;;  %11850 = vst [vmem:[#allocation95_spill] sm:$0xff] %v7101_v53 }
  0x53   :  { %4907 = vmatpush3.msra.mxu0 %v7087_v51  ;;  %v7108_v51 = vld [vmem:[%s11286_s4 + $0x30] sm:$0xff] }
  0x54   :  { %4908 = vmatprep.subr.mxu0 %v11841_v59  ;;  %11851 = vst [vmem:[#allocation96_spill] sm:$0xff] %v7108_v51 }
  0x55   :  { %4909 = vmatpush3.msra.mxu0 %v7094_v57  ;;  %v7115_v57 = vld [vmem:[%s11286_s4 + $0x28] sm:$0xff] }
  0x56   :  { %4910 = vmatprep.subr.mxu0 %v11841_v59  ;;  %11852 = vst [vmem:[#allocation97_spill] sm:$0xff] %v7115_v57 }
  0x57   :  { %4911 = vmatpush3.msra.mxu0 %v7101_v53  ;;  %v7122_v53 = vld [vmem:[%s11286_s4 + $0x20] sm:$0xff] }
  0x58   :  { %4912 = vmatprep.subr.mxu0 %v11841_v59  ;;  %11853 = vst [vmem:[#allocation98_spill] sm:$0xff] %v7122_v53 }
  0x59   :  { %4913 = vmatpush3.msra.mxu0 %v7108_v51  ;;  %v7129_v51 = vld [vmem:[%s11286_s4 + $0x18] sm:$0xff] }
  0x5a   :  { %4914 = vmatprep.subr.mxu0 %v11841_v59  ;;  %11854 = vst [vmem:[#allocation99_spill] sm:$0xff] %v7129_v51 }
  0x5b   :  { %4915 = vmatpush3.msra.mxu0 %v7115_v57  ;;  %v7136_v57 = vld [vmem:[%s11286_s4 + $0x10] sm:$0xff] }
  0x5c   :  { %4916 = vmatprep.subr.mxu0 %v11841_v59  ;;  %11855 = vst [vmem:[#allocation100_spill] sm:$0xff] %v7136_v57 }
  0x5d   :  { %4917 = vmatpush3.msra.mxu0 %v7122_v53  ;;  %v7143_v53 = vld [vmem:[%s11286_s4 + $0x8] sm:$0xff] }
  0x5e   :  { %4918 = vmatprep.subr.mxu0 %v11841_v59  ;;  %11856 = vst [vmem:[#allocation101_spill] sm:$0xff] %v7143_v53 }
  0x5f   :  { %4919 = vmatpush3.msra.mxu0 %v7129_v51  ;;  %v7150_v51 = vld [vmem:[%s11286_s4] sm:$0xff] }
  0x60   :  { %4920 = vmatprep.subr.mxu0 %v11841_v59  ;;  %11857 = vst [vmem:[#allocation102_spill] sm:$0xff] %v7150_v51 }
  0x61   :  { %4921 = vmatpush3.msra.mxu0 %v7136_v57  ;;  %v7159_v57 = vld [vmem:[%s11287_s5 + $0x78] sm:$0xff] }
  0x62   :  { %4922 = vmatprep.subr.mxu0 %v11841_v59  ;;  %11858 = vst [vmem:[#allocation103_spill] sm:$0xff] %v7159_v57  ;;  %4930 = vmatpush3.msra.mxu1 %v7159_v57  ;;  %v7182_v57 = vld [vmem:[%s11287_s5 + $0x60] sm:$0xff] }
  0x63   :  { %4923 = vmatpush3.msra.mxu0 %v7143_v53  ;;  %4931 = vmatprep.subr.mxu1 %v11841_v59  ;;  %11861 = vst [vmem:[#allocation106_spill] sm:$0xff] %v7182_v57 }
  0x64   :  { %4924 = vmatprep.subr.mxu0 %v11841_v59 }
  0x65   :  { %4925 = vmatpush3.msra.mxu0 %v7150_v51  ;;  %v7168_v51 = vld [vmem:[%s11287_s5 + $0x70] sm:$0xff] }
  0x66   :  { %746 = vmatprep.subr.mxu0 %v6267_v0  ;;  %11859 = vst [vmem:[#allocation104_spill] sm:$0xff] %v7168_v51  ;;  %4932 = vmatpush3.msra.mxu1 %v7168_v51  ;;  %v7175_v0 = vld [vmem:[%s11287_s5 + $0x68] sm:$0xff]  ;;  %v7189_v51 = vld [vmem:[%s11287_s5 + $0x58] sm:$0xff] }
  0x67   :  { %4933 = vmatprep.subr.mxu1 %v11841_v59  ;;  %11860 = vst [vmem:[#allocation105_spill] sm:$0xff] %v7175_v0  ;;  %11862 = vst [vmem:[#allocation107_spill] sm:$0xff] %v7189_v51 }
  0x68   :  { %4934 = vmatpush3.msra.mxu1 %v7175_v0  ;;  %v7196_v0 = vld [vmem:[%s11287_s5 + $0x50] sm:$0xff] }
  0x69   :  { %4935 = vmatprep.subr.mxu1 %v11841_v59  ;;  %11863 = vst [vmem:[#allocation108_spill] sm:$0xff] %v7196_v0 }
  0x6a   :  { %4936 = vmatpush3.msra.mxu1 %v7182_v57  ;;  %v7203_v57 = vld [vmem:[%s11287_s5 + $0x48] sm:$0xff] }
  0x6b   :  { %4937 = vmatprep.subr.mxu1 %v11841_v59  ;;  %11864 = vst [vmem:[#allocation109_spill] sm:$0xff] %v7203_v57 }
  0x6c   :  { %4938 = vmatpush3.msra.mxu1 %v7189_v51  ;;  %v7210_v51 = vld [vmem:[%s11287_s5 + $0x40] sm:$0xff] }
  0x6d   :  { %4939 = vmatprep.subr.mxu1 %v11841_v59  ;;  %11865 = vst [vmem:[#allocation110_spill] sm:$0xff] %v7210_v51 }
  0x6e   :  { %4940 = vmatpush3.msra.mxu1 %v7196_v0  ;;  %v7217_v0 = vld [vmem:[%s11287_s5 + $0x38] sm:$0xff] }
  0x6f   :  { %4941 = vmatprep.subr.mxu1 %v11841_v59  ;;  %11866 = vst [vmem:[#allocation111_spill] sm:$0xff] %v7217_v0 }
  0x70   :  { %4942 = vmatpush3.msra.mxu1 %v7203_v57  ;;  %v7224_v57 = vld [vmem:[%s11287_s5 + $0x30] sm:$0xff] }
  0x71   :  { %4943 = vmatprep.subr.mxu1 %v11841_v59  ;;  %11867 = vst [vmem:[#allocation112_spill] sm:$0xff] %v7224_v57 }
  0x72   :  { %4944 = vmatpush3.msra.mxu1 %v7210_v51  ;;  %v7231_v51 = vld [vmem:[%s11287_s5 + $0x28] sm:$0xff] }
  0x73   :  { %4945 = vmatprep.subr.mxu1 %v11841_v59  ;;  %11868 = vst [vmem:[#allocation113_spill] sm:$0xff] %v7231_v51 }
  0x74   :  { %4946 = vmatpush3.msra.mxu1 %v7217_v0  ;;  %v7238_v0 = vld [vmem:[%s11287_s5 + $0x20] sm:$0xff] }
  0x75   :  { %4947 = vmatprep.subr.mxu1 %v11841_v59  ;;  %11869 = vst [vmem:[#allocation114_spill] sm:$0xff] %v7238_v0 }
  0x76   :  { %4948 = vmatpush3.msra.mxu1 %v7224_v57  ;;  %v7245_v57 = vld [vmem:[%s11287_s5 + $0x18] sm:$0xff] }
  0x77   :  { %4949 = vmatprep.subr.mxu1 %v11841_v59  ;;  %11870 = vst [vmem:[#allocation115_spill] sm:$0xff] %v7245_v57 }
  0x78   :  { %4950 = vmatpush3.msra.mxu1 %v7231_v51  ;;  %v7252_v51 = vld [vmem:[%s11287_s5 + $0x10] sm:$0xff] }
  0x79   :  { %4951 = vmatprep.subr.mxu1 %v11841_v59  ;;  %11871 = vst [vmem:[#allocation116_spill] sm:$0xff] %v7252_v51 }
  0x7a   :  { %4952 = vmatpush3.msra.mxu1 %v7238_v0  ;;  %v7259_v0 = vld [vmem:[%s11287_s5 + $0x8] sm:$0xff] }
  0x7b   :  { %4953 = vmatprep.subr.mxu1 %v11841_v59  ;;  %11872 = vst [vmem:[#allocation117_spill] sm:$0xff] %v7259_v0 }
  0x7c   :  { %4954 = vmatpush3.msra.mxu1 %v7245_v57  ;;  %v7266_v57 = vld [vmem:[%s11287_s5] sm:$0xff] }
  0x7d   :  { %4955 = vmatprep.subr.mxu1 %v11841_v59  ;;  %11873 = vst [vmem:[#allocation118_spill] sm:$0xff] %v7266_v57 }
  0x7e   :  { %4956 = vmatpush3.msra.mxu1 %v7252_v51  ;;  %v6220_v51 = vmov 1983009808  }
  0x7f   :  { %4957 = vmatprep.subr.mxu1 %v11841_v59  ;;  %v352_v53 = vunpack.c.l.s4 %v6220_v51 }
  0x80   :  { %4958 = vmatpush3.msra.mxu1 %v7259_v0 }
  0x81   :  { %4959 = vmatprep.subr.mxu1 %v11841_v59  ;;  %v353_v27 = vunpack.c.0.s8 %v352_v53 }
  0x82   :  { %4960 = vmatpush3.msra.mxu1 %v7266_v57 }
  0x83   :  { %817 = vmatprep.subr.mxu1 %v6272_v1  ;;  %v7270_v33 = vsub.s32 %v353_v27, %v355_v29  ;;  %v202_v1 = vld [vmem:[%s11282_s0] sm:$0xff] }
  0x85   :  { %11874 = vst [vmem:[#allocation119_spill] sm:$0xff] %v7270_v33 }
  0xe3   :  { %v269_v31 = vpop.f32.mrf.mxu0  ;;  %v340_v23 = vpop.f32.mrf.mxu1 }
  0xe5   :  { %v271_v0 = vpop.f32.mrf.mxu0  ;;  %v342_v21 = vpop.f32.mrf.mxu1 }
  0xe6   :  { %v349_v35 = vcombine.low %v269_v31, %v271_v0  ;;  %v350_v19 = vcombine.low %v340_v23, %v342_v21 }
  0xe8   :  { %v357_v37 = vrot.slane %v349_v35, %v7270_v33  ;;  %v364_v17 = vrot.slane %v350_v19, %v7270_v33 }
  0xea   :  { %v365_v51 = vcombine.low %v357_v37, %v364_v17 }
  0xec   :  { %v367_v57 = vadd.f32 %v365_v51, %v202_v1 }
  0xee   :  { %v4561_v53 = vmul.f32 -1.442695, %v367_v57  ;;  %v542_v25 = vrot.slane %v367_v57, 2  ;;  %v553_v27 = vrot.slane %v367_v57, 6  ;;  %v550_v29 = vrot.slane %v367_v57, 4 }
  0xf0   :  { %5460 = vpow2.f32 %v4561_v53  ;;  %v4562_v39 = vmul.f32 -1.442695, %v542_v25  ;;  %v4563_v31 = vmul.f32 -1.442695, %v553_v27  ;;  %v4560_v53 = vld [vmem:[%s11283_s1 + $0x38] sm:$0xff] }
  0xf2   :  { %5462 = vpow2.f32 %v4562_v39  ;;  %v4559_v39 = vld [vmem:[%s11288_s6] ss:$0 sm:$0xff] }
  0xf3   :  { %5464 = vtanh.f32 %v550_v29  ;;  %194 = vst [vmem:[#allocation2] sm:$0x3] %v4559_v39  ;;  %195 = vst [vmem:[#allocation2 + $0x2] sm:$0x3] %v4559_v39 }
  0xf4   :  { %196 = vst [vmem:[#allocation2 + $0x4] sm:$0x3] %v4559_v39  ;;  %197 = vst [vmem:[#allocation2 + $0x6] sm:$0x3] %v4559_v39 }
  0xf5   :  { %198 = vst [vmem:[#allocation2 + $0x8] sm:$0x3] %v4559_v39  ;;  %199 = vst [vmem:[#allocation2 + $0xa] sm:$0x3] %v4559_v39 }
  0xf6   :  { %200 = vst [vmem:[#allocation2 + $0xc] sm:$0x3] %v4559_v39  ;;  %201 = vst [vmem:[#allocation2 + $0xe] sm:$0x3] %v4559_v39 }
  0xfd   :  { %v5461_v15 = vpop.eup %5460 }
  0xfe   :  { %v538_v21 = vadd.f32 1.0, %v5461_v15 }
  0xff   :  { %v5463_v23 = vpop.eup %5462 }
 0x100   :  { %5466 = vrcp.f32 %v538_v21  ;;  %v547_v19 = vadd.f32 1.0, %v5463_v23  ;;  %v5465_v25 = vpop.eup %5464 }
 0x101   :  { %5468 = vpow2.f32 %v4563_v31 }
 0x102   :  { %5470 = vrcp.f32 %v547_v19 }
 0x105   :  { %v436_v35 = vpop.f32.mrf.mxu0  ;;  %v507_v0 = vpop.f32.mrf.mxu1 }
 0x107   :  { %v438_v17 = vpop.f32.mrf.mxu0  ;;  %v509_v37 = vpop.f32.mrf.mxu1 }
 0x108   :  { %v516_v1 = vcombine.low %v436_v35, %v438_v17  ;;  %v517_v51 = vcombine.low %v507_v0, %v509_v37 }
 0x10a   :  { %v524_v15 = vrot.slane %v516_v1, %v7270_v33  ;;  %v531_v57 = vrot.slane %v517_v51, %v7270_v33 }
 0x10c   :  { %v532_v27 = vcombine.low %v524_v15, %v531_v57 }
 0x10d   :  { %v5467_v29 = vpop.eup %5466 }
 0x10e   :  { %v5469_v31 = vpop.eup %5468  ;;  %v534_v21 = vadd.f32 %v4560_v53, %v532_v27  ;;  %v562_v17 = vmul.f32 %v5467_v29, %v5465_v25 }
 0x10f   :  { %v5471_v23 = vpop.eup %5470  ;;  %v558_v37 = vadd.f32 1.0, %v5469_v31 }
 0x110   :  { %v561_v19 = vmul.f32 0.0, %v5471_v23  ;;  %v4564_v35 = vmul.f32 -1.442695, %v534_v21  ;;  %v573_v0 = vrot.slane %v534_v21, 2  ;;  %v584_v51 = vrot.slane %v534_v21, 6 }
 0x111   :  { %v581_v57 = vrot.slane %v534_v21, 4  ;;  %v11911_v21 = vld [vmem:[#allocation73_spill] sm:$0xff] }
 0x112   :  { %5472 = vpow2.f32 %v4564_v35  ;;  %v4565_v39 = vmul.f32 -1.442695, %v573_v0  ;;  %v7285_v1 = vadd.f32 %v562_v17, %v561_v19  ;;  %v4566_v33 = vmul.f32 -1.442695, %v584_v51  ;;  %v11912_v19 = vld [vmem:[#allocation23_spill] sm:$0xff]  ;;  %v11914_v0 = vld [vmem:[#allocation24_spill] sm:$0xff] }
 0x113   :  { %v11913_v35 = vld [vmem:[#allocation75_spill] sm:$0xff]  ;;  %v11915_v17 = vld [vmem:[#allocation77_spill] sm:$0xff]  ;;  %v11918_v51 = vld [vmem:[#allocation26_spill] sm:$0xff] }
 0x114   :  { %5474 = vpow2.f32 %v4565_v39  ;;  %v11917_v39 = vld [vmem:[#allocation79_spill] sm:$0xff] }
 0x115   :  { %5476 = vrcp.f32 %v558_v37  ;;  %v11916_v37 = vld [vmem:[#allocation25_spill] sm:$0xff] }
 0x116   :  { %5478 = vtanh.f32 %v7285_v1 }
 0x117   :  { %5480 = vpow2.f32 %v4566_v33 }
 0x11f   :  { %v5473_v15 = vpop.eup %5472 }
 0x120   :  { %v569_v41 = vadd.f32 1.0, %v5473_v15  ;;  %v11919_v15 = vld [vmem:[#allocation81_spill] sm:$0xff] }
 0x121   :  { %v5475_v53 = vpop.eup %5474 }
 0x122   :  { %v5477_v27 = vpop.eup %5476  ;;  %5482 = vrcp.f32 %v569_v41  ;;  %v578_v23 = vadd.f32 1.0, %v5475_v53  ;;  %v11921_v53 = vld [vmem:[#allocation83_spill] sm:$0xff] }
 0x123   :  { %v5479_v25 = vpop.eup %5478  ;;  %5484 = vtanh.f32 %v581_v57  ;;  %v11920_v57 = vld [vmem:[#allocation27_spill] sm:$0xff] }
 0x124   :  { %5486 = vrcp.f32 %v578_v23  ;;  %v7288_v29 = vmul.f32 %v5479_v25, %v5477_v27  ;;  %v5481_v33 = vpop.eup %5480  ;;  %v11922_v27 = vld [vmem:[#allocation28_spill] sm:$0xff]  ;;  %v11923_v23 = vld [vmem:[#allocation29_spill] sm:$0xff] }
 0x125   :  { %v589_v31 = vadd.f32 1.0, %v5481_v33  ;;  %v11924_v25 = vld [vmem:[#allocation85_spill] sm:$0xff]  ;;  %v11925_v33 = vld [vmem:[#allocation30_spill] sm:$0xff] }
 0x126   :  { %4927 = vmatmul.mubr.f32.vlgmr.msra.gmra.mxu0 %v7288_v29 }
 0x127   :  { %747 = vmatpush1.msra.mxu0 %v6277_v2  ;;  %810 = vmatprep.mubr.f32.mxu0 %v11841_v59  ;;  %5488 = vrcp.f32 %v589_v31  ;;  %v11929_v31 = vld [vmem:[#allocation87_spill] sm:$0xff] }
 0x128   :  { %748 = vmatprep.subr.mxu0 %v6289_v4 }
 0x129   :  { %749 = vmatpush1.msra.mxu0 %v6301_v6 }
 0x12a   :  { %750 = vmatprep.subr.mxu0 %v6311_v8 }
 0x12b   :  { %751 = vmatpush1.msra.mxu0 %v6323_v10 }
 0x12c   :  { %752 = vmatprep.subr.mxu0 %v6335_v12 }
 0x12d   :  { %753 = vmatpush1.msra.mxu0 %v6347_v14 }
 0x12e   :  { %754 = vmatprep.subr.mxu0 %v6359_v16 }
 0x12f   :  { %v5483_v41 = vpop.eup %5482  ;;  %755 = vmatpush1.msra.mxu0 %v6371_v18  ;;  %v11876_v18 = vld [vmem:[#allocation5_spill] sm:$0xff] }
 0x130   :  { %v5485_v2 = vpop.eup %5484  ;;  %756 = vmatprep.subr.mxu0 %v6383_v20  ;;  %v11878_v20 = vld [vmem:[#allocation6_spill] sm:$0xff] }
 0x131   :  { %v5487_v4 = vpop.eup %5486  ;;  %757 = vmatpush1.msra.mxu0 %v6395_v22  ;;  %v593_v8 = vmul.f32 %v5485_v2, %v5483_v41  ;;  %v11880_v22 = vld [vmem:[#allocation7_spill] sm:$0xff]  ;;  %v11927_v2 = vld [vmem:[#allocation32_spill] sm:$0xff] }
 0x132   :  { %v592_v6 = vmul.f32 0.0, %v5487_v4  ;;  %758 = vmatprep.subr.mxu0 %v6407_v24  ;;  %v11882_v24 = vld [vmem:[#allocation8_spill] sm:$0xff]  ;;  %v11926_v41 = vld [vmem:[#allocation31_spill] sm:$0xff]  ;;  %v11928_v4 = vld [vmem:[#allocation33_spill] sm:$0xff] }
 0x133   :  { %759 = vmatpush1.msra.mxu0 %v6419_v26  ;;  %v11884_v26 = vld [vmem:[#allocation9_spill] sm:$0xff] }
 0x134   :  { %760 = vmatprep.subr.mxu0 %v6431_v28  ;;  %v7306_v10 = vadd.f32 %v593_v8, %v592_v6  ;;  %v5489_v12 = vpop.eup %5488  ;;  %v11886_v28 = vld [vmem:[#allocation10_spill] sm:$0xff]  ;;  %v11932_v8 = vld [vmem:[#allocation88_spill] sm:$0xff] }
 0x135   :  { %761 = vmatpush1.msra.mxu0 %v6443_v30  ;;  %v11887_v30 = vld [vmem:[#allocation49_spill] sm:$0xff]  ;;  %v11930_v6 = vld [vmem:[#allocation34_spill] sm:$0xff] }
 0x136   :  { %762 = vmatprep.subr.mxu0 %v6455_v32  ;;  %5490 = vtanh.f32 %v7306_v10  ;;  %v11888_v32 = vld [vmem:[#allocation11_spill] sm:$0xff] }
 0x137   :  { %763 = vmatpush1.msra.mxu0 %v6467_v34  ;;  %v11889_v34 = vld [vmem:[#allocation51_spill] sm:$0xff] }
 0x138   :  { %764 = vmatprep.subr.mxu0 %v6479_v36  ;;  %v11890_v36 = vld [vmem:[#allocation12_spill] sm:$0xff] }
 0x139   :  { %765 = vmatpush1.msra.mxu0 %v6491_v38  ;;  %v11891_v38 = vld [vmem:[#allocation53_spill] sm:$0xff] }
 0x13a   :  { %766 = vmatprep.subr.mxu0 %v6503_v40  ;;  %v11892_v40 = vld [vmem:[#allocation13_spill] sm:$0xff] }
 0x13b   :  { %767 = vmatpush1.msra.mxu0 %v6515_v42  ;;  %v11893_v42 = vld [vmem:[#allocation55_spill] sm:$0xff] }
 0x13c   :  { %768 = vmatprep.subr.mxu0 %v6527_v44  ;;  %v11895_v44 = vld [vmem:[#allocation57_spill] sm:$0xff] }
 0x13d   :  { %769 = vmatpush1.msra.mxu0 %v6539_v46  ;;  %v11897_v46 = vld [vmem:[#allocation59_spill] sm:$0xff] }
 0x13e   :  { %770 = vmatprep.subr.mxu0 %v6551_v48  ;;  %v11899_v48 = vld [vmem:[#allocation61_spill] sm:$0xff] }
 0x13f   :  { %771 = vmatpush1.msra.mxu0 %v6563_v50  ;;  %v11901_v50 = vld [vmem:[#allocation63_spill] sm:$0xff] }
 0x140   :  { %772 = vmatprep.subr.mxu0 %v6575_v52  ;;  %v11902_v52 = vld [vmem:[#allocation18_spill] sm:$0xff] }
 0x141   :  { %773 = vmatpush1.msra.mxu0 %v6587_v54  ;;  %v11903_v54 = vld [vmem:[#allocation65_spill] sm:$0xff] }
 0x142   :  { %774 = vmatprep.subr.mxu0 %v6599_v56  ;;  %v11905_v56 = vld [vmem:[#allocation67_spill] sm:$0xff] }
 0x143   :  { %v5491_v14 = vpop.eup %5490  ;;  %775 = vmatpush1.msra.mxu0 %v6611_v58  ;;  %v11906_v58 = vld [vmem:[#allocation20_spill] sm:$0xff] }
 0x144   :  { %776 = vmatprep.subr.mxu0 %v6623_v60  ;;  %v7325_v16 = vmul.f32 %v5491_v14, %v5489_v12  ;;  %v11907_v60 = vld [vmem:[#allocation69_spill] sm:$0xff]  ;;  %v11933_v12 = vld [vmem:[#allocation36_spill] sm:$0xff]  ;;  %v11934_v14 = vld [vmem:[#allocation38_spill] sm:$0xff] }
 0x145   :  { %777 = vmatpush1.msra.mxu0 %v6635_v62  ;;  %v11909_v62 = vld [vmem:[#allocation71_spill] sm:$0xff] }
 0x146   :  { %811 = vmatmul.mubr.f32.vlgmr.msra.gmra.mxu0 %v7288_v29  ;;  %913 = vmatprep.subr.mxu0 %v6651_v55  ;;  %v11904_v55 = vld [vmem:[#allocation19_spill] sm:$0xff] }
 0x147   :  { %4962 = vmatmul.mubr.f32.vlgmr.msra.gmra.mxu1 %v7325_v16  ;;  %914 = vmatpush1.msra.mxu0 %v6663_v61  ;;  %v11908_v61 = vld [vmem:[#allocation21_spill] sm:$0xff] }
 0x148   :  { %818 = vmatpush1.msra.mxu1 %v6284_v3  ;;  %915 = vmatprep.subr.mxu0 %v6675_v63  ;;  %v11875_v3 = vld [vmem:[#allocation37_spill] sm:$0xff]  ;;  %v11910_v63 = vld [vmem:[#allocation22_spill] sm:$0xff] }
 0x149   :  { %819 = vmatprep.subr.mxu1 %v6294_v5  ;;  %916 = vmatpush1.msra.mxu0 %v6687_v49  ;;  %v11877_v5 = vld [vmem:[#allocation39_spill] sm:$0xff]  ;;  %v11900_v49 = vld [vmem:[#allocation17_spill] sm:$0xff] }
 0x14a   :  { %820 = vmatpush1.msra.mxu1 %v6306_v7  ;;  %917 = vmatprep.subr.mxu0 %v6699_v47  ;;  %v11879_v7 = vld [vmem:[#allocation41_spill] sm:$0xff]  ;;  %v11898_v47 = vld [vmem:[#allocation16_spill] sm:$0xff] }
 0x14b   :  { %821 = vmatprep.subr.mxu1 %v6318_v9  ;;  %918 = vmatpush1.msra.mxu0 %v6711_v45  ;;  %v11881_v9 = vld [vmem:[#allocation43_spill] sm:$0xff] }
 0x14c   :  { %822 = vmatpush1.msra.mxu1 %v6328_v11  ;;  %919 = vmatprep.subr.mxu0 %v6723_v43  ;;  %v11883_v11 = vld [vmem:[#allocation45_spill] sm:$0xff]  ;;  %v11894_v43 = vld [vmem:[#allocation14_spill] sm:$0xff]  ;;  %v11896_v45 = vld [vmem:[#allocation15_spill] sm:$0xff] }
 0x14d   :  { %823 = vmatprep.subr.mxu1 %v6340_v13  ;;  %920 = vmatpush1.msra.mxu0 %v11875_v3  ;;  %v11885_v13 = vld [vmem:[#allocation47_spill] sm:$0xff]  ;;  %v11935_v3 = vld [vmem:[#allocation89_spill] sm:$0xff] }
 0x14e   :  { %824 = vmatpush1.msra.mxu1 %v11876_v18  ;;  %921 = vmatprep.subr.mxu0 %v11877_v5  ;;  %v11936_v18 = vld [vmem:[#allocation40_spill] sm:$0xff]  ;;  %v11937_v5 = vld [vmem:[#allocation42_spill] sm:$0xff] }
 0x14f   :  { %825 = vmatprep.subr.mxu1 %v11878_v20  ;;  %922 = vmatpush1.msra.mxu0 %v11879_v7  ;;  %v11938_v20 = vld [vmem:[#allocation90_spill] sm:$0xff]  ;;  %v11939_v7 = vld [vmem:[#allocation44_spill] sm:$0xff] }
 0x150   :  { %826 = vmatpush1.msra.mxu1 %v11880_v22  ;;  %923 = vmatprep.subr.mxu0 %v11881_v9  ;;  %v11940_v22 = vld [vmem:[#allocation46_spill] sm:$0xff]  ;;  %v11941_v9 = vld [vmem:[#allocation91_spill] sm:$0xff] }
 0x151   :  { %827 = vmatprep.subr.mxu1 %v11882_v24  ;;  %924 = vmatpush1.msra.mxu0 %v11883_v11  ;;  %v11942_v24 = vld [vmem:[#allocation48_spill] sm:$0xff]  ;;  %v11943_v11 = vld [vmem:[#allocation50_spill] sm:$0xff] }
 0x152   :  { %828 = vmatpush1.msra.mxu1 %v11884_v26  ;;  %925 = vmatprep.subr.mxu0 %v11885_v13  ;;  %v11944_v26 = vld [vmem:[#allocation92_spill] sm:$0xff] }
 0x153   :  { %829 = vmatprep.subr.mxu1 %v11886_v28  ;;  %926 = vmatpush1.msra.mxu0 %v11887_v30  ;;  %v11945_v13 = vld [vmem:[#allocation52_spill] sm:$0xff]  ;;  %v11946_v28 = vld [vmem:[#allocation54_spill] sm:$0xff]  ;;  %v11947_v30 = vld [vmem:[#allocation93_spill] sm:$0xff] }
 0x154   :  { %830 = vmatpush1.msra.mxu1 %v11888_v32  ;;  %927 = vmatprep.subr.mxu0 %v11889_v34  ;;  %v11948_v32 = vld [vmem:[#allocation56_spill] sm:$0xff]  ;;  %v11949_v34 = vld [vmem:[#allocation58_spill] sm:$0xff] }
 0x155   :  { %831 = vmatprep.subr.mxu1 %v11890_v36  ;;  %928 = vmatpush1.msra.mxu0 %v11891_v38  ;;  %v11950_v36 = vld [vmem:[#allocation94_spill] sm:$0xff]  ;;  %v11951_v38 = vld [vmem:[#allocation60_spill] sm:$0xff] }
 0x156   :  { %832 = vmatpush1.msra.mxu1 %v11892_v40  ;;  %929 = vmatprep.subr.mxu0 %v11893_v42  ;;  %v11952_v40 = vld [vmem:[#allocation62_spill] sm:$0xff]  ;;  %v11953_v42 = vld [vmem:[#allocation95_spill] sm:$0xff] }
 0x157   :  { %833 = vmatprep.subr.mxu1 %v11894_v43  ;;  %930 = vmatpush1.msra.mxu0 %v11895_v44  ;;  %v11954_v43 = vld [vmem:[#allocation64_spill] sm:$0xff]  ;;  %v11955_v44 = vld [vmem:[#allocation66_spill] sm:$0xff] }
 0x158   :  { %834 = vmatpush1.msra.mxu1 %v11896_v45  ;;  %931 = vmatprep.subr.mxu0 %v11897_v46  ;;  %v11956_v45 = vld [vmem:[#allocation96_spill] sm:$0xff] }
 0x159   :  { %835 = vmatprep.subr.mxu1 %v11898_v47  ;;  %932 = vmatpush1.msra.mxu0 %v11899_v48  ;;  %v11957_v46 = vld [vmem:[#allocation68_spill] sm:$0xff]  ;;  %v11958_v47 = vld [vmem:[#allocation70_spill] sm:$0xff]  ;;  %v11959_v48 = vld [vmem:[#allocation97_spill] sm:$0xff] }
 0x15a   :  { %836 = vmatpush1.msra.mxu1 %v11900_v49  ;;  %933 = vmatprep.subr.mxu0 %v11901_v50  ;;  %v11960_v49 = vld [vmem:[#allocation72_spill] sm:$0xff]  ;;  %v11961_v50 = vld [vmem:[#allocation74_spill] sm:$0xff] }
 0x15b   :  { %837 = vmatprep.subr.mxu1 %v11902_v52  ;;  %934 = vmatpush1.msra.mxu0 %v11903_v54  ;;  %v11962_v52 = vld [vmem:[#allocation98_spill] sm:$0xff]  ;;  %v11963_v54 = vld [vmem:[#allocation76_spill] sm:$0xff] }
 0x15c   :  { %838 = vmatpush1.msra.mxu1 %v11904_v55  ;;  %935 = vmatprep.subr.mxu0 %v11905_v56  ;;  %v11964_v55 = vld [vmem:[#allocation78_spill] sm:$0xff]  ;;  %v11965_v56 = vld [vmem:[#allocation99_spill] sm:$0xff] }
 0x15d   :  { %839 = vmatprep.subr.mxu1 %v11906_v58  ;;  %936 = vmatpush1.msra.mxu0 %v11907_v60  ;;  %v11966_v58 = vld [vmem:[#allocation80_spill] sm:$0xff]  ;;  %v11967_v60 = vld [vmem:[#allocation82_spill] sm:$0xff] }
 0x15e   :  { %840 = vmatpush1.msra.mxu1 %v11908_v61  ;;  %937 = vmatprep.subr.mxu0 %v11909_v62  ;;  %v11968_v61 = vld [vmem:[#allocation100_spill] sm:$0xff] }
 0x15f   :  { %841 = vmatprep.subr.mxu1 %v11910_v63  ;;  %938 = vmatpush1.msra.mxu0 %v11911_v21  ;;  %v11969_v62 = vld [vmem:[#allocation84_spill] sm:$0xff]  ;;  %v11970_v63 = vld [vmem:[#allocation86_spill] sm:$0xff]  ;;  %v11971_v21 = vld [vmem:[#allocation101_spill] sm:$0xff] }
 0x160   :  { %842 = vmatpush1.msra.mxu1 %v11912_v19  ;;  %939 = vmatprep.subr.mxu0 %v11913_v35  ;;  %v11972_v19 = vld [vmem:[#allocation102_spill] sm:$0xff]  ;;  %v7469_v35 = vld [vmem:[%s11284_s2 + $0x1e8] sm:$0xff] }
 0x161   :  { %843 = vmatprep.subr.mxu1 %v11914_v0  ;;  %940 = vmatpush1.msra.mxu0 %v11915_v17  ;;  %v11973_v0 = vld [vmem:[#allocation103_spill] sm:$0xff]  ;;  %v11975_v17 = vld [vmem:[#allocation105_spill] sm:$0xff] }
 0x162   :  { %844 = vmatpush1.msra.mxu1 %v11916_v37  ;;  %941 = vmatprep.subr.mxu0 %v11917_v39  ;;  %v11976_v37 = vld [vmem:[#allocation106_spill] sm:$0xff]  ;;  %v11977_v39 = vld [vmem:[#allocation107_spill] sm:$0xff] }
 0x163   :  { %845 = vmatprep.subr.mxu1 %v11918_v51  ;;  %942 = vmatpush1.msra.mxu0 %v11919_v15  ;;  %v11978_v51 = vld [vmem:[#allocation108_spill] sm:$0xff]  ;;  %v11979_v15 = vld [vmem:[#allocation109_spill] sm:$0xff] }
 0x164   :  { %846 = vmatpush1.msra.mxu1 %v11920_v57  ;;  %943 = vmatprep.subr.mxu0 %v11921_v53  ;;  %v11980_v57 = vld [vmem:[#allocation110_spill] sm:$0xff]  ;;  %v11981_v53 = vld [vmem:[#allocation111_spill] sm:$0xff] }
 0x165   :  { %847 = vmatprep.subr.mxu1 %v11922_v27  ;;  %881 = vmatprep.mubr.f32.mxu1 %v11841_v59  ;;  %v11982_v27 = vld [vmem:[#allocation112_spill] sm:$0xff] }
 0x166   :  { %848 = vmatpush1.msra.mxu1 %v11923_v23  ;;  %944 = vmatpush1.msra.mxu0 %v11924_v25  ;;  %v11983_v23 = vld [vmem:[#allocation113_spill] sm:$0xff]  ;;  %v11984_v25 = vld [vmem:[#allocation114_spill] sm:$0xff] }
 0x167   :  { %977 = vmatprep.mubr.f32.mxu0 %v11841_v59  ;;  %882 = vmatmul.mubr.f32.vlgmr.msra.gmra.mxu1 %v7288_v29  ;;  %v11931_v29 = vld [vmem:[#allocation35_spill] sm:$0xff] }
 0x168   :  { %978 = vmatmul.mubr.f32.vlgmr.msra.gmra.mxu0 %v7325_v16  ;;  %984 = vmatprep.subr.mxu1 %v11925_v33  ;;  %v11985_v33 = vld [vmem:[#allocation115_spill] sm:$0xff] }
 0x169   :  { %985 = vmatpush1.msra.mxu1 %v11926_v41  ;;  %1048 = vmatprep.mubr.f32.mxu1 %v11841_v59  ;;  %v11986_v41 = vld [vmem:[#allocation116_spill] sm:$0xff] }
 0x16a   :  { %986 = vmatprep.subr.mxu1 %v11927_v2  ;;  %4964 = vmatprep.subr.mxu0 %v11841_v59  ;;  %v11987_v2 = vld [vmem:[#allocation117_spill] sm:$0xff] }
 0x16b   :  { %987 = vmatpush1.msra.mxu1 %v11928_v4  ;;  %4965 = vmatpush3.msra.mxu0 %v11929_v31  ;;  %v11988_v4 = vld [vmem:[#allocation118_spill] sm:$0xff] }
 0x16c   :  { %988 = vmatprep.subr.mxu1 %v11930_v6  ;;  %4966 = vmatprep.subr.mxu0 %v11841_v59  ;;  %v7508_v31 = vld [vmem:[%s11284_s2 + $0x1f8] sm:$0xff]  ;;  %v597_v6 = vld [vmem:[#allocation2] sm:$0x3] }
 0x16d   :  { %989 = vmatpush1.msra.mxu1 %v11931_v29  ;;  %4967 = vmatpush3.msra.mxu0 %v11932_v8 }
 0x16e   :  { %990 = vmatprep.subr.mxu1 %v11933_v12  ;;  %4968 = vmatprep.subr.mxu0 %v11841_v59 }
 0x16f   :  { %991 = vmatpush1.msra.mxu1 %v11934_v14  ;;  %4969 = vmatpush3.msra.mxu0 %v11935_v3  ;;  %v671_v14 = vld [vmem:[#allocation2 + $0xe] sm:$0x3] }
 0x170   :  { %992 = vmatprep.subr.mxu1 %v11936_v18  ;;  %4970 = vmatprep.subr.mxu0 %v11841_v59 }
 0x171   :  { %993 = vmatpush1.msra.mxu1 %v11937_v5  ;;  %4971 = vmatpush3.msra.mxu0 %v11938_v20 }
 0x172   :  { %994 = vmatprep.subr.mxu1 %v11939_v7  ;;  %4972 = vmatprep.subr.mxu0 %v11841_v59 }
 0x173   :  { %995 = vmatpush1.msra.mxu1 %v11940_v22  ;;  %4973 = vmatpush3.msra.mxu0 %v11941_v9 }
 0x174   :  { %996 = vmatprep.subr.mxu1 %v11942_v24  ;;  %4974 = vmatprep.subr.mxu0 %v11841_v59 }
 0x175   :  { %997 = vmatpush1.msra.mxu1 %v11943_v11  ;;  %4975 = vmatpush3.msra.mxu0 %v11944_v26  ;;  %v11989_v26 = vld [vmem:[#allocation119_spill] sm:$0xff] }
 0x176   :  { %998 = vmatprep.subr.mxu1 %v11945_v13  ;;  %4976 = vmatprep.subr.mxu0 %v11841_v59 }
 0x177   :  { %999 = vmatpush1.msra.mxu1 %v11946_v28  ;;  %4977 = vmatpush3.msra.mxu0 %v11947_v30  ;;  %v4567_v30 = vld [vmem:[%s11282_s0 + $0x8] sm:$0xff] }
 0x178   :  { %1000 = vmatprep.subr.mxu1 %v11948_v32  ;;  %4978 = vmatprep.subr.mxu0 %v11841_v59 }
 0x179   :  { %1001 = vmatpush1.msra.mxu1 %v11949_v34  ;;  %4979 = vmatpush3.msra.mxu0 %v11950_v36 }
 0x17a   :  { %1002 = vmatprep.subr.mxu1 %v11951_v38  ;;  %4980 = vmatprep.subr.mxu0 %v11841_v59 }
 0x17b   :  { %1003 = vmatpush1.msra.mxu1 %v11952_v40  ;;  %4981 = vmatpush3.msra.mxu0 %v11953_v42 }
 0x17c   :  { %1004 = vmatprep.subr.mxu1 %v11954_v43  ;;  %4982 = vmatprep.subr.mxu0 %v11841_v59 }
 0x17d   :  { %1005 = vmatpush1.msra.mxu1 %v11955_v44  ;;  %4983 = vmatpush3.msra.mxu0 %v11956_v45 }
 0x17e   :  { %1006 = vmatprep.subr.mxu1 %v11957_v46  ;;  %4984 = vmatprep.subr.mxu0 %v11841_v59 }
 0x17f   :  { %1007 = vmatpush1.msra.mxu1 %v11958_v47  ;;  %4985 = vmatpush3.msra.mxu0 %v11959_v48 }
 0x180   :  { %1008 = vmatprep.subr.mxu1 %v11960_v49  ;;  %4986 = vmatprep.subr.mxu0 %v11841_v59 }
 0x181   :  { %1009 = vmatpush1.msra.mxu1 %v11961_v50  ;;  %4987 = vmatpush3.msra.mxu0 %v11962_v52 }
 0x182   :  { %1010 = vmatprep.subr.mxu1 %v11963_v54  ;;  %4988 = vmatprep.subr.mxu0 %v11841_v59 }
 0x183   :  { %1011 = vmatpush1.msra.mxu1 %v11964_v55  ;;  %4989 = vmatpush3.msra.mxu0 %v11965_v56 }
 0x184   :  { %1012 = vmatprep.subr.mxu1 %v11966_v58  ;;  %4990 = vmatprep.subr.mxu0 %v11841_v59 }
 0x185   :  { %1013 = vmatpush1.msra.mxu1 %v11967_v60  ;;  %4991 = vmatpush3.msra.mxu0 %v11968_v61  ;;  %v4568_v61 = vld [vmem:[%s11283_s1 + $0x30] sm:$0xff] }
 0x186   :  { %1014 = vmatprep.subr.mxu1 %v11969_v62  ;;  %4992 = vmatprep.subr.mxu0 %v11841_v59 }
 0x187   :  { %1015 = vmatpush1.msra.mxu1 %v11970_v63  ;;  %4993 = vmatpush3.msra.mxu0 %v11971_v21 }
 0x188   :  { %1049 = vmatmul.mubr.f32.vlgmr.msra.gmra.mxu1 %v7325_v16  ;;  %4994 = vmatprep.subr.mxu0 %v11841_v59  ;;  %v11974_v16 = vld [vmem:[#allocation104_spill] sm:$0xff] }
 0x189   :  { %4995 = vmatpush3.msra.mxu0 %v11972_v19  ;;  %4996 = vmatprep.mubr.msk.f32.mxu0 %vm6219_vm0, %v11841_v59 }
 0x18a   :  { %4999 = vmatprep.subr.mxu1 %v11841_v59  ;;  %1290 = vmatprep.subr.mxu0 %v7469_v35 }
 0x18b   :  { %5000 = vmatpush3.msra.mxu1 %v11973_v0  ;;  %5031 = vmatprep.mubr.msk.f32.mxu1 %vm6219_vm0, %v11841_v59 }
 0x18c   :  { %5001 = vmatprep.subr.mxu1 %v11841_v59 }
 0x18d   :  { %5002 = vmatpush3.msra.mxu1 %v11974_v16 }
 0x18e   :  { %5003 = vmatprep.subr.mxu1 %v11841_v59 }
 0x18f   :  { %5004 = vmatpush3.msra.mxu1 %v11975_v17 }
 0x190   :  { %5005 = vmatprep.subr.mxu1 %v11841_v59 }
 0x191   :  { %5006 = vmatpush3.msra.mxu1 %v11976_v37 }
 0x192   :  { %5007 = vmatprep.subr.mxu1 %v11841_v59 }
 0x193   :  { %5008 = vmatpush3.msra.mxu1 %v11977_v39 }
 0x194   :  { %5009 = vmatprep.subr.mxu1 %v11841_v59 }
 0x195   :  { %5010 = vmatpush3.msra.mxu1 %v11978_v51 }
 0x196   :  { %5011 = vmatprep.subr.mxu1 %v11841_v59 }
 0x197   :  { %5012 = vmatpush3.msra.mxu1 %v11979_v15 }
 0x198   :  { %5013 = vmatprep.subr.mxu1 %v11841_v59 }
 0x199   :  { %5014 = vmatpush3.msra.mxu1 %v11980_v57 }
 0x19a   :  { %5015 = vmatprep.subr.mxu1 %v11841_v59 }
 0x19b   :  { %5016 = vmatpush3.msra.mxu1 %v11981_v53 }
 0x19c   :  { %5017 = vmatprep.subr.mxu1 %v11841_v59 }
 0x19d   :  { %5018 = vmatpush3.msra.mxu1 %v11982_v27 }
 0x19e   :  { %5019 = vmatprep.subr.mxu1 %v11841_v59 }
 0x19f   :  { %5020 = vmatpush3.msra.mxu1 %v11983_v23 }
 0x1a0   :  { %5021 = vmatprep.subr.mxu1 %v11841_v59 }
 0x1a1   :  { %5022 = vmatpush3.msra.mxu1 %v11984_v25 }
 0x1a2   :  { %5023 = vmatprep.subr.mxu1 %v11841_v59 }
 0x1a3   :  { %5024 = vmatpush3.msra.mxu1 %v11985_v33 }
 0x1a4   :  { %5025 = vmatprep.subr.mxu1 %v11841_v59 }
 0x1a5   :  { %5026 = vmatpush3.msra.mxu1 %v11986_v41 }
 0x1a6   :  { %5027 = vmatprep.subr.mxu1 %v11841_v59 }
 0x1a7   :  { %5028 = vmatpush3.msra.mxu1 %v11987_v2 }
 0x1a8   :  { %5029 = vmatprep.subr.mxu1 %v11841_v59 }
 0x1a9   :  { %5030 = vmatpush3.msra.mxu1 %v11988_v4 }
 0x1aa   :  { %1361 = vmatprep.subr.mxu1 %v7508_v31 }
 0x1e6   :  { %v664_v29 = vpop.f32.mrf.mxu0 }
 0x1e7   :  { %v668_v8 = vadd.f32 %v664_v29, %v597_v6 }
 0x1e8   :  { %v4928_v12 = vpop.f32.mrf.mxu0 }
 0x1e9   :  { %669 = vst [vmem:[#allocation2] sm:$0x3] %v668_v8  ;;  %v7531_v8 = vld [vmem:[%s11284_s2 + $0x1e0] sm:$0xff]  ;;  %v7538_v12 = vld [vmem:[%s11284_s2 + $0x1c8] sm:$0xff] }
 0x206   :  { %v812_v20 = vpop.f32.mrf.mxu0 }
 0x207   :  { %v738_v3 = vpop.f32.mrf.mxu1 }
 0x208   :  { %v742_v18 = vadd.f32 %v738_v3, %v671_v14  ;;  %v814_v7 = vpop.f32.mrf.mxu0  ;;  %v7544_v14 = vld [vmem:[%s11284_s2 + $0x1c0] sm:$0xff]  ;;  %v7550_v3 = vld [vmem:[%s11284_s2 + $0x1a8] sm:$0xff] }
 0x209   :  { %v4963_v5 = vpop.f32.mrf.mxu1  ;;  %v892_v9 = vcombine.low %v812_v20, %v814_v7  ;;  %v7568_v20 = vld [vmem:[%s11284_s2 + $0x180] sm:$0xff] }
 0x20a   :  { %743 = vst [vmem:[#allocation2 + $0xe] sm:$0x3] %v742_v18  ;;  %v7556_v18 = vld [vmem:[%s11284_s2 + $0x1a0] sm:$0xff]  ;;  %v7562_v5 = vld [vmem:[%s11284_s2 + $0x188] sm:$0xff] }
 0x20b   :  { %v900_v13 = vrot.slane %v892_v9, %v11989_v26 }
 0x227   :  { %v883_v22 = vpop.f32.mrf.mxu1 }
 0x228   :  { %v979_v46 = vpop.f32.mrf.mxu0 }
 0x229   :  { %v885_v24 = vpop.f32.mrf.mxu1 }
 0x22a   :  { %v893_v11 = vcombine.low %v883_v22, %v885_v24  ;;  %v981_v50 = vpop.f32.mrf.mxu0  ;;  %v7574_v22 = vld [vmem:[%s11284_s2 + $0x168] sm:$0xff]  ;;  %v7580_v24 = vld [vmem:[%s11284_s2 + $0x160] sm:$0xff] }
 0x22b   :  { %v1059_v54 = vcombine.low %v979_v46, %v981_v50  ;;  %v7638_v46 = vld [vmem:[%s11284_s2 + $0xc8] sm:$0xff] }
 0x22c   :  { %v907_v28 = vrot.slane %v893_v11, %v11989_v26  ;;  %v7662_v50 = vld [vmem:[%s11284_s2 + $0x88] sm:$0xff] }
 0x22d   :  { %v1067_v58 = vrot.slane %v1059_v54, %v11989_v26  ;;  %v7674_v54 = vld [vmem:[%s11284_s2 + $0x68] sm:$0xff] }
 0x22e   :  { %v908_v32 = vcombine.low %v900_v13, %v907_v28  ;;  %v7586_v13 = vld [vmem:[%s11284_s2 + $0x148] sm:$0xff] }
 0x230   :  { %v910_v34 = vadd.f32 %v4567_v30, %v908_v32  ;;  %v7592_v32 = vld [vmem:[%s11284_s2 + $0x140] sm:$0xff] }
 0x232   :  { %v4569_v36 = vmul.f32 -1.442695, %v910_v34  ;;  %v1085_v38 = vrot.slane %v910_v34, 2  ;;  %v1096_v42 = vrot.slane %v910_v34, 6  ;;  %v1093_v45 = vrot.slane %v910_v34, 4  ;;  %v7598_v34 = vld [vmem:[%s11284_s2 + $0x128] sm:$0xff] }
 0x234   :  { %5492 = vpow2.f32 %v4569_v36  ;;  %v4570_v40 = vmul.f32 -1.442695, %v1085_v38  ;;  %v4571_v43 = vmul.f32 -1.442695, %v1096_v42  ;;  %v7611_v42 = vld [vmem:[%s11284_s2 + $0x108] sm:$0xff] }
 0x236   :  { %5494 = vpow2.f32 %v4570_v40  ;;  %v7605_v40 = vld [vmem:[%s11284_s2 + $0x120] sm:$0xff] }
 0x237   :  { %5496 = vpow2.f32 %v4571_v43 }
 0x241   :  { %v5493_v44 = vpop.eup %5492 }
 0x242   :  { %v1081_v47 = vadd.f32 1.0, %v5493_v44  ;;  %v7625_v44 = vld [vmem:[%s11284_s2 + $0xe8] sm:$0xff] }
 0x243   :  { %v5495_v48 = vpop.eup %5494 }
 0x244   :  { %5498 = vrcp.f32 %v1081_v47  ;;  %v1090_v49 = vadd.f32 1.0, %v5495_v48  ;;  %v5497_v63 = vpop.eup %5496  ;;  %v7644_v47 = vld [vmem:[%s11284_s2 + $0xc0] sm:$0xff]  ;;  %v7650_v48 = vld [vmem:[%s11284_s2 + $0xa8] sm:$0xff] }
 0x245   :  { %5500 = vtanh.f32 %v1093_v45  ;;  %v1101_v39 = vadd.f32 1.0, %v5497_v63  ;;  %v7632_v45 = vld [vmem:[%s11284_s2 + $0xe0] sm:$0xff] }
 0x246   :  { %5502 = vrcp.f32 %v1090_v49  ;;  %v7656_v49 = vld [vmem:[%s11284_s2 + $0xa0] sm:$0xff] }
 0x247   :  { %v7704_v63 = vld [vmem:[%s11284_s2 + $0x20] sm:$0xff] }
 0x248   :  { %v1050_v52 = vpop.f32.mrf.mxu1 }
 0x24a   :  { %v1052_v55 = vpop.f32.mrf.mxu1 }
 0x24b   :  { %v1060_v56 = vcombine.low %v1050_v52, %v1052_v55  ;;  %v7668_v52 = vld [vmem:[%s11284_s2 + $0x80] sm:$0xff] }
 0x24c   :  { %v7680_v55 = vld [vmem:[%s11284_s2 + $0x60] sm:$0xff] }
 0x24d   :  { %v1074_v60 = vrot.slane %v1060_v56, %v11989_v26  ;;  %v7686_v56 = vld [vmem:[%s11284_s2 + $0x48] sm:$0xff] }
 0x24f   :  { %v1075_v62 = vcombine.low %v1067_v58, %v1074_v60  ;;  %v7692_v58 = vld [vmem:[%s11284_s2 + $0x40] sm:$0xff] }
 0x251   :  { %v5499_v21 = vpop.eup %5498  ;;  %v1077_v19 = vadd.f32 %v4568_v61, %v1075_v62  ;;  %v7698_v61 = vld [vmem:[%s11284_s2 + $0x28] sm:$0xff] }
 0x252   :  { %v5501_v0 = vpop.eup %5500 }
 0x253   :  { %v5503_v16 = vpop.eup %5502  ;;  %v4572_v17 = vmul.f32 -1.442695, %v1077_v19  ;;  %v1116_v37 = vrot.slane %v1077_v19, 2  ;;  %v1105_v15 = vmul.f32 %v5501_v0, %v5499_v21  ;;  %v1127_v27 = vrot.slane %v1077_v19, 6  ;;  %v7710_v21 = vld [vmem:[%s11284_s2 + $0x8] sm:$0xff]  ;;  %v7718_v0 = vld [vmem:[%s11284_s2] sm:$0xff] }
 0x254   :  { %v1104_v51 = vmul.f32 %v5503_v16, %v7285_v1  ;;  %v1124_v33 = vrot.slane %v1077_v19, 4  ;;  %v7725_v16 = vld [vmem:[%s11285_s3 + $0x1e8] sm:$0xff] }
 0x255   :  { %5504 = vpow2.f32 %v4572_v17  ;;  %v4573_v57 = vmul.f32 -1.442695, %v1116_v37  ;;  %v4574_v23 = vmul.f32 -1.442695, %v1127_v27  ;;  %v7732_v17 = vld [vmem:[%s11285_s3 + $0x1e0] sm:$0xff]  ;;  %v7738_v37 = vld [vmem:[%s11284_s2 + $0x1f0] sm:$0xff] }
 0x256   :  { %v7522_v53 = vadd.f32 %v1105_v15, %v1104_v51  ;;  %v7750_v51 = vld [vmem:[%s11284_s2 + $0x1d8] sm:$0xff]  ;;  %v7756_v15 = vld [vmem:[%s11285_s3 + $0x1c0] sm:$0xff]  ;;  %v7768_v27 = vld [vmem:[%s11285_s3 + $0x1a8] sm:$0xff] }
 0x257   :  { %5506 = vpow2.f32 %v4573_v57  ;;  %v7762_v57 = vld [vmem:[%s11284_s2 + $0x1d0] sm:$0xff] }
 0x258   :  { %5508 = vrcp.f32 %v1101_v39  ;;  %v7744_v39 = vld [vmem:[%s11285_s3 + $0x1c8] sm:$0xff] }
 0x259   :  { %5510 = vtanh.f32 %v7522_v53 }
 0x25a   :  { %5512 = vpow2.f32 %v4574_v23  ;;  %v7774_v23 = vld [vmem:[%s11284_s2 + $0x1b8] sm:$0xff] }
 0x262   :  { %v5505_v25 = vpop.eup %5504 }
 0x263   :  { %v1112_v41 = vadd.f32 1.0, %v5505_v25  ;;  %v7780_v25 = vld [vmem:[%s11285_s3 + $0x1a0] sm:$0xff] }
 0x264   :  { %v5507_v2 = vpop.eup %5506 }
 0x265   :  { %v5509_v4 = vpop.eup %5508  ;;  %5514 = vrcp.f32 %v1112_v41  ;;  %v1121_v6 = vadd.f32 1.0, %v5507_v2  ;;  %v7792_v41 = vld [vmem:[%s11285_s3 + $0x188] sm:$0xff]  ;;  %v7798_v2 = vld [vmem:[%s11284_s2 + $0x198] sm:$0xff] }
 0x266   :  { %v5511_v1 = vpop.eup %5510  ;;  %5516 = vtanh.f32 %v1124_v33  ;;  %v7786_v33 = vld [vmem:[%s11284_s2 + $0x1b0] sm:$0xff]  ;;  %11990 = vst [vmem:[#allocation37_spill] sm:$0xff] %v7792_v41  ;;  %11991 = vst [vmem:[#allocation5_spill] sm:$0xff] %v7798_v2 }
 0x267   :  { %5518 = vrcp.f32 %v1121_v6  ;;  %v7525_v29 = vmul.f32 %v5511_v1, %v5509_v4  ;;  %v5513_v7 = vpop.eup %5512  ;;  %v7804_v4 = vld [vmem:[%s11285_s3 + $0x180] sm:$0xff]  ;;  %v7810_v6 = vld [vmem:[%s11284_s2 + $0x190] sm:$0xff]  ;;  %v7816_v1 = vld [vmem:[%s11285_s3 + $0x168] sm:$0xff] }
 0x268   :  { %v1132_v30 = vadd.f32 1.0, %v5513_v7  ;;  %11992 = vst [vmem:[#allocation39_spill] sm:$0xff] %v7804_v4  ;;  %11993 = vst [vmem:[#allocation6_spill] sm:$0xff] %v7810_v6  ;;  %v7822_v7 = vld [vmem:[%s11284_s2 + $0x178] sm:$0xff] }
 0x269   :  { %4997 = vmatmul.mubr.f32.vlgmr.msra.gmra.mxu0 %v7525_v29  ;;  %11994 = vst [vmem:[#allocation41_spill] sm:$0xff] %v7816_v1  ;;  %11995 = vst [vmem:[#allocation7_spill] sm:$0xff] %v7822_v7 }
 0x26a   :  { %1291 = vmatpush1.msra.mxu0 %v7531_v8  ;;  %1354 = vmatprep.mubr.f32.mxu0 %v11841_v59  ;;  %5520 = vrcp.f32 %v1132_v30  ;;  %v7846_v30 = vld [vmem:[%s11284_s2 + $0x158] sm:$0xff] }
 0x26b   :  { %1292 = vmatprep.subr.mxu0 %v7538_v12  ;;  %11999 = vst [vmem:[#allocation9_spill] sm:$0xff] %v7846_v30 }
 0x26c   :  { %1293 = vmatpush1.msra.mxu0 %v7544_v14 }
 0x26d   :  { %1294 = vmatprep.subr.mxu0 %v7550_v3 }
 0x26e   :  { %1295 = vmatpush1.msra.mxu0 %v7556_v18 }
 0x26f   :  { %1296 = vmatprep.subr.mxu0 %v7562_v5 }
 0x270   :  { %1297 = vmatpush1.msra.mxu0 %v7568_v20 }
 0x271   :  { %1298 = vmatprep.subr.mxu0 %v7574_v22 }
 0x272   :  { %v5515_v9 = vpop.eup %5514  ;;  %1299 = vmatpush1.msra.mxu0 %v7580_v24 }
 0x273   :  { %v5517_v11 = vpop.eup %5516  ;;  %1300 = vmatprep.subr.mxu0 %v7586_v13 }
 0x274   :  { %v5519_v28 = vpop.eup %5518  ;;  %1301 = vmatpush1.msra.mxu0 %v7592_v32  ;;  %v1136_v38 = vmul.f32 %v5517_v11, %v5515_v9  ;;  %v7828_v9 = vld [vmem:[%s11285_s3 + $0x160] sm:$0xff]  ;;  %v7834_v11 = vld [vmem:[%s11284_s2 + $0x170] sm:$0xff] }
 0x275   :  { %1302 = vmatprep.subr.mxu0 %v7598_v34  ;;  %v1135_v36 = vmul.f32 %v5519_v28, %v7306_v10  ;;  %v7619_v10 = vld [vmem:[%s11284_s2 + $0x100] sm:$0xff]  ;;  %11996 = vst [vmem:[#allocation43_spill] sm:$0xff] %v7828_v9  ;;  %11997 = vst [vmem:[#allocation8_spill] sm:$0xff] %v7834_v11  ;;  %v7840_v28 = vld [vmem:[%s11285_s3 + $0x148] sm:$0xff] }
 0x276   :  { %1303 = vmatpush1.msra.mxu0 %v7605_v40  ;;  %11998 = vst [vmem:[#allocation45_spill] sm:$0xff] %v7840_v28 }
 0x277   :  { %1304 = vmatprep.subr.mxu0 %v7611_v42  ;;  %v7614_v43 = vadd.f32 %v1136_v38, %v1135_v36  ;;  %v5521_v60 = vpop.eup %5520  ;;  %v7852_v36 = vld [vmem:[%s11285_s3 + $0x140] sm:$0xff]  ;;  %v7858_v38 = vld [vmem:[%s11284_s2 + $0x150] sm:$0xff] }
 0x278   :  { %1305 = vmatpush1.msra.mxu0 %v7619_v10  ;;  %12000 = vst [vmem:[#allocation47_spill] sm:$0xff] %v7852_v36  ;;  %12001 = vst [vmem:[#allocation10_spill] sm:$0xff] %v7858_v38 }
 0x279   :  { %1306 = vmatprep.subr.mxu0 %v7625_v44  ;;  %5522 = vtanh.f32 %v7614_v43 }
 0x27a   :  { %1307 = vmatpush1.msra.mxu0 %v7632_v45 }
 0x27b   :  { %1308 = vmatprep.subr.mxu0 %v7638_v46 }
 0x27c   :  { %1309 = vmatpush1.msra.mxu0 %v7644_v47 }
 0x27d   :  { %1310 = vmatprep.subr.mxu0 %v7650_v48 }
 0x27e   :  { %1311 = vmatpush1.msra.mxu0 %v7656_v49 }
 0x27f   :  { %1312 = vmatprep.subr.mxu0 %v7662_v50 }
 0x280   :  { %1313 = vmatpush1.msra.mxu0 %v7668_v52 }
 0x281   :  { %1314 = vmatprep.subr.mxu0 %v7674_v54 }
 0x282   :  { %1315 = vmatpush1.msra.mxu0 %v7680_v55 }
 0x283   :  { %1316 = vmatprep.subr.mxu0 %v7686_v56 }
 0x284   :  { %1317 = vmatpush1.msra.mxu0 %v7692_v58 }
 0x285   :  { %1318 = vmatprep.subr.mxu0 %v7698_v61 }
 0x286   :  { %v5523_v62 = vpop.eup %5522  ;;  %1319 = vmatpush1.msra.mxu0 %v7704_v63 }
 0x287   :  { %1320 = vmatprep.subr.mxu0 %v7710_v21  ;;  %v7713_v19 = vmul.f32 %v5523_v62, %v5521_v60  ;;  %v7864_v60 = vld [vmem:[%s11285_s3 + $0x128] sm:$0xff]  ;;  %v7870_v62 = vld [vmem:[%s11284_s2 + $0x138] sm:$0xff] }
 0x288   :  { %1321 = vmatpush1.msra.mxu0 %v7718_v0  ;;  %12002 = vst [vmem:[#allocation49_spill] sm:$0xff] %v7864_v60  ;;  %12003 = vst [vmem:[#allocation11_spill] sm:$0xff] %v7870_v62 }
 0x289   :  { %1355 = vmatmul.mubr.f32.vlgmr.msra.gmra.mxu0 %v7525_v29  ;;  %1457 = vmatprep.subr.mxu0 %v7725_v16 }
 0x28a   :  { %5032 = vmatmul.mubr.f32.vlgmr.msra.gmra.mxu1 %v7713_v19  ;;  %1458 = vmatpush1.msra.mxu0 %v7732_v17 }
 0x28b   :  { %1362 = vmatpush1.msra.mxu1 %v7738_v37  ;;  %1459 = vmatprep.subr.mxu0 %v7744_v39 }
 0x28c   :  { %1363 = vmatprep.subr.mxu1 %v7750_v51  ;;  %1460 = vmatpush1.msra.mxu0 %v7756_v15 }
 0x28d   :  { %1364 = vmatpush1.msra.mxu1 %v7762_v57  ;;  %1461 = vmatprep.subr.mxu0 %v7768_v27 }
 0x28e   :  { %1365 = vmatprep.subr.mxu1 %v7774_v23  ;;  %1462 = vmatpush1.msra.mxu0 %v7780_v25 }
 0x28f   :  { %1366 = vmatpush1.msra.mxu1 %v7786_v33  ;;  %1463 = vmatprep.subr.mxu0 %v7792_v41 }
 0x290   :  { %1367 = vmatprep.subr.mxu1 %v7798_v2  ;;  %1464 = vmatpush1.msra.mxu0 %v7804_v4 }
 0x291   :  { %1368 = vmatpush1.msra.mxu1 %v7810_v6  ;;  %1465 = vmatprep.subr.mxu0 %v7816_v1 }
 0x292   :  { %1369 = vmatprep.subr.mxu1 %v7822_v7  ;;  %1466 = vmatpush1.msra.mxu0 %v7828_v9 }
 0x293   :  { %1370 = vmatpush1.msra.mxu1 %v7834_v11  ;;  %1467 = vmatprep.subr.mxu0 %v7840_v28 }
 0x294   :  { %1371 = vmatprep.subr.mxu1 %v7846_v30  ;;  %1468 = vmatpush1.msra.mxu0 %v7852_v36  ;;  %v7876_v36 = vld [vmem:[%s11285_s3 + $0x120] sm:$0xff] }
 0x295   :  { %1372 = vmatpush1.msra.mxu1 %v7858_v38  ;;  %1469 = vmatprep.subr.mxu0 %v7864_v60  ;;  %12004 = vst [vmem:[#allocation51_spill] sm:$0xff] %v7876_v36  ;;  %v7882_v38 = vld [vmem:[%s11284_s2 + $0x130] sm:$0xff]  ;;  %v7888_v60 = vld [vmem:[%s11285_s3 + $0x108] sm:$0xff] }
 0x296   :  { %1373 = vmatprep.subr.mxu1 %v7870_v62  ;;  %1470 = vmatpush1.msra.mxu0 %v7876_v36  ;;  %12005 = vst [vmem:[#allocation12_spill] sm:$0xff] %v7882_v38  ;;  %12006 = vst [vmem:[#allocation53_spill] sm:$0xff] %v7888_v60  ;;  %v7894_v62 = vld [vmem:[%s11284_s2 + $0x118] sm:$0xff]  ;;  %v7900_v36 = vld [vmem:[%s11285_s3 + $0x100] sm:$0xff] }
 0x297   :  { %1374 = vmatpush1.msra.mxu1 %v7882_v38  ;;  %1471 = vmatprep.subr.mxu0 %v7888_v60  ;;  %12007 = vst [vmem:[#allocation13_spill] sm:$0xff] %v7894_v62  ;;  %12008 = vst [vmem:[#allocation55_spill] sm:$0xff] %v7900_v36  ;;  %v7906_v38 = vld [vmem:[%s11284_s2 + $0x110] sm:$0xff]  ;;  %v7912_v60 = vld [vmem:[%s11285_s3 + $0xe8] sm:$0xff] }
 0x298   :  { %1375 = vmatprep.subr.mxu1 %v7894_v62  ;;  %1472 = vmatpush1.msra.mxu0 %v7900_v36  ;;  %12009 = vst [vmem:[#allocation14_spill] sm:$0xff] %v7906_v38  ;;  %12010 = vst [vmem:[#allocation57_spill] sm:$0xff] %v7912_v60  ;;  %v7918_v62 = vld [vmem:[%s11284_s2 + $0xf8] sm:$0xff]  ;;  %v7924_v36 = vld [vmem:[%s11285_s3 + $0xe0] sm:$0xff] }
 0x299   :  { %1376 = vmatpush1.msra.mxu1 %v7906_v38  ;;  %1473 = vmatprep.subr.mxu0 %v7912_v60  ;;  %12011 = vst [vmem:[#allocation15_spill] sm:$0xff] %v7918_v62  ;;  %12012 = vst [vmem:[#allocation59_spill] sm:$0xff] %v7924_v36  ;;  %v7930_v38 = vld [vmem:[%s11284_s2 + $0xf0] sm:$0xff]  ;;  %v7936_v60 = vld [vmem:[%s11285_s3 + $0xc8] sm:$0xff] }
 0x29a   :  { %1377 = vmatprep.subr.mxu1 %v7918_v62  ;;  %1474 = vmatpush1.msra.mxu0 %v7924_v36  ;;  %12013 = vst [vmem:[#allocation16_spill] sm:$0xff] %v7930_v38  ;;  %12014 = vst [vmem:[#allocation61_spill] sm:$0xff] %v7936_v60  ;;  %v7942_v62 = vld [vmem:[%s11284_s2 + $0xd8] sm:$0xff]  ;;  %v7948_v36 = vld [vmem:[%s11285_s3 + $0xc0] sm:$0xff] }
 0x29b   :  { %1378 = vmatpush1.msra.mxu1 %v7930_v38  ;;  %1475 = vmatprep.subr.mxu0 %v7936_v60  ;;  %12015 = vst [vmem:[#allocation17_spill] sm:$0xff] %v7942_v62  ;;  %12016 = vst [vmem:[#allocation63_spill] sm:$0xff] %v7948_v36  ;;  %v7954_v38 = vld [vmem:[%s11284_s2 + $0xd0] sm:$0xff]  ;;  %v7960_v60 = vld [vmem:[%s11285_s3 + $0xa8] sm:$0xff] }
 0x29c   :  { %1379 = vmatprep.subr.mxu1 %v7942_v62  ;;  %1476 = vmatpush1.msra.mxu0 %v7948_v36  ;;  %12017 = vst [vmem:[#allocation18_spill] sm:$0xff] %v7954_v38  ;;  %12018 = vst [vmem:[#allocation65_spill] sm:$0xff] %v7960_v60  ;;  %v7966_v62 = vld [vmem:[%s11284_s2 + $0xb8] sm:$0xff]  ;;  %v7972_v36 = vld [vmem:[%s11285_s3 + $0xa0] sm:$0xff] }
 0x29d   :  { %1380 = vmatpush1.msra.mxu1 %v7954_v38  ;;  %1477 = vmatprep.subr.mxu0 %v7960_v60  ;;  %12019 = vst [vmem:[#allocation19_spill] sm:$0xff] %v7966_v62  ;;  %12020 = vst [vmem:[#allocation67_spill] sm:$0xff] %v7972_v36  ;;  %v7978_v38 = vld [vmem:[%s11284_s2 + $0xb0] sm:$0xff]  ;;  %v7984_v60 = vld [vmem:[%s11285_s3 + $0x88] sm:$0xff] }
 0x29e   :  { %1381 = vmatprep.subr.mxu1 %v7966_v62  ;;  %1478 = vmatpush1.msra.mxu0 %v7972_v36  ;;  %12021 = vst [vmem:[#allocation20_spill] sm:$0xff] %v7978_v38  ;;  %12022 = vst [vmem:[#allocation69_spill] sm:$0xff] %v7984_v60  ;;  %v7990_v62 = vld [vmem:[%s11284_s2 + $0x98] sm:$0xff]  ;;  %v7996_v36 = vld [vmem:[%s11285_s3 + $0x80] sm:$0xff] }
 0x29f   :  { %1382 = vmatpush1.msra.mxu1 %v7978_v38  ;;  %1479 = vmatprep.subr.mxu0 %v7984_v60  ;;  %12023 = vst [vmem:[#allocation21_spill] sm:$0xff] %v7990_v62  ;;  %12024 = vst [vmem:[#allocation71_spill] sm:$0xff] %v7996_v36  ;;  %v8002_v38 = vld [vmem:[%s11284_s2 + $0x90] sm:$0xff]  ;;  %v8008_v60 = vld [vmem:[%s11285_s3 + $0x68] sm:$0xff] }
 0x2a0   :  { %1383 = vmatprep.subr.mxu1 %v7990_v62  ;;  %1480 = vmatpush1.msra.mxu0 %v7996_v36  ;;  %12025 = vst [vmem:[#allocation22_spill] sm:$0xff] %v8002_v38  ;;  %12026 = vst [vmem:[#allocation73_spill] sm:$0xff] %v8008_v60  ;;  %v8014_v62 = vld [vmem:[%s11284_s2 + $0x78] sm:$0xff]  ;;  %v8020_v36 = vld [vmem:[%s11285_s3 + $0x60] sm:$0xff] }
 0x2a1   :  { %1384 = vmatpush1.msra.mxu1 %v8002_v38  ;;  %1481 = vmatprep.subr.mxu0 %v8008_v60  ;;  %12027 = vst [vmem:[#allocation23_spill] sm:$0xff] %v8014_v62  ;;  %12028 = vst [vmem:[#allocation75_spill] sm:$0xff] %v8020_v36  ;;  %v8026_v38 = vld [vmem:[%s11284_s2 + $0x70] sm:$0xff]  ;;  %v8032_v60 = vld [vmem:[%s11285_s3 + $0x48] sm:$0xff] }
 0x2a2   :  { %1385 = vmatprep.subr.mxu1 %v8014_v62  ;;  %1482 = vmatpush1.msra.mxu0 %v8020_v36  ;;  %12029 = vst [vmem:[#allocation24_spill] sm:$0xff] %v8026_v38  ;;  %12030 = vst [vmem:[#allocation77_spill] sm:$0xff] %v8032_v60  ;;  %v8038_v62 = vld [vmem:[%s11284_s2 + $0x58] sm:$0xff]  ;;  %v8044_v36 = vld [vmem:[%s11285_s3 + $0x40] sm:$0xff] }
 0x2a3   :  { %1386 = vmatpush1.msra.mxu1 %v8026_v38  ;;  %1483 = vmatprep.subr.mxu0 %v8032_v60  ;;  %12031 = vst [vmem:[#allocation25_spill] sm:$0xff] %v8038_v62  ;;  %12032 = vst [vmem:[#allocation79_spill] sm:$0xff] %v8044_v36  ;;  %v8050_v38 = vld [vmem:[%s11284_s2 + $0x50] sm:$0xff]  ;;  %v8056_v60 = vld [vmem:[%s11285_s3 + $0x28] sm:$0xff] }
 0x2a4   :  { %1387 = vmatprep.subr.mxu1 %v8038_v62  ;;  %1484 = vmatpush1.msra.mxu0 %v8044_v36  ;;  %12033 = vst [vmem:[#allocation26_spill] sm:$0xff] %v8050_v38  ;;  %12034 = vst [vmem:[#allocation81_spill] sm:$0xff] %v8056_v60  ;;  %v8062_v62 = vld [vmem:[%s11284_s2 + $0x38] sm:$0xff]  ;;  %v8068_v36 = vld [vmem:[%s11285_s3 + $0x20] sm:$0xff] }
 0x2a5   :  { %1388 = vmatpush1.msra.mxu1 %v8050_v38  ;;  %1485 = vmatprep.subr.mxu0 %v8056_v60  ;;  %12035 = vst [vmem:[#allocation27_spill] sm:$0xff] %v8062_v62  ;;  %12036 = vst [vmem:[#allocation83_spill] sm:$0xff] %v8068_v36  ;;  %v8074_v38 = vld [vmem:[%s11284_s2 + $0x30] sm:$0xff]  ;;  %v8080_v60 = vld [vmem:[%s11285_s3 + $0x8] sm:$0xff] }
 0x2a6   :  { %1389 = vmatprep.subr.mxu1 %v8062_v62  ;;  %1486 = vmatpush1.msra.mxu0 %v8068_v36  ;;  %12037 = vst [vmem:[#allocation28_spill] sm:$0xff] %v8074_v38  ;;  %12038 = vst [vmem:[#allocation29_spill] sm:$0xff] %v8080_v60  ;;  %v8086_v62 = vld [vmem:[%s11284_s2 + $0x18] sm:$0xff]  ;;  %v1215_v36 = vld [vmem:[#allocation2 + $0xc] sm:$0x3] }
 0x2a7   :  { %1390 = vmatpush1.msra.mxu1 %v8074_v38  ;;  %1487 = vmatprep.subr.mxu0 %v8080_v60  ;;  %12039 = vst [vmem:[#allocation85_spill] sm:$0xff] %v8086_v62  ;;  %v8093_v38 = vld [vmem:[%s11284_s2 + $0x10] sm:$0xff]  ;;  %v8099_v60 = vld [vmem:[%s11285_s3] sm:$0xff] }
 0x2a8   :  { %1391 = vmatprep.subr.mxu1 %v8086_v62  ;;  %1425 = vmatprep.mubr.f32.mxu1 %v11841_v59  ;;  %12040 = vst [vmem:[#allocation30_spill] sm:$0xff] %v8093_v38  ;;  %12041 = vst [vmem:[#allocation31_spill] sm:$0xff] %v8099_v60  ;;  %v8108_v62 = vld [vmem:[%s11285_s3 + $0x1f8] sm:$0xff] }
 0x2a9   :  { %1392 = vmatpush1.msra.mxu1 %v8093_v38  ;;  %1488 = vmatpush1.msra.mxu0 %v8099_v60  ;;  %12042 = vst [vmem:[#allocation32_spill] sm:$0xff] %v8108_v62  ;;  %v8114_v38 = vld [vmem:[%s11285_s3 + $0x1f0] sm:$0xff] }
 0x2aa   :  { %1521 = vmatprep.mubr.f32.mxu0 %v11841_v59  ;;  %1426 = vmatmul.mubr.f32.vlgmr.msra.gmra.mxu1 %v7525_v29  ;;  %12043 = vst [vmem:[#allocation33_spill] sm:$0xff] %v8114_v38  ;;  %v8121_v29 = vld [vmem:[%s11285_s3 + $0x1d8] sm:$0xff] }
 0x2ab   :  { %1522 = vmatmul.mubr.f32.vlgmr.msra.gmra.mxu0 %v7713_v19  ;;  %1528 = vmatprep.subr.mxu1 %v8108_v62  ;;  %12044 = vst [vmem:[#allocation87_spill] sm:$0xff] %v8121_v29  ;;  %v8128_v62 = vld [vmem:[%s11285_s3 + $0x1d0] sm:$0xff] }
 0x2ac   :  { %1529 = vmatpush1.msra.mxu1 %v8114_v38  ;;  %1592 = vmatprep.mubr.f32.mxu1 %v11841_v59  ;;  %12045 = vst [vmem:[#allocation34_spill] sm:$0xff] %v8128_v62  ;;  %v8134_v38 = vld [vmem:[%s11286_s4 + $0x78] sm:$0xff] }
 0x2ad   :  { %1530 = vmatprep.subr.mxu1 %v8121_v29  ;;  %5034 = vmatprep.subr.mxu0 %v11841_v59  ;;  %12046 = vst [vmem:[#allocation35_spill] sm:$0xff] %v8134_v38  ;;  %v8140_v29 = vld [vmem:[%s11285_s3 + $0x1b8] sm:$0xff] }
 0x2ae   :  { %1531 = vmatpush1.msra.mxu1 %v8128_v62  ;;  %5035 = vmatpush3.msra.mxu0 %v8134_v38  ;;  %12047 = vst [vmem:[#allocation88_spill] sm:$0xff] %v8140_v29  ;;  %v8147_v62 = vld [vmem:[%s11285_s3 + $0x1b0] sm:$0xff] }
 0x2af   :  { %1532 = vmatprep.subr.mxu1 %v8140_v29  ;;  %5036 = vmatprep.subr.mxu0 %v11841_v59  ;;  %12048 = vst [vmem:[#allocation36_spill] sm:$0xff] %v8147_v62  ;;  %v8153_v38 = vld [vmem:[%s11286_s4 + $0x70] sm:$0xff]  ;;  %v8159_v29 = vld [vmem:[%s11285_s3 + $0x198] sm:$0xff] }
 0x2b0   :  { %1533 = vmatpush1.msra.mxu1 %v8147_v62  ;;  %12049 = vst [vmem:[#allocation38_spill] sm:$0xff] %v8153_v38  ;;  %5037 = vmatpush3.msra.mxu0 %v8153_v38  ;;  %12050 = vst [vmem:[#allocation89_spill] sm:$0xff] %v8159_v29  ;;  %v8166_v62 = vld [vmem:[%s11285_s3 + $0x190] sm:$0xff]  ;;  %v8172_v38 = vld [vmem:[%s11286_s4 + $0x68] sm:$0xff] }
 0x2b1   :  { %1534 = vmatprep.subr.mxu1 %v8159_v29  ;;  %5038 = vmatprep.subr.mxu0 %v11841_v59  ;;  %12051 = vst [vmem:[#allocation40_spill] sm:$0xff] %v8166_v62  ;;  %12052 = vst [vmem:[#allocation42_spill] sm:$0xff] %v8172_v38  ;;  %v8178_v29 = vld [vmem:[%s11285_s3 + $0x178] sm:$0xff] }
 0x2b2   :  { %1535 = vmatpush1.msra.mxu1 %v8166_v62  ;;  %5039 = vmatpush3.msra.mxu0 %v8172_v38  ;;  %12053 = vst [vmem:[#allocation90_spill] sm:$0xff] %v8178_v29  ;;  %v8185_v62 = vld [vmem:[%s11285_s3 + $0x170] sm:$0xff]  ;;  %v8191_v38 = vld [vmem:[%s11286_s4 + $0x60] sm:$0xff] }
 0x2b3   :  { %1536 = vmatprep.subr.mxu1 %v8178_v29  ;;  %5040 = vmatprep.subr.mxu0 %v11841_v59  ;;  %12054 = vst [vmem:[#allocation44_spill] sm:$0xff] %v8185_v62  ;;  %12055 = vst [vmem:[#allocation46_spill] sm:$0xff] %v8191_v38  ;;  %v8197_v29 = vld [vmem:[%s11285_s3 + $0x158] sm:$0xff] }
 0x2b4   :  { %1537 = vmatpush1.msra.mxu1 %v8185_v62  ;;  %5041 = vmatpush3.msra.mxu0 %v8191_v38  ;;  %12056 = vst [vmem:[#allocation91_spill] sm:$0xff] %v8197_v29  ;;  %v8204_v62 = vld [vmem:[%s11285_s3 + $0x150] sm:$0xff]  ;;  %v8210_v38 = vld [vmem:[%s11286_s4 + $0x58] sm:$0xff] }
 0x2b5   :  { %1538 = vmatprep.subr.mxu1 %v8197_v29  ;;  %5042 = vmatprep.subr.mxu0 %v11841_v59  ;;  %12057 = vst [vmem:[#allocation48_spill] sm:$0xff] %v8204_v62  ;;  %12058 = vst [vmem:[#allocation50_spill] sm:$0xff] %v8210_v38  ;;  %v8216_v29 = vld [vmem:[%s11285_s3 + $0x138] sm:$0xff] }
 0x2b6   :  { %1539 = vmatpush1.msra.mxu1 %v8204_v62  ;;  %5043 = vmatpush3.msra.mxu0 %v8210_v38  ;;  %12059 = vst [vmem:[#allocation92_spill] sm:$0xff] %v8216_v29  ;;  %v8223_v62 = vld [vmem:[%s11285_s3 + $0x130] sm:$0xff] }
 0x2b7   :  { %1540 = vmatprep.subr.mxu1 %v8216_v29  ;;  %5044 = vmatprep.subr.mxu0 %v11841_v59  ;;  %12060 = vst [vmem:[#allocation52_spill] sm:$0xff] %v8223_v62  ;;  %v8229_v38 = vld [vmem:[%s11286_s4 + $0x50] sm:$0xff]  ;;  %v8235_v29 = vld [vmem:[%s11285_s3 + $0x118] sm:$0xff] }
 0x2b8   :  { %1541 = vmatpush1.msra.mxu1 %v8223_v62  ;;  %12061 = vst [vmem:[#allocation54_spill] sm:$0xff] %v8229_v38  ;;  %5045 = vmatpush3.msra.mxu0 %v8229_v38  ;;  %12062 = vst [vmem:[#allocation93_spill] sm:$0xff] %v8235_v29  ;;  %v8242_v62 = vld [vmem:[%s11285_s3 + $0x110] sm:$0xff]  ;;  %v8248_v38 = vld [vmem:[%s11286_s4 + $0x48] sm:$0xff] }
 0x2b9   :  { %1542 = vmatprep.subr.mxu1 %v8235_v29  ;;  %5046 = vmatprep.subr.mxu0 %v11841_v59  ;;  %12063 = vst [vmem:[#allocation56_spill] sm:$0xff] %v8242_v62  ;;  %12064 = vst [vmem:[#allocation58_spill] sm:$0xff] %v8248_v38  ;;  %v8254_v29 = vld [vmem:[%s11285_s3 + $0xf8] sm:$0xff] }
 0x2ba   :  { %1543 = vmatpush1.msra.mxu1 %v8242_v62  ;;  %5047 = vmatpush3.msra.mxu0 %v8248_v38  ;;  %12065 = vst [vmem:[#allocation94_spill] sm:$0xff] %v8254_v29  ;;  %v8261_v62 = vld [vmem:[%s11285_s3 + $0xf0] sm:$0xff]  ;;  %v8267_v38 = vld [vmem:[%s11286_s4 + $0x40] sm:$0xff] }
 0x2bb   :  { %1544 = vmatprep.subr.mxu1 %v8254_v29  ;;  %5048 = vmatprep.subr.mxu0 %v11841_v59  ;;  %12066 = vst [vmem:[#allocation60_spill] sm:$0xff] %v8261_v62  ;;  %12067 = vst [vmem:[#allocation62_spill] sm:$0xff] %v8267_v38  ;;  %v8273_v29 = vld [vmem:[%s11285_s3 + $0xd8] sm:$0xff] }
 0x2bc   :  { %1545 = vmatpush1.msra.mxu1 %v8261_v62  ;;  %5049 = vmatpush3.msra.mxu0 %v8267_v38  ;;  %12068 = vst [vmem:[#allocation95_spill] sm:$0xff] %v8273_v29  ;;  %v8280_v62 = vld [vmem:[%s11285_s3 + $0xd0] sm:$0xff]  ;;  %v8286_v38 = vld [vmem:[%s11286_s4 + $0x38] sm:$0xff] }
 0x2bd   :  { %1546 = vmatprep.subr.mxu1 %v8273_v29  ;;  %5050 = vmatprep.subr.mxu0 %v11841_v59  ;;  %12069 = vst [vmem:[#allocation64_spill] sm:$0xff] %v8280_v62  ;;  %12070 = vst [vmem:[#allocation66_spill] sm:$0xff] %v8286_v38  ;;  %v8292_v29 = vld [vmem:[%s11285_s3 + $0xb8] sm:$0xff] }
 0x2be   :  { %1547 = vmatpush1.msra.mxu1 %v8280_v62  ;;  %5051 = vmatpush3.msra.mxu0 %v8286_v38  ;;  %12071 = vst [vmem:[#allocation96_spill] sm:$0xff] %v8292_v29  ;;  %v8299_v62 = vld [vmem:[%s11285_s3 + $0xb0] sm:$0xff] }
 0x2bf   :  { %1548 = vmatprep.subr.mxu1 %v8292_v29  ;;  %5052 = vmatprep.subr.mxu0 %v11841_v59  ;;  %12072 = vst [vmem:[#allocation68_spill] sm:$0xff] %v8299_v62  ;;  %v8305_v38 = vld [vmem:[%s11286_s4 + $0x30] sm:$0xff]  ;;  %v8311_v29 = vld [vmem:[%s11285_s3 + $0x98] sm:$0xff] }
 0x2c0   :  { %1549 = vmatpush1.msra.mxu1 %v8299_v62  ;;  %12073 = vst [vmem:[#allocation70_spill] sm:$0xff] %v8305_v38  ;;  %5053 = vmatpush3.msra.mxu0 %v8305_v38  ;;  %12074 = vst [vmem:[#allocation97_spill] sm:$0xff] %v8311_v29  ;;  %v8318_v62 = vld [vmem:[%s11285_s3 + $0x90] sm:$0xff]  ;;  %v8324_v38 = vld [vmem:[%s11286_s4 + $0x28] sm:$0xff] }
 0x2c1   :  { %1550 = vmatprep.subr.mxu1 %v8311_v29  ;;  %5054 = vmatprep.subr.mxu0 %v11841_v59  ;;  %12075 = vst [vmem:[#allocation72_spill] sm:$0xff] %v8318_v62  ;;  %12076 = vst [vmem:[#allocation74_spill] sm:$0xff] %v8324_v38  ;;  %v8330_v29 = vld [vmem:[%s11285_s3 + $0x78] sm:$0xff] }
 0x2c2   :  { %1551 = vmatpush1.msra.mxu1 %v8318_v62  ;;  %5055 = vmatpush3.msra.mxu0 %v8324_v38  ;;  %12077 = vst [vmem:[#allocation98_spill] sm:$0xff] %v8330_v29  ;;  %v8337_v62 = vld [vmem:[%s11285_s3 + $0x70] sm:$0xff]  ;;  %v8343_v38 = vld [vmem:[%s11286_s4 + $0x20] sm:$0xff] }
 0x2c3   :  { %1552 = vmatprep.subr.mxu1 %v8330_v29  ;;  %5056 = vmatprep.subr.mxu0 %v11841_v59  ;;  %12078 = vst [vmem:[#allocation76_spill] sm:$0xff] %v8337_v62  ;;  %12079 = vst [vmem:[#allocation78_spill] sm:$0xff] %v8343_v38  ;;  %v8349_v29 = vld [vmem:[%s11285_s3 + $0x58] sm:$0xff] }
 0x2c4   :  { %1553 = vmatpush1.msra.mxu1 %v8337_v62  ;;  %5057 = vmatpush3.msra.mxu0 %v8343_v38  ;;  %12080 = vst [vmem:[#allocation99_spill] sm:$0xff] %v8349_v29  ;;  %v8356_v62 = vld [vmem:[%s11285_s3 + $0x50] sm:$0xff]  ;;  %v8362_v38 = vld [vmem:[%s11286_s4 + $0x18] sm:$0xff] }
 0x2c5   :  { %1554 = vmatprep.subr.mxu1 %v8349_v29  ;;  %5058 = vmatprep.subr.mxu0 %v11841_v59  ;;  %12081 = vst [vmem:[#allocation80_spill] sm:$0xff] %v8356_v62  ;;  %12082 = vst [vmem:[#allocation82_spill] sm:$0xff] %v8362_v38  ;;  %v8368_v29 = vld [vmem:[%s11285_s3 + $0x38] sm:$0xff] }
 0x2c6   :  { %1555 = vmatpush1.msra.mxu1 %v8356_v62  ;;  %5059 = vmatpush3.msra.mxu0 %v8362_v38  ;;  %12083 = vst [vmem:[#allocation100_spill] sm:$0xff] %v8368_v29  ;;  %v8375_v62 = vld [vmem:[%s11285_s3 + $0x30] sm:$0xff] }
 0x2c7   :  { %1556 = vmatprep.subr.mxu1 %v8368_v29  ;;  %5060 = vmatprep.subr.mxu0 %v11841_v59  ;;  %12084 = vst [vmem:[#allocation84_spill] sm:$0xff] %v8375_v62  ;;  %v8381_v38 = vld [vmem:[%s11286_s4 + $0x10] sm:$0xff]  ;;  %v8387_v29 = vld [vmem:[%s11285_s3 + $0x18] sm:$0xff] }
 0x2c8   :  { %1557 = vmatpush1.msra.mxu1 %v8375_v62  ;;  %12085 = vst [vmem:[#allocation86_spill] sm:$0xff] %v8381_v38  ;;  %5061 = vmatpush3.msra.mxu0 %v8381_v38  ;;  %12086 = vst [vmem:[#allocation101_spill] sm:$0xff] %v8387_v29  ;;  %v8394_v62 = vld [vmem:[%s11285_s3 + $0x10] sm:$0xff]  ;;  %v8400_v38 = vld [vmem:[%s11286_s4 + $0x8] sm:$0xff] }
 0x2c9   :  { %1558 = vmatprep.subr.mxu1 %v8387_v29  ;;  %5062 = vmatprep.subr.mxu0 %v11841_v59  ;;  %12087 = vst [vmem:[#allocation102_spill] sm:$0xff] %v8394_v62  ;;  %12088 = vst [vmem:[#allocation103_spill] sm:$0xff] %v8400_v38  ;;  %v8408_v29 = vld [vmem:[%s11286_s4] sm:$0xff] }
 0x2ca   :  { %1559 = vmatpush1.msra.mxu1 %v8394_v62  ;;  %5063 = vmatpush3.msra.mxu0 %v8400_v38  ;;  %12089 = vst [vmem:[#allocation104_spill] sm:$0xff] %v8408_v29 }
 0x2cb   :  { %1593 = vmatmul.mubr.f32.vlgmr.msra.gmra.mxu1 %v7713_v19  ;;  %5064 = vmatprep.subr.mxu0 %v11841_v59  ;;  %v8418_v19 = vld [vmem:[%s11287_s5 + $0x78] sm:$0xff] }
 0x2cc   :  { %5065 = vmatpush3.msra.mxu0 %v8408_v29  ;;  %5066 = vmatprep.mubr.msk.f32.mxu0 %vm6219_vm0, %v11841_v59  ;;  %12090 = vst [vmem:[#allocation105_spill] sm:$0xff] %v8418_v19  ;;  %v8427_v29 = vld [vmem:[%s11287_s5 + $0x70] sm:$0xff] }
 0x2cd   :  { %5069 = vmatprep.subr.mxu1 %v11841_v59  ;;  %1834 = vmatprep.subr.mxu0 %v7469_v35  ;;  %12091 = vst [vmem:[#allocation106_spill] sm:$0xff] %v8427_v29  ;;  %v8434_v35 = vld [vmem:[%s11287_s5 + $0x68] sm:$0xff] }
 0x2ce   :  { %5070 = vmatpush3.msra.mxu1 %v8418_v19  ;;  %5101 = vmatprep.mubr.msk.f32.mxu1 %vm6219_vm0, %v11841_v59  ;;  %12092 = vst [vmem:[#allocation107_spill] sm:$0xff] %v8434_v35  ;;  %v8441_v19 = vld [vmem:[%s11287_s5 + $0x60] sm:$0xff] }
 0x2cf   :  { %5071 = vmatprep.subr.mxu1 %v11841_v59  ;;  %12093 = vst [vmem:[#allocation108_spill] sm:$0xff] %v8441_v19 }
 0x2d0   :  { %5072 = vmatpush3.msra.mxu1 %v8427_v29  ;;  %v8448_v29 = vld [vmem:[%s11287_s5 + $0x58] sm:$0xff] }
 0x2d1   :  { %5073 = vmatprep.subr.mxu1 %v11841_v59  ;;  %12094 = vst [vmem:[#allocation109_spill] sm:$0xff] %v8448_v29 }
 0x2d2   :  { %5074 = vmatpush3.msra.mxu1 %v8434_v35  ;;  %v8455_v35 = vld [vmem:[%s11287_s5 + $0x50] sm:$0xff] }
 0x2d3   :  { %5075 = vmatprep.subr.mxu1 %v11841_v59  ;;  %12095 = vst [vmem:[#allocation110_spill] sm:$0xff] %v8455_v35 }
 0x2d4   :  { %5076 = vmatpush3.msra.mxu1 %v8441_v19  ;;  %v8462_v19 = vld [vmem:[%s11287_s5 + $0x48] sm:$0xff] }
 0x2d5   :  { %5077 = vmatprep.subr.mxu1 %v11841_v59  ;;  %12096 = vst [vmem:[#allocation111_spill] sm:$0xff] %v8462_v19 }
 0x2d6   :  { %5078 = vmatpush3.msra.mxu1 %v8448_v29  ;;  %v8469_v29 = vld [vmem:[%s11287_s5 + $0x40] sm:$0xff] }
 0x2d7   :  { %5079 = vmatprep.subr.mxu1 %v11841_v59  ;;  %12097 = vst [vmem:[#allocation112_spill] sm:$0xff] %v8469_v29 }
 0x2d8   :  { %5080 = vmatpush3.msra.mxu1 %v8455_v35  ;;  %v8476_v35 = vld [vmem:[%s11287_s5 + $0x38] sm:$0xff] }
 0x2d9   :  { %5081 = vmatprep.subr.mxu1 %v11841_v59  ;;  %12098 = vst [vmem:[#allocation113_spill] sm:$0xff] %v8476_v35 }
 0x2da   :  { %5082 = vmatpush3.msra.mxu1 %v8462_v19  ;;  %v8483_v19 = vld [vmem:[%s11287_s5 + $0x30] sm:$0xff] }
 0x2db   :  { %5083 = vmatprep.subr.mxu1 %v11841_v59  ;;  %12099 = vst [vmem:[#allocation114_spill] sm:$0xff] %v8483_v19 }
 0x2dc   :  { %5084 = vmatpush3.msra.mxu1 %v8469_v29  ;;  %v8490_v29 = vld [vmem:[%s11287_s5 + $0x28] sm:$0xff] }
 0x2dd   :  { %5085 = vmatprep.subr.mxu1 %v11841_v59  ;;  %12100 = vst [vmem:[#allocation115_spill] sm:$0xff] %v8490_v29 }
 0x2de   :  { %5086 = vmatpush3.msra.mxu1 %v8476_v35  ;;  %v8497_v35 = vld [vmem:[%s11287_s5 + $0x20] sm:$0xff] }
 0x2df   :  { %5087 = vmatprep.subr.mxu1 %v11841_v59  ;;  %12101 = vst [vmem:[#allocation116_spill] sm:$0xff] %v8497_v35 }
 0x2e0   :  { %5088 = vmatpush3.msra.mxu1 %v8483_v19  ;;  %v8504_v19 = vld [vmem:[%s11287_s5 + $0x18] sm:$0xff] }
 0x2e1   :  { %5089 = vmatprep.subr.mxu1 %v11841_v59  ;;  %12102 = vst [vmem:[#allocation117_spill] sm:$0xff] %v8504_v19 }
 0x2e2   :  { %5090 = vmatpush3.msra.mxu1 %v8490_v29  ;;  %v8511_v29 = vld [vmem:[%s11287_s5 + $0x10] sm:$0xff] }
 0x2e3   :  { %5091 = vmatprep.subr.mxu1 %v11841_v59  ;;  %12103 = vst [vmem:[#allocation118_spill] sm:$0xff] %v8511_v29 }
 0x2e4   :  { %5092 = vmatpush3.msra.mxu1 %v8497_v35  ;;  %v8518_v35 = vld [vmem:[%s11287_s5 + $0x8] sm:$0xff] }
 0x2e5   :  { %5093 = vmatprep.subr.mxu1 %v11841_v59  ;;  %12104 = vst [vmem:[#allocation120_spill] sm:$0xff] %v8518_v35 }
 0x2e6   :  { %5094 = vmatpush3.msra.mxu1 %v8504_v19  ;;  %v8525_v19 = vld [vmem:[%s11287_s5] sm:$0xff] }
 0x2e7   :  { %5095 = vmatprep.subr.mxu1 %v11841_v59  ;;  %12105 = vst [vmem:[#allocation121_spill] sm:$0xff] %v8525_v19 }
 0x2e8   :  { %5096 = vmatpush3.msra.mxu1 %v8511_v29  ;;  %v1141_v29 = vld [vmem:[#allocation2 + $0x2] sm:$0x3] }
 0x2e9   :  { %5097 = vmatprep.subr.mxu1 %v11841_v59 }
 0x2ea   :  { %5098 = vmatpush3.msra.mxu1 %v8518_v35 }
 0x2eb   :  { %5099 = vmatprep.subr.mxu1 %v11841_v59 }
 0x2ec   :  { %5100 = vmatpush3.msra.mxu1 %v8525_v19 }
 0x2ed   :  { %1905 = vmatprep.subr.mxu1 %v7508_v31 }
 0x329   :  { %v1208_v38 = vpop.f32.mrf.mxu0 }
 0x32a   :  { %v1212_v62 = vadd.f32 %v1208_v38, %v1141_v29  ;;  %v4575_v38 = vld [vmem:[%s11282_s0 + $0x10] sm:$0xff] }
 0x32b   :  { %v4998_v60 = vpop.f32.mrf.mxu0 }
 0x32c   :  { %1213 = vst [vmem:[#allocation2 + $0x2] sm:$0x3] %v1212_v62 }
 0x349   :  { %v1356_v11 = vpop.f32.mrf.mxu0 }
 0x34a   :  { %v1282_v30 = vpop.f32.mrf.mxu1 }
 0x34b   :  { %v1286_v28 = vadd.f32 %v1282_v30, %v1215_v36  ;;  %v1358_v9 = vpop.f32.mrf.mxu0 }
 0x34c   :  { %v5033_v35 = vpop.f32.mrf.mxu1  ;;  %v1436_v1 = vcombine.low %v1356_v11, %v1358_v9 }
 0x34d   :  { %1287 = vst [vmem:[#allocation2 + $0xc] sm:$0x3] %v1286_v28 }
 0x34e   :  { %v1444_v19 = vrot.slane %v1436_v1, %v11989_v26 }
 0x36a   :  { %v1427_v7 = vpop.f32.mrf.mxu1 }
 0x36c   :  { %v1429_v6 = vpop.f32.mrf.mxu1 }
 0x36d   :  { %v1437_v4 = vcombine.low %v1427_v7, %v1429_v6  ;;  %v1523_v6 = vpop.f32.mrf.mxu0 }
 0x36f   :  { %v1451_v31 = vrot.slane %v1437_v4, %v11989_v26  ;;  %v1525_v2 = vpop.f32.mrf.mxu0 }
 0x371   :  { %v1452_v60 = vcombine.low %v1444_v19, %v1451_v31  ;;  %v1603_v31 = vcombine.low %v1523_v6, %v1525_v2 }
 0x373   :  { %v1454_v62 = vadd.f32 %v4575_v38, %v1452_v60 }
 0x375   :  { %v4577_v29 = vmul.f32 -1.442695, %v1454_v62  ;;  %v1629_v30 = vrot.slane %v1454_v62, 2  ;;  %v1640_v36 = vrot.slane %v1454_v62, 6  ;;  %v1637_v11 = vrot.slane %v1454_v62, 4  ;;  %v4576_v62 = vld [vmem:[%s11283_s1 + $0x28] sm:$0xff] }
 0x377   :  { %5524 = vpow2.f32 %v4577_v29  ;;  %v4578_v28 = vmul.f32 -1.442695, %v1629_v30  ;;  %v4579_v35 = vmul.f32 -1.442695, %v1640_v36  ;;  %v1611_v29 = vrot.slane %v1603_v31, %v11989_v26 }
 0x379   :  { %5526 = vpow2.f32 %v4578_v28 }
 0x37a   :  { %5528 = vpow2.f32 %v4579_v35 }
 0x384   :  { %v5525_v9 = vpop.eup %5524 }
 0x385   :  { %v1625_v7 = vadd.f32 1.0, %v5525_v9 }
 0x386   :  { %v5527_v1 = vpop.eup %5526 }
 0x387   :  { %5530 = vrcp.f32 %v1625_v7  ;;  %v1634_v4 = vadd.f32 1.0, %v5527_v1  ;;  %v5529_v36 = vpop.eup %5528 }
 0x388   :  { %5532 = vtanh.f32 %v1637_v11  ;;  %v1645_v41 = vadd.f32 1.0, %v5529_v36 }
 0x389   :  { %5534 = vrcp.f32 %v1634_v4 }
 0x38b   :  { %v1594_v19 = vpop.f32.mrf.mxu1 }
 0x38d   :  { %v1596_v38 = vpop.f32.mrf.mxu1 }
 0x38e   :  { %v1604_v60 = vcombine.low %v1594_v19, %v1596_v38 }
 0x390   :  { %v1618_v30 = vrot.slane %v1604_v60, %v11989_v26 }
 0x392   :  { %v1619_v28 = vcombine.low %v1611_v29, %v1618_v30 }
 0x394   :  { %v5531_v35 = vpop.eup %5530  ;;  %v1621_v9 = vadd.f32 %v4576_v62, %v1619_v28 }
 0x395   :  { %v5533_v7 = vpop.eup %5532 }
 0x396   :  { %v5535_v11 = vpop.eup %5534  ;;  %v4580_v1 = vmul.f32 -1.442695, %v1621_v9  ;;  %v1660_v4 = vrot.slane %v1621_v9, 2  ;;  %v1649_v6 = vmul.f32 %v5533_v7, %v5531_v35  ;;  %v1671_v38 = vrot.slane %v1621_v9, 6  ;;  %v12141_v7 = vld [vmem:[#allocation22_spill] sm:$0xff] }
 0x397   :  { %v1648_v2 = vmul.f32 %v5535_v11, %v7522_v53  ;;  %v1668_v30 = vrot.slane %v1621_v9, 4  ;;  %v12142_v11 = vld [vmem:[#allocation73_spill] sm:$0xff] }
 0x398   :  { %5536 = vpow2.f32 %v4580_v1  ;;  %v4581_v19 = vmul.f32 -1.442695, %v1660_v4  ;;  %v4582_v60 = vmul.f32 -1.442695, %v1671_v38  ;;  %v12143_v1 = vld [vmem:[#allocation23_spill] sm:$0xff] }
 0x399   :  { %v8540_v31 = vadd.f32 %v1649_v6, %v1648_v2  ;;  %v12144_v4 = vld [vmem:[#allocation75_spill] sm:$0xff]  ;;  %v12145_v2 = vld [vmem:[#allocation24_spill] sm:$0xff]  ;;  %v12146_v6 = vld [vmem:[#allocation77_spill] sm:$0xff] }
 0x39a   :  { %5538 = vpow2.f32 %v4581_v19  ;;  %v12147_v19 = vld [vmem:[#allocation25_spill] sm:$0xff]  ;;  %v12148_v38 = vld [vmem:[#allocation79_spill] sm:$0xff] }
 0x39b   :  { %5540 = vrcp.f32 %v1645_v41 }
 0x39c   :  { %5542 = vtanh.f32 %v8540_v31 }
 0x39d   :  { %5544 = vpow2.f32 %v4582_v60  ;;  %v12149_v60 = vld [vmem:[#allocation26_spill] sm:$0xff] }
 0x3a5   :  { %v5537_v29 = vpop.eup %5536 }
 0x3a6   :  { %v1656_v62 = vadd.f32 1.0, %v5537_v29  ;;  %v12150_v29 = vld [vmem:[#allocation81_spill] sm:$0xff] }
 0x3a7   :  { %v5539_v28 = vpop.eup %5538 }
 0x3a8   :  { %v5541_v26 = vpop.eup %5540  ;;  %5546 = vrcp.f32 %v1656_v62  ;;  %v1665_v36 = vadd.f32 1.0, %v5539_v28  ;;  %v12152_v62 = vld [vmem:[#allocation83_spill] sm:$0xff]  ;;  %v12153_v28 = vld [vmem:[#allocation28_spill] sm:$0xff] }
 0x3a9   :  { %v5543_v53 = vpop.eup %5542  ;;  %5548 = vtanh.f32 %v1668_v30  ;;  %v12151_v30 = vld [vmem:[#allocation27_spill] sm:$0xff] }
 0x3aa   :  { %5550 = vrcp.f32 %v1665_v36  ;;  %v8543_v35 = vmul.f32 %v5543_v53, %v5541_v26  ;;  %v5545_v26 = vpop.eup %5544  ;;  %v12154_v36 = vld [vmem:[#allocation29_spill] sm:$0xff] }
 0x3ab   :  { %v1676_v9 = vadd.f32 1.0, %v5545_v26  ;;  %v12155_v53 = vld [vmem:[#allocation85_spill] sm:$0xff]  ;;  %v12156_v26 = vld [vmem:[#allocation30_spill] sm:$0xff] }
 0x3ac   :  { %5067 = vmatmul.mubr.f32.vlgmr.msra.gmra.mxu0 %v8543_v35 }
 0x3ad   :  { %1835 = vmatpush1.msra.mxu0 %v7531_v8  ;;  %1898 = vmatprep.mubr.f32.mxu0 %v11841_v59  ;;  %5552 = vrcp.f32 %v1676_v9  ;;  %v12160_v9 = vld [vmem:[#allocation87_spill] sm:$0xff] }
 0x3ae   :  { %1836 = vmatprep.subr.mxu0 %v7538_v12 }
 0x3af   :  { %1837 = vmatpush1.msra.mxu0 %v7544_v14 }
 0x3b0   :  { %1838 = vmatprep.subr.mxu0 %v7550_v3 }
 0x3b1   :  { %1839 = vmatpush1.msra.mxu0 %v7556_v18 }
 0x3b2   :  { %1840 = vmatprep.subr.mxu0 %v7562_v5 }
 0x3b3   :  { %1841 = vmatpush1.msra.mxu0 %v7568_v20 }
 0x3b4   :  { %1842 = vmatprep.subr.mxu0 %v7574_v22 }
 0x3b5   :  { %v5547_v41 = vpop.eup %5546  ;;  %1843 = vmatpush1.msra.mxu0 %v7580_v24  ;;  %v12106_v24 = vld [vmem:[#allocation37_spill] sm:$0xff] }
 0x3b6   :  { %v5549_v8 = vpop.eup %5548  ;;  %1844 = vmatprep.subr.mxu0 %v7586_v13  ;;  %v12107_v13 = vld [vmem:[#allocation5_spill] sm:$0xff] }
 0x3b7   :  { %v5551_v12 = vpop.eup %5550  ;;  %1845 = vmatpush1.msra.mxu0 %v7592_v32  ;;  %v1680_v3 = vmul.f32 %v5549_v8, %v5547_v41  ;;  %v12108_v32 = vld [vmem:[#allocation39_spill] sm:$0xff]  ;;  %v12158_v8 = vld [vmem:[#allocation32_spill] sm:$0xff] }
 0x3b8   :  { %1846 = vmatprep.subr.mxu0 %v7598_v34  ;;  %v1679_v14 = vmul.f32 %v5551_v12, %v7614_v43  ;;  %v12109_v34 = vld [vmem:[#allocation6_spill] sm:$0xff]  ;;  %v12112_v43 = vld [vmem:[#allocation43_spill] sm:$0xff]  ;;  %v12159_v12 = vld [vmem:[#allocation33_spill] sm:$0xff] }
 0x3b9   :  { %1847 = vmatpush1.msra.mxu0 %v7605_v40  ;;  %v12110_v40 = vld [vmem:[#allocation41_spill] sm:$0xff]  ;;  %v12157_v41 = vld [vmem:[#allocation31_spill] sm:$0xff] }
 0x3ba   :  { %1848 = vmatprep.subr.mxu0 %v7611_v42  ;;  %v8562_v18 = vadd.f32 %v1680_v3, %v1679_v14  ;;  %v5553_v5 = vpop.eup %5552  ;;  %v12111_v42 = vld [vmem:[#allocation7_spill] sm:$0xff]  ;;  %v12161_v14 = vld [vmem:[#allocation34_spill] sm:$0xff] }
 0x3bb   :  { %1849 = vmatpush1.msra.mxu0 %v7619_v10  ;;  %v12113_v10 = vld [vmem:[#allocation8_spill] sm:$0xff]  ;;  %v12162_v3 = vld [vmem:[#allocation35_spill] sm:$0xff] }
 0x3bc   :  { %1850 = vmatprep.subr.mxu0 %v7625_v44  ;;  %5554 = vtanh.f32 %v8562_v18  ;;  %v12114_v44 = vld [vmem:[#allocation45_spill] sm:$0xff] }
 0x3bd   :  { %1851 = vmatpush1.msra.mxu0 %v7632_v45  ;;  %v12115_v45 = vld [vmem:[#allocation9_spill] sm:$0xff] }
 0x3be   :  { %1852 = vmatprep.subr.mxu0 %v7638_v46  ;;  %v12116_v46 = vld [vmem:[#allocation47_spill] sm:$0xff] }
 0x3bf   :  { %1853 = vmatpush1.msra.mxu0 %v7644_v47  ;;  %v12117_v47 = vld [vmem:[#allocation10_spill] sm:$0xff] }
 0x3c0   :  { %1854 = vmatprep.subr.mxu0 %v7650_v48  ;;  %v12118_v48 = vld [vmem:[#allocation49_spill] sm:$0xff] }
 0x3c1   :  { %1855 = vmatpush1.msra.mxu0 %v7656_v49  ;;  %v12119_v49 = vld [vmem:[#allocation11_spill] sm:$0xff] }
 0x3c2   :  { %1856 = vmatprep.subr.mxu0 %v7662_v50  ;;  %v12120_v50 = vld [vmem:[#allocation51_spill] sm:$0xff] }
 0x3c3   :  { %1857 = vmatpush1.msra.mxu0 %v7668_v52  ;;  %v12121_v52 = vld [vmem:[#allocation12_spill] sm:$0xff] }
 0x3c4   :  { %1858 = vmatprep.subr.mxu0 %v7674_v54  ;;  %v12122_v54 = vld [vmem:[#allocation53_spill] sm:$0xff] }
 0x3c5   :  { %1859 = vmatpush1.msra.mxu0 %v7680_v55  ;;  %v12123_v55 = vld [vmem:[#allocation13_spill] sm:$0xff] }
 0x3c6   :  { %1860 = vmatprep.subr.mxu0 %v7686_v56  ;;  %v12124_v56 = vld [vmem:[#allocation55_spill] sm:$0xff] }
 0x3c7   :  { %1861 = vmatpush1.msra.mxu0 %v7692_v58  ;;  %v12125_v58 = vld [vmem:[#allocation14_spill] sm:$0xff] }
 0x3c8   :  { %1862 = vmatprep.subr.mxu0 %v7698_v61  ;;  %v12126_v61 = vld [vmem:[#allocation57_spill] sm:$0xff] }
 0x3c9   :  { %v5555_v20 = vpop.eup %5554  ;;  %1863 = vmatpush1.msra.mxu0 %v7704_v63  ;;  %v12127_v63 = vld [vmem:[#allocation15_spill] sm:$0xff] }
 0x3ca   :  { %1864 = vmatprep.subr.mxu0 %v7710_v21  ;;  %v8581_v22 = vmul.f32 %v5555_v20, %v5553_v5  ;;  %v12128_v21 = vld [vmem:[#allocation59_spill] sm:$0xff]  ;;  %v12163_v5 = vld [vmem:[#allocation88_spill] sm:$0xff]  ;;  %v12165_v20 = vld [vmem:[#allocation38_spill] sm:$0xff] }
 0x3cb   :  { %1865 = vmatpush1.msra.mxu0 %v7718_v0  ;;  %v12129_v0 = vld [vmem:[#allocation16_spill] sm:$0xff] }
 0x3cc   :  { %1899 = vmatmul.mubr.f32.vlgmr.msra.gmra.mxu0 %v8543_v35  ;;  %2001 = vmatprep.subr.mxu0 %v7725_v16  ;;  %v12130_v16 = vld [vmem:[#allocation61_spill] sm:$0xff] }
 0x3cd   :  { %5102 = vmatmul.mubr.f32.vlgmr.msra.gmra.mxu1 %v8581_v22  ;;  %2002 = vmatpush1.msra.mxu0 %v7732_v17  ;;  %v12131_v17 = vld [vmem:[#allocation17_spill] sm:$0xff] }
 0x3ce   :  { %1906 = vmatpush1.msra.mxu1 %v7738_v37  ;;  %2003 = vmatprep.subr.mxu0 %v7744_v39  ;;  %v12132_v37 = vld [vmem:[#allocation63_spill] sm:$0xff]  ;;  %v12133_v39 = vld [vmem:[#allocation18_spill] sm:$0xff] }
 0x3cf   :  { %1907 = vmatprep.subr.mxu1 %v7750_v51  ;;  %2004 = vmatpush1.msra.mxu0 %v7756_v15  ;;  %v12134_v51 = vld [vmem:[#allocation65_spill] sm:$0xff]  ;;  %v12135_v15 = vld [vmem:[#allocation19_spill] sm:$0xff] }
 0x3d0   :  { %1908 = vmatpush1.msra.mxu1 %v7762_v57  ;;  %2005 = vmatprep.subr.mxu0 %v7768_v27  ;;  %v12136_v57 = vld [vmem:[#allocation67_spill] sm:$0xff]  ;;  %v12137_v27 = vld [vmem:[#allocation20_spill] sm:$0xff] }
 0x3d1   :  { %1909 = vmatprep.subr.mxu1 %v7774_v23  ;;  %2006 = vmatpush1.msra.mxu0 %v7780_v25  ;;  %v12138_v23 = vld [vmem:[#allocation69_spill] sm:$0xff] }
 0x3d2   :  { %1910 = vmatpush1.msra.mxu1 %v7786_v33  ;;  %2007 = vmatprep.subr.mxu0 %v12106_v24  ;;  %v12139_v25 = vld [vmem:[#allocation21_spill] sm:$0xff]  ;;  %v12140_v33 = vld [vmem:[#allocation71_spill] sm:$0xff] }
 0x3d3   :  { %1911 = vmatprep.subr.mxu1 %v12107_v13  ;;  %2008 = vmatpush1.msra.mxu0 %v12108_v32  ;;  %v12166_v24 = vld [vmem:[#allocation89_spill] sm:$0xff]  ;;  %v12167_v13 = vld [vmem:[#allocation40_spill] sm:$0xff]  ;;  %v12168_v32 = vld [vmem:[#allocation42_spill] sm:$0xff] }
 0x3d4   :  { %1912 = vmatpush1.msra.mxu1 %v12109_v34  ;;  %2009 = vmatprep.subr.mxu0 %v12110_v40  ;;  %v12169_v34 = vld [vmem:[#allocation90_spill] sm:$0xff]  ;;  %v12170_v40 = vld [vmem:[#allocation44_spill] sm:$0xff] }
 0x3d5   :  { %1913 = vmatprep.subr.mxu1 %v12111_v42  ;;  %2010 = vmatpush1.msra.mxu0 %v12112_v43  ;;  %v12171_v42 = vld [vmem:[#allocation46_spill] sm:$0xff]  ;;  %v12172_v43 = vld [vmem:[#allocation91_spill] sm:$0xff] }
 0x3d6   :  { %1914 = vmatpush1.msra.mxu1 %v12113_v10  ;;  %2011 = vmatprep.subr.mxu0 %v12114_v44  ;;  %v12173_v10 = vld [vmem:[#allocation48_spill] sm:$0xff]  ;;  %v12174_v44 = vld [vmem:[#allocation50_spill] sm:$0xff] }
 0x3d7   :  { %1915 = vmatprep.subr.mxu1 %v12115_v45  ;;  %2012 = vmatpush1.msra.mxu0 %v12116_v46  ;;  %v12175_v45 = vld [vmem:[#allocation92_spill] sm:$0xff] }
 0x3d8   :  { %1916 = vmatpush1.msra.mxu1 %v12117_v47  ;;  %2013 = vmatprep.subr.mxu0 %v12118_v48  ;;  %v12176_v46 = vld [vmem:[#allocation52_spill] sm:$0xff]  ;;  %v12177_v47 = vld [vmem:[#allocation54_spill] sm:$0xff]  ;;  %v12178_v48 = vld [vmem:[#allocation93_spill] sm:$0xff] }
 0x3d9   :  { %1917 = vmatprep.subr.mxu1 %v12119_v49  ;;  %2014 = vmatpush1.msra.mxu0 %v12120_v50  ;;  %v12179_v49 = vld [vmem:[#allocation56_spill] sm:$0xff]  ;;  %v12180_v50 = vld [vmem:[#allocation58_spill] sm:$0xff] }
 0x3da   :  { %1918 = vmatpush1.msra.mxu1 %v12121_v52  ;;  %2015 = vmatprep.subr.mxu0 %v12122_v54  ;;  %v12181_v52 = vld [vmem:[#allocation94_spill] sm:$0xff]  ;;  %v12182_v54 = vld [vmem:[#allocation60_spill] sm:$0xff] }
 0x3db   :  { %1919 = vmatprep.subr.mxu1 %v12123_v55  ;;  %2016 = vmatpush1.msra.mxu0 %v12124_v56  ;;  %v12183_v55 = vld [vmem:[#allocation62_spill] sm:$0xff]  ;;  %v12184_v56 = vld [vmem:[#allocation95_spill] sm:$0xff] }
 0x3dc   :  { %1920 = vmatpush1.msra.mxu1 %v12125_v58  ;;  %2017 = vmatprep.subr.mxu0 %v12126_v61  ;;  %v12185_v58 = vld [vmem:[#allocation64_spill] sm:$0xff]  ;;  %v12186_v61 = vld [vmem:[#allocation66_spill] sm:$0xff] }
 0x3dd   :  { %1921 = vmatprep.subr.mxu1 %v12127_v63  ;;  %2018 = vmatpush1.msra.mxu0 %v12128_v21  ;;  %v12187_v63 = vld [vmem:[#allocation96_spill] sm:$0xff] }
 0x3de   :  { %1922 = vmatpush1.msra.mxu1 %v12129_v0  ;;  %2019 = vmatprep.subr.mxu0 %v12130_v16  ;;  %v12188_v21 = vld [vmem:[#allocation68_spill] sm:$0xff]  ;;  %v12189_v0 = vld [vmem:[#allocation70_spill] sm:$0xff]  ;;  %v12190_v16 = vld [vmem:[#allocation97_spill] sm:$0xff] }
 0x3df   :  { %1923 = vmatprep.subr.mxu1 %v12131_v17  ;;  %2020 = vmatpush1.msra.mxu0 %v12132_v37  ;;  %v12191_v17 = vld [vmem:[#allocation72_spill] sm:$0xff]  ;;  %v12192_v37 = vld [vmem:[#allocation74_spill] sm:$0xff] }
 0x3e0   :  { %1924 = vmatpush1.msra.mxu1 %v12133_v39  ;;  %2021 = vmatprep.subr.mxu0 %v12134_v51  ;;  %v12193_v39 = vld [vmem:[#allocation98_spill] sm:$0xff]  ;;  %v12194_v51 = vld [vmem:[#allocation76_spill] sm:$0xff] }
 0x3e1   :  { %1925 = vmatprep.subr.mxu1 %v12135_v15  ;;  %2022 = vmatpush1.msra.mxu0 %v12136_v57  ;;  %v12195_v15 = vld [vmem:[#allocation78_spill] sm:$0xff]  ;;  %v12196_v57 = vld [vmem:[#allocation99_spill] sm:$0xff] }
 0x3e2   :  { %1926 = vmatpush1.msra.mxu1 %v12137_v27  ;;  %2023 = vmatprep.subr.mxu0 %v12138_v23  ;;  %v12197_v27 = vld [vmem:[#allocation80_spill] sm:$0xff]  ;;  %v12198_v23 = vld [vmem:[#allocation82_spill] sm:$0xff] }
 0x3e3   :  { %1927 = vmatprep.subr.mxu1 %v12139_v25  ;;  %2024 = vmatpush1.msra.mxu0 %v12140_v33  ;;  %v12199_v25 = vld [vmem:[#allocation100_spill] sm:$0xff] }
 0x3e4   :  { %1928 = vmatpush1.msra.mxu1 %v12141_v7  ;;  %2025 = vmatprep.subr.mxu0 %v12142_v11  ;;  %v12200_v33 = vld [vmem:[#allocation84_spill] sm:$0xff]  ;;  %v12201_v7 = vld [vmem:[#allocation86_spill] sm:$0xff]  ;;  %v12202_v11 = vld [vmem:[#allocation101_spill] sm:$0xff] }
 0x3e5   :  { %1929 = vmatprep.subr.mxu1 %v12143_v1  ;;  %2026 = vmatpush1.msra.mxu0 %v12144_v4  ;;  %v12203_v1 = vld [vmem:[#allocation102_spill] sm:$0xff]  ;;  %v12204_v4 = vld [vmem:[#allocation103_spill] sm:$0xff] }
 0x3e6   :  { %1930 = vmatpush1.msra.mxu1 %v12145_v2  ;;  %2027 = vmatprep.subr.mxu0 %v12146_v6  ;;  %v12205_v2 = vld [vmem:[#allocation104_spill] sm:$0xff] }
 0x3e7   :  { %1931 = vmatprep.subr.mxu1 %v12147_v19  ;;  %2028 = vmatpush1.msra.mxu0 %v12148_v38  ;;  %v8725_v6 = vld [vmem:[%s11284_s2 + $0x1e8] sm:$0xff]  ;;  %v12206_v19 = vld [vmem:[#allocation105_spill] sm:$0xff]  ;;  %v12208_v38 = vld [vmem:[#allocation107_spill] sm:$0xff] }
 0x3e8   :  { %1932 = vmatpush1.msra.mxu1 %v12149_v60  ;;  %2029 = vmatprep.subr.mxu0 %v12150_v29  ;;  %v12209_v60 = vld [vmem:[#allocation108_spill] sm:$0xff]  ;;  %v12210_v29 = vld [vmem:[#allocation109_spill] sm:$0xff] }
 0x3e9   :  { %1933 = vmatprep.subr.mxu1 %v12151_v30  ;;  %2030 = vmatpush1.msra.mxu0 %v12152_v62  ;;  %v12211_v30 = vld [vmem:[#allocation110_spill] sm:$0xff]  ;;  %v12212_v62 = vld [vmem:[#allocation111_spill] sm:$0xff] }
 0x3ea   :  { %1934 = vmatpush1.msra.mxu1 %v12153_v28  ;;  %2031 = vmatprep.subr.mxu0 %v12154_v36  ;;  %v12213_v28 = vld [vmem:[#allocation112_spill] sm:$0xff]  ;;  %v12214_v36 = vld [vmem:[#allocation113_spill] sm:$0xff] }
 0x3eb   :  { %1935 = vmatprep.subr.mxu1 %v12155_v53  ;;  %1969 = vmatprep.mubr.f32.mxu1 %v11841_v59  ;;  %v12215_v53 = vld [vmem:[#allocation114_spill] sm:$0xff] }
 0x3ec   :  { %1936 = vmatpush1.msra.mxu1 %v12156_v26  ;;  %2032 = vmatpush1.msra.mxu0 %v12157_v41  ;;  %v12216_v26 = vld [vmem:[#allocation115_spill] sm:$0xff]  ;;  %v12217_v41 = vld [vmem:[#allocation116_spill] sm:$0xff] }
 0x3ed   :  { %2065 = vmatprep.mubr.f32.mxu0 %v11841_v59  ;;  %1970 = vmatmul.mubr.f32.vlgmr.msra.gmra.mxu1 %v8543_v35  ;;  %v12164_v35 = vld [vmem:[#allocation36_spill] sm:$0xff] }
 0x3ee   :  { %2066 = vmatmul.mubr.f32.vlgmr.msra.gmra.mxu0 %v8581_v22  ;;  %2072 = vmatprep.subr.mxu1 %v12158_v8  ;;  %v12218_v8 = vld [vmem:[#allocation117_spill] sm:$0xff] }
 0x3ef   :  { %2073 = vmatpush1.msra.mxu1 %v12159_v12  ;;  %2136 = vmatprep.mubr.f32.mxu1 %v11841_v59  ;;  %v12219_v12 = vld [vmem:[#allocation118_spill] sm:$0xff] }
 0x3f0   :  { %2074 = vmatprep.subr.mxu1 %v12160_v9  ;;  %5104 = vmatprep.subr.mxu0 %v11841_v59  ;;  %v12220_v9 = vld [vmem:[#allocation120_spill] sm:$0xff] }
 0x3f1   :  { %2075 = vmatpush1.msra.mxu1 %v12161_v14  ;;  %5105 = vmatpush3.msra.mxu0 %v12162_v3  ;;  %v12221_v14 = vld [vmem:[#allocation121_spill] sm:$0xff]  ;;  %v8764_v3 = vld [vmem:[%s11284_s2 + $0x1f8] sm:$0xff] }
 0x3f2   :  { %2076 = vmatprep.subr.mxu1 %v12163_v5  ;;  %5106 = vmatprep.subr.mxu0 %v11841_v59  ;;  %v1685_v5 = vld [vmem:[#allocation2 + $0x4] sm:$0x3] }
 0x3f3   :  { %2077 = vmatpush1.msra.mxu1 %v12164_v35  ;;  %5107 = vmatpush3.msra.mxu0 %v12165_v20 }
 0x3f4   :  { %2078 = vmatprep.subr.mxu1 %v12166_v24  ;;  %5108 = vmatprep.subr.mxu0 %v11841_v59 }
 0x3f5   :  { %2079 = vmatpush1.msra.mxu1 %v12167_v13  ;;  %5109 = vmatpush3.msra.mxu0 %v12168_v32  ;;  %v1759_v13 = vld [vmem:[#allocation2 + $0xa] sm:$0x3] }
 0x3f6   :  { %2080 = vmatprep.subr.mxu1 %v12169_v34  ;;  %5110 = vmatprep.subr.mxu0 %v11841_v59 }
 0x3f7   :  { %2081 = vmatpush1.msra.mxu1 %v12170_v40  ;;  %5111 = vmatpush3.msra.mxu0 %v12171_v42 }
 0x3f8   :  { %2082 = vmatprep.subr.mxu1 %v12172_v43  ;;  %5112 = vmatprep.subr.mxu0 %v11841_v59 }
 0x3f9   :  { %2083 = vmatpush1.msra.mxu1 %v12173_v10  ;;  %5113 = vmatpush3.msra.mxu0 %v12174_v44 }
 0x3fa   :  { %2084 = vmatprep.subr.mxu1 %v12175_v45  ;;  %5114 = vmatprep.subr.mxu0 %v11841_v59 }
 0x3fb   :  { %2085 = vmatpush1.msra.mxu1 %v12176_v46  ;;  %5115 = vmatpush3.msra.mxu0 %v12177_v47  ;;  %v12222_v47 = vld [vmem:[#allocation119_spill] sm:$0xff] }
 0x3fc   :  { %2086 = vmatprep.subr.mxu1 %v12178_v48  ;;  %5116 = vmatprep.subr.mxu0 %v11841_v59 }
 0x3fd   :  { %2087 = vmatpush1.msra.mxu1 %v12179_v49  ;;  %5117 = vmatpush3.msra.mxu0 %v12180_v50  ;;  %v4583_v50 = vld [vmem:[%s11282_s0 + $0x18] sm:$0xff] }
 0x3fe   :  { %2088 = vmatprep.subr.mxu1 %v12181_v52  ;;  %5118 = vmatprep.subr.mxu0 %v11841_v59 }
 0x3ff   :  { %2089 = vmatpush1.msra.mxu1 %v12182_v54  ;;  %5119 = vmatpush3.msra.mxu0 %v12183_v55 }
 0x400   :  { %2090 = vmatprep.subr.mxu1 %v12184_v56  ;;  %5120 = vmatprep.subr.mxu0 %v11841_v59 }
 0x401   :  { %2091 = vmatpush1.msra.mxu1 %v12185_v58  ;;  %5121 = vmatpush3.msra.mxu0 %v12186_v61 }
 0x402   :  { %2092 = vmatprep.subr.mxu1 %v12187_v63  ;;  %5122 = vmatprep.subr.mxu0 %v11841_v59 }
 0x403   :  { %2093 = vmatpush1.msra.mxu1 %v12188_v21  ;;  %5123 = vmatpush3.msra.mxu0 %v12189_v0 }
 0x404   :  { %2094 = vmatprep.subr.mxu1 %v12190_v16  ;;  %5124 = vmatprep.subr.mxu0 %v11841_v59 }
 0x405   :  { %2095 = vmatpush1.msra.mxu1 %v12191_v17  ;;  %5125 = vmatpush3.msra.mxu0 %v12192_v37 }
 0x406   :  { %2096 = vmatprep.subr.mxu1 %v12193_v39  ;;  %5126 = vmatprep.subr.mxu0 %v11841_v59 }
 0x407   :  { %2097 = vmatpush1.msra.mxu1 %v12194_v51  ;;  %5127 = vmatpush3.msra.mxu0 %v12195_v15 }
 0x408   :  { %2098 = vmatprep.subr.mxu1 %v12196_v57  ;;  %5128 = vmatprep.subr.mxu0 %v11841_v59 }
 0x409   :  { %2099 = vmatpush1.msra.mxu1 %v12197_v27  ;;  %5129 = vmatpush3.msra.mxu0 %v12198_v23 }
 0x40a   :  { %2100 = vmatprep.subr.mxu1 %v12199_v25  ;;  %5130 = vmatprep.subr.mxu0 %v11841_v59 }
 0x40b   :  { %2101 = vmatpush1.msra.mxu1 %v12200_v33  ;;  %5131 = vmatpush3.msra.mxu0 %v12201_v7  ;;  %v4584_v7 = vld [vmem:[%s11283_s1 + $0x20] sm:$0xff] }
 0x40c   :  { %2102 = vmatprep.subr.mxu1 %v12202_v11  ;;  %5132 = vmatprep.subr.mxu0 %v11841_v59 }
 0x40d   :  { %2103 = vmatpush1.msra.mxu1 %v12203_v1  ;;  %5133 = vmatpush3.msra.mxu0 %v12204_v4 }
 0x40e   :  { %2137 = vmatmul.mubr.f32.vlgmr.msra.gmra.mxu1 %v8581_v22  ;;  %5134 = vmatprep.subr.mxu0 %v11841_v59  ;;  %v12207_v22 = vld [vmem:[#allocation106_spill] sm:$0xff] }
 0x40f   :  { %5135 = vmatpush3.msra.mxu0 %v12205_v2  ;;  %5136 = vmatprep.mubr.msk.f32.mxu0 %vm6219_vm0, %v11841_v59 }
 0x410   :  { %5139 = vmatprep.subr.mxu1 %v11841_v59  ;;  %2378 = vmatprep.subr.mxu0 %v8725_v6 }
 0x411   :  { %5140 = vmatpush3.msra.mxu1 %v12206_v19  ;;  %5171 = vmatprep.mubr.msk.f32.mxu1 %vm6219_vm0, %v11841_v59 }
 0x412   :  { %5141 = vmatprep.subr.mxu1 %v11841_v59 }
 0x413   :  { %5142 = vmatpush3.msra.mxu1 %v12207_v22 }
 0x414   :  { %5143 = vmatprep.subr.mxu1 %v11841_v59 }
 0x415   :  { %5144 = vmatpush3.msra.mxu1 %v12208_v38 }
 0x416   :  { %5145 = vmatprep.subr.mxu1 %v11841_v59 }
 0x417   :  { %5146 = vmatpush3.msra.mxu1 %v12209_v60 }
 0x418   :  { %5147 = vmatprep.subr.mxu1 %v11841_v59 }
 0x419   :  { %5148 = vmatpush3.msra.mxu1 %v12210_v29 }
 0x41a   :  { %5149 = vmatprep.subr.mxu1 %v11841_v59 }
 0x41b   :  { %5150 = vmatpush3.msra.mxu1 %v12211_v30 }
 0x41c   :  { %5151 = vmatprep.subr.mxu1 %v11841_v59 }
 0x41d   :  { %5152 = vmatpush3.msra.mxu1 %v12212_v62 }
 0x41e   :  { %5153 = vmatprep.subr.mxu1 %v11841_v59 }
 0x41f   :  { %5154 = vmatpush3.msra.mxu1 %v12213_v28 }
 0x420   :  { %5155 = vmatprep.subr.mxu1 %v11841_v59 }
 0x421   :  { %5156 = vmatpush3.msra.mxu1 %v12214_v36 }
 0x422   :  { %5157 = vmatprep.subr.mxu1 %v11841_v59 }
 0x423   :  { %5158 = vmatpush3.msra.mxu1 %v12215_v53 }
 0x424   :  { %5159 = vmatprep.subr.mxu1 %v11841_v59 }
 0x425   :  { %5160 = vmatpush3.msra.mxu1 %v12216_v26 }
 0x426   :  { %5161 = vmatprep.subr.mxu1 %v11841_v59 }
 0x427   :  { %5162 = vmatpush3.msra.mxu1 %v12217_v41 }
 0x428   :  { %5163 = vmatprep.subr.mxu1 %v11841_v59 }
 0x429   :  { %5164 = vmatpush3.msra.mxu1 %v12218_v8 }
 0x42a   :  { %5165 = vmatprep.subr.mxu1 %v11841_v59 }
 0x42b   :  { %5166 = vmatpush3.msra.mxu1 %v12219_v12 }
 0x42c   :  { %5167 = vmatprep.subr.mxu1 %v11841_v59 }
 0x42d   :  { %5168 = vmatpush3.msra.mxu1 %v12220_v9 }
 0x42e   :  { %5169 = vmatprep.subr.mxu1 %v11841_v59 }
 0x42f   :  { %5170 = vmatpush3.msra.mxu1 %v12221_v14 }
 0x430   :  { %2449 = vmatprep.subr.mxu1 %v8764_v3 }
 0x46c   :  { %v1752_v35 = vpop.f32.mrf.mxu0 }
 0x46d   :  { %v1756_v20 = vadd.f32 %v1752_v35, %v1685_v5 }
 0x46e   :  { %v5068_v24 = vpop.f32.mrf.mxu0 }
 0x46f   :  { %1757 = vst [vmem:[#allocation2 + $0x4] sm:$0x3] %v1756_v20  ;;  %v8787_v20 = vld [vmem:[%s11284_s2 + $0x1e0] sm:$0xff]  ;;  %v8794_v24 = vld [vmem:[%s11284_s2 + $0x1c8] sm:$0xff] }
 0x48c   :  { %v1900_v42 = vpop.f32.mrf.mxu0 }
 0x48d   :  { %v1826_v32 = vpop.f32.mrf.mxu1 }
 0x48e   :  { %v1830_v34 = vadd.f32 %v1826_v32, %v1759_v13  ;;  %v1902_v43 = vpop.f32.mrf.mxu0  ;;  %v8800_v13 = vld [vmem:[%s11284_s2 + $0x1c0] sm:$0xff]  ;;  %v8806_v32 = vld [vmem:[%s11284_s2 + $0x1a8] sm:$0xff] }
 0x48f   :  { %v5103_v40 = vpop.f32.mrf.mxu1  ;;  %v1980_v44 = vcombine.low %v1900_v42, %v1902_v43  ;;  %v8824_v42 = vld [vmem:[%s11284_s2 + $0x180] sm:$0xff] }
 0x490   :  { %1831 = vst [vmem:[#allocation2 + $0xa] sm:$0x3] %v1830_v34  ;;  %v8812_v34 = vld [vmem:[%s11284_s2 + $0x1a0] sm:$0xff]  ;;  %v8818_v40 = vld [vmem:[%s11284_s2 + $0x188] sm:$0xff] }
 0x491   :  { %v1988_v48 = vrot.slane %v1980_v44, %v12222_v47 }
 0x4ad   :  { %v1971_v10 = vpop.f32.mrf.mxu1 }
 0x4ae   :  { %v2067_v16 = vpop.f32.mrf.mxu0 }
 0x4af   :  { %v1973_v45 = vpop.f32.mrf.mxu1 }
 0x4b0   :  { %v1981_v46 = vcombine.low %v1971_v10, %v1973_v45  ;;  %v2069_v51 = vpop.f32.mrf.mxu0  ;;  %v8830_v10 = vld [vmem:[%s11284_s2 + $0x168] sm:$0xff]  ;;  %v8836_v45 = vld [vmem:[%s11284_s2 + $0x160] sm:$0xff] }
 0x4b1   :  { %v2147_v57 = vcombine.low %v2067_v16, %v2069_v51  ;;  %v8894_v16 = vld [vmem:[%s11284_s2 + $0xc8] sm:$0xff] }
 0x4b2   :  { %v1995_v49 = vrot.slane %v1981_v46, %v12222_v47  ;;  %v8918_v51 = vld [vmem:[%s11284_s2 + $0x88] sm:$0xff] }
 0x4b3   :  { %v2155_v25 = vrot.slane %v2147_v57, %v12222_v47  ;;  %v8930_v57 = vld [vmem:[%s11284_s2 + $0x68] sm:$0xff] }
 0x4b4   :  { %v1996_v52 = vcombine.low %v1988_v48, %v1995_v49  ;;  %v8842_v48 = vld [vmem:[%s11284_s2 + $0x148] sm:$0xff] }
 0x4b6   :  { %v1998_v54 = vadd.f32 %v4583_v50, %v1996_v52  ;;  %v8848_v52 = vld [vmem:[%s11284_s2 + $0x140] sm:$0xff] }
 0x4b8   :  { %v4585_v55 = vmul.f32 -1.442695, %v1998_v54  ;;  %v2173_v56 = vrot.slane %v1998_v54, 2  ;;  %v2184_v61 = vrot.slane %v1998_v54, 6  ;;  %v2181_v0 = vrot.slane %v1998_v54, 4  ;;  %v8854_v54 = vld [vmem:[%s11284_s2 + $0x128] sm:$0xff] }
 0x4ba   :  { %5556 = vpow2.f32 %v4585_v55  ;;  %v4586_v58 = vmul.f32 -1.442695, %v2173_v56  ;;  %v4587_v63 = vmul.f32 -1.442695, %v2184_v61  ;;  %v8867_v61 = vld [vmem:[%s11284_s2 + $0x108] sm:$0xff] }
 0x4bc   :  { %5558 = vpow2.f32 %v4586_v58  ;;  %v8861_v58 = vld [vmem:[%s11284_s2 + $0x120] sm:$0xff] }
 0x4bd   :  { %5560 = vpow2.f32 %v4587_v63 }
 0x4c7   :  { %v5557_v21 = vpop.eup %5556 }
 0x4c8   :  { %v2169_v17 = vadd.f32 1.0, %v5557_v21  ;;  %v8881_v21 = vld [vmem:[%s11284_s2 + $0xe8] sm:$0xff] }
 0x4c9   :  { %v5559_v37 = vpop.eup %5558 }
 0x4ca   :  { %5562 = vrcp.f32 %v2169_v17  ;;  %v2178_v39 = vadd.f32 1.0, %v5559_v37  ;;  %v5561_v1 = vpop.eup %5560  ;;  %v8900_v17 = vld [vmem:[%s11284_s2 + $0xc0] sm:$0xff]  ;;  %v8906_v37 = vld [vmem:[%s11284_s2 + $0xa8] sm:$0xff] }
 0x4cb   :  { %5564 = vtanh.f32 %v2181_v0  ;;  %v2189_v29 = vadd.f32 1.0, %v5561_v1  ;;  %v8888_v0 = vld [vmem:[%s11284_s2 + $0xe0] sm:$0xff] }
 0x4cc   :  { %5566 = vrcp.f32 %v2178_v39  ;;  %v8912_v39 = vld [vmem:[%s11284_s2 + $0xa0] sm:$0xff] }
 0x4cd   :  { %v8960_v1 = vld [vmem:[%s11284_s2 + $0x20] sm:$0xff] }
 0x4ce   :  { %v2138_v15 = vpop.f32.mrf.mxu1 }
 0x4d0   :  { %v2140_v27 = vpop.f32.mrf.mxu1 }
 0x4d1   :  { %v2148_v23 = vcombine.low %v2138_v15, %v2140_v27  ;;  %v8924_v15 = vld [vmem:[%s11284_s2 + $0x80] sm:$0xff] }
 0x4d2   :  { %v8936_v27 = vld [vmem:[%s11284_s2 + $0x60] sm:$0xff] }
 0x4d3   :  { %v2162_v33 = vrot.slane %v2148_v23, %v12222_v47  ;;  %v8942_v23 = vld [vmem:[%s11284_s2 + $0x48] sm:$0xff] }
 0x4d5   :  { %v2163_v11 = vcombine.low %v2155_v25, %v2162_v33  ;;  %v8948_v25 = vld [vmem:[%s11284_s2 + $0x40] sm:$0xff] }
 0x4d7   :  { %v5563_v4 = vpop.eup %5562  ;;  %v2165_v2 = vadd.f32 %v4584_v7, %v2163_v11  ;;  %v8954_v7 = vld [vmem:[%s11284_s2 + $0x28] sm:$0xff] }
 0x4d8   :  { %v5565_v19 = vpop.eup %5564 }
 0x4d9   :  { %v5567_v22 = vpop.eup %5566  ;;  %v4588_v38 = vmul.f32 -1.442695, %v2165_v2  ;;  %v2204_v60 = vrot.slane %v2165_v2, 2  ;;  %v2193_v62 = vmul.f32 %v5565_v19, %v5563_v4  ;;  %v2215_v53 = vrot.slane %v2165_v2, 6  ;;  %v8966_v4 = vld [vmem:[%s11284_s2 + $0x8] sm:$0xff]  ;;  %v8974_v19 = vld [vmem:[%s11284_s2] sm:$0xff] }
 0x4da   :  { %v2192_v30 = vmul.f32 %v5567_v22, %v8540_v31  ;;  %v2212_v8 = vrot.slane %v2165_v2, 4  ;;  %v8981_v22 = vld [vmem:[%s11285_s3 + $0x1e8] sm:$0xff] }
 0x4db   :  { %5568 = vpow2.f32 %v4588_v38  ;;  %v4589_v28 = vmul.f32 -1.442695, %v2204_v60  ;;  %v4590_v26 = vmul.f32 -1.442695, %v2215_v53  ;;  %v8988_v38 = vld [vmem:[%s11285_s3 + $0x1e0] sm:$0xff]  ;;  %v8994_v60 = vld [vmem:[%s11284_s2 + $0x1f0] sm:$0xff] }
 0x4dc   :  { %v8778_v36 = vadd.f32 %v2193_v62, %v2192_v30  ;;  %v9006_v30 = vld [vmem:[%s11284_s2 + $0x1d8] sm:$0xff]  ;;  %v9012_v62 = vld [vmem:[%s11285_s3 + $0x1c0] sm:$0xff]  ;;  %v9024_v53 = vld [vmem:[%s11285_s3 + $0x1a8] sm:$0xff] }
 0x4dd   :  { %5570 = vpow2.f32 %v4589_v28  ;;  %v9018_v28 = vld [vmem:[%s11284_s2 + $0x1d0] sm:$0xff] }
 0x4de   :  { %5572 = vrcp.f32 %v2189_v29  ;;  %v9000_v29 = vld [vmem:[%s11285_s3 + $0x1c8] sm:$0xff] }
 0x4df   :  { %5574 = vtanh.f32 %v8778_v36 }
 0x4e0   :  { %5576 = vpow2.f32 %v4590_v26  ;;  %v9030_v26 = vld [vmem:[%s11284_s2 + $0x1b8] sm:$0xff] }
 0x4e8   :  { %v5569_v41 = vpop.eup %5568 }
 0x4e9   :  { %v2200_v12 = vadd.f32 1.0, %v5569_v41  ;;  %v9036_v41 = vld [vmem:[%s11285_s3 + $0x1a0] sm:$0xff] }
 0x4ea   :  { %v5571_v9 = vpop.eup %5570 }
 0x4eb   :  { %v5573_v14 = vpop.eup %5572  ;;  %5578 = vrcp.f32 %v2200_v12  ;;  %v2209_v5 = vadd.f32 1.0, %v5571_v9  ;;  %v9048_v12 = vld [vmem:[%s11285_s3 + $0x188] sm:$0xff]  ;;  %v9054_v9 = vld [vmem:[%s11284_s2 + $0x198] sm:$0xff] }
 0x4ec   :  { %v5575_v31 = vpop.eup %5574  ;;  %5580 = vtanh.f32 %v2212_v8  ;;  %v9042_v8 = vld [vmem:[%s11284_s2 + $0x1b0] sm:$0xff]  ;;  %12223 = vst [vmem:[#allocation37_spill] sm:$0xff] %v9048_v12  ;;  %12224 = vst [vmem:[#allocation5_spill] sm:$0xff] %v9054_v9 }
 0x4ed   :  { %5582 = vrcp.f32 %v2209_v5  ;;  %v8781_v35 = vmul.f32 %v5575_v31, %v5573_v14  ;;  %v5577_v43 = vpop.eup %5576  ;;  %v9060_v14 = vld [vmem:[%s11285_s3 + $0x180] sm:$0xff]  ;;  %v9066_v5 = vld [vmem:[%s11284_s2 + $0x190] sm:$0xff]  ;;  %v9072_v31 = vld [vmem:[%s11285_s3 + $0x168] sm:$0xff] }
 0x4ee   :  { %v2220_v50 = vadd.f32 1.0, %v5577_v43  ;;  %12225 = vst [vmem:[#allocation39_spill] sm:$0xff] %v9060_v14  ;;  %12226 = vst [vmem:[#allocation6_spill] sm:$0xff] %v9066_v5  ;;  %v9078_v43 = vld [vmem:[%s11284_s2 + $0x178] sm:$0xff] }
 0x4ef   :  { %5137 = vmatmul.mubr.f32.vlgmr.msra.gmra.mxu0 %v8781_v35  ;;  %12227 = vst [vmem:[#allocation41_spill] sm:$0xff] %v9072_v31  ;;  %12228 = vst [vmem:[#allocation7_spill] sm:$0xff] %v9078_v43 }
 0x4f0   :  { %2379 = vmatpush1.msra.mxu0 %v8787_v20  ;;  %2442 = vmatprep.mubr.f32.mxu0 %v11841_v59  ;;  %5584 = vrcp.f32 %v2220_v50  ;;  %v9102_v50 = vld [vmem:[%s11284_s2 + $0x158] sm:$0xff] }
 0x4f1   :  { %2380 = vmatprep.subr.mxu0 %v8794_v24  ;;  %12232 = vst [vmem:[#allocation9_spill] sm:$0xff] %v9102_v50 }
 0x4f2   :  { %2381 = vmatpush1.msra.mxu0 %v8800_v13 }
 0x4f3   :  { %2382 = vmatprep.subr.mxu0 %v8806_v32 }
 0x4f4   :  { %2383 = vmatpush1.msra.mxu0 %v8812_v34 }
 0x4f5   :  { %2384 = vmatprep.subr.mxu0 %v8818_v40 }
 0x4f6   :  { %2385 = vmatpush1.msra.mxu0 %v8824_v42 }
 0x4f7   :  { %2386 = vmatprep.subr.mxu0 %v8830_v10 }
 0x4f8   :  { %v5579_v44 = vpop.eup %5578  ;;  %2387 = vmatpush1.msra.mxu0 %v8836_v45 }
 0x4f9   :  { %v5581_v46 = vpop.eup %5580  ;;  %2388 = vmatprep.subr.mxu0 %v8842_v48 }
 0x4fa   :  { %v5583_v49 = vpop.eup %5582  ;;  %2389 = vmatpush1.msra.mxu0 %v8848_v52  ;;  %v2224_v56 = vmul.f32 %v5581_v46, %v5579_v44  ;;  %v9084_v44 = vld [vmem:[%s11285_s3 + $0x160] sm:$0xff]  ;;  %v9090_v46 = vld [vmem:[%s11284_s2 + $0x170] sm:$0xff] }
 0x4fb   :  { %2390 = vmatprep.subr.mxu0 %v8854_v54  ;;  %v2223_v55 = vmul.f32 %v5583_v49, %v8562_v18  ;;  %v8875_v18 = vld [vmem:[%s11284_s2 + $0x100] sm:$0xff]  ;;  %12229 = vst [vmem:[#allocation43_spill] sm:$0xff] %v9084_v44  ;;  %12230 = vst [vmem:[#allocation8_spill] sm:$0xff] %v9090_v46  ;;  %v9096_v49 = vld [vmem:[%s11285_s3 + $0x148] sm:$0xff] }
 0x4fc   :  { %2391 = vmatpush1.msra.mxu0 %v8861_v58  ;;  %12231 = vst [vmem:[#allocation45_spill] sm:$0xff] %v9096_v49 }
 0x4fd   :  { %2392 = vmatprep.subr.mxu0 %v8867_v61  ;;  %v8870_v63 = vadd.f32 %v2224_v56, %v2223_v55  ;;  %v5585_v33 = vpop.eup %5584  ;;  %v9108_v55 = vld [vmem:[%s11285_s3 + $0x140] sm:$0xff]  ;;  %v9114_v56 = vld [vmem:[%s11284_s2 + $0x150] sm:$0xff] }
 0x4fe   :  { %2393 = vmatpush1.msra.mxu0 %v8875_v18  ;;  %12233 = vst [vmem:[#allocation47_spill] sm:$0xff] %v9108_v55  ;;  %12234 = vst [vmem:[#allocation10_spill] sm:$0xff] %v9114_v56 }
 0x4ff   :  { %2394 = vmatprep.subr.mxu0 %v8881_v21  ;;  %5586 = vtanh.f32 %v8870_v63 }
 0x500   :  { %2395 = vmatpush1.msra.mxu0 %v8888_v0 }
 0x501   :  { %2396 = vmatprep.subr.mxu0 %v8894_v16 }
 0x502   :  { %2397 = vmatpush1.msra.mxu0 %v8900_v17 }
 0x503   :  { %2398 = vmatprep.subr.mxu0 %v8906_v37 }
 0x504   :  { %2399 = vmatpush1.msra.mxu0 %v8912_v39 }
 0x505   :  { %2400 = vmatprep.subr.mxu0 %v8918_v51 }
 0x506   :  { %2401 = vmatpush1.msra.mxu0 %v8924_v15 }
 0x507   :  { %2402 = vmatprep.subr.mxu0 %v8930_v57 }
 0x508   :  { %2403 = vmatpush1.msra.mxu0 %v8936_v27 }
 0x509   :  { %2404 = vmatprep.subr.mxu0 %v8942_v23 }
 0x50a   :  { %2405 = vmatpush1.msra.mxu0 %v8948_v25 }
 0x50b   :  { %2406 = vmatprep.subr.mxu0 %v8954_v7 }
 0x50c   :  { %v5587_v11 = vpop.eup %5586  ;;  %2407 = vmatpush1.msra.mxu0 %v8960_v1 }
 0x50d   :  { %2408 = vmatprep.subr.mxu0 %v8966_v4  ;;  %v8969_v2 = vmul.f32 %v5587_v11, %v5585_v33  ;;  %v9120_v33 = vld [vmem:[%s11285_s3 + $0x128] sm:$0xff]  ;;  %v9126_v11 = vld [vmem:[%s11284_s2 + $0x138] sm:$0xff] }
 0x50e   :  { %2409 = vmatpush1.msra.mxu0 %v8974_v19  ;;  %12235 = vst [vmem:[#allocation49_spill] sm:$0xff] %v9120_v33  ;;  %12236 = vst [vmem:[#allocation11_spill] sm:$0xff] %v9126_v11 }
 0x50f   :  { %2443 = vmatmul.mubr.f32.vlgmr.msra.gmra.mxu0 %v8781_v35  ;;  %2545 = vmatprep.subr.mxu0 %v8981_v22 }
 0x510   :  { %5172 = vmatmul.mubr.f32.vlgmr.msra.gmra.mxu1 %v8969_v2  ;;  %2546 = vmatpush1.msra.mxu0 %v8988_v38 }
 0x511   :  { %2450 = vmatpush1.msra.mxu1 %v8994_v60  ;;  %2547 = vmatprep.subr.mxu0 %v9000_v29 }
 0x512   :  { %2451 = vmatprep.subr.mxu1 %v9006_v30  ;;  %2548 = vmatpush1.msra.mxu0 %v9012_v62 }
 0x513   :  { %2452 = vmatpush1.msra.mxu1 %v9018_v28  ;;  %2549 = vmatprep.subr.mxu0 %v9024_v53 }
 0x514   :  { %2453 = vmatprep.subr.mxu1 %v9030_v26  ;;  %2550 = vmatpush1.msra.mxu0 %v9036_v41 }
 0x515   :  { %2454 = vmatpush1.msra.mxu1 %v9042_v8  ;;  %2551 = vmatprep.subr.mxu0 %v9048_v12 }
 0x516   :  { %2455 = vmatprep.subr.mxu1 %v9054_v9  ;;  %2552 = vmatpush1.msra.mxu0 %v9060_v14 }
 0x517   :  { %2456 = vmatpush1.msra.mxu1 %v9066_v5  ;;  %2553 = vmatprep.subr.mxu0 %v9072_v31 }
 0x518   :  { %2457 = vmatprep.subr.mxu1 %v9078_v43  ;;  %2554 = vmatpush1.msra.mxu0 %v9084_v44 }
 0x519   :  { %2458 = vmatpush1.msra.mxu1 %v9090_v46  ;;  %2555 = vmatprep.subr.mxu0 %v9096_v49 }
 0x51a   :  { %2459 = vmatprep.subr.mxu1 %v9102_v50  ;;  %2556 = vmatpush1.msra.mxu0 %v9108_v55  ;;  %v9132_v55 = vld [vmem:[%s11285_s3 + $0x120] sm:$0xff] }
 0x51b   :  { %2460 = vmatpush1.msra.mxu1 %v9114_v56  ;;  %2557 = vmatprep.subr.mxu0 %v9120_v33  ;;  %12237 = vst [vmem:[#allocation51_spill] sm:$0xff] %v9132_v55  ;;  %v9138_v56 = vld [vmem:[%s11284_s2 + $0x130] sm:$0xff]  ;;  %v9144_v33 = vld [vmem:[%s11285_s3 + $0x108] sm:$0xff] }
 0x51c   :  { %2461 = vmatprep.subr.mxu1 %v9126_v11  ;;  %2558 = vmatpush1.msra.mxu0 %v9132_v55  ;;  %12238 = vst [vmem:[#allocation12_spill] sm:$0xff] %v9138_v56  ;;  %12239 = vst [vmem:[#allocation53_spill] sm:$0xff] %v9144_v33  ;;  %v9150_v11 = vld [vmem:[%s11284_s2 + $0x118] sm:$0xff]  ;;  %v9156_v55 = vld [vmem:[%s11285_s3 + $0x100] sm:$0xff] }
 0x51d   :  { %2462 = vmatpush1.msra.mxu1 %v9138_v56  ;;  %2559 = vmatprep.subr.mxu0 %v9144_v33  ;;  %12240 = vst [vmem:[#allocation13_spill] sm:$0xff] %v9150_v11  ;;  %12241 = vst [vmem:[#allocation55_spill] sm:$0xff] %v9156_v55  ;;  %v9162_v56 = vld [vmem:[%s11284_s2 + $0x110] sm:$0xff]  ;;  %v9168_v33 = vld [vmem:[%s11285_s3 + $0xe8] sm:$0xff] }
 0x51e   :  { %2463 = vmatprep.subr.mxu1 %v9150_v11  ;;  %2560 = vmatpush1.msra.mxu0 %v9156_v55  ;;  %12242 = vst [vmem:[#allocation14_spill] sm:$0xff] %v9162_v56  ;;  %12243 = vst [vmem:[#allocation57_spill] sm:$0xff] %v9168_v33  ;;  %v9174_v11 = vld [vmem:[%s11284_s2 + $0xf8] sm:$0xff]  ;;  %v9180_v55 = vld [vmem:[%s11285_s3 + $0xe0] sm:$0xff] }
 0x51f   :  { %2464 = vmatpush1.msra.mxu1 %v9162_v56  ;;  %2561 = vmatprep.subr.mxu0 %v9168_v33  ;;  %12244 = vst [vmem:[#allocation15_spill] sm:$0xff] %v9174_v11  ;;  %12245 = vst [vmem:[#allocation59_spill] sm:$0xff] %v9180_v55  ;;  %v9186_v56 = vld [vmem:[%s11284_s2 + $0xf0] sm:$0xff]  ;;  %v9192_v33 = vld [vmem:[%s11285_s3 + $0xc8] sm:$0xff] }
 0x520   :  { %2465 = vmatprep.subr.mxu1 %v9174_v11  ;;  %2562 = vmatpush1.msra.mxu0 %v9180_v55  ;;  %12246 = vst [vmem:[#allocation16_spill] sm:$0xff] %v9186_v56  ;;  %12247 = vst [vmem:[#allocation61_spill] sm:$0xff] %v9192_v33  ;;  %v9198_v11 = vld [vmem:[%s11284_s2 + $0xd8] sm:$0xff]  ;;  %v9204_v55 = vld [vmem:[%s11285_s3 + $0xc0] sm:$0xff] }
 0x521   :  { %2466 = vmatpush1.msra.mxu1 %v9186_v56  ;;  %2563 = vmatprep.subr.mxu0 %v9192_v33  ;;  %12248 = vst [vmem:[#allocation17_spill] sm:$0xff] %v9198_v11  ;;  %12249 = vst [vmem:[#allocation63_spill] sm:$0xff] %v9204_v55  ;;  %v9210_v56 = vld [vmem:[%s11284_s2 + $0xd0] sm:$0xff]  ;;  %v9216_v33 = vld [vmem:[%s11285_s3 + $0xa8] sm:$0xff] }
 0x522   :  { %2467 = vmatprep.subr.mxu1 %v9198_v11  ;;  %2564 = vmatpush1.msra.mxu0 %v9204_v55  ;;  %12250 = vst [vmem:[#allocation18_spill] sm:$0xff] %v9210_v56  ;;  %12251 = vst [vmem:[#allocation65_spill] sm:$0xff] %v9216_v33  ;;  %v9222_v11 = vld [vmem:[%s11284_s2 + $0xb8] sm:$0xff]  ;;  %v9228_v55 = vld [vmem:[%s11285_s3 + $0xa0] sm:$0xff] }
 0x523   :  { %2468 = vmatpush1.msra.mxu1 %v9210_v56  ;;  %2565 = vmatprep.subr.mxu0 %v9216_v33  ;;  %12252 = vst [vmem:[#allocation19_spill] sm:$0xff] %v9222_v11  ;;  %12253 = vst [vmem:[#allocation67_spill] sm:$0xff] %v9228_v55  ;;  %v9234_v56 = vld [vmem:[%s11284_s2 + $0xb0] sm:$0xff]  ;;  %v9240_v33 = vld [vmem:[%s11285_s3 + $0x88] sm:$0xff] }
 0x524   :  { %2469 = vmatprep.subr.mxu1 %v9222_v11  ;;  %2566 = vmatpush1.msra.mxu0 %v9228_v55  ;;  %12254 = vst [vmem:[#allocation20_spill] sm:$0xff] %v9234_v56  ;;  %12255 = vst [vmem:[#allocation69_spill] sm:$0xff] %v9240_v33  ;;  %v9246_v11 = vld [vmem:[%s11284_s2 + $0x98] sm:$0xff]  ;;  %v9252_v55 = vld [vmem:[%s11285_s3 + $0x80] sm:$0xff] }
 0x525   :  { %2470 = vmatpush1.msra.mxu1 %v9234_v56  ;;  %2567 = vmatprep.subr.mxu0 %v9240_v33  ;;  %12256 = vst [vmem:[#allocation21_spill] sm:$0xff] %v9246_v11  ;;  %12257 = vst [vmem:[#allocation71_spill] sm:$0xff] %v9252_v55  ;;  %v9258_v56 = vld [vmem:[%s11284_s2 + $0x90] sm:$0xff]  ;;  %v9264_v33 = vld [vmem:[%s11285_s3 + $0x68] sm:$0xff] }
 0x526   :  { %2471 = vmatprep.subr.mxu1 %v9246_v11  ;;  %2568 = vmatpush1.msra.mxu0 %v9252_v55  ;;  %12258 = vst [vmem:[#allocation22_spill] sm:$0xff] %v9258_v56  ;;  %12259 = vst [vmem:[#allocation73_spill] sm:$0xff] %v9264_v33  ;;  %v9270_v11 = vld [vmem:[%s11284_s2 + $0x78] sm:$0xff]  ;;  %v9276_v55 = vld [vmem:[%s11285_s3 + $0x60] sm:$0xff] }
 0x527   :  { %2472 = vmatpush1.msra.mxu1 %v9258_v56  ;;  %2569 = vmatprep.subr.mxu0 %v9264_v33  ;;  %12260 = vst [vmem:[#allocation23_spill] sm:$0xff] %v9270_v11  ;;  %12261 = vst [vmem:[#allocation75_spill] sm:$0xff] %v9276_v55  ;;  %v9282_v56 = vld [vmem:[%s11284_s2 + $0x70] sm:$0xff]  ;;  %v9288_v33 = vld [vmem:[%s11285_s3 + $0x48] sm:$0xff] }
 0x528   :  { %2473 = vmatprep.subr.mxu1 %v9270_v11  ;;  %2570 = vmatpush1.msra.mxu0 %v9276_v55  ;;  %12262 = vst [vmem:[#allocation24_spill] sm:$0xff] %v9282_v56  ;;  %12263 = vst [vmem:[#allocation77_spill] sm:$0xff] %v9288_v33  ;;  %v9294_v11 = vld [vmem:[%s11284_s2 + $0x58] sm:$0xff]  ;;  %v9300_v55 = vld [vmem:[%s11285_s3 + $0x40] sm:$0xff] }
 0x529   :  { %2474 = vmatpush1.msra.mxu1 %v9282_v56  ;;  %2571 = vmatprep.subr.mxu0 %v9288_v33  ;;  %12264 = vst [vmem:[#allocation25_spill] sm:$0xff] %v9294_v11  ;;  %12265 = vst [vmem:[#allocation79_spill] sm:$0xff] %v9300_v55  ;;  %v9306_v56 = vld [vmem:[%s11284_s2 + $0x50] sm:$0xff]  ;;  %v9312_v33 = vld [vmem:[%s11285_s3 + $0x28] sm:$0xff] }
 0x52a   :  { %2475 = vmatprep.subr.mxu1 %v9294_v11  ;;  %2572 = vmatpush1.msra.mxu0 %v9300_v55  ;;  %12266 = vst [vmem:[#allocation26_spill] sm:$0xff] %v9306_v56  ;;  %12267 = vst [vmem:[#allocation81_spill] sm:$0xff] %v9312_v33  ;;  %v9318_v11 = vld [vmem:[%s11284_s2 + $0x38] sm:$0xff]  ;;  %v9324_v55 = vld [vmem:[%s11285_s3 + $0x20] sm:$0xff] }
 0x52b   :  { %2476 = vmatpush1.msra.mxu1 %v9306_v56  ;;  %2573 = vmatprep.subr.mxu0 %v9312_v33  ;;  %12268 = vst [vmem:[#allocation27_spill] sm:$0xff] %v9318_v11  ;;  %12269 = vst [vmem:[#allocation83_spill] sm:$0xff] %v9324_v55  ;;  %v9330_v56 = vld [vmem:[%s11284_s2 + $0x30] sm:$0xff]  ;;  %v9336_v33 = vld [vmem:[%s11285_s3 + $0x8] sm:$0xff] }
 0x52c   :  { %2477 = vmatprep.subr.mxu1 %v9318_v11  ;;  %2574 = vmatpush1.msra.mxu0 %v9324_v55  ;;  %12270 = vst [vmem:[#allocation28_spill] sm:$0xff] %v9330_v56  ;;  %12271 = vst [vmem:[#allocation29_spill] sm:$0xff] %v9336_v33  ;;  %v9342_v11 = vld [vmem:[%s11284_s2 + $0x18] sm:$0xff]  ;;  %v2303_v55 = vld [vmem:[#allocation2 + $0x8] sm:$0x3] }
 0x52d   :  { %2478 = vmatpush1.msra.mxu1 %v9330_v56  ;;  %2575 = vmatprep.subr.mxu0 %v9336_v33  ;;  %12272 = vst [vmem:[#allocation85_spill] sm:$0xff] %v9342_v11  ;;  %v9349_v56 = vld [vmem:[%s11284_s2 + $0x10] sm:$0xff]  ;;  %v9355_v33 = vld [vmem:[%s11285_s3] sm:$0xff] }
 0x52e   :  { %2479 = vmatprep.subr.mxu1 %v9342_v11  ;;  %2513 = vmatprep.mubr.f32.mxu1 %v11841_v59  ;;  %12273 = vst [vmem:[#allocation30_spill] sm:$0xff] %v9349_v56  ;;  %12274 = vst [vmem:[#allocation31_spill] sm:$0xff] %v9355_v33  ;;  %v9364_v11 = vld [vmem:[%s11285_s3 + $0x1f8] sm:$0xff] }
 0x52f   :  { %2480 = vmatpush1.msra.mxu1 %v9349_v56  ;;  %2576 = vmatpush1.msra.mxu0 %v9355_v33  ;;  %12275 = vst [vmem:[#allocation32_spill] sm:$0xff] %v9364_v11  ;;  %v9370_v56 = vld [vmem:[%s11285_s3 + $0x1f0] sm:$0xff] }
 0x530   :  { %2609 = vmatprep.mubr.f32.mxu0 %v11841_v59  ;;  %2514 = vmatmul.mubr.f32.vlgmr.msra.gmra.mxu1 %v8781_v35  ;;  %12276 = vst [vmem:[#allocation33_spill] sm:$0xff] %v9370_v56  ;;  %v9377_v35 = vld [vmem:[%s11285_s3 + $0x1d8] sm:$0xff] }
 0x531   :  { %2610 = vmatmul.mubr.f32.vlgmr.msra.gmra.mxu0 %v8969_v2  ;;  %2616 = vmatprep.subr.mxu1 %v9364_v11  ;;  %12277 = vst [vmem:[#allocation87_spill] sm:$0xff] %v9377_v35  ;;  %v9384_v11 = vld [vmem:[%s11285_s3 + $0x1d0] sm:$0xff] }
 0x532   :  { %2617 = vmatpush1.msra.mxu1 %v9370_v56  ;;  %2680 = vmatprep.mubr.f32.mxu1 %v11841_v59  ;;  %12278 = vst [vmem:[#allocation34_spill] sm:$0xff] %v9384_v11  ;;  %v9390_v56 = vld [vmem:[%s11286_s4 + $0x78] sm:$0xff] }
 0x533   :  { %2618 = vmatprep.subr.mxu1 %v9377_v35  ;;  %5174 = vmatprep.subr.mxu0 %v11841_v59  ;;  %12279 = vst [vmem:[#allocation35_spill] sm:$0xff] %v9390_v56  ;;  %v9396_v35 = vld [vmem:[%s11285_s3 + $0x1b8] sm:$0xff] }
 0x534   :  { %2619 = vmatpush1.msra.mxu1 %v9384_v11  ;;  %5175 = vmatpush3.msra.mxu0 %v9390_v56  ;;  %12280 = vst [vmem:[#allocation88_spill] sm:$0xff] %v9396_v35  ;;  %v9403_v11 = vld [vmem:[%s11285_s3 + $0x1b0] sm:$0xff] }
 0x535   :  { %2620 = vmatprep.subr.mxu1 %v9396_v35  ;;  %5176 = vmatprep.subr.mxu0 %v11841_v59  ;;  %12281 = vst [vmem:[#allocation36_spill] sm:$0xff] %v9403_v11  ;;  %v9409_v56 = vld [vmem:[%s11286_s4 + $0x70] sm:$0xff]  ;;  %v9415_v35 = vld [vmem:[%s11285_s3 + $0x198] sm:$0xff] }
 0x536   :  { %2621 = vmatpush1.msra.mxu1 %v9403_v11  ;;  %12282 = vst [vmem:[#allocation38_spill] sm:$0xff] %v9409_v56  ;;  %5177 = vmatpush3.msra.mxu0 %v9409_v56  ;;  %12283 = vst [vmem:[#allocation89_spill] sm:$0xff] %v9415_v35  ;;  %v9422_v11 = vld [vmem:[%s11285_s3 + $0x190] sm:$0xff]  ;;  %v9428_v56 = vld [vmem:[%s11286_s4 + $0x68] sm:$0xff] }
 0x537   :  { %2622 = vmatprep.subr.mxu1 %v9415_v35  ;;  %5178 = vmatprep.subr.mxu0 %v11841_v59  ;;  %12284 = vst [vmem:[#allocation40_spill] sm:$0xff] %v9422_v11  ;;  %12285 = vst [vmem:[#allocation42_spill] sm:$0xff] %v9428_v56  ;;  %v9434_v35 = vld [vmem:[%s11285_s3 + $0x178] sm:$0xff] }
 0x538   :  { %2623 = vmatpush1.msra.mxu1 %v9422_v11  ;;  %5179 = vmatpush3.msra.mxu0 %v9428_v56  ;;  %12286 = vst [vmem:[#allocation90_spill] sm:$0xff] %v9434_v35  ;;  %v9441_v11 = vld [vmem:[%s11285_s3 + $0x170] sm:$0xff]  ;;  %v9447_v56 = vld [vmem:[%s11286_s4 + $0x60] sm:$0xff] }
 0x539   :  { %2624 = vmatprep.subr.mxu1 %v9434_v35  ;;  %5180 = vmatprep.subr.mxu0 %v11841_v59  ;;  %12287 = vst [vmem:[#allocation44_spill] sm:$0xff] %v9441_v11  ;;  %12288 = vst [vmem:[#allocation46_spill] sm:$0xff] %v9447_v56  ;;  %v9453_v35 = vld [vmem:[%s11285_s3 + $0x158] sm:$0xff] }
 0x53a   :  { %2625 = vmatpush1.msra.mxu1 %v9441_v11  ;;  %5181 = vmatpush3.msra.mxu0 %v9447_v56  ;;  %12289 = vst [vmem:[#allocation91_spill] sm:$0xff] %v9453_v35  ;;  %v9460_v11 = vld [vmem:[%s11285_s3 + $0x150] sm:$0xff]  ;;  %v9466_v56 = vld [vmem:[%s11286_s4 + $0x58] sm:$0xff] }
 0x53b   :  { %2626 = vmatprep.subr.mxu1 %v9453_v35  ;;  %5182 = vmatprep.subr.mxu0 %v11841_v59  ;;  %12290 = vst [vmem:[#allocation48_spill] sm:$0xff] %v9460_v11  ;;  %12291 = vst [vmem:[#allocation50_spill] sm:$0xff] %v9466_v56  ;;  %v9472_v35 = vld [vmem:[%s11285_s3 + $0x138] sm:$0xff] }
 0x53c   :  { %2627 = vmatpush1.msra.mxu1 %v9460_v11  ;;  %5183 = vmatpush3.msra.mxu0 %v9466_v56  ;;  %12292 = vst [vmem:[#allocation92_spill] sm:$0xff] %v9472_v35  ;;  %v9479_v11 = vld [vmem:[%s11285_s3 + $0x130] sm:$0xff] }
 0x53d   :  { %2628 = vmatprep.subr.mxu1 %v9472_v35  ;;  %5184 = vmatprep.subr.mxu0 %v11841_v59  ;;  %12293 = vst [vmem:[#allocation52_spill] sm:$0xff] %v9479_v11  ;;  %v9485_v56 = vld [vmem:[%s11286_s4 + $0x50] sm:$0xff]  ;;  %v9491_v35 = vld [vmem:[%s11285_s3 + $0x118] sm:$0xff] }
 0x53e   :  { %2629 = vmatpush1.msra.mxu1 %v9479_v11  ;;  %12294 = vst [vmem:[#allocation54_spill] sm:$0xff] %v9485_v56  ;;  %5185 = vmatpush3.msra.mxu0 %v9485_v56  ;;  %12295 = vst [vmem:[#allocation93_spill] sm:$0xff] %v9491_v35  ;;  %v9498_v11 = vld [vmem:[%s11285_s3 + $0x110] sm:$0xff]  ;;  %v9504_v56 = vld [vmem:[%s11286_s4 + $0x48] sm:$0xff] }
 0x53f   :  { %2630 = vmatprep.subr.mxu1 %v9491_v35  ;;  %5186 = vmatprep.subr.mxu0 %v11841_v59  ;;  %12296 = vst [vmem:[#allocation56_spill] sm:$0xff] %v9498_v11  ;;  %12297 = vst [vmem:[#allocation58_spill] sm:$0xff] %v9504_v56  ;;  %v9510_v35 = vld [vmem:[%s11285_s3 + $0xf8] sm:$0xff] }
 0x540   :  { %2631 = vmatpush1.msra.mxu1 %v9498_v11  ;;  %5187 = vmatpush3.msra.mxu0 %v9504_v56  ;;  %12298 = vst [vmem:[#allocation94_spill] sm:$0xff] %v9510_v35  ;;  %v9517_v11 = vld [vmem:[%s11285_s3 + $0xf0] sm:$0xff]  ;;  %v9523_v56 = vld [vmem:[%s11286_s4 + $0x40] sm:$0xff] }
 0x541   :  { %2632 = vmatprep.subr.mxu1 %v9510_v35  ;;  %5188 = vmatprep.subr.mxu0 %v11841_v59  ;;  %12299 = vst [vmem:[#allocation60_spill] sm:$0xff] %v9517_v11  ;;  %12300 = vst [vmem:[#allocation62_spill] sm:$0xff] %v9523_v56  ;;  %v9529_v35 = vld [vmem:[%s11285_s3 + $0xd8] sm:$0xff] }
 0x542   :  { %2633 = vmatpush1.msra.mxu1 %v9517_v11  ;;  %5189 = vmatpush3.msra.mxu0 %v9523_v56  ;;  %12301 = vst [vmem:[#allocation95_spill] sm:$0xff] %v9529_v35  ;;  %v9536_v11 = vld [vmem:[%s11285_s3 + $0xd0] sm:$0xff]  ;;  %v9542_v56 = vld [vmem:[%s11286_s4 + $0x38] sm:$0xff] }
 0x543   :  { %2634 = vmatprep.subr.mxu1 %v9529_v35  ;;  %5190 = vmatprep.subr.mxu0 %v11841_v59  ;;  %12302 = vst [vmem:[#allocation64_spill] sm:$0xff] %v9536_v11  ;;  %12303 = vst [vmem:[#allocation66_spill] sm:$0xff] %v9542_v56  ;;  %v9548_v35 = vld [vmem:[%s11285_s3 + $0xb8] sm:$0xff] }
 0x544   :  { %2635 = vmatpush1.msra.mxu1 %v9536_v11  ;;  %5191 = vmatpush3.msra.mxu0 %v9542_v56  ;;  %12304 = vst [vmem:[#allocation96_spill] sm:$0xff] %v9548_v35  ;;  %v9555_v11 = vld [vmem:[%s11285_s3 + $0xb0] sm:$0xff] }
 0x545   :  { %2636 = vmatprep.subr.mxu1 %v9548_v35  ;;  %5192 = vmatprep.subr.mxu0 %v11841_v59  ;;  %12305 = vst [vmem:[#allocation68_spill] sm:$0xff] %v9555_v11  ;;  %v9561_v56 = vld [vmem:[%s11286_s4 + $0x30] sm:$0xff]  ;;  %v9567_v35 = vld [vmem:[%s11285_s3 + $0x98] sm:$0xff] }
 0x546   :  { %2637 = vmatpush1.msra.mxu1 %v9555_v11  ;;  %12306 = vst [vmem:[#allocation70_spill] sm:$0xff] %v9561_v56  ;;  %5193 = vmatpush3.msra.mxu0 %v9561_v56  ;;  %12307 = vst [vmem:[#allocation97_spill] sm:$0xff] %v9567_v35  ;;  %v9574_v11 = vld [vmem:[%s11285_s3 + $0x90] sm:$0xff]  ;;  %v9580_v56 = vld [vmem:[%s11286_s4 + $0x28] sm:$0xff] }
 0x547   :  { %2638 = vmatprep.subr.mxu1 %v9567_v35  ;;  %5194 = vmatprep.subr.mxu0 %v11841_v59  ;;  %12308 = vst [vmem:[#allocation72_spill] sm:$0xff] %v9574_v11  ;;  %12309 = vst [vmem:[#allocation74_spill] sm:$0xff] %v9580_v56  ;;  %v9586_v35 = vld [vmem:[%s11285_s3 + $0x78] sm:$0xff] }
 0x548   :  { %2639 = vmatpush1.msra.mxu1 %v9574_v11  ;;  %5195 = vmatpush3.msra.mxu0 %v9580_v56  ;;  %12310 = vst [vmem:[#allocation98_spill] sm:$0xff] %v9586_v35  ;;  %v9593_v11 = vld [vmem:[%s11285_s3 + $0x70] sm:$0xff]  ;;  %v9599_v56 = vld [vmem:[%s11286_s4 + $0x20] sm:$0xff] }
 0x549   :  { %2640 = vmatprep.subr.mxu1 %v9586_v35  ;;  %5196 = vmatprep.subr.mxu0 %v11841_v59  ;;  %12311 = vst [vmem:[#allocation76_spill] sm:$0xff] %v9593_v11  ;;  %12312 = vst [vmem:[#allocation78_spill] sm:$0xff] %v9599_v56  ;;  %v9605_v35 = vld [vmem:[%s11285_s3 + $0x58] sm:$0xff] }
 0x54a   :  { %2641 = vmatpush1.msra.mxu1 %v9593_v11  ;;  %5197 = vmatpush3.msra.mxu0 %v9599_v56  ;;  %12313 = vst [vmem:[#allocation99_spill] sm:$0xff] %v9605_v35  ;;  %v9612_v11 = vld [vmem:[%s11285_s3 + $0x50] sm:$0xff]  ;;  %v9618_v56 = vld [vmem:[%s11286_s4 + $0x18] sm:$0xff] }
 0x54b   :  { %2642 = vmatprep.subr.mxu1 %v9605_v35  ;;  %5198 = vmatprep.subr.mxu0 %v11841_v59  ;;  %12314 = vst [vmem:[#allocation80_spill] sm:$0xff] %v9612_v11  ;;  %12315 = vst [vmem:[#allocation82_spill] sm:$0xff] %v9618_v56  ;;  %v9624_v35 = vld [vmem:[%s11285_s3 + $0x38] sm:$0xff] }
 0x54c   :  { %2643 = vmatpush1.msra.mxu1 %v9612_v11  ;;  %5199 = vmatpush3.msra.mxu0 %v9618_v56  ;;  %12316 = vst [vmem:[#allocation100_spill] sm:$0xff] %v9624_v35  ;;  %v9631_v11 = vld [vmem:[%s11285_s3 + $0x30] sm:$0xff] }
 0x54d   :  { %2644 = vmatprep.subr.mxu1 %v9624_v35  ;;  %5200 = vmatprep.subr.mxu0 %v11841_v59  ;;  %12317 = vst [vmem:[#allocation84_spill] sm:$0xff] %v9631_v11  ;;  %v9637_v56 = vld [vmem:[%s11286_s4 + $0x10] sm:$0xff]  ;;  %v9643_v35 = vld [vmem:[%s11285_s3 + $0x18] sm:$0xff] }
 0x54e   :  { %2645 = vmatpush1.msra.mxu1 %v9631_v11  ;;  %12318 = vst [vmem:[#allocation86_spill] sm:$0xff] %v9637_v56  ;;  %5201 = vmatpush3.msra.mxu0 %v9637_v56  ;;  %12319 = vst [vmem:[#allocation101_spill] sm:$0xff] %v9643_v35  ;;  %v9650_v11 = vld [vmem:[%s11285_s3 + $0x10] sm:$0xff]  ;;  %v9656_v56 = vld [vmem:[%s11286_s4 + $0x8] sm:$0xff] }
 0x54f   :  { %2646 = vmatprep.subr.mxu1 %v9643_v35  ;;  %5202 = vmatprep.subr.mxu0 %v11841_v59  ;;  %12320 = vst [vmem:[#allocation102_spill] sm:$0xff] %v9650_v11  ;;  %12321 = vst [vmem:[#allocation103_spill] sm:$0xff] %v9656_v56  ;;  %v9664_v35 = vld [vmem:[%s11286_s4] sm:$0xff] }
 0x550   :  { %2647 = vmatpush1.msra.mxu1 %v9650_v11  ;;  %5203 = vmatpush3.msra.mxu0 %v9656_v56  ;;  %12322 = vst [vmem:[#allocation104_spill] sm:$0xff] %v9664_v35 }
 0x551   :  { %2681 = vmatmul.mubr.f32.vlgmr.msra.gmra.mxu1 %v8969_v2  ;;  %5204 = vmatprep.subr.mxu0 %v11841_v59  ;;  %v9674_v2 = vld [vmem:[%s11287_s5 + $0x78] sm:$0xff] }
 0x552   :  { %5205 = vmatpush3.msra.mxu0 %v9664_v35  ;;  %5206 = vmatprep.mubr.msk.f32.mxu0 %vm6219_vm0, %v11841_v59  ;;  %12323 = vst [vmem:[#allocation105_spill] sm:$0xff] %v9674_v2  ;;  %v9683_v35 = vld [vmem:[%s11287_s5 + $0x70] sm:$0xff] }
 0x553   :  { %5209 = vmatprep.subr.mxu1 %v11841_v59  ;;  %2920 = vmatprep.subr.mxu0 %v8725_v6  ;;  %12324 = vst [vmem:[#allocation106_spill] sm:$0xff] %v9683_v35  ;;  %v9690_v6 = vld [vmem:[%s11287_s5 + $0x68] sm:$0xff] }
 0x554   :  { %5210 = vmatpush3.msra.mxu1 %v9674_v2  ;;  %5241 = vmatprep.mubr.msk.f32.mxu1 %vm6219_vm0, %v11841_v59  ;;  %12325 = vst [vmem:[#allocation107_spill] sm:$0xff] %v9690_v6  ;;  %v9697_v2 = vld [vmem:[%s11287_s5 + $0x60] sm:$0xff] }
 0x555   :  { %5211 = vmatprep.subr.mxu1 %v11841_v59  ;;  %12326 = vst [vmem:[#allocation108_spill] sm:$0xff] %v9697_v2 }
 0x556   :  { %5212 = vmatpush3.msra.mxu1 %v9683_v35  ;;  %v9704_v35 = vld [vmem:[%s11287_s5 + $0x58] sm:$0xff] }
 0x557   :  { %5213 = vmatprep.subr.mxu1 %v11841_v59  ;;  %12327 = vst [vmem:[#allocation109_spill] sm:$0xff] %v9704_v35 }
 0x558   :  { %5214 = vmatpush3.msra.mxu1 %v9690_v6  ;;  %v9711_v6 = vld [vmem:[%s11287_s5 + $0x50] sm:$0xff] }
 0x559   :  { %5215 = vmatprep.subr.mxu1 %v11841_v59  ;;  %12328 = vst [vmem:[#allocation110_spill] sm:$0xff] %v9711_v6 }
 0x55a   :  { %5216 = vmatpush3.msra.mxu1 %v9697_v2  ;;  %v9718_v2 = vld [vmem:[%s11287_s5 + $0x48] sm:$0xff] }
 0x55b   :  { %5217 = vmatprep.subr.mxu1 %v11841_v59  ;;  %12329 = vst [vmem:[#allocation111_spill] sm:$0xff] %v9718_v2 }
 0x55c   :  { %5218 = vmatpush3.msra.mxu1 %v9704_v35  ;;  %v9725_v35 = vld [vmem:[%s11287_s5 + $0x40] sm:$0xff] }
 0x55d   :  { %5219 = vmatprep.subr.mxu1 %v11841_v59  ;;  %12330 = vst [vmem:[#allocation112_spill] sm:$0xff] %v9725_v35 }
 0x55e   :  { %5220 = vmatpush3.msra.mxu1 %v9711_v6  ;;  %v9732_v6 = vld [vmem:[%s11287_s5 + $0x38] sm:$0xff] }
 0x55f   :  { %5221 = vmatprep.subr.mxu1 %v11841_v59  ;;  %12331 = vst [vmem:[#allocation113_spill] sm:$0xff] %v9732_v6 }
 0x560   :  { %5222 = vmatpush3.msra.mxu1 %v9718_v2  ;;  %v9739_v2 = vld [vmem:[%s11287_s5 + $0x30] sm:$0xff] }
 0x561   :  { %5223 = vmatprep.subr.mxu1 %v11841_v59  ;;  %12332 = vst [vmem:[#allocation114_spill] sm:$0xff] %v9739_v2 }
 0x562   :  { %5224 = vmatpush3.msra.mxu1 %v9725_v35  ;;  %v9746_v35 = vld [vmem:[%s11287_s5 + $0x28] sm:$0xff] }
 0x563   :  { %5225 = vmatprep.subr.mxu1 %v11841_v59  ;;  %12333 = vst [vmem:[#allocation115_spill] sm:$0xff] %v9746_v35 }
 0x564   :  { %5226 = vmatpush3.msra.mxu1 %v9732_v6  ;;  %v9753_v6 = vld [vmem:[%s11287_s5 + $0x20] sm:$0xff] }
 0x565   :  { %5227 = vmatprep.subr.mxu1 %v11841_v59  ;;  %12334 = vst [vmem:[#allocation116_spill] sm:$0xff] %v9753_v6 }
 0x566   :  { %5228 = vmatpush3.msra.mxu1 %v9739_v2  ;;  %v9760_v2 = vld [vmem:[%s11287_s5 + $0x18] sm:$0xff] }
 0x567   :  { %5229 = vmatprep.subr.mxu1 %v11841_v59  ;;  %12335 = vst [vmem:[#allocation117_spill] sm:$0xff] %v9760_v2 }
 0x568   :  { %5230 = vmatpush3.msra.mxu1 %v9746_v35  ;;  %v9767_v35 = vld [vmem:[%s11287_s5 + $0x10] sm:$0xff] }
 0x569   :  { %5231 = vmatprep.subr.mxu1 %v11841_v59  ;;  %12336 = vst [vmem:[#allocation118_spill] sm:$0xff] %v9767_v35 }
 0x56a   :  { %5232 = vmatpush3.msra.mxu1 %v9753_v6  ;;  %v9774_v6 = vld [vmem:[%s11287_s5 + $0x8] sm:$0xff] }
 0x56b   :  { %5233 = vmatprep.subr.mxu1 %v11841_v59  ;;  %12337 = vst [vmem:[#allocation120_spill] sm:$0xff] %v9774_v6 }
 0x56c   :  { %5234 = vmatpush3.msra.mxu1 %v9760_v2  ;;  %v9781_v2 = vld [vmem:[%s11287_s5] sm:$0xff] }
 0x56d   :  { %5235 = vmatprep.subr.mxu1 %v11841_v59  ;;  %12338 = vst [vmem:[#allocation121_spill] sm:$0xff] %v9781_v2 }
 0x56e   :  { %5236 = vmatpush3.msra.mxu1 %v9767_v35  ;;  %v2229_v35 = vld [vmem:[#allocation2 + $0x6] sm:$0x3] }
 0x56f   :  { %5237 = vmatprep.subr.mxu1 %v11841_v59 }
 0x570   :  { %5238 = vmatpush3.msra.mxu1 %v9774_v6 }
 0x571   :  { %5239 = vmatprep.subr.mxu1 %v11841_v59 }
 0x572   :  { %5240 = vmatpush3.msra.mxu1 %v9781_v2 }
 0x573   :  { %2991 = vmatprep.subr.mxu1 %v8764_v3 }
 0x5af   :  { %v2296_v56 = vpop.f32.mrf.mxu0 }
 0x5b0   :  { %v2300_v11 = vadd.f32 %v2296_v56, %v2229_v35  ;;  %v4591_v56 = vld [vmem:[%s11282_s0 + $0x20] sm:$0xff] }
 0x5b1   :  { %v5138_v33 = vpop.f32.mrf.mxu0 }
 0x5b2   :  { %2301 = vst [vmem:[#allocation2 + $0x6] sm:$0x3] %v2300_v11 }
 0x5cf   :  { %v2444_v46 = vpop.f32.mrf.mxu0 }
 0x5d0   :  { %v2370_v50 = vpop.f32.mrf.mxu1 }
 0x5d1   :  { %v2374_v49 = vadd.f32 %v2370_v50, %v2303_v55  ;;  %v2446_v44 = vpop.f32.mrf.mxu0 }
 0x5d2   :  { %v5173_v6 = vpop.f32.mrf.mxu1  ;;  %v2524_v31 = vcombine.low %v2444_v46, %v2446_v44 }
 0x5d3   :  { %2375 = vst [vmem:[#allocation2 + $0x8] sm:$0x3] %v2374_v49 }
 0x5d4   :  { %v2532_v2 = vrot.slane %v2524_v31, %v12222_v47 }
 0x5f0   :  { %v2515_v43 = vpop.f32.mrf.mxu1 }
 0x5f2   :  { %v2517_v5 = vpop.f32.mrf.mxu1 }
 0x5f3   :  { %v2525_v14 = vcombine.low %v2515_v43, %v2517_v5  ;;  %v2611_v5 = vpop.f32.mrf.mxu0 }
 0x5f5   :  { %v2539_v3 = vrot.slane %v2525_v14, %v12222_v47  ;;  %v2613_v9 = vpop.f32.mrf.mxu0 }
 0x5f7   :  { %v2540_v33 = vcombine.low %v2532_v2, %v2539_v3  ;;  %v2691_v3 = vcombine.low %v2611_v5, %v2613_v9 }
 0x5f9   :  { %v2542_v11 = vadd.f32 %v4591_v56, %v2540_v33 }
 0x5fb   :  { %v4593_v35 = vmul.f32 -1.442695, %v2542_v11  ;;  %v2717_v50 = vrot.slane %v2542_v11, 2  ;;  %v2728_v55 = vrot.slane %v2542_v11, 6  ;;  %v2725_v46 = vrot.slane %v2542_v11, 4  ;;  %v4592_v11 = vld [vmem:[%s11283_s1 + $0x18] sm:$0xff] }
 0x5fd   :  { %5588 = vpow2.f32 %v4593_v35  ;;  %v4594_v49 = vmul.f32 -1.442695, %v2717_v50  ;;  %v4595_v6 = vmul.f32 -1.442695, %v2728_v55  ;;  %v2699_v35 = vrot.slane %v2691_v3, %v12222_v47 }
 0x5ff   :  { %5590 = vpow2.f32 %v4594_v49 }
 0x600   :  { %5592 = vpow2.f32 %v4595_v6 }
 0x60a   :  { %v5589_v44 = vpop.eup %5588 }
 0x60b   :  { %v2713_v43 = vadd.f32 1.0, %v5589_v44 }
 0x60c   :  { %v5591_v31 = vpop.eup %5590 }
 0x60d   :  { %5594 = vrcp.f32 %v2713_v43  ;;  %v2722_v14 = vadd.f32 1.0, %v5591_v31  ;;  %v5593_v55 = vpop.eup %5592 }
 0x60e   :  { %5596 = vtanh.f32 %v2725_v46  ;;  %v2733_v12 = vadd.f32 1.0, %v5593_v55 }
 0x60f   :  { %5598 = vrcp.f32 %v2722_v14 }
 0x611   :  { %v2682_v2 = vpop.f32.mrf.mxu1 }
 0x613   :  { %v2684_v56 = vpop.f32.mrf.mxu1 }
 0x614   :  { %v2692_v33 = vcombine.low %v2682_v2, %v2684_v56 }
 0x616   :  { %v2706_v50 = vrot.slane %v2692_v33, %v12222_v47 }
 0x618   :  { %v2707_v49 = vcombine.low %v2699_v35, %v2706_v50 }
 0x61a   :  { %v5595_v6 = vpop.eup %5594  ;;  %v2709_v44 = vadd.f32 %v4592_v11, %v2707_v49 }
 0x61b   :  { %v5597_v43 = vpop.eup %5596 }
 0x61c   :  { %v5599_v46 = vpop.eup %5598  ;;  %v4596_v31 = vmul.f32 -1.442695, %v2709_v44  ;;  %v2748_v14 = vrot.slane %v2709_v44, 2  ;;  %v2737_v5 = vmul.f32 %v5597_v43, %v5595_v6  ;;  %v2759_v56 = vrot.slane %v2709_v44, 6  ;;  %v12374_v43 = vld [vmem:[#allocation22_spill] sm:$0xff] }
 0x61d   :  { %v2736_v9 = vmul.f32 %v5599_v46, %v8778_v36  ;;  %v2756_v50 = vrot.slane %v2709_v44, 4  ;;  %v12375_v46 = vld [vmem:[#allocation73_spill] sm:$0xff] }
 0x61e   :  { %5600 = vpow2.f32 %v4596_v31  ;;  %v4597_v2 = vmul.f32 -1.442695, %v2748_v14  ;;  %v4598_v33 = vmul.f32 -1.442695, %v2759_v56  ;;  %v12376_v31 = vld [vmem:[#allocation23_spill] sm:$0xff] }
 0x61f   :  { %v9796_v3 = vadd.f32 %v2737_v5, %v2736_v9  ;;  %v12377_v14 = vld [vmem:[#allocation75_spill] sm:$0xff]  ;;  %v12378_v9 = vld [vmem:[#allocation24_spill] sm:$0xff]  ;;  %v12379_v5 = vld [vmem:[#allocation77_spill] sm:$0xff] }
 0x620   :  { %5602 = vpow2.f32 %v4597_v2  ;;  %v12380_v2 = vld [vmem:[#allocation25_spill] sm:$0xff]  ;;  %v12381_v56 = vld [vmem:[#allocation79_spill] sm:$0xff] }
 0x621   :  { %5604 = vrcp.f32 %v2733_v12 }
 0x622   :  { %5606 = vtanh.f32 %v9796_v3 }
 0x623   :  { %5608 = vpow2.f32 %v4598_v33  ;;  %v12382_v33 = vld [vmem:[#allocation26_spill] sm:$0xff] }
 0x62b   :  { %v5601_v35 = vpop.eup %5600 }
 0x62c   :  { %v2744_v11 = vadd.f32 1.0, %v5601_v35  ;;  %v12383_v35 = vld [vmem:[#allocation81_spill] sm:$0xff] }
 0x62d   :  { %v5603_v49 = vpop.eup %5602 }
 0x62e   :  { %v5605_v47 = vpop.eup %5604  ;;  %5610 = vrcp.f32 %v2744_v11  ;;  %v2753_v55 = vadd.f32 1.0, %v5603_v49  ;;  %v12385_v11 = vld [vmem:[#allocation83_spill] sm:$0xff]  ;;  %v12386_v49 = vld [vmem:[#allocation28_spill] sm:$0xff] }
 0x62f   :  { %v5607_v36 = vpop.eup %5606  ;;  %5612 = vtanh.f32 %v2756_v50  ;;  %v12384_v50 = vld [vmem:[#allocation27_spill] sm:$0xff] }
 0x630   :  { %5614 = vrcp.f32 %v2753_v55  ;;  %v9799_v6 = vmul.f32 %v5607_v36, %v5605_v47  ;;  %v5609_v47 = vpop.eup %5608  ;;  %v12387_v55 = vld [vmem:[#allocation29_spill] sm:$0xff] }
 0x631   :  { %v2764_v44 = vadd.f32 1.0, %v5609_v47  ;;  %v12388_v36 = vld [vmem:[#allocation85_spill] sm:$0xff]  ;;  %v12389_v47 = vld [vmem:[#allocation30_spill] sm:$0xff] }
 0x632   :  { %5207 = vmatmul.mubr.f32.vlgmr.msra.gmra.mxu0 %v9799_v6 }
 0x633   :  { %2921 = vmatpush1.msra.mxu0 %v8787_v20  ;;  %2984 = vmatprep.mubr.f32.mxu0 %v11841_v59  ;;  %5616 = vrcp.f32 %v2764_v44  ;;  %v12393_v44 = vld [vmem:[#allocation87_spill] sm:$0xff] }
 0x634   :  { %2922 = vmatprep.subr.mxu0 %v8794_v24 }
 0x635   :  { %2923 = vmatpush1.msra.mxu0 %v8800_v13 }
 0x636   :  { %2924 = vmatprep.subr.mxu0 %v8806_v32 }
 0x637   :  { %2925 = vmatpush1.msra.mxu0 %v8812_v34 }
 0x638   :  { %2926 = vmatprep.subr.mxu0 %v8818_v40 }
 0x639   :  { %2927 = vmatpush1.msra.mxu0 %v8824_v42 }
 0x63a   :  { %2928 = vmatprep.subr.mxu0 %v8830_v10 }
 0x63b   :  { %v5611_v12 = vpop.eup %5610  ;;  %2929 = vmatpush1.msra.mxu0 %v8836_v45  ;;  %v12339_v45 = vld [vmem:[#allocation37_spill] sm:$0xff] }
 0x63c   :  { %v5613_v20 = vpop.eup %5612  ;;  %2930 = vmatprep.subr.mxu0 %v8842_v48  ;;  %v12340_v48 = vld [vmem:[#allocation5_spill] sm:$0xff] }
 0x63d   :  { %v5615_v24 = vpop.eup %5614  ;;  %2931 = vmatpush1.msra.mxu0 %v8848_v52  ;;  %v2768_v32 = vmul.f32 %v5613_v20, %v5611_v12  ;;  %v12341_v52 = vld [vmem:[#allocation39_spill] sm:$0xff]  ;;  %v12391_v20 = vld [vmem:[#allocation32_spill] sm:$0xff] }
 0x63e   :  { %2932 = vmatprep.subr.mxu0 %v8854_v54  ;;  %v2767_v13 = vmul.f32 %v5615_v24, %v8870_v63  ;;  %v12342_v54 = vld [vmem:[#allocation6_spill] sm:$0xff]  ;;  %v12345_v63 = vld [vmem:[#allocation43_spill] sm:$0xff]  ;;  %v12392_v24 = vld [vmem:[#allocation33_spill] sm:$0xff] }
 0x63f   :  { %2933 = vmatpush1.msra.mxu0 %v8861_v58  ;;  %v12343_v58 = vld [vmem:[#allocation41_spill] sm:$0xff]  ;;  %v12390_v12 = vld [vmem:[#allocation31_spill] sm:$0xff] }
 0x640   :  { %2934 = vmatprep.subr.mxu0 %v8867_v61  ;;  %v9818_v34 = vadd.f32 %v2768_v32, %v2767_v13  ;;  %v5617_v40 = vpop.eup %5616  ;;  %v12344_v61 = vld [vmem:[#allocation7_spill] sm:$0xff]  ;;  %v12394_v13 = vld [vmem:[#allocation34_spill] sm:$0xff] }
 0x641   :  { %2935 = vmatpush1.msra.mxu0 %v8875_v18  ;;  %v12346_v18 = vld [vmem:[#allocation8_spill] sm:$0xff]  ;;  %v12395_v32 = vld [vmem:[#allocation35_spill] sm:$0xff] }
 0x642   :  { %2936 = vmatprep.subr.mxu0 %v8881_v21  ;;  %5618 = vtanh.f32 %v9818_v34  ;;  %v12347_v21 = vld [vmem:[#allocation45_spill] sm:$0xff] }
 0x643   :  { %2937 = vmatpush1.msra.mxu0 %v8888_v0  ;;  %v12348_v0 = vld [vmem:[#allocation9_spill] sm:$0xff] }
 0x644   :  { %2938 = vmatprep.subr.mxu0 %v8894_v16  ;;  %v12349_v16 = vld [vmem:[#allocation47_spill] sm:$0xff] }
 0x645   :  { %2939 = vmatpush1.msra.mxu0 %v8900_v17  ;;  %v12350_v17 = vld [vmem:[#allocation10_spill] sm:$0xff] }
 0x646   :  { %2940 = vmatprep.subr.mxu0 %v8906_v37  ;;  %v12351_v37 = vld [vmem:[#allocation49_spill] sm:$0xff] }
 0x647   :  { %2941 = vmatpush1.msra.mxu0 %v8912_v39  ;;  %v12352_v39 = vld [vmem:[#allocation11_spill] sm:$0xff] }
 0x648   :  { %2942 = vmatprep.subr.mxu0 %v8918_v51  ;;  %v12353_v51 = vld [vmem:[#allocation51_spill] sm:$0xff] }
 0x649   :  { %2943 = vmatpush1.msra.mxu0 %v8924_v15  ;;  %v12354_v15 = vld [vmem:[#allocation12_spill] sm:$0xff] }
 0x64a   :  { %2944 = vmatprep.subr.mxu0 %v8930_v57  ;;  %v12355_v57 = vld [vmem:[#allocation53_spill] sm:$0xff] }
 0x64b   :  { %2945 = vmatpush1.msra.mxu0 %v8936_v27  ;;  %v12356_v27 = vld [vmem:[#allocation13_spill] sm:$0xff] }
 0x64c   :  { %2946 = vmatprep.subr.mxu0 %v8942_v23  ;;  %v12357_v23 = vld [vmem:[#allocation55_spill] sm:$0xff] }
 0x64d   :  { %2947 = vmatpush1.msra.mxu0 %v8948_v25  ;;  %v12358_v25 = vld [vmem:[#allocation14_spill] sm:$0xff] }
 0x64e   :  { %2948 = vmatprep.subr.mxu0 %v8954_v7  ;;  %v12359_v7 = vld [vmem:[#allocation57_spill] sm:$0xff] }
 0x64f   :  { %v5619_v42 = vpop.eup %5618  ;;  %2949 = vmatpush1.msra.mxu0 %v8960_v1  ;;  %v12360_v1 = vld [vmem:[#allocation15_spill] sm:$0xff] }
 0x650   :  { %2950 = vmatprep.subr.mxu0 %v8966_v4  ;;  %v9837_v10 = vmul.f32 %v5619_v42, %v5617_v40  ;;  %v12361_v4 = vld [vmem:[#allocation59_spill] sm:$0xff]  ;;  %v12396_v40 = vld [vmem:[#allocation88_spill] sm:$0xff]  ;;  %v12398_v42 = vld [vmem:[#allocation38_spill] sm:$0xff] }
 0x651   :  { %2951 = vmatpush1.msra.mxu0 %v8974_v19  ;;  %v12362_v19 = vld [vmem:[#allocation16_spill] sm:$0xff] }
 0x652   :  { %2985 = vmatmul.mubr.f32.vlgmr.msra.gmra.mxu0 %v9799_v6  ;;  %3087 = vmatprep.subr.mxu0 %v8981_v22  ;;  %v12363_v22 = vld [vmem:[#allocation61_spill] sm:$0xff] }
 0x653   :  { %5242 = vmatmul.mubr.f32.vlgmr.msra.gmra.mxu1 %v9837_v10  ;;  %3088 = vmatpush1.msra.mxu0 %v8988_v38  ;;  %v12364_v38 = vld [vmem:[#allocation17_spill] sm:$0xff] }
 0x654   :  { %2992 = vmatpush1.msra.mxu1 %v8994_v60  ;;  %3089 = vmatprep.subr.mxu0 %v9000_v29  ;;  %v12365_v60 = vld [vmem:[#allocation63_spill] sm:$0xff]  ;;  %v12366_v29 = vld [vmem:[#allocation18_spill] sm:$0xff] }
 0x655   :  { %2993 = vmatprep.subr.mxu1 %v9006_v30  ;;  %3090 = vmatpush1.msra.mxu0 %v9012_v62  ;;  %v12367_v30 = vld [vmem:[#allocation65_spill] sm:$0xff]  ;;  %v12368_v62 = vld [vmem:[#allocation19_spill] sm:$0xff] }
 0x656   :  { %2994 = vmatpush1.msra.mxu1 %v9018_v28  ;;  %3091 = vmatprep.subr.mxu0 %v9024_v53  ;;  %v12369_v28 = vld [vmem:[#allocation67_spill] sm:$0xff]  ;;  %v12370_v53 = vld [vmem:[#allocation20_spill] sm:$0xff] }
 0x657   :  { %2995 = vmatprep.subr.mxu1 %v9030_v26  ;;  %3092 = vmatpush1.msra.mxu0 %v9036_v41  ;;  %v12371_v26 = vld [vmem:[#allocation69_spill] sm:$0xff] }
 0x658   :  { %2996 = vmatpush1.msra.mxu1 %v9042_v8  ;;  %3093 = vmatprep.subr.mxu0 %v12339_v45  ;;  %v12372_v41 = vld [vmem:[#allocation21_spill] sm:$0xff]  ;;  %v12373_v8 = vld [vmem:[#allocation71_spill] sm:$0xff] }
 0x659   :  { %2997 = vmatprep.subr.mxu1 %v12340_v48  ;;  %3094 = vmatpush1.msra.mxu0 %v12341_v52  ;;  %v12399_v45 = vld [vmem:[#allocation89_spill] sm:$0xff]  ;;  %v12400_v48 = vld [vmem:[#allocation40_spill] sm:$0xff]  ;;  %v12401_v52 = vld [vmem:[#allocation42_spill] sm:$0xff] }
 0x65a   :  { %2998 = vmatpush1.msra.mxu1 %v12342_v54  ;;  %3095 = vmatprep.subr.mxu0 %v12343_v58  ;;  %v12402_v54 = vld [vmem:[#allocation90_spill] sm:$0xff]  ;;  %v12403_v58 = vld [vmem:[#allocation44_spill] sm:$0xff] }
 0x65b   :  { %2999 = vmatprep.subr.mxu1 %v12344_v61  ;;  %3096 = vmatpush1.msra.mxu0 %v12345_v63  ;;  %v12404_v61 = vld [vmem:[#allocation46_spill] sm:$0xff]  ;;  %v12405_v63 = vld [vmem:[#allocation91_spill] sm:$0xff] }
 0x65c   :  { %3000 = vmatpush1.msra.mxu1 %v12346_v18  ;;  %3097 = vmatprep.subr.mxu0 %v12347_v21  ;;  %v12406_v18 = vld [vmem:[#allocation48_spill] sm:$0xff]  ;;  %v12407_v21 = vld [vmem:[#allocation50_spill] sm:$0xff] }
 0x65d   :  { %3001 = vmatprep.subr.mxu1 %v12348_v0  ;;  %3098 = vmatpush1.msra.mxu0 %v12349_v16  ;;  %v12408_v0 = vld [vmem:[#allocation92_spill] sm:$0xff] }
 0x65e   :  { %3002 = vmatpush1.msra.mxu1 %v12350_v17  ;;  %3099 = vmatprep.subr.mxu0 %v12351_v37  ;;  %v12409_v16 = vld [vmem:[#allocation52_spill] sm:$0xff]  ;;  %v12410_v17 = vld [vmem:[#allocation54_spill] sm:$0xff]  ;;  %v12411_v37 = vld [vmem:[#allocation93_spill] sm:$0xff] }
 0x65f   :  { %3003 = vmatprep.subr.mxu1 %v12352_v39  ;;  %3100 = vmatpush1.msra.mxu0 %v12353_v51  ;;  %v12412_v39 = vld [vmem:[#allocation56_spill] sm:$0xff]  ;;  %v12413_v51 = vld [vmem:[#allocation58_spill] sm:$0xff] }
 0x660   :  { %3004 = vmatpush1.msra.mxu1 %v12354_v15  ;;  %3101 = vmatprep.subr.mxu0 %v12355_v57  ;;  %v12414_v15 = vld [vmem:[#allocation94_spill] sm:$0xff]  ;;  %v12415_v57 = vld [vmem:[#allocation60_spill] sm:$0xff] }
 0x661   :  { %3005 = vmatprep.subr.mxu1 %v12356_v27  ;;  %3102 = vmatpush1.msra.mxu0 %v12357_v23  ;;  %v12416_v27 = vld [vmem:[#allocation62_spill] sm:$0xff]  ;;  %v12417_v23 = vld [vmem:[#allocation95_spill] sm:$0xff] }
 0x662   :  { %3006 = vmatpush1.msra.mxu1 %v12358_v25  ;;  %3103 = vmatprep.subr.mxu0 %v12359_v7  ;;  %v12418_v25 = vld [vmem:[#allocation64_spill] sm:$0xff]  ;;  %v12419_v7 = vld [vmem:[#allocation66_spill] sm:$0xff] }
 0x663   :  { %3007 = vmatprep.subr.mxu1 %v12360_v1  ;;  %3104 = vmatpush1.msra.mxu0 %v12361_v4  ;;  %v12420_v1 = vld [vmem:[#allocation96_spill] sm:$0xff] }
 0x664   :  { %3008 = vmatpush1.msra.mxu1 %v12362_v19  ;;  %3105 = vmatprep.subr.mxu0 %v12363_v22  ;;  %v12421_v4 = vld [vmem:[#allocation68_spill] sm:$0xff]  ;;  %v12422_v19 = vld [vmem:[#allocation70_spill] sm:$0xff]  ;;  %v12423_v22 = vld [vmem:[#allocation97_spill] sm:$0xff] }
 0x665   :  { %3009 = vmatprep.subr.mxu1 %v12364_v38  ;;  %3106 = vmatpush1.msra.mxu0 %v12365_v60  ;;  %v12424_v38 = vld [vmem:[#allocation72_spill] sm:$0xff]  ;;  %v12425_v60 = vld [vmem:[#allocation74_spill] sm:$0xff] }
 0x666   :  { %3010 = vmatpush1.msra.mxu1 %v12366_v29  ;;  %3107 = vmatprep.subr.mxu0 %v12367_v30  ;;  %v12426_v29 = vld [vmem:[#allocation98_spill] sm:$0xff]  ;;  %v12427_v30 = vld [vmem:[#allocation76_spill] sm:$0xff] }
 0x667   :  { %3011 = vmatprep.subr.mxu1 %v12368_v62  ;;  %3108 = vmatpush1.msra.mxu0 %v12369_v28  ;;  %v12428_v62 = vld [vmem:[#allocation78_spill] sm:$0xff]  ;;  %v12429_v28 = vld [vmem:[#allocation99_spill] sm:$0xff] }
 0x668   :  { %3012 = vmatpush1.msra.mxu1 %v12370_v53  ;;  %3109 = vmatprep.subr.mxu0 %v12371_v26  ;;  %v12430_v53 = vld [vmem:[#allocation80_spill] sm:$0xff]  ;;  %v12431_v26 = vld [vmem:[#allocation82_spill] sm:$0xff] }
 0x669   :  { %3013 = vmatprep.subr.mxu1 %v12372_v41  ;;  %3110 = vmatpush1.msra.mxu0 %v12373_v8  ;;  %v12432_v41 = vld [vmem:[#allocation100_spill] sm:$0xff] }
 0x66a   :  { %3014 = vmatpush1.msra.mxu1 %v12374_v43  ;;  %3111 = vmatprep.subr.mxu0 %v12375_v46  ;;  %v12433_v8 = vld [vmem:[#allocation84_spill] sm:$0xff]  ;;  %v12434_v43 = vld [vmem:[#allocation86_spill] sm:$0xff]  ;;  %v12435_v46 = vld [vmem:[#allocation101_spill] sm:$0xff] }
 0x66b   :  { %3015 = vmatprep.subr.mxu1 %v12376_v31  ;;  %3112 = vmatpush1.msra.mxu0 %v12377_v14  ;;  %v12436_v31 = vld [vmem:[#allocation102_spill] sm:$0xff]  ;;  %v12437_v14 = vld [vmem:[#allocation103_spill] sm:$0xff] }
 0x66c   :  { %3016 = vmatpush1.msra.mxu1 %v12378_v9  ;;  %3113 = vmatprep.subr.mxu0 %v12379_v5  ;;  %v12438_v9 = vld [vmem:[#allocation104_spill] sm:$0xff] }
 0x66d   :  { %3017 = vmatprep.subr.mxu1 %v12380_v2  ;;  %3114 = vmatpush1.msra.mxu0 %v12381_v56  ;;  %v9981_v5 = vld [vmem:[%s11284_s2 + $0x1e8] sm:$0xff]  ;;  %v12439_v2 = vld [vmem:[#allocation105_spill] sm:$0xff]  ;;  %v12441_v56 = vld [vmem:[#allocation107_spill] sm:$0xff] }
 0x66e   :  { %3018 = vmatpush1.msra.mxu1 %v12382_v33  ;;  %3115 = vmatprep.subr.mxu0 %v12383_v35  ;;  %v12442_v33 = vld [vmem:[#allocation108_spill] sm:$0xff]  ;;  %v12443_v35 = vld [vmem:[#allocation109_spill] sm:$0xff] }
 0x66f   :  { %3019 = vmatprep.subr.mxu1 %v12384_v50  ;;  %3116 = vmatpush1.msra.mxu0 %v12385_v11  ;;  %v12444_v50 = vld [vmem:[#allocation110_spill] sm:$0xff]  ;;  %v12445_v11 = vld [vmem:[#allocation111_spill] sm:$0xff] }
 0x670   :  { %3020 = vmatpush1.msra.mxu1 %v12386_v49  ;;  %3117 = vmatprep.subr.mxu0 %v12387_v55  ;;  %v12446_v49 = vld [vmem:[#allocation112_spill] sm:$0xff]  ;;  %v12447_v55 = vld [vmem:[#allocation113_spill] sm:$0xff] }
 0x671   :  { %3021 = vmatprep.subr.mxu1 %v12388_v36  ;;  %3055 = vmatprep.mubr.f32.mxu1 %v11841_v59  ;;  %v12448_v36 = vld [vmem:[#allocation114_spill] sm:$0xff] }
 0x672   :  { %3022 = vmatpush1.msra.mxu1 %v12389_v47  ;;  %3118 = vmatpush1.msra.mxu0 %v12390_v12  ;;  %v12449_v47 = vld [vmem:[#allocation115_spill] sm:$0xff]  ;;  %v12450_v12 = vld [vmem:[#allocation116_spill] sm:$0xff] }
 0x673   :  { %3151 = vmatprep.mubr.f32.mxu0 %v11841_v59  ;;  %3056 = vmatmul.mubr.f32.vlgmr.msra.gmra.mxu1 %v9799_v6  ;;  %v12397_v6 = vld [vmem:[#allocation36_spill] sm:$0xff] }
 0x674   :  { %3152 = vmatmul.mubr.f32.vlgmr.msra.gmra.mxu0 %v9837_v10  ;;  %3158 = vmatprep.subr.mxu1 %v12391_v20  ;;  %v12451_v20 = vld [vmem:[#allocation117_spill] sm:$0xff] }
 0x675   :  { %3159 = vmatpush1.msra.mxu1 %v12392_v24  ;;  %3222 = vmatprep.mubr.f32.mxu1 %v11841_v59  ;;  %v12452_v24 = vld [vmem:[#allocation118_spill] sm:$0xff] }
 0x676   :  { %3160 = vmatprep.subr.mxu1 %v12393_v44  ;;  %5244 = vmatprep.subr.mxu0 %v11841_v59  ;;  %v12453_v44 = vld [vmem:[#allocation120_spill] sm:$0xff] }
 0x677   :  { %3161 = vmatpush1.msra.mxu1 %v12394_v13  ;;  %5245 = vmatpush3.msra.mxu0 %v12395_v32  ;;  %v12454_v13 = vld [vmem:[#allocation121_spill] sm:$0xff]  ;;  %v10020_v32 = vld [vmem:[%s11284_s2 + $0x1f8] sm:$0xff] }
 0x678   :  { %3162 = vmatprep.subr.mxu1 %v12396_v40  ;;  %5246 = vmatprep.subr.mxu0 %v11841_v59  ;;  %v2772_v40 = vld [vmem:[#allocation2 + $0x8] sm:$0x3] }
 0x679   :  { %3163 = vmatpush1.msra.mxu1 %v12397_v6  ;;  %5247 = vmatpush3.msra.mxu0 %v12398_v42 }
 0x67a   :  { %3164 = vmatprep.subr.mxu1 %v12399_v45  ;;  %5248 = vmatprep.subr.mxu0 %v11841_v59 }
 0x67b   :  { %3165 = vmatpush1.msra.mxu1 %v12400_v48  ;;  %5249 = vmatpush3.msra.mxu0 %v12401_v52  ;;  %v2845_v48 = vld [vmem:[#allocation2 + $0x6] sm:$0x3] }
 0x67c   :  { %3166 = vmatprep.subr.mxu1 %v12402_v54  ;;  %5250 = vmatprep.subr.mxu0 %v11841_v59 }
 0x67d   :  { %3167 = vmatpush1.msra.mxu1 %v12403_v58  ;;  %5251 = vmatpush3.msra.mxu0 %v12404_v61 }
 0x67e   :  { %3168 = vmatprep.subr.mxu1 %v12405_v63  ;;  %5252 = vmatprep.subr.mxu0 %v11841_v59 }
 0x67f   :  { %3169 = vmatpush1.msra.mxu1 %v12406_v18  ;;  %5253 = vmatpush3.msra.mxu0 %v12407_v21 }
 0x680   :  { %3170 = vmatprep.subr.mxu1 %v12408_v0  ;;  %5254 = vmatprep.subr.mxu0 %v11841_v59 }
 0x681   :  { %3171 = vmatpush1.msra.mxu1 %v12409_v16  ;;  %5255 = vmatpush3.msra.mxu0 %v12410_v17  ;;  %v12455_v17 = vld [vmem:[#allocation119_spill] sm:$0xff] }
 0x682   :  { %3172 = vmatprep.subr.mxu1 %v12411_v37  ;;  %5256 = vmatprep.subr.mxu0 %v11841_v59 }
 0x683   :  { %3173 = vmatpush1.msra.mxu1 %v12412_v39  ;;  %5257 = vmatpush3.msra.mxu0 %v12413_v51  ;;  %v4599_v51 = vld [vmem:[%s11282_s0 + $0x28] sm:$0xff] }
 0x684   :  { %3174 = vmatprep.subr.mxu1 %v12414_v15  ;;  %5258 = vmatprep.subr.mxu0 %v11841_v59 }
 0x685   :  { %3175 = vmatpush1.msra.mxu1 %v12415_v57  ;;  %5259 = vmatpush3.msra.mxu0 %v12416_v27 }
 0x686   :  { %3176 = vmatprep.subr.mxu1 %v12417_v23  ;;  %5260 = vmatprep.subr.mxu0 %v11841_v59 }
 0x687   :  { %3177 = vmatpush1.msra.mxu1 %v12418_v25  ;;  %5261 = vmatpush3.msra.mxu0 %v12419_v7 }
 0x688   :  { %3178 = vmatprep.subr.mxu1 %v12420_v1  ;;  %5262 = vmatprep.subr.mxu0 %v11841_v59 }
 0x689   :  { %3179 = vmatpush1.msra.mxu1 %v12421_v4  ;;  %5263 = vmatpush3.msra.mxu0 %v12422_v19 }
 0x68a   :  { %3180 = vmatprep.subr.mxu1 %v12423_v22  ;;  %5264 = vmatprep.subr.mxu0 %v11841_v59 }
 0x68b   :  { %3181 = vmatpush1.msra.mxu1 %v12424_v38  ;;  %5265 = vmatpush3.msra.mxu0 %v12425_v60 }
 0x68c   :  { %3182 = vmatprep.subr.mxu1 %v12426_v29  ;;  %5266 = vmatprep.subr.mxu0 %v11841_v59 }
 0x68d   :  { %3183 = vmatpush1.msra.mxu1 %v12427_v30  ;;  %5267 = vmatpush3.msra.mxu0 %v12428_v62 }
 0x68e   :  { %3184 = vmatprep.subr.mxu1 %v12429_v28  ;;  %5268 = vmatprep.subr.mxu0 %v11841_v59 }
 0x68f   :  { %3185 = vmatpush1.msra.mxu1 %v12430_v53  ;;  %5269 = vmatpush3.msra.mxu0 %v12431_v26 }
 0x690   :  { %3186 = vmatprep.subr.mxu1 %v12432_v41  ;;  %5270 = vmatprep.subr.mxu0 %v11841_v59 }
 0x691   :  { %3187 = vmatpush1.msra.mxu1 %v12433_v8  ;;  %5271 = vmatpush3.msra.mxu0 %v12434_v43  ;;  %v4600_v43 = vld [vmem:[%s11283_s1 + $0x10] sm:$0xff] }
 0x692   :  { %3188 = vmatprep.subr.mxu1 %v12435_v46  ;;  %5272 = vmatprep.subr.mxu0 %v11841_v59 }
 0x693   :  { %3189 = vmatpush1.msra.mxu1 %v12436_v31  ;;  %5273 = vmatpush3.msra.mxu0 %v12437_v14 }
 0x694   :  { %3223 = vmatmul.mubr.f32.vlgmr.msra.gmra.mxu1 %v9837_v10  ;;  %5274 = vmatprep.subr.mxu0 %v11841_v59  ;;  %v12440_v10 = vld [vmem:[#allocation106_spill] sm:$0xff] }
 0x695   :  { %5275 = vmatpush3.msra.mxu0 %v12438_v9  ;;  %5276 = vmatprep.mubr.msk.f32.mxu0 %vm6219_vm0, %v11841_v59 }
 0x696   :  { %5279 = vmatprep.subr.mxu1 %v11841_v59  ;;  %3462 = vmatprep.subr.mxu0 %v9981_v5 }
 0x697   :  { %5280 = vmatpush3.msra.mxu1 %v12439_v2  ;;  %5311 = vmatprep.mubr.msk.f32.mxu1 %vm6219_vm0, %v11841_v59 }
 0x698   :  { %5281 = vmatprep.subr.mxu1 %v11841_v59 }
 0x699   :  { %5282 = vmatpush3.msra.mxu1 %v12440_v10 }
 0x69a   :  { %5283 = vmatprep.subr.mxu1 %v11841_v59 }
 0x69b   :  { %5284 = vmatpush3.msra.mxu1 %v12441_v56 }
 0x69c   :  { %5285 = vmatprep.subr.mxu1 %v11841_v59 }
 0x69d   :  { %5286 = vmatpush3.msra.mxu1 %v12442_v33 }
 0x69e   :  { %5287 = vmatprep.subr.mxu1 %v11841_v59 }
 0x69f   :  { %5288 = vmatpush3.msra.mxu1 %v12443_v35 }
 0x6a0   :  { %5289 = vmatprep.subr.mxu1 %v11841_v59 }
 0x6a1   :  { %5290 = vmatpush3.msra.mxu1 %v12444_v50 }
 0x6a2   :  { %5291 = vmatprep.subr.mxu1 %v11841_v59 }
 0x6a3   :  { %5292 = vmatpush3.msra.mxu1 %v12445_v11 }
 0x6a4   :  { %5293 = vmatprep.subr.mxu1 %v11841_v59 }
 0x6a5   :  { %5294 = vmatpush3.msra.mxu1 %v12446_v49 }
 0x6a6   :  { %5295 = vmatprep.subr.mxu1 %v11841_v59 }
 0x6a7   :  { %5296 = vmatpush3.msra.mxu1 %v12447_v55 }
 0x6a8   :  { %5297 = vmatprep.subr.mxu1 %v11841_v59 }
 0x6a9   :  { %5298 = vmatpush3.msra.mxu1 %v12448_v36 }
 0x6aa   :  { %5299 = vmatprep.subr.mxu1 %v11841_v59 }
 0x6ab   :  { %5300 = vmatpush3.msra.mxu1 %v12449_v47 }
 0x6ac   :  { %5301 = vmatprep.subr.mxu1 %v11841_v59 }
 0x6ad   :  { %5302 = vmatpush3.msra.mxu1 %v12450_v12 }
 0x6ae   :  { %5303 = vmatprep.subr.mxu1 %v11841_v59 }
 0x6af   :  { %5304 = vmatpush3.msra.mxu1 %v12451_v20 }
 0x6b0   :  { %5305 = vmatprep.subr.mxu1 %v11841_v59 }
 0x6b1   :  { %5306 = vmatpush3.msra.mxu1 %v12452_v24 }
 0x6b2   :  { %5307 = vmatprep.subr.mxu1 %v11841_v59 }
 0x6b3   :  { %5308 = vmatpush3.msra.mxu1 %v12453_v44 }
 0x6b4   :  { %5309 = vmatprep.subr.mxu1 %v11841_v59 }
 0x6b5   :  { %5310 = vmatpush3.msra.mxu1 %v12454_v13 }
 0x6b6   :  { %3533 = vmatprep.subr.mxu1 %v10020_v32 }
 0x6f2   :  { %v2839_v6 = vpop.f32.mrf.mxu0 }
 0x6f3   :  { %v2843_v42 = vadd.f32 %v2839_v6, %v2772_v40 }
 0x6f4   :  { %v5208_v45 = vpop.f32.mrf.mxu0 }
 0x6f5   :  { %2844 = vst [vmem:[#allocation2 + $0x8] sm:$0x3] %v2843_v42  ;;  %v10043_v42 = vld [vmem:[%s11284_s2 + $0x1e0] sm:$0xff]  ;;  %v10050_v45 = vld [vmem:[%s11284_s2 + $0x1c8] sm:$0xff] }
 0x712   :  { %v2986_v61 = vpop.f32.mrf.mxu0 }
 0x713   :  { %v2912_v52 = vpop.f32.mrf.mxu1 }
 0x714   :  { %v2916_v54 = vadd.f32 %v2912_v52, %v2845_v48  ;;  %v2988_v63 = vpop.f32.mrf.mxu0  ;;  %v10056_v48 = vld [vmem:[%s11284_s2 + $0x1c0] sm:$0xff]  ;;  %v10062_v52 = vld [vmem:[%s11284_s2 + $0x1a8] sm:$0xff] }
 0x715   :  { %v5243_v58 = vpop.f32.mrf.mxu1  ;;  %v3066_v21 = vcombine.low %v2986_v61, %v2988_v63  ;;  %v10080_v61 = vld [vmem:[%s11284_s2 + $0x180] sm:$0xff] }
 0x716   :  { %2917 = vst [vmem:[#allocation2 + $0x6] sm:$0x3] %v2916_v54  ;;  %v10068_v54 = vld [vmem:[%s11284_s2 + $0x1a0] sm:$0xff]  ;;  %v10074_v58 = vld [vmem:[%s11284_s2 + $0x188] sm:$0xff] }
 0x717   :  { %v3074_v37 = vrot.slane %v3066_v21, %v12455_v17 }
 0x733   :  { %v3057_v18 = vpop.f32.mrf.mxu1 }
 0x734   :  { %v3153_v22 = vpop.f32.mrf.mxu0 }
 0x735   :  { %v3059_v0 = vpop.f32.mrf.mxu1 }
 0x736   :  { %v3067_v16 = vcombine.low %v3057_v18, %v3059_v0  ;;  %v3155_v30 = vpop.f32.mrf.mxu0  ;;  %v10086_v18 = vld [vmem:[%s11284_s2 + $0x168] sm:$0xff]  ;;  %v10092_v0 = vld [vmem:[%s11284_s2 + $0x160] sm:$0xff] }
 0x737   :  { %v3233_v28 = vcombine.low %v3153_v22, %v3155_v30  ;;  %v10150_v22 = vld [vmem:[%s11284_s2 + $0xc8] sm:$0xff] }
 0x738   :  { %v3081_v39 = vrot.slane %v3067_v16, %v12455_v17  ;;  %v10174_v30 = vld [vmem:[%s11284_s2 + $0x88] sm:$0xff] }
 0x739   :  { %v3241_v41 = vrot.slane %v3233_v28, %v12455_v17  ;;  %v10186_v28 = vld [vmem:[%s11284_s2 + $0x68] sm:$0xff] }
 0x73a   :  { %v3082_v15 = vcombine.low %v3074_v37, %v3081_v39  ;;  %v10098_v37 = vld [vmem:[%s11284_s2 + $0x148] sm:$0xff] }
 0x73c   :  { %v3084_v57 = vadd.f32 %v4599_v51, %v3082_v15  ;;  %v10104_v15 = vld [vmem:[%s11284_s2 + $0x140] sm:$0xff] }
 0x73e   :  { %v4601_v27 = vmul.f32 -1.442695, %v3084_v57  ;;  %v3259_v23 = vrot.slane %v3084_v57, 2  ;;  %v3270_v7 = vrot.slane %v3084_v57, 6  ;;  %v3267_v19 = vrot.slane %v3084_v57, 4  ;;  %v10110_v57 = vld [vmem:[%s11284_s2 + $0x128] sm:$0xff] }
 0x740   :  { %5620 = vpow2.f32 %v4601_v27  ;;  %v4602_v25 = vmul.f32 -1.442695, %v3259_v23  ;;  %v4603_v1 = vmul.f32 -1.442695, %v3270_v7  ;;  %v10123_v7 = vld [vmem:[%s11284_s2 + $0x108] sm:$0xff] }
 0x742   :  { %5622 = vpow2.f32 %v4602_v25  ;;  %v10117_v25 = vld [vmem:[%s11284_s2 + $0x120] sm:$0xff] }
 0x743   :  { %5624 = vpow2.f32 %v4603_v1 }
 0x74d   :  { %v5621_v4 = vpop.eup %5620 }
 0x74e   :  { %v3255_v38 = vadd.f32 1.0, %v5621_v4  ;;  %v10137_v4 = vld [vmem:[%s11284_s2 + $0xe8] sm:$0xff] }
 0x74f   :  { %v5623_v60 = vpop.eup %5622 }
 0x750   :  { %5626 = vrcp.f32 %v3255_v38  ;;  %v3264_v29 = vadd.f32 1.0, %v5623_v60  ;;  %v5625_v31 = vpop.eup %5624  ;;  %v10156_v38 = vld [vmem:[%s11284_s2 + $0xc0] sm:$0xff]  ;;  %v10162_v60 = vld [vmem:[%s11284_s2 + $0xa8] sm:$0xff] }
 0x751   :  { %5628 = vtanh.f32 %v3267_v19  ;;  %v3275_v35 = vadd.f32 1.0, %v5625_v31  ;;  %v10144_v19 = vld [vmem:[%s11284_s2 + $0xe0] sm:$0xff] }
 0x752   :  { %5630 = vrcp.f32 %v3264_v29  ;;  %v10168_v29 = vld [vmem:[%s11284_s2 + $0xa0] sm:$0xff] }
 0x753   :  { %v10216_v31 = vld [vmem:[%s11284_s2 + $0x20] sm:$0xff] }
 0x754   :  { %v3224_v62 = vpop.f32.mrf.mxu1 }
 0x756   :  { %v3226_v53 = vpop.f32.mrf.mxu1 }
 0x757   :  { %v3234_v26 = vcombine.low %v3224_v62, %v3226_v53  ;;  %v10180_v62 = vld [vmem:[%s11284_s2 + $0x80] sm:$0xff] }
 0x758   :  { %v10192_v53 = vld [vmem:[%s11284_s2 + $0x60] sm:$0xff] }
 0x759   :  { %v3248_v8 = vrot.slane %v3234_v26, %v12455_v17  ;;  %v10198_v26 = vld [vmem:[%s11284_s2 + $0x48] sm:$0xff] }
 0x75b   :  { %v3249_v46 = vcombine.low %v3241_v41, %v3248_v8  ;;  %v10204_v41 = vld [vmem:[%s11284_s2 + $0x40] sm:$0xff] }
 0x75d   :  { %v5627_v14 = vpop.eup %5626  ;;  %v3251_v9 = vadd.f32 %v4600_v43, %v3249_v46  ;;  %v10210_v43 = vld [vmem:[%s11284_s2 + $0x28] sm:$0xff] }
 0x75e   :  { %v5629_v2 = vpop.eup %5628 }
 0x75f   :  { %v5631_v10 = vpop.eup %5630  ;;  %v4604_v56 = vmul.f32 -1.442695, %v3251_v9  ;;  %v3290_v33 = vrot.slane %v3251_v9, 2  ;;  %v3279_v11 = vmul.f32 %v5629_v2, %v5627_v14  ;;  %v3301_v36 = vrot.slane %v3251_v9, 6  ;;  %v10222_v14 = vld [vmem:[%s11284_s2 + $0x8] sm:$0xff]  ;;  %v10230_v2 = vld [vmem:[%s11284_s2] sm:$0xff] }
 0x760   :  { %v3278_v50 = vmul.f32 %v5631_v10, %v9796_v3  ;;  %v3298_v20 = vrot.slane %v3251_v9, 4  ;;  %v10237_v10 = vld [vmem:[%s11285_s3 + $0x1e8] sm:$0xff] }
 0x761   :  { %5632 = vpow2.f32 %v4604_v56  ;;  %v4605_v49 = vmul.f32 -1.442695, %v3290_v33  ;;  %v4606_v47 = vmul.f32 -1.442695, %v3301_v36  ;;  %v10244_v56 = vld [vmem:[%s11285_s3 + $0x1e0] sm:$0xff]  ;;  %v10250_v33 = vld [vmem:[%s11284_s2 + $0x1f0] sm:$0xff] }
 0x762   :  { %v10034_v55 = vadd.f32 %v3279_v11, %v3278_v50  ;;  %v10262_v50 = vld [vmem:[%s11284_s2 + $0x1d8] sm:$0xff]  ;;  %v10268_v11 = vld [vmem:[%s11285_s3 + $0x1c0] sm:$0xff]  ;;  %v10280_v36 = vld [vmem:[%s11285_s3 + $0x1a8] sm:$0xff] }
 0x763   :  { %5634 = vpow2.f32 %v4605_v49  ;;  %v10274_v49 = vld [vmem:[%s11284_s2 + $0x1d0] sm:$0xff] }
 0x764   :  { %5636 = vrcp.f32 %v3275_v35  ;;  %v10256_v35 = vld [vmem:[%s11285_s3 + $0x1c8] sm:$0xff] }
 0x765   :  { %5638 = vtanh.f32 %v10034_v55 }
 0x766   :  { %5640 = vpow2.f32 %v4606_v47  ;;  %v10286_v47 = vld [vmem:[%s11284_s2 + $0x1b8] sm:$0xff] }
 0x76e   :  { %v5633_v12 = vpop.eup %5632 }
 0x76f   :  { %v3286_v24 = vadd.f32 1.0, %v5633_v12  ;;  %v10292_v12 = vld [vmem:[%s11285_s3 + $0x1a0] sm:$0xff] }
 0x770   :  { %v5635_v44 = vpop.eup %5634 }
 0x771   :  { %v5637_v13 = vpop.eup %5636  ;;  %5642 = vrcp.f32 %v3286_v24  ;;  %v3295_v40 = vadd.f32 1.0, %v5635_v44  ;;  %v10304_v24 = vld [vmem:[%s11285_s3 + $0x188] sm:$0xff]  ;;  %v10310_v44 = vld [vmem:[%s11284_s2 + $0x198] sm:$0xff] }
 0x772   :  { %v5639_v3 = vpop.eup %5638  ;;  %5644 = vtanh.f32 %v3298_v20  ;;  %v10298_v20 = vld [vmem:[%s11284_s2 + $0x1b0] sm:$0xff]  ;;  %12456 = vst [vmem:[#allocation37_spill] sm:$0xff] %v10304_v24  ;;  %12457 = vst [vmem:[#allocation5_spill] sm:$0xff] %v10310_v44 }
 0x773   :  { %5646 = vrcp.f32 %v3295_v40  ;;  %v10037_v6 = vmul.f32 %v5639_v3, %v5637_v13  ;;  %v5641_v63 = vpop.eup %5640  ;;  %v10316_v13 = vld [vmem:[%s11285_s3 + $0x180] sm:$0xff]  ;;  %v10322_v40 = vld [vmem:[%s11284_s2 + $0x190] sm:$0xff]  ;;  %v10328_v3 = vld [vmem:[%s11285_s3 + $0x168] sm:$0xff] }
 0x774   :  { %v3306_v51 = vadd.f32 1.0, %v5641_v63  ;;  %12458 = vst [vmem:[#allocation39_spill] sm:$0xff] %v10316_v13  ;;  %12459 = vst [vmem:[#allocation6_spill] sm:$0xff] %v10322_v40  ;;  %v10334_v63 = vld [vmem:[%s11284_s2 + $0x178] sm:$0xff] }
 0x775   :  { %5277 = vmatmul.mubr.f32.vlgmr.msra.gmra.mxu0 %v10037_v6  ;;  %12460 = vst [vmem:[#allocation41_spill] sm:$0xff] %v10328_v3  ;;  %12461 = vst [vmem:[#allocation7_spill] sm:$0xff] %v10334_v63 }
 0x776   :  { %3463 = vmatpush1.msra.mxu0 %v10043_v42  ;;  %3526 = vmatprep.mubr.f32.mxu0 %v11841_v59  ;;  %5648 = vrcp.f32 %v3306_v51  ;;  %v10358_v51 = vld [vmem:[%s11284_s2 + $0x158] sm:$0xff] }
 0x777   :  { %3464 = vmatprep.subr.mxu0 %v10050_v45  ;;  %12465 = vst [vmem:[#allocation9_spill] sm:$0xff] %v10358_v51 }
 0x778   :  { %3465 = vmatpush1.msra.mxu0 %v10056_v48 }
 0x779   :  { %3466 = vmatprep.subr.mxu0 %v10062_v52 }
 0x77a   :  { %3467 = vmatpush1.msra.mxu0 %v10068_v54 }
 0x77b   :  { %3468 = vmatprep.subr.mxu0 %v10074_v58 }
 0x77c   :  { %3469 = vmatpush1.msra.mxu0 %v10080_v61 }
 0x77d   :  { %3470 = vmatprep.subr.mxu0 %v10086_v18 }
 0x77e   :  { %v5643_v21 = vpop.eup %5642  ;;  %3471 = vmatpush1.msra.mxu0 %v10092_v0 }
 0x77f   :  { %v5645_v16 = vpop.eup %5644  ;;  %3472 = vmatprep.subr.mxu0 %v10098_v37 }
 0x780   :  { %v5647_v39 = vpop.eup %5646  ;;  %3473 = vmatpush1.msra.mxu0 %v10104_v15  ;;  %v3310_v23 = vmul.f32 %v5645_v16, %v5643_v21  ;;  %v10340_v21 = vld [vmem:[%s11285_s3 + $0x160] sm:$0xff]  ;;  %v10346_v16 = vld [vmem:[%s11284_s2 + $0x170] sm:$0xff] }
 0x781   :  { %3474 = vmatprep.subr.mxu0 %v10110_v57  ;;  %v3309_v27 = vmul.f32 %v5647_v39, %v9818_v34  ;;  %v10131_v34 = vld [vmem:[%s11284_s2 + $0x100] sm:$0xff]  ;;  %12462 = vst [vmem:[#allocation43_spill] sm:$0xff] %v10340_v21  ;;  %12463 = vst [vmem:[#allocation8_spill] sm:$0xff] %v10346_v16  ;;  %v10352_v39 = vld [vmem:[%s11285_s3 + $0x148] sm:$0xff] }
 0x782   :  { %3475 = vmatpush1.msra.mxu0 %v10117_v25  ;;  %12464 = vst [vmem:[#allocation45_spill] sm:$0xff] %v10352_v39 }
 0x783   :  { %3476 = vmatprep.subr.mxu0 %v10123_v7  ;;  %v10126_v1 = vadd.f32 %v3310_v23, %v3309_v27  ;;  %v5649_v8 = vpop.eup %5648  ;;  %v10364_v27 = vld [vmem:[%s11285_s3 + $0x140] sm:$0xff]  ;;  %v10370_v23 = vld [vmem:[%s11284_s2 + $0x150] sm:$0xff] }
 0x784   :  { %3477 = vmatpush1.msra.mxu0 %v10131_v34  ;;  %12466 = vst [vmem:[#allocation47_spill] sm:$0xff] %v10364_v27  ;;  %12467 = vst [vmem:[#allocation10_spill] sm:$0xff] %v10370_v23 }
 0x785   :  { %3478 = vmatprep.subr.mxu0 %v10137_v4  ;;  %5650 = vtanh.f32 %v10126_v1 }
 0x786   :  { %3479 = vmatpush1.msra.mxu0 %v10144_v19 }
 0x787   :  { %3480 = vmatprep.subr.mxu0 %v10150_v22 }
 0x788   :  { %3481 = vmatpush1.msra.mxu0 %v10156_v38 }
 0x789   :  { %3482 = vmatprep.subr.mxu0 %v10162_v60 }
 0x78a   :  { %3483 = vmatpush1.msra.mxu0 %v10168_v29 }
 0x78b   :  { %3484 = vmatprep.subr.mxu0 %v10174_v30 }
 0x78c   :  { %3485 = vmatpush1.msra.mxu0 %v10180_v62 }
 0x78d   :  { %3486 = vmatprep.subr.mxu0 %v10186_v28 }
 0x78e   :  { %3487 = vmatpush1.msra.mxu0 %v10192_v53 }
 0x78f   :  { %3488 = vmatprep.subr.mxu0 %v10198_v26 }
 0x790   :  { %3489 = vmatpush1.msra.mxu0 %v10204_v41 }
 0x791   :  { %3490 = vmatprep.subr.mxu0 %v10210_v43 }
 0x792   :  { %v5651_v46 = vpop.eup %5650  ;;  %3491 = vmatpush1.msra.mxu0 %v10216_v31 }
 0x793   :  { %3492 = vmatprep.subr.mxu0 %v10222_v14  ;;  %v10225_v9 = vmul.f32 %v5651_v46, %v5649_v8  ;;  %v10376_v8 = vld [vmem:[%s11285_s3 + $0x128] sm:$0xff]  ;;  %v10382_v46 = vld [vmem:[%s11284_s2 + $0x138] sm:$0xff] }
 0x794   :  { %3493 = vmatpush1.msra.mxu0 %v10230_v2  ;;  %12468 = vst [vmem:[#allocation49_spill] sm:$0xff] %v10376_v8  ;;  %12469 = vst [vmem:[#allocation11_spill] sm:$0xff] %v10382_v46 }
 0x795   :  { %3527 = vmatmul.mubr.f32.vlgmr.msra.gmra.mxu0 %v10037_v6  ;;  %3629 = vmatprep.subr.mxu0 %v10237_v10 }
 0x796   :  { %5312 = vmatmul.mubr.f32.vlgmr.msra.gmra.mxu1 %v10225_v9  ;;  %3630 = vmatpush1.msra.mxu0 %v10244_v56 }
 0x797   :  { %3534 = vmatpush1.msra.mxu1 %v10250_v33  ;;  %3631 = vmatprep.subr.mxu0 %v10256_v35 }
 0x798   :  { %3535 = vmatprep.subr.mxu1 %v10262_v50  ;;  %3632 = vmatpush1.msra.mxu0 %v10268_v11 }
 0x799   :  { %3536 = vmatpush1.msra.mxu1 %v10274_v49  ;;  %3633 = vmatprep.subr.mxu0 %v10280_v36 }
 0x79a   :  { %3537 = vmatprep.subr.mxu1 %v10286_v47  ;;  %3634 = vmatpush1.msra.mxu0 %v10292_v12 }
 0x79b   :  { %3538 = vmatpush1.msra.mxu1 %v10298_v20  ;;  %3635 = vmatprep.subr.mxu0 %v10304_v24 }
 0x79c   :  { %3539 = vmatprep.subr.mxu1 %v10310_v44  ;;  %3636 = vmatpush1.msra.mxu0 %v10316_v13 }
 0x79d   :  { %3540 = vmatpush1.msra.mxu1 %v10322_v40  ;;  %3637 = vmatprep.subr.mxu0 %v10328_v3 }
 0x79e   :  { %3541 = vmatprep.subr.mxu1 %v10334_v63  ;;  %3638 = vmatpush1.msra.mxu0 %v10340_v21 }
 0x79f   :  { %3542 = vmatpush1.msra.mxu1 %v10346_v16  ;;  %3639 = vmatprep.subr.mxu0 %v10352_v39 }
 0x7a0   :  { %3543 = vmatprep.subr.mxu1 %v10358_v51  ;;  %3640 = vmatpush1.msra.mxu0 %v10364_v27  ;;  %v10388_v27 = vld [vmem:[%s11285_s3 + $0x120] sm:$0xff] }
 0x7a1   :  { %3544 = vmatpush1.msra.mxu1 %v10370_v23  ;;  %3641 = vmatprep.subr.mxu0 %v10376_v8  ;;  %12470 = vst [vmem:[#allocation51_spill] sm:$0xff] %v10388_v27  ;;  %v10394_v23 = vld [vmem:[%s11284_s2 + $0x130] sm:$0xff]  ;;  %v10400_v8 = vld [vmem:[%s11285_s3 + $0x108] sm:$0xff] }
 0x7a2   :  { %3545 = vmatprep.subr.mxu1 %v10382_v46  ;;  %3642 = vmatpush1.msra.mxu0 %v10388_v27  ;;  %12471 = vst [vmem:[#allocation12_spill] sm:$0xff] %v10394_v23  ;;  %12472 = vst [vmem:[#allocation53_spill] sm:$0xff] %v10400_v8  ;;  %v10406_v46 = vld [vmem:[%s11284_s2 + $0x118] sm:$0xff]  ;;  %v10412_v27 = vld [vmem:[%s11285_s3 + $0x100] sm:$0xff] }
 0x7a3   :  { %3546 = vmatpush1.msra.mxu1 %v10394_v23  ;;  %3643 = vmatprep.subr.mxu0 %v10400_v8  ;;  %12473 = vst [vmem:[#allocation13_spill] sm:$0xff] %v10406_v46  ;;  %12474 = vst [vmem:[#allocation55_spill] sm:$0xff] %v10412_v27  ;;  %v10418_v23 = vld [vmem:[%s11284_s2 + $0x110] sm:$0xff]  ;;  %v10424_v8 = vld [vmem:[%s11285_s3 + $0xe8] sm:$0xff] }
 0x7a4   :  { %3547 = vmatprep.subr.mxu1 %v10406_v46  ;;  %3644 = vmatpush1.msra.mxu0 %v10412_v27  ;;  %12475 = vst [vmem:[#allocation14_spill] sm:$0xff] %v10418_v23  ;;  %12476 = vst [vmem:[#allocation57_spill] sm:$0xff] %v10424_v8  ;;  %v10430_v46 = vld [vmem:[%s11284_s2 + $0xf8] sm:$0xff]  ;;  %v10436_v27 = vld [vmem:[%s11285_s3 + $0xe0] sm:$0xff] }
 0x7a5   :  { %3548 = vmatpush1.msra.mxu1 %v10418_v23  ;;  %3645 = vmatprep.subr.mxu0 %v10424_v8  ;;  %12477 = vst [vmem:[#allocation15_spill] sm:$0xff] %v10430_v46  ;;  %12478 = vst [vmem:[#allocation59_spill] sm:$0xff] %v10436_v27  ;;  %v10442_v23 = vld [vmem:[%s11284_s2 + $0xf0] sm:$0xff]  ;;  %v10448_v8 = vld [vmem:[%s11285_s3 + $0xc8] sm:$0xff] }
 0x7a6   :  { %3549 = vmatprep.subr.mxu1 %v10430_v46  ;;  %3646 = vmatpush1.msra.mxu0 %v10436_v27  ;;  %12479 = vst [vmem:[#allocation16_spill] sm:$0xff] %v10442_v23  ;;  %12480 = vst [vmem:[#allocation61_spill] sm:$0xff] %v10448_v8  ;;  %v10454_v46 = vld [vmem:[%s11284_s2 + $0xd8] sm:$0xff]  ;;  %v10460_v27 = vld [vmem:[%s11285_s3 + $0xc0] sm:$0xff] }
 0x7a7   :  { %3550 = vmatpush1.msra.mxu1 %v10442_v23  ;;  %3647 = vmatprep.subr.mxu0 %v10448_v8  ;;  %12481 = vst [vmem:[#allocation17_spill] sm:$0xff] %v10454_v46  ;;  %12482 = vst [vmem:[#allocation63_spill] sm:$0xff] %v10460_v27  ;;  %v10466_v23 = vld [vmem:[%s11284_s2 + $0xd0] sm:$0xff]  ;;  %v10472_v8 = vld [vmem:[%s11285_s3 + $0xa8] sm:$0xff] }
 0x7a8   :  { %3551 = vmatprep.subr.mxu1 %v10454_v46  ;;  %3648 = vmatpush1.msra.mxu0 %v10460_v27  ;;  %12483 = vst [vmem:[#allocation18_spill] sm:$0xff] %v10466_v23  ;;  %12484 = vst [vmem:[#allocation65_spill] sm:$0xff] %v10472_v8  ;;  %v10478_v46 = vld [vmem:[%s11284_s2 + $0xb8] sm:$0xff]  ;;  %v10484_v27 = vld [vmem:[%s11285_s3 + $0xa0] sm:$0xff] }
 0x7a9   :  { %3552 = vmatpush1.msra.mxu1 %v10466_v23  ;;  %3649 = vmatprep.subr.mxu0 %v10472_v8  ;;  %12485 = vst [vmem:[#allocation19_spill] sm:$0xff] %v10478_v46  ;;  %12486 = vst [vmem:[#allocation67_spill] sm:$0xff] %v10484_v27  ;;  %v10490_v23 = vld [vmem:[%s11284_s2 + $0xb0] sm:$0xff]  ;;  %v10496_v8 = vld [vmem:[%s11285_s3 + $0x88] sm:$0xff] }
 0x7aa   :  { %3553 = vmatprep.subr.mxu1 %v10478_v46  ;;  %3650 = vmatpush1.msra.mxu0 %v10484_v27  ;;  %12487 = vst [vmem:[#allocation20_spill] sm:$0xff] %v10490_v23  ;;  %12488 = vst [vmem:[#allocation69_spill] sm:$0xff] %v10496_v8  ;;  %v10502_v46 = vld [vmem:[%s11284_s2 + $0x98] sm:$0xff]  ;;  %v10508_v27 = vld [vmem:[%s11285_s3 + $0x80] sm:$0xff] }
 0x7ab   :  { %3554 = vmatpush1.msra.mxu1 %v10490_v23  ;;  %3651 = vmatprep.subr.mxu0 %v10496_v8  ;;  %12489 = vst [vmem:[#allocation21_spill] sm:$0xff] %v10502_v46  ;;  %12490 = vst [vmem:[#allocation71_spill] sm:$0xff] %v10508_v27  ;;  %v10514_v23 = vld [vmem:[%s11284_s2 + $0x90] sm:$0xff]  ;;  %v10520_v8 = vld [vmem:[%s11285_s3 + $0x68] sm:$0xff] }
 0x7ac   :  { %3555 = vmatprep.subr.mxu1 %v10502_v46  ;;  %3652 = vmatpush1.msra.mxu0 %v10508_v27  ;;  %12491 = vst [vmem:[#allocation22_spill] sm:$0xff] %v10514_v23  ;;  %12492 = vst [vmem:[#allocation73_spill] sm:$0xff] %v10520_v8  ;;  %v10526_v46 = vld [vmem:[%s11284_s2 + $0x78] sm:$0xff]  ;;  %v10532_v27 = vld [vmem:[%s11285_s3 + $0x60] sm:$0xff] }
 0x7ad   :  { %3556 = vmatpush1.msra.mxu1 %v10514_v23  ;;  %3653 = vmatprep.subr.mxu0 %v10520_v8  ;;  %12493 = vst [vmem:[#allocation23_spill] sm:$0xff] %v10526_v46  ;;  %12494 = vst [vmem:[#allocation75_spill] sm:$0xff] %v10532_v27  ;;  %v10538_v23 = vld [vmem:[%s11284_s2 + $0x70] sm:$0xff]  ;;  %v10544_v8 = vld [vmem:[%s11285_s3 + $0x48] sm:$0xff] }
 0x7ae   :  { %3557 = vmatprep.subr.mxu1 %v10526_v46  ;;  %3654 = vmatpush1.msra.mxu0 %v10532_v27  ;;  %12495 = vst [vmem:[#allocation24_spill] sm:$0xff] %v10538_v23  ;;  %12496 = vst [vmem:[#allocation77_spill] sm:$0xff] %v10544_v8  ;;  %v10550_v46 = vld [vmem:[%s11284_s2 + $0x58] sm:$0xff]  ;;  %v10556_v27 = vld [vmem:[%s11285_s3 + $0x40] sm:$0xff] }
 0x7af   :  { %3558 = vmatpush1.msra.mxu1 %v10538_v23  ;;  %3655 = vmatprep.subr.mxu0 %v10544_v8  ;;  %12497 = vst [vmem:[#allocation25_spill] sm:$0xff] %v10550_v46  ;;  %12498 = vst [vmem:[#allocation79_spill] sm:$0xff] %v10556_v27  ;;  %v10562_v23 = vld [vmem:[%s11284_s2 + $0x50] sm:$0xff]  ;;  %v10568_v8 = vld [vmem:[%s11285_s3 + $0x28] sm:$0xff] }
 0x7b0   :  { %3559 = vmatprep.subr.mxu1 %v10550_v46  ;;  %3656 = vmatpush1.msra.mxu0 %v10556_v27  ;;  %12499 = vst [vmem:[#allocation26_spill] sm:$0xff] %v10562_v23  ;;  %12500 = vst [vmem:[#allocation81_spill] sm:$0xff] %v10568_v8  ;;  %v10574_v46 = vld [vmem:[%s11284_s2 + $0x38] sm:$0xff]  ;;  %v10580_v27 = vld [vmem:[%s11285_s3 + $0x20] sm:$0xff] }
 0x7b1   :  { %3560 = vmatpush1.msra.mxu1 %v10562_v23  ;;  %3657 = vmatprep.subr.mxu0 %v10568_v8  ;;  %12501 = vst [vmem:[#allocation27_spill] sm:$0xff] %v10574_v46  ;;  %12502 = vst [vmem:[#allocation83_spill] sm:$0xff] %v10580_v27  ;;  %v10586_v23 = vld [vmem:[%s11284_s2 + $0x30] sm:$0xff]  ;;  %v10592_v8 = vld [vmem:[%s11285_s3 + $0x8] sm:$0xff] }
 0x7b2   :  { %3561 = vmatprep.subr.mxu1 %v10574_v46  ;;  %3658 = vmatpush1.msra.mxu0 %v10580_v27  ;;  %12503 = vst [vmem:[#allocation28_spill] sm:$0xff] %v10586_v23  ;;  %12504 = vst [vmem:[#allocation29_spill] sm:$0xff] %v10592_v8  ;;  %v10598_v46 = vld [vmem:[%s11284_s2 + $0x18] sm:$0xff]  ;;  %v3387_v27 = vld [vmem:[#allocation2 + $0x4] sm:$0x3] }
 0x7b3   :  { %3562 = vmatpush1.msra.mxu1 %v10586_v23  ;;  %3659 = vmatprep.subr.mxu0 %v10592_v8  ;;  %12505 = vst [vmem:[#allocation85_spill] sm:$0xff] %v10598_v46  ;;  %v10605_v23 = vld [vmem:[%s11284_s2 + $0x10] sm:$0xff]  ;;  %v10611_v8 = vld [vmem:[%s11285_s3] sm:$0xff] }
 0x7b4   :  { %3563 = vmatprep.subr.mxu1 %v10598_v46  ;;  %3597 = vmatprep.mubr.f32.mxu1 %v11841_v59  ;;  %12506 = vst [vmem:[#allocation30_spill] sm:$0xff] %v10605_v23  ;;  %12507 = vst [vmem:[#allocation31_spill] sm:$0xff] %v10611_v8  ;;  %v10620_v46 = vld [vmem:[%s11285_s3 + $0x1f8] sm:$0xff] }
 0x7b5   :  { %3564 = vmatpush1.msra.mxu1 %v10605_v23  ;;  %3660 = vmatpush1.msra.mxu0 %v10611_v8  ;;  %12508 = vst [vmem:[#allocation32_spill] sm:$0xff] %v10620_v46  ;;  %v10626_v23 = vld [vmem:[%s11285_s3 + $0x1f0] sm:$0xff] }
 0x7b6   :  { %3693 = vmatprep.mubr.f32.mxu0 %v11841_v59  ;;  %3598 = vmatmul.mubr.f32.vlgmr.msra.gmra.mxu1 %v10037_v6  ;;  %12509 = vst [vmem:[#allocation33_spill] sm:$0xff] %v10626_v23  ;;  %v10633_v6 = vld [vmem:[%s11285_s3 + $0x1d8] sm:$0xff] }
 0x7b7   :  { %3694 = vmatmul.mubr.f32.vlgmr.msra.gmra.mxu0 %v10225_v9  ;;  %3700 = vmatprep.subr.mxu1 %v10620_v46  ;;  %12510 = vst [vmem:[#allocation87_spill] sm:$0xff] %v10633_v6  ;;  %v10640_v46 = vld [vmem:[%s11285_s3 + $0x1d0] sm:$0xff] }
 0x7b8   :  { %3701 = vmatpush1.msra.mxu1 %v10626_v23  ;;  %3764 = vmatprep.mubr.f32.mxu1 %v11841_v59  ;;  %12511 = vst [vmem:[#allocation34_spill] sm:$0xff] %v10640_v46  ;;  %v10646_v23 = vld [vmem:[%s11286_s4 + $0x78] sm:$0xff] }
 0x7b9   :  { %3702 = vmatprep.subr.mxu1 %v10633_v6  ;;  %5314 = vmatprep.subr.mxu0 %v11841_v59  ;;  %12512 = vst [vmem:[#allocation35_spill] sm:$0xff] %v10646_v23  ;;  %v10652_v6 = vld [vmem:[%s11285_s3 + $0x1b8] sm:$0xff] }
 0x7ba   :  { %3703 = vmatpush1.msra.mxu1 %v10640_v46  ;;  %5315 = vmatpush3.msra.mxu0 %v10646_v23  ;;  %12513 = vst [vmem:[#allocation88_spill] sm:$0xff] %v10652_v6  ;;  %v10659_v46 = vld [vmem:[%s11285_s3 + $0x1b0] sm:$0xff] }
 0x7bb   :  { %3704 = vmatprep.subr.mxu1 %v10652_v6  ;;  %5316 = vmatprep.subr.mxu0 %v11841_v59  ;;  %12514 = vst [vmem:[#allocation36_spill] sm:$0xff] %v10659_v46  ;;  %v10665_v23 = vld [vmem:[%s11286_s4 + $0x70] sm:$0xff]  ;;  %v10671_v6 = vld [vmem:[%s11285_s3 + $0x198] sm:$0xff] }
 0x7bc   :  { %3705 = vmatpush1.msra.mxu1 %v10659_v46  ;;  %12515 = vst [vmem:[#allocation38_spill] sm:$0xff] %v10665_v23  ;;  %5317 = vmatpush3.msra.mxu0 %v10665_v23  ;;  %12516 = vst [vmem:[#allocation89_spill] sm:$0xff] %v10671_v6  ;;  %v10678_v46 = vld [vmem:[%s11285_s3 + $0x190] sm:$0xff]  ;;  %v10684_v23 = vld [vmem:[%s11286_s4 + $0x68] sm:$0xff] }
 0x7bd   :  { %3706 = vmatprep.subr.mxu1 %v10671_v6  ;;  %5318 = vmatprep.subr.mxu0 %v11841_v59  ;;  %12517 = vst [vmem:[#allocation40_spill] sm:$0xff] %v10678_v46  ;;  %12518 = vst [vmem:[#allocation42_spill] sm:$0xff] %v10684_v23  ;;  %v10690_v6 = vld [vmem:[%s11285_s3 + $0x178] sm:$0xff] }
 0x7be   :  { %3707 = vmatpush1.msra.mxu1 %v10678_v46  ;;  %5319 = vmatpush3.msra.mxu0 %v10684_v23  ;;  %12519 = vst [vmem:[#allocation90_spill] sm:$0xff] %v10690_v6  ;;  %v10697_v46 = vld [vmem:[%s11285_s3 + $0x170] sm:$0xff]  ;;  %v10703_v23 = vld [vmem:[%s11286_s4 + $0x60] sm:$0xff] }
 0x7bf   :  { %3708 = vmatprep.subr.mxu1 %v10690_v6  ;;  %5320 = vmatprep.subr.mxu0 %v11841_v59  ;;  %12520 = vst [vmem:[#allocation44_spill] sm:$0xff] %v10697_v46  ;;  %12521 = vst [vmem:[#allocation46_spill] sm:$0xff] %v10703_v23  ;;  %v10709_v6 = vld [vmem:[%s11285_s3 + $0x158] sm:$0xff] }
 0x7c0   :  { %3709 = vmatpush1.msra.mxu1 %v10697_v46  ;;  %5321 = vmatpush3.msra.mxu0 %v10703_v23  ;;  %12522 = vst [vmem:[#allocation91_spill] sm:$0xff] %v10709_v6  ;;  %v10716_v46 = vld [vmem:[%s11285_s3 + $0x150] sm:$0xff]  ;;  %v10722_v23 = vld [vmem:[%s11286_s4 + $0x58] sm:$0xff] }
 0x7c1   :  { %3710 = vmatprep.subr.mxu1 %v10709_v6  ;;  %5322 = vmatprep.subr.mxu0 %v11841_v59  ;;  %12523 = vst [vmem:[#allocation48_spill] sm:$0xff] %v10716_v46  ;;  %12524 = vst [vmem:[#allocation50_spill] sm:$0xff] %v10722_v23  ;;  %v10728_v6 = vld [vmem:[%s11285_s3 + $0x138] sm:$0xff] }
 0x7c2   :  { %3711 = vmatpush1.msra.mxu1 %v10716_v46  ;;  %5323 = vmatpush3.msra.mxu0 %v10722_v23  ;;  %12525 = vst [vmem:[#allocation92_spill] sm:$0xff] %v10728_v6  ;;  %v10735_v46 = vld [vmem:[%s11285_s3 + $0x130] sm:$0xff] }
 0x7c3   :  { %3712 = vmatprep.subr.mxu1 %v10728_v6  ;;  %5324 = vmatprep.subr.mxu0 %v11841_v59  ;;  %12526 = vst [vmem:[#allocation52_spill] sm:$0xff] %v10735_v46  ;;  %v10741_v23 = vld [vmem:[%s11286_s4 + $0x50] sm:$0xff]  ;;  %v10747_v6 = vld [vmem:[%s11285_s3 + $0x118] sm:$0xff] }
 0x7c4   :  { %3713 = vmatpush1.msra.mxu1 %v10735_v46  ;;  %12527 = vst [vmem:[#allocation54_spill] sm:$0xff] %v10741_v23  ;;  %5325 = vmatpush3.msra.mxu0 %v10741_v23  ;;  %12528 = vst [vmem:[#allocation93_spill] sm:$0xff] %v10747_v6  ;;  %v10754_v46 = vld [vmem:[%s11285_s3 + $0x110] sm:$0xff]  ;;  %v10760_v23 = vld [vmem:[%s11286_s4 + $0x48] sm:$0xff] }
 0x7c5   :  { %3714 = vmatprep.subr.mxu1 %v10747_v6  ;;  %5326 = vmatprep.subr.mxu0 %v11841_v59  ;;  %12529 = vst [vmem:[#allocation56_spill] sm:$0xff] %v10754_v46  ;;  %12530 = vst [vmem:[#allocation58_spill] sm:$0xff] %v10760_v23  ;;  %v10766_v6 = vld [vmem:[%s11285_s3 + $0xf8] sm:$0xff] }
 0x7c6   :  { %3715 = vmatpush1.msra.mxu1 %v10754_v46  ;;  %5327 = vmatpush3.msra.mxu0 %v10760_v23  ;;  %12531 = vst [vmem:[#allocation94_spill] sm:$0xff] %v10766_v6  ;;  %v10773_v46 = vld [vmem:[%s11285_s3 + $0xf0] sm:$0xff]  ;;  %v10779_v23 = vld [vmem:[%s11286_s4 + $0x40] sm:$0xff] }
 0x7c7   :  { %3716 = vmatprep.subr.mxu1 %v10766_v6  ;;  %5328 = vmatprep.subr.mxu0 %v11841_v59  ;;  %12532 = vst [vmem:[#allocation60_spill] sm:$0xff] %v10773_v46  ;;  %12533 = vst [vmem:[#allocation62_spill] sm:$0xff] %v10779_v23  ;;  %v10785_v6 = vld [vmem:[%s11285_s3 + $0xd8] sm:$0xff] }
 0x7c8   :  { %3717 = vmatpush1.msra.mxu1 %v10773_v46  ;;  %5329 = vmatpush3.msra.mxu0 %v10779_v23  ;;  %12534 = vst [vmem:[#allocation95_spill] sm:$0xff] %v10785_v6  ;;  %v10792_v46 = vld [vmem:[%s11285_s3 + $0xd0] sm:$0xff]  ;;  %v10798_v23 = vld [vmem:[%s11286_s4 + $0x38] sm:$0xff] }
 0x7c9   :  { %3718 = vmatprep.subr.mxu1 %v10785_v6  ;;  %5330 = vmatprep.subr.mxu0 %v11841_v59  ;;  %12535 = vst [vmem:[#allocation64_spill] sm:$0xff] %v10792_v46  ;;  %12536 = vst [vmem:[#allocation66_spill] sm:$0xff] %v10798_v23  ;;  %v10804_v6 = vld [vmem:[%s11285_s3 + $0xb8] sm:$0xff] }
 0x7ca   :  { %3719 = vmatpush1.msra.mxu1 %v10792_v46  ;;  %5331 = vmatpush3.msra.mxu0 %v10798_v23  ;;  %12537 = vst [vmem:[#allocation96_spill] sm:$0xff] %v10804_v6  ;;  %v10811_v46 = vld [vmem:[%s11285_s3 + $0xb0] sm:$0xff] }
 0x7cb   :  { %3720 = vmatprep.subr.mxu1 %v10804_v6  ;;  %5332 = vmatprep.subr.mxu0 %v11841_v59  ;;  %12538 = vst [vmem:[#allocation68_spill] sm:$0xff] %v10811_v46  ;;  %v10817_v23 = vld [vmem:[%s11286_s4 + $0x30] sm:$0xff]  ;;  %v10823_v6 = vld [vmem:[%s11285_s3 + $0x98] sm:$0xff] }
 0x7cc   :  { %3721 = vmatpush1.msra.mxu1 %v10811_v46  ;;  %12539 = vst [vmem:[#allocation70_spill] sm:$0xff] %v10817_v23  ;;  %5333 = vmatpush3.msra.mxu0 %v10817_v23  ;;  %12540 = vst [vmem:[#allocation97_spill] sm:$0xff] %v10823_v6  ;;  %v10830_v46 = vld [vmem:[%s11285_s3 + $0x90] sm:$0xff]  ;;  %v10836_v23 = vld [vmem:[%s11286_s4 + $0x28] sm:$0xff] }
 0x7cd   :  { %3722 = vmatprep.subr.mxu1 %v10823_v6  ;;  %5334 = vmatprep.subr.mxu0 %v11841_v59  ;;  %12541 = vst [vmem:[#allocation72_spill] sm:$0xff] %v10830_v46  ;;  %12542 = vst [vmem:[#allocation74_spill] sm:$0xff] %v10836_v23  ;;  %v10842_v6 = vld [vmem:[%s11285_s3 + $0x78] sm:$0xff] }
 0x7ce   :  { %3723 = vmatpush1.msra.mxu1 %v10830_v46  ;;  %5335 = vmatpush3.msra.mxu0 %v10836_v23  ;;  %12543 = vst [vmem:[#allocation98_spill] sm:$0xff] %v10842_v6  ;;  %v10849_v46 = vld [vmem:[%s11285_s3 + $0x70] sm:$0xff]  ;;  %v10855_v23 = vld [vmem:[%s11286_s4 + $0x20] sm:$0xff] }
 0x7cf   :  { %3724 = vmatprep.subr.mxu1 %v10842_v6  ;;  %5336 = vmatprep.subr.mxu0 %v11841_v59  ;;  %12544 = vst [vmem:[#allocation76_spill] sm:$0xff] %v10849_v46  ;;  %12545 = vst [vmem:[#allocation78_spill] sm:$0xff] %v10855_v23  ;;  %v10861_v6 = vld [vmem:[%s11285_s3 + $0x58] sm:$0xff] }
 0x7d0   :  { %3725 = vmatpush1.msra.mxu1 %v10849_v46  ;;  %5337 = vmatpush3.msra.mxu0 %v10855_v23  ;;  %12546 = vst [vmem:[#allocation99_spill] sm:$0xff] %v10861_v6  ;;  %v10868_v46 = vld [vmem:[%s11285_s3 + $0x50] sm:$0xff]  ;;  %v10874_v23 = vld [vmem:[%s11286_s4 + $0x18] sm:$0xff] }
 0x7d1   :  { %3726 = vmatprep.subr.mxu1 %v10861_v6  ;;  %5338 = vmatprep.subr.mxu0 %v11841_v59  ;;  %12547 = vst [vmem:[#allocation80_spill] sm:$0xff] %v10868_v46  ;;  %12548 = vst [vmem:[#allocation82_spill] sm:$0xff] %v10874_v23  ;;  %v10880_v6 = vld [vmem:[%s11285_s3 + $0x38] sm:$0xff] }
 0x7d2   :  { %3727 = vmatpush1.msra.mxu1 %v10868_v46  ;;  %5339 = vmatpush3.msra.mxu0 %v10874_v23  ;;  %12549 = vst [vmem:[#allocation100_spill] sm:$0xff] %v10880_v6  ;;  %v10887_v46 = vld [vmem:[%s11285_s3 + $0x30] sm:$0xff] }
 0x7d3   :  { %3728 = vmatprep.subr.mxu1 %v10880_v6  ;;  %5340 = vmatprep.subr.mxu0 %v11841_v59  ;;  %12550 = vst [vmem:[#allocation84_spill] sm:$0xff] %v10887_v46  ;;  %v10893_v23 = vld [vmem:[%s11286_s4 + $0x10] sm:$0xff]  ;;  %v10899_v6 = vld [vmem:[%s11285_s3 + $0x18] sm:$0xff] }
 0x7d4   :  { %3729 = vmatpush1.msra.mxu1 %v10887_v46  ;;  %12551 = vst [vmem:[#allocation86_spill] sm:$0xff] %v10893_v23  ;;  %5341 = vmatpush3.msra.mxu0 %v10893_v23  ;;  %12552 = vst [vmem:[#allocation101_spill] sm:$0xff] %v10899_v6  ;;  %v10906_v46 = vld [vmem:[%s11285_s3 + $0x10] sm:$0xff]  ;;  %v10912_v23 = vld [vmem:[%s11286_s4 + $0x8] sm:$0xff] }
 0x7d5   :  { %3730 = vmatprep.subr.mxu1 %v10899_v6  ;;  %5342 = vmatprep.subr.mxu0 %v11841_v59  ;;  %12553 = vst [vmem:[#allocation102_spill] sm:$0xff] %v10906_v46  ;;  %12554 = vst [vmem:[#allocation103_spill] sm:$0xff] %v10912_v23  ;;  %v10920_v6 = vld [vmem:[%s11286_s4] sm:$0xff] }
 0x7d6   :  { %3731 = vmatpush1.msra.mxu1 %v10906_v46  ;;  %5343 = vmatpush3.msra.mxu0 %v10912_v23  ;;  %12555 = vst [vmem:[#allocation104_spill] sm:$0xff] %v10920_v6 }
 0x7d7   :  { %3765 = vmatmul.mubr.f32.vlgmr.msra.gmra.mxu1 %v10225_v9  ;;  %5344 = vmatprep.subr.mxu0 %v11841_v59  ;;  %v10930_v9 = vld [vmem:[%s11287_s5 + $0x78] sm:$0xff] }
 0x7d8   :  { %5345 = vmatpush3.msra.mxu0 %v10920_v6  ;;  %5346 = vmatprep.mubr.msk.f32.mxu0 %vm6219_vm0, %v11841_v59  ;;  %12556 = vst [vmem:[#allocation105_spill] sm:$0xff] %v10930_v9  ;;  %v10939_v6 = vld [vmem:[%s11287_s5 + $0x70] sm:$0xff] }
 0x7d9   :  { %5349 = vmatprep.subr.mxu1 %v11841_v59  ;;  %4004 = vmatprep.subr.mxu0 %v9981_v5  ;;  %12557 = vst [vmem:[#allocation106_spill] sm:$0xff] %v10939_v6  ;;  %v10946_v5 = vld [vmem:[%s11287_s5 + $0x68] sm:$0xff] }
 0x7da   :  { %5350 = vmatpush3.msra.mxu1 %v10930_v9  ;;  %5381 = vmatprep.mubr.msk.f32.mxu1 %vm6219_vm0, %v11841_v59  ;;  %12558 = vst [vmem:[#allocation107_spill] sm:$0xff] %v10946_v5  ;;  %v10953_v9 = vld [vmem:[%s11287_s5 + $0x60] sm:$0xff] }
 0x7db   :  { %5351 = vmatprep.subr.mxu1 %v11841_v59  ;;  %12559 = vst [vmem:[#allocation108_spill] sm:$0xff] %v10953_v9 }
 0x7dc   :  { %5352 = vmatpush3.msra.mxu1 %v10939_v6  ;;  %v10960_v6 = vld [vmem:[%s11287_s5 + $0x58] sm:$0xff] }
 0x7dd   :  { %5353 = vmatprep.subr.mxu1 %v11841_v59  ;;  %12560 = vst [vmem:[#allocation109_spill] sm:$0xff] %v10960_v6 }
 0x7de   :  { %5354 = vmatpush3.msra.mxu1 %v10946_v5  ;;  %v10967_v5 = vld [vmem:[%s11287_s5 + $0x50] sm:$0xff] }
 0x7df   :  { %5355 = vmatprep.subr.mxu1 %v11841_v59  ;;  %12561 = vst [vmem:[#allocation110_spill] sm:$0xff] %v10967_v5 }
 0x7e0   :  { %5356 = vmatpush3.msra.mxu1 %v10953_v9  ;;  %v10974_v9 = vld [vmem:[%s11287_s5 + $0x48] sm:$0xff] }
 0x7e1   :  { %5357 = vmatprep.subr.mxu1 %v11841_v59  ;;  %12562 = vst [vmem:[#allocation111_spill] sm:$0xff] %v10974_v9 }
 0x7e2   :  { %5358 = vmatpush3.msra.mxu1 %v10960_v6  ;;  %v10981_v6 = vld [vmem:[%s11287_s5 + $0x40] sm:$0xff] }
 0x7e3   :  { %5359 = vmatprep.subr.mxu1 %v11841_v59  ;;  %12563 = vst [vmem:[#allocation112_spill] sm:$0xff] %v10981_v6 }
 0x7e4   :  { %5360 = vmatpush3.msra.mxu1 %v10967_v5  ;;  %v10988_v5 = vld [vmem:[%s11287_s5 + $0x38] sm:$0xff] }
 0x7e5   :  { %5361 = vmatprep.subr.mxu1 %v11841_v59  ;;  %12564 = vst [vmem:[#allocation113_spill] sm:$0xff] %v10988_v5 }
 0x7e6   :  { %5362 = vmatpush3.msra.mxu1 %v10974_v9  ;;  %v10995_v9 = vld [vmem:[%s11287_s5 + $0x30] sm:$0xff] }
 0x7e7   :  { %5363 = vmatprep.subr.mxu1 %v11841_v59  ;;  %12565 = vst [vmem:[#allocation114_spill] sm:$0xff] %v10995_v9 }
 0x7e8   :  { %5364 = vmatpush3.msra.mxu1 %v10981_v6  ;;  %v11002_v6 = vld [vmem:[%s11287_s5 + $0x28] sm:$0xff] }
 0x7e9   :  { %5365 = vmatprep.subr.mxu1 %v11841_v59  ;;  %12566 = vst [vmem:[#allocation115_spill] sm:$0xff] %v11002_v6 }
 0x7ea   :  { %5366 = vmatpush3.msra.mxu1 %v10988_v5  ;;  %v11009_v5 = vld [vmem:[%s11287_s5 + $0x20] sm:$0xff] }
 0x7eb   :  { %5367 = vmatprep.subr.mxu1 %v11841_v59  ;;  %12567 = vst [vmem:[#allocation116_spill] sm:$0xff] %v11009_v5 }
 0x7ec   :  { %5368 = vmatpush3.msra.mxu1 %v10995_v9  ;;  %v11016_v9 = vld [vmem:[%s11287_s5 + $0x18] sm:$0xff] }
 0x7ed   :  { %5369 = vmatprep.subr.mxu1 %v11841_v59  ;;  %12568 = vst [vmem:[#allocation117_spill] sm:$0xff] %v11016_v9 }
 0x7ee   :  { %5370 = vmatpush3.msra.mxu1 %v11002_v6  ;;  %v11023_v6 = vld [vmem:[%s11287_s5 + $0x10] sm:$0xff] }
 0x7ef   :  { %5371 = vmatprep.subr.mxu1 %v11841_v59  ;;  %12569 = vst [vmem:[#allocation118_spill] sm:$0xff] %v11023_v6 }
 0x7f0   :  { %5372 = vmatpush3.msra.mxu1 %v11009_v5  ;;  %v11030_v5 = vld [vmem:[%s11287_s5 + $0x8] sm:$0xff] }
 0x7f1   :  { %5373 = vmatprep.subr.mxu1 %v11841_v59  ;;  %12570 = vst [vmem:[#allocation120_spill] sm:$0xff] %v11030_v5 }
 0x7f2   :  { %5374 = vmatpush3.msra.mxu1 %v11016_v9  ;;  %v11037_v9 = vld [vmem:[%s11287_s5] sm:$0xff] }
 0x7f3   :  { %5375 = vmatprep.subr.mxu1 %v11841_v59  ;;  %12571 = vst [vmem:[#allocation121_spill] sm:$0xff] %v11037_v9 }
 0x7f4   :  { %5376 = vmatpush3.msra.mxu1 %v11023_v6  ;;  %v3314_v6 = vld [vmem:[#allocation2 + $0xa] sm:$0x3] }
 0x7f5   :  { %5377 = vmatprep.subr.mxu1 %v11841_v59 }
 0x7f6   :  { %5378 = vmatpush3.msra.mxu1 %v11030_v5 }
 0x7f7   :  { %5379 = vmatprep.subr.mxu1 %v11841_v59 }
 0x7f8   :  { %5380 = vmatpush3.msra.mxu1 %v11037_v9 }
 0x7f9   :  { %4075 = vmatprep.subr.mxu1 %v10020_v32 }
 0x835   :  { %v3381_v23 = vpop.f32.mrf.mxu0 }
 0x836   :  { %v3385_v46 = vadd.f32 %v3381_v23, %v3314_v6  ;;  %v4607_v23 = vld [vmem:[%s11282_s0 + $0x30] sm:$0xff] }
 0x837   :  { %v5278_v8 = vpop.f32.mrf.mxu0 }
 0x838   :  { %3386 = vst [vmem:[#allocation2 + $0xa] sm:$0x3] %v3385_v46 }
 0x855   :  { %v3528_v16 = vpop.f32.mrf.mxu0 }
 0x856   :  { %v3454_v51 = vpop.f32.mrf.mxu1 }
 0x857   :  { %v3458_v39 = vadd.f32 %v3454_v51, %v3387_v27  ;;  %v3530_v21 = vpop.f32.mrf.mxu0 }
 0x858   :  { %v5313_v5 = vpop.f32.mrf.mxu1  ;;  %v3608_v3 = vcombine.low %v3528_v16, %v3530_v21 }
 0x859   :  { %3459 = vst [vmem:[#allocation2 + $0x4] sm:$0x3] %v3458_v39 }
 0x85a   :  { %v3616_v9 = vrot.slane %v3608_v3, %v12455_v17 }
 0x876   :  { %v3599_v63 = vpop.f32.mrf.mxu1 }
 0x878   :  { %v3601_v40 = vpop.f32.mrf.mxu1 }
 0x879   :  { %v3609_v13 = vcombine.low %v3599_v63, %v3601_v40  ;;  %v3695_v40 = vpop.f32.mrf.mxu0 }
 0x87b   :  { %v3623_v32 = vrot.slane %v3609_v13, %v12455_v17  ;;  %v3697_v44 = vpop.f32.mrf.mxu0 }
 0x87d   :  { %v3624_v8 = vcombine.low %v3616_v9, %v3623_v32  ;;  %v3775_v32 = vcombine.low %v3695_v40, %v3697_v44 }
 0x87f   :  { %v3626_v46 = vadd.f32 %v4607_v23, %v3624_v8 }
 0x881   :  { %v4609_v6 = vmul.f32 -1.442695, %v3626_v46  ;;  %v3801_v51 = vrot.slane %v3626_v46, 2  ;;  %v3812_v27 = vrot.slane %v3626_v46, 6  ;;  %v3809_v16 = vrot.slane %v3626_v46, 4  ;;  %v4608_v46 = vld [vmem:[%s11283_s1 + $0x8] sm:$0xff] }
 0x883   :  { %5652 = vpow2.f32 %v4609_v6  ;;  %v4610_v39 = vmul.f32 -1.442695, %v3801_v51  ;;  %v4611_v5 = vmul.f32 -1.442695, %v3812_v27  ;;  %v3783_v6 = vrot.slane %v3775_v32, %v12455_v17 }
 0x885   :  { %5654 = vpow2.f32 %v4610_v39 }
 0x886   :  { %5656 = vpow2.f32 %v4611_v5 }
 0x890   :  { %v5653_v21 = vpop.eup %5652 }
 0x891   :  { %v3797_v63 = vadd.f32 1.0, %v5653_v21 }
 0x892   :  { %v5655_v3 = vpop.eup %5654 }
 0x893   :  { %5658 = vrcp.f32 %v3797_v63  ;;  %v3806_v13 = vadd.f32 1.0, %v5655_v3  ;;  %v5657_v27 = vpop.eup %5656 }
 0x894   :  { %5660 = vtanh.f32 %v3809_v16  ;;  %v3817_v24 = vadd.f32 1.0, %v5657_v27 }
 0x895   :  { %5662 = vrcp.f32 %v3806_v13 }
 0x897   :  { %v3766_v9 = vpop.f32.mrf.mxu1 }
 0x899   :  { %v3768_v23 = vpop.f32.mrf.mxu1 }
 0x89a   :  { %v3776_v8 = vcombine.low %v3766_v9, %v3768_v23 }
 0x89c   :  { %v3790_v51 = vrot.slane %v3776_v8, %v12455_v17 }
 0x89e   :  { %v3791_v39 = vcombine.low %v3783_v6, %v3790_v51 }
 0x8a0   :  { %v5659_v5 = vpop.eup %5658  ;;  %v3793_v21 = vadd.f32 %v4608_v46, %v3791_v39 }
 0x8a1   :  { %v5661_v63 = vpop.eup %5660 }
 0x8a2   :  { %v5663_v16 = vpop.eup %5662  ;;  %v4612_v3 = vmul.f32 -1.442695, %v3793_v21  ;;  %v3832_v13 = vrot.slane %v3793_v21, 2  ;;  %v3821_v40 = vmul.f32 %v5661_v63, %v5659_v5  ;;  %v3843_v23 = vrot.slane %v3793_v21, 6  ;;  %v12607_v63 = vld [vmem:[#allocation22_spill] sm:$0xff] }
 0x8a3   :  { %v3820_v44 = vmul.f32 %v5663_v16, %v10034_v55  ;;  %v3840_v51 = vrot.slane %v3793_v21, 4  ;;  %v12608_v16 = vld [vmem:[#allocation73_spill] sm:$0xff] }
 0x8a4   :  { %5664 = vpow2.f32 %v4612_v3  ;;  %v4613_v9 = vmul.f32 -1.442695, %v3832_v13  ;;  %v4614_v8 = vmul.f32 -1.442695, %v3843_v23  ;;  %v12609_v3 = vld [vmem:[#allocation23_spill] sm:$0xff] }
 0x8a5   :  { %v11052_v32 = vadd.f32 %v3821_v40, %v3820_v44  ;;  %v12610_v13 = vld [vmem:[#allocation75_spill] sm:$0xff]  ;;  %v12611_v44 = vld [vmem:[#allocation24_spill] sm:$0xff]  ;;  %v12612_v40 = vld [vmem:[#allocation77_spill] sm:$0xff] }
 0x8a6   :  { %5666 = vpow2.f32 %v4613_v9  ;;  %v12613_v9 = vld [vmem:[#allocation25_spill] sm:$0xff]  ;;  %v12614_v23 = vld [vmem:[#allocation79_spill] sm:$0xff] }
 0x8a7   :  { %5668 = vrcp.f32 %v3817_v24 }
 0x8a8   :  { %5670 = vtanh.f32 %v11052_v32 }
 0x8a9   :  { %5672 = vpow2.f32 %v4614_v8  ;;  %v12615_v8 = vld [vmem:[#allocation26_spill] sm:$0xff] }
 0x8b1   :  { %v5665_v6 = vpop.eup %5664 }
 0x8b2   :  { %v3828_v46 = vadd.f32 1.0, %v5665_v6  ;;  %v12616_v6 = vld [vmem:[#allocation81_spill] sm:$0xff] }
 0x8b3   :  { %v5667_v39 = vpop.eup %5666 }
 0x8b4   :  { %v5669_v17 = vpop.eup %5668  ;;  %5674 = vrcp.f32 %v3828_v46  ;;  %v3837_v27 = vadd.f32 1.0, %v5667_v39  ;;  %v12618_v46 = vld [vmem:[#allocation83_spill] sm:$0xff]  ;;  %v12619_v39 = vld [vmem:[#allocation28_spill] sm:$0xff] }
 0x8b5   :  { %v5671_v55 = vpop.eup %5670  ;;  %5676 = vtanh.f32 %v3840_v51  ;;  %v12617_v51 = vld [vmem:[#allocation27_spill] sm:$0xff] }
 0x8b6   :  { %5678 = vrcp.f32 %v3837_v27  ;;  %v11055_v5 = vmul.f32 %v5671_v55, %v5669_v17  ;;  %v5673_v17 = vpop.eup %5672  ;;  %v12620_v27 = vld [vmem:[#allocation29_spill] sm:$0xff] }
 0x8b7   :  { %v3848_v21 = vadd.f32 1.0, %v5673_v17  ;;  %v12621_v55 = vld [vmem:[#allocation85_spill] sm:$0xff]  ;;  %v12622_v17 = vld [vmem:[#allocation30_spill] sm:$0xff] }
 0x8b8   :  { %5347 = vmatmul.mubr.f32.vlgmr.msra.gmra.mxu0 %v11055_v5 }
 0x8b9   :  { %4005 = vmatpush1.msra.mxu0 %v10043_v42  ;;  %4068 = vmatprep.mubr.f32.mxu0 %v11841_v59  ;;  %5680 = vrcp.f32 %v3848_v21  ;;  %v12626_v21 = vld [vmem:[#allocation87_spill] sm:$0xff] }
 0x8ba   :  { %4006 = vmatprep.subr.mxu0 %v10050_v45 }
 0x8bb   :  { %4007 = vmatpush1.msra.mxu0 %v10056_v48 }
 0x8bc   :  { %4008 = vmatprep.subr.mxu0 %v10062_v52 }
 0x8bd   :  { %4009 = vmatpush1.msra.mxu0 %v10068_v54 }
 0x8be   :  { %4010 = vmatprep.subr.mxu0 %v10074_v58 }
 0x8bf   :  { %4011 = vmatpush1.msra.mxu0 %v10080_v61 }
 0x8c0   :  { %4012 = vmatprep.subr.mxu0 %v10086_v18 }
 0x8c1   :  { %v5675_v24 = vpop.eup %5674  ;;  %4013 = vmatpush1.msra.mxu0 %v10092_v0  ;;  %v12572_v0 = vld [vmem:[#allocation37_spill] sm:$0xff] }
 0x8c2   :  { %v5677_v42 = vpop.eup %5676  ;;  %4014 = vmatprep.subr.mxu0 %v10098_v37  ;;  %v12573_v37 = vld [vmem:[#allocation5_spill] sm:$0xff] }
 0x8c3   :  { %v5679_v45 = vpop.eup %5678  ;;  %4015 = vmatpush1.msra.mxu0 %v10104_v15  ;;  %v3852_v52 = vmul.f32 %v5677_v42, %v5675_v24  ;;  %v12574_v15 = vld [vmem:[#allocation39_spill] sm:$0xff]  ;;  %v12624_v42 = vld [vmem:[#allocation32_spill] sm:$0xff] }
 0x8c4   :  { %4016 = vmatprep.subr.mxu0 %v10110_v57  ;;  %v3851_v48 = vmul.f32 %v5679_v45, %v10126_v1  ;;  %v12575_v57 = vld [vmem:[#allocation6_spill] sm:$0xff]  ;;  %v12578_v1 = vld [vmem:[#allocation43_spill] sm:$0xff]  ;;  %v12625_v45 = vld [vmem:[#allocation33_spill] sm:$0xff] }
 0x8c5   :  { %4017 = vmatpush1.msra.mxu0 %v10117_v25  ;;  %v12576_v25 = vld [vmem:[#allocation41_spill] sm:$0xff]  ;;  %v12623_v24 = vld [vmem:[#allocation31_spill] sm:$0xff] }
 0x8c6   :  { %4018 = vmatprep.subr.mxu0 %v10123_v7  ;;  %v11074_v54 = vadd.f32 %v3852_v52, %v3851_v48  ;;  %v5681_v58 = vpop.eup %5680  ;;  %v12577_v7 = vld [vmem:[#allocation7_spill] sm:$0xff]  ;;  %v12627_v48 = vld [vmem:[#allocation34_spill] sm:$0xff] }
 0x8c7   :  { %4019 = vmatpush1.msra.mxu0 %v10131_v34  ;;  %v12579_v34 = vld [vmem:[#allocation8_spill] sm:$0xff]  ;;  %v12628_v52 = vld [vmem:[#allocation35_spill] sm:$0xff] }
 0x8c8   :  { %4020 = vmatprep.subr.mxu0 %v10137_v4  ;;  %5682 = vtanh.f32 %v11074_v54  ;;  %v12580_v4 = vld [vmem:[#allocation45_spill] sm:$0xff] }
 0x8c9   :  { %4021 = vmatpush1.msra.mxu0 %v10144_v19  ;;  %v12581_v19 = vld [vmem:[#allocation9_spill] sm:$0xff] }
 0x8ca   :  { %4022 = vmatprep.subr.mxu0 %v10150_v22  ;;  %v12582_v22 = vld [vmem:[#allocation47_spill] sm:$0xff] }
 0x8cb   :  { %4023 = vmatpush1.msra.mxu0 %v10156_v38  ;;  %v12583_v38 = vld [vmem:[#allocation10_spill] sm:$0xff] }
 0x8cc   :  { %4024 = vmatprep.subr.mxu0 %v10162_v60  ;;  %v12584_v60 = vld [vmem:[#allocation49_spill] sm:$0xff] }
 0x8cd   :  { %4025 = vmatpush1.msra.mxu0 %v10168_v29  ;;  %v12585_v29 = vld [vmem:[#allocation11_spill] sm:$0xff] }
 0x8ce   :  { %4026 = vmatprep.subr.mxu0 %v10174_v30  ;;  %v12586_v30 = vld [vmem:[#allocation51_spill] sm:$0xff] }
 0x8cf   :  { %4027 = vmatpush1.msra.mxu0 %v10180_v62  ;;  %v12587_v62 = vld [vmem:[#allocation12_spill] sm:$0xff] }
 0x8d0   :  { %4028 = vmatprep.subr.mxu0 %v10186_v28  ;;  %v12588_v28 = vld [vmem:[#allocation53_spill] sm:$0xff] }
 0x8d1   :  { %4029 = vmatpush1.msra.mxu0 %v10192_v53  ;;  %v12589_v53 = vld [vmem:[#allocation13_spill] sm:$0xff] }
 0x8d2   :  { %4030 = vmatprep.subr.mxu0 %v10198_v26  ;;  %v12590_v26 = vld [vmem:[#allocation55_spill] sm:$0xff] }
 0x8d3   :  { %4031 = vmatpush1.msra.mxu0 %v10204_v41  ;;  %v12591_v41 = vld [vmem:[#allocation14_spill] sm:$0xff] }
 0x8d4   :  { %4032 = vmatprep.subr.mxu0 %v10210_v43  ;;  %v12592_v43 = vld [vmem:[#allocation57_spill] sm:$0xff] }
 0x8d5   :  { %v5683_v61 = vpop.eup %5682  ;;  %4033 = vmatpush1.msra.mxu0 %v10216_v31  ;;  %v12593_v31 = vld [vmem:[#allocation15_spill] sm:$0xff] }
 0x8d6   :  { %4034 = vmatprep.subr.mxu0 %v10222_v14  ;;  %v11093_v18 = vmul.f32 %v5683_v61, %v5681_v58  ;;  %v12594_v14 = vld [vmem:[#allocation59_spill] sm:$0xff]  ;;  %v12629_v58 = vld [vmem:[#allocation88_spill] sm:$0xff]  ;;  %v12631_v61 = vld [vmem:[#allocation38_spill] sm:$0xff] }
 0x8d7   :  { %4035 = vmatpush1.msra.mxu0 %v10230_v2  ;;  %v12595_v2 = vld [vmem:[#allocation16_spill] sm:$0xff] }
 0x8d8   :  { %4069 = vmatmul.mubr.f32.vlgmr.msra.gmra.mxu0 %v11055_v5  ;;  %4170 = vmatprep.subr.mxu0 %v10237_v10  ;;  %v12596_v10 = vld [vmem:[#allocation61_spill] sm:$0xff] }
 0x8d9   :  { %5382 = vmatmul.mubr.f32.vlgmr.msra.gmra.mxu1 %v11093_v18  ;;  %4171 = vmatpush1.msra.mxu0 %v10244_v56  ;;  %v12597_v56 = vld [vmem:[#allocation17_spill] sm:$0xff] }
 0x8da   :  { %4076 = vmatpush1.msra.mxu1 %v10250_v33  ;;  %4172 = vmatprep.subr.mxu0 %v10256_v35  ;;  %v12598_v33 = vld [vmem:[#allocation63_spill] sm:$0xff]  ;;  %v12599_v35 = vld [vmem:[#allocation18_spill] sm:$0xff] }
 0x8db   :  { %4077 = vmatprep.subr.mxu1 %v10262_v50  ;;  %4173 = vmatpush1.msra.mxu0 %v10268_v11  ;;  %v12600_v50 = vld [vmem:[#allocation65_spill] sm:$0xff]  ;;  %v12601_v11 = vld [vmem:[#allocation19_spill] sm:$0xff] }
 0x8dc   :  { %4078 = vmatpush1.msra.mxu1 %v10274_v49  ;;  %4174 = vmatprep.subr.mxu0 %v10280_v36  ;;  %v12602_v49 = vld [vmem:[#allocation67_spill] sm:$0xff]  ;;  %v12603_v36 = vld [vmem:[#allocation20_spill] sm:$0xff] }
 0x8dd   :  { %4079 = vmatprep.subr.mxu1 %v10286_v47  ;;  %4175 = vmatpush1.msra.mxu0 %v10292_v12  ;;  %v12604_v47 = vld [vmem:[#allocation69_spill] sm:$0xff] }
 0x8de   :  { %4080 = vmatpush1.msra.mxu1 %v10298_v20  ;;  %4176 = vmatprep.subr.mxu0 %v12572_v0  ;;  %v12605_v12 = vld [vmem:[#allocation21_spill] sm:$0xff]  ;;  %v12606_v20 = vld [vmem:[#allocation71_spill] sm:$0xff] }
 0x8df   :  { %4081 = vmatprep.subr.mxu1 %v12573_v37  ;;  %4177 = vmatpush1.msra.mxu0 %v12574_v15  ;;  %v12632_v0 = vld [vmem:[#allocation89_spill] sm:$0xff]  ;;  %v12633_v37 = vld [vmem:[#allocation40_spill] sm:$0xff]  ;;  %v12634_v15 = vld [vmem:[#allocation42_spill] sm:$0xff] }
 0x8e0   :  { %4082 = vmatpush1.msra.mxu1 %v12575_v57  ;;  %4178 = vmatprep.subr.mxu0 %v12576_v25  ;;  %v12635_v57 = vld [vmem:[#allocation90_spill] sm:$0xff]  ;;  %v12636_v25 = vld [vmem:[#allocation44_spill] sm:$0xff] }
 0x8e1   :  { %4083 = vmatprep.subr.mxu1 %v12577_v7  ;;  %4179 = vmatpush1.msra.mxu0 %v12578_v1  ;;  %v12637_v7 = vld [vmem:[#allocation46_spill] sm:$0xff]  ;;  %v12638_v1 = vld [vmem:[#allocation91_spill] sm:$0xff] }
 0x8e2   :  { %4084 = vmatpush1.msra.mxu1 %v12579_v34  ;;  %4180 = vmatprep.subr.mxu0 %v12580_v4  ;;  %v12639_v34 = vld [vmem:[#allocation48_spill] sm:$0xff]  ;;  %v12640_v4 = vld [vmem:[#allocation50_spill] sm:$0xff] }
 0x8e3   :  { %4085 = vmatprep.subr.mxu1 %v12581_v19  ;;  %4181 = vmatpush1.msra.mxu0 %v12582_v22  ;;  %v12641_v19 = vld [vmem:[#allocation92_spill] sm:$0xff] }
 0x8e4   :  { %4086 = vmatpush1.msra.mxu1 %v12583_v38  ;;  %4182 = vmatprep.subr.mxu0 %v12584_v60  ;;  %v12642_v22 = vld [vmem:[#allocation52_spill] sm:$0xff]  ;;  %v12643_v38 = vld [vmem:[#allocation54_spill] sm:$0xff]  ;;  %v12644_v60 = vld [vmem:[#allocation93_spill] sm:$0xff] }
 0x8e5   :  { %4087 = vmatprep.subr.mxu1 %v12585_v29  ;;  %4183 = vmatpush1.msra.mxu0 %v12586_v30  ;;  %v12645_v29 = vld [vmem:[#allocation56_spill] sm:$0xff]  ;;  %v12646_v30 = vld [vmem:[#allocation58_spill] sm:$0xff] }
 0x8e6   :  { %4088 = vmatpush1.msra.mxu1 %v12587_v62  ;;  %4184 = vmatprep.subr.mxu0 %v12588_v28  ;;  %v12647_v62 = vld [vmem:[#allocation94_spill] sm:$0xff]  ;;  %v12648_v28 = vld [vmem:[#allocation60_spill] sm:$0xff] }
 0x8e7   :  { %4089 = vmatprep.subr.mxu1 %v12589_v53  ;;  %4185 = vmatpush1.msra.mxu0 %v12590_v26  ;;  %v12649_v53 = vld [vmem:[#allocation62_spill] sm:$0xff]  ;;  %v12650_v26 = vld [vmem:[#allocation95_spill] sm:$0xff] }
 0x8e8   :  { %4090 = vmatpush1.msra.mxu1 %v12591_v41  ;;  %4186 = vmatprep.subr.mxu0 %v12592_v43  ;;  %v12651_v41 = vld [vmem:[#allocation64_spill] sm:$0xff]  ;;  %v12652_v43 = vld [vmem:[#allocation66_spill] sm:$0xff] }
 0x8e9   :  { %4091 = vmatprep.subr.mxu1 %v12593_v31  ;;  %4187 = vmatpush1.msra.mxu0 %v12594_v14  ;;  %v12653_v31 = vld [vmem:[#allocation96_spill] sm:$0xff] }
 0x8ea   :  { %4092 = vmatpush1.msra.mxu1 %v12595_v2  ;;  %4188 = vmatprep.subr.mxu0 %v12596_v10  ;;  %v12654_v14 = vld [vmem:[#allocation68_spill] sm:$0xff]  ;;  %v12655_v2 = vld [vmem:[#allocation70_spill] sm:$0xff]  ;;  %v12656_v10 = vld [vmem:[#allocation97_spill] sm:$0xff] }
 0x8eb   :  { %4093 = vmatprep.subr.mxu1 %v12597_v56  ;;  %4189 = vmatpush1.msra.mxu0 %v12598_v33  ;;  %v12657_v56 = vld [vmem:[#allocation72_spill] sm:$0xff]  ;;  %v12658_v33 = vld [vmem:[#allocation74_spill] sm:$0xff] }
 0x8ec   :  { %4094 = vmatpush1.msra.mxu1 %v12599_v35  ;;  %4190 = vmatprep.subr.mxu0 %v12600_v50  ;;  %v12659_v35 = vld [vmem:[#allocation98_spill] sm:$0xff]  ;;  %v12660_v50 = vld [vmem:[#allocation76_spill] sm:$0xff] }
 0x8ed   :  { %4095 = vmatprep.subr.mxu1 %v12601_v11  ;;  %4191 = vmatpush1.msra.mxu0 %v12602_v49  ;;  %v12661_v11 = vld [vmem:[#allocation78_spill] sm:$0xff]  ;;  %v12662_v49 = vld [vmem:[#allocation99_spill] sm:$0xff] }
 0x8ee   :  { %4096 = vmatpush1.msra.mxu1 %v12603_v36  ;;  %4192 = vmatprep.subr.mxu0 %v12604_v47  ;;  %v12663_v36 = vld [vmem:[#allocation80_spill] sm:$0xff]  ;;  %v12664_v47 = vld [vmem:[#allocation82_spill] sm:$0xff] }
 0x8ef   :  { %4097 = vmatprep.subr.mxu1 %v12605_v12  ;;  %4193 = vmatpush1.msra.mxu0 %v12606_v20  ;;  %v12665_v12 = vld [vmem:[#allocation100_spill] sm:$0xff] }
 0x8f0   :  { %4098 = vmatpush1.msra.mxu1 %v12607_v63  ;;  %4194 = vmatprep.subr.mxu0 %v12608_v16  ;;  %v12666_v20 = vld [vmem:[#allocation84_spill] sm:$0xff]  ;;  %v12667_v63 = vld [vmem:[#allocation86_spill] sm:$0xff]  ;;  %v12668_v16 = vld [vmem:[#allocation101_spill] sm:$0xff] }
 0x8f1   :  { %4099 = vmatprep.subr.mxu1 %v12609_v3  ;;  %4195 = vmatpush1.msra.mxu0 %v12610_v13  ;;  %v12669_v3 = vld [vmem:[#allocation102_spill] sm:$0xff]  ;;  %v12670_v13 = vld [vmem:[#allocation103_spill] sm:$0xff] }
 0x8f2   :  { %4100 = vmatpush1.msra.mxu1 %v12611_v44  ;;  %4196 = vmatprep.subr.mxu0 %v12612_v40  ;;  %v12671_v44 = vld [vmem:[#allocation104_spill] sm:$0xff]  ;;  %v12672_v40 = vld [vmem:[#allocation105_spill] sm:$0xff] }
 0x8f3   :  { %4101 = vmatprep.subr.mxu1 %v12613_v9  ;;  %4197 = vmatpush1.msra.mxu0 %v12614_v23  ;;  %v12673_v9 = vld [vmem:[#allocation106_spill] sm:$0xff]  ;;  %v12675_v23 = vld [vmem:[#allocation108_spill] sm:$0xff] }
 0x8f4   :  { %4102 = vmatpush1.msra.mxu1 %v12615_v8  ;;  %4198 = vmatprep.subr.mxu0 %v12616_v6  ;;  %v12676_v8 = vld [vmem:[#allocation109_spill] sm:$0xff]  ;;  %v12677_v6 = vld [vmem:[#allocation110_spill] sm:$0xff] }
 0x8f5   :  { %4103 = vmatprep.subr.mxu1 %v12617_v51  ;;  %4199 = vmatpush1.msra.mxu0 %v12618_v46  ;;  %v12678_v51 = vld [vmem:[#allocation111_spill] sm:$0xff]  ;;  %v12679_v46 = vld [vmem:[#allocation112_spill] sm:$0xff] }
 0x8f6   :  { %4104 = vmatpush1.msra.mxu1 %v12619_v39  ;;  %4200 = vmatprep.subr.mxu0 %v12620_v27  ;;  %v12680_v39 = vld [vmem:[#allocation113_spill] sm:$0xff]  ;;  %v12681_v27 = vld [vmem:[#allocation114_spill] sm:$0xff] }
 0x8f7   :  { %4105 = vmatprep.subr.mxu1 %v12621_v55  ;;  %4139 = vmatprep.mubr.f32.mxu1 %v11841_v59  ;;  %v12682_v55 = vld [vmem:[#allocation115_spill] sm:$0xff] }
 0x8f8   :  { %4106 = vmatpush1.msra.mxu1 %v12622_v17  ;;  %4201 = vmatpush1.msra.mxu0 %v12623_v24  ;;  %v12683_v17 = vld [vmem:[#allocation116_spill] sm:$0xff]  ;;  %v12684_v24 = vld [vmem:[#allocation117_spill] sm:$0xff] }
 0x8f9   :  { %4234 = vmatprep.mubr.f32.mxu0 %v11841_v59  ;;  %4140 = vmatmul.mubr.f32.vlgmr.msra.gmra.mxu1 %v11055_v5  ;;  %v12630_v5 = vld [vmem:[#allocation36_spill] sm:$0xff] }
 0x8fa   :  { %4235 = vmatmul.mubr.f32.vlgmr.msra.gmra.mxu0 %v11093_v18  ;;  %4241 = vmatprep.subr.mxu1 %v12624_v42  ;;  %v12685_v42 = vld [vmem:[#allocation118_spill] sm:$0xff] }
 0x8fb   :  { %4242 = vmatpush1.msra.mxu1 %v12625_v45  ;;  %4305 = vmatprep.mubr.f32.mxu1 %v11841_v59  ;;  %v12686_v45 = vld [vmem:[#allocation120_spill] sm:$0xff] }
 0x8fc   :  { %4243 = vmatprep.subr.mxu1 %v12626_v21  ;;  %5384 = vmatprep.subr.mxu0 %v11841_v59  ;;  %v12687_v21 = vld [vmem:[#allocation121_spill] sm:$0xff] }
 0x8fd   :  { %4244 = vmatpush1.msra.mxu1 %v12627_v48  ;;  %5385 = vmatpush3.msra.mxu0 %v12628_v52  ;;  %v3856_v48 = vld [vmem:[#allocation2 + $0xc] sm:$0x3] }
 0x8fe   :  { %4245 = vmatprep.subr.mxu1 %v12629_v58  ;;  %5386 = vmatprep.subr.mxu0 %v11841_v59 }
 0x8ff   :  { %4246 = vmatpush1.msra.mxu1 %v12630_v5  ;;  %5387 = vmatpush3.msra.mxu0 %v12631_v61  ;;  %v3929_v61 = vld [vmem:[#allocation2 + $0x2] sm:$0x3] }
 0x900   :  { %4247 = vmatprep.subr.mxu1 %v12632_v0  ;;  %5388 = vmatprep.subr.mxu0 %v11841_v59 }
 0x901   :  { %4248 = vmatpush1.msra.mxu1 %v12633_v37  ;;  %5389 = vmatpush3.msra.mxu0 %v12634_v15 }
 0x902   :  { %4249 = vmatprep.subr.mxu1 %v12635_v57  ;;  %5390 = vmatprep.subr.mxu0 %v11841_v59 }
 0x903   :  { %4250 = vmatpush1.msra.mxu1 %v12636_v25  ;;  %5391 = vmatpush3.msra.mxu0 %v12637_v7 }
 0x904   :  { %4251 = vmatprep.subr.mxu1 %v12638_v1  ;;  %5392 = vmatprep.subr.mxu0 %v11841_v59 }
 0x905   :  { %4252 = vmatpush1.msra.mxu1 %v12639_v34  ;;  %5393 = vmatpush3.msra.mxu0 %v12640_v4 }
 0x906   :  { %4253 = vmatprep.subr.mxu1 %v12641_v19  ;;  %5394 = vmatprep.subr.mxu0 %v11841_v59  ;;  %v12688_v19 = vld [vmem:[#allocation119_spill] sm:$0xff] }
 0x907   :  { %4254 = vmatpush1.msra.mxu1 %v12642_v22  ;;  %5395 = vmatpush3.msra.mxu0 %v12643_v38  ;;  %v4615_v38 = vld [vmem:[%s11282_s0 + $0x38] sm:$0xff] }
 0x908   :  { %4255 = vmatprep.subr.mxu1 %v12644_v60  ;;  %5396 = vmatprep.subr.mxu0 %v11841_v59 }
 0x909   :  { %4256 = vmatpush1.msra.mxu1 %v12645_v29  ;;  %5397 = vmatpush3.msra.mxu0 %v12646_v30 }
 0x90a   :  { %4257 = vmatprep.subr.mxu1 %v12647_v62  ;;  %5398 = vmatprep.subr.mxu0 %v11841_v59 }
 0x90b   :  { %4258 = vmatpush1.msra.mxu1 %v12648_v28  ;;  %5399 = vmatpush3.msra.mxu0 %v12649_v53 }
 0x90c   :  { %4259 = vmatprep.subr.mxu1 %v12650_v26  ;;  %5400 = vmatprep.subr.mxu0 %v11841_v59 }
 0x90d   :  { %4260 = vmatpush1.msra.mxu1 %v12651_v41  ;;  %5401 = vmatpush3.msra.mxu0 %v12652_v43 }
 0x90e   :  { %4261 = vmatprep.subr.mxu1 %v12653_v31  ;;  %5402 = vmatprep.subr.mxu0 %v11841_v59 }
 0x90f   :  { %4262 = vmatpush1.msra.mxu1 %v12654_v14  ;;  %5403 = vmatpush3.msra.mxu0 %v12655_v2 }
 0x910   :  { %4263 = vmatprep.subr.mxu1 %v12656_v10  ;;  %5404 = vmatprep.subr.mxu0 %v11841_v59 }
 0x911   :  { %4264 = vmatpush1.msra.mxu1 %v12657_v56  ;;  %5405 = vmatpush3.msra.mxu0 %v12658_v33 }
 0x912   :  { %4265 = vmatprep.subr.mxu1 %v12659_v35  ;;  %5406 = vmatprep.subr.mxu0 %v11841_v59 }
 0x913   :  { %4266 = vmatpush1.msra.mxu1 %v12660_v50  ;;  %5407 = vmatpush3.msra.mxu0 %v12661_v11 }
 0x914   :  { %4267 = vmatprep.subr.mxu1 %v12662_v49  ;;  %5408 = vmatprep.subr.mxu0 %v11841_v59 }
 0x915   :  { %4268 = vmatpush1.msra.mxu1 %v12663_v36  ;;  %5409 = vmatpush3.msra.mxu0 %v12664_v47  ;;  %v4169_v47 = vld [vmem:[%s11283_s1] sm:$0xff]  ;;  %s6221_s1 = smov [#allocation2]  }
 0x916   :  { %4269 = vmatprep.subr.mxu1 %v12665_v12  ;;  %5410 = vmatprep.subr.mxu0 %v11841_v59  ;;  %s4548_s20 = sshll.u32 %s6221_s1, 4  ;;  %s4549_s20 = int_to_ptr.vmem [resolvable:$true] %s4548_s20 }
 0x917   :  { %4270 = vmatpush1.msra.mxu1 %v12666_v20  ;;  %5411 = vmatpush3.msra.mxu0 %v12667_v63  ;;  %s6196_s21 = scalar_lea.vmem %s4549_s20, 256  ;;  %p6201_p1 = scmp.lt.s32.totalorder %s4549_s20, %s4549_s20 }
 0x918   :  { %4271 = vmatprep.subr.mxu1 %v12668_v16  ;;  %5412 = vmatprep.subr.mxu0 %v11841_v59  ;;  %p6197_p0 = scmp.ne.s32.totalorder %s4549_s20, %s6196_s21  ;;  %p6202_p2 = scmp.lt.s32.totalorder %s6196_s21, %s6196_s21 }
 0x919   :  { %4272 = vmatpush1.msra.mxu1 %v12669_v3  ;;  %5413 = vmatpush3.msra.mxu0 %v12670_v13 }
 0x91a   :  { %4306 = vmatmul.mubr.f32.vlgmr.msra.gmra.mxu1 %v11093_v18  ;;  %5414 = vmatprep.subr.mxu0 %v11841_v59  ;;  %v12674_v18 = vld [vmem:[#allocation107_spill] sm:$0xff]  ;;  %p6203_p3 = por %p6202_p2, %p6201_p1 }
 0x91b   :  { %5415 = vmatpush3.msra.mxu0 %v12671_v44  ;;  %5416 = vmatprep.mubr.msk.f32.mxu0 %vm6219_vm0, %v11841_v59 }
 0x91c   :  { %5419 = vmatprep.subr.mxu1 %v11841_v59  ;;  %5451 = vmatprep.mubr.msk.f32.mxu1 %vm6219_vm0, %v11841_v59  ;;  %p6204_p4 = pnand %p6203_p3, %p6197_p0 }
 0x91d   :  { %5420 = vmatpush3.msra.mxu1 %v12672_v40 }
 0x91e   :  { %5421 = vmatprep.subr.mxu1 %v11841_v59 }
 0x91f   :  { %5422 = vmatpush3.msra.mxu1 %v12673_v9 }
 0x920   :  { %5423 = vmatprep.subr.mxu1 %v11841_v59 }
 0x921   :  { %5424 = vmatpush3.msra.mxu1 %v12674_v18 }
 0x922   :  { %5425 = vmatprep.subr.mxu1 %v11841_v59 }
 0x923   :  { %5426 = vmatpush3.msra.mxu1 %v12675_v23 }
 0x924   :  { %5427 = vmatprep.subr.mxu1 %v11841_v59 }
 0x925   :  { %5428 = vmatpush3.msra.mxu1 %v12676_v8 }
 0x926   :  { %5429 = vmatprep.subr.mxu1 %v11841_v59 }
 0x927   :  { %5430 = vmatpush3.msra.mxu1 %v12677_v6 }
 0x928   :  { %5431 = vmatprep.subr.mxu1 %v11841_v59 }
 0x929   :  { %5432 = vmatpush3.msra.mxu1 %v12678_v51 }
 0x92a   :  { %5433 = vmatprep.subr.mxu1 %v11841_v59 }
 0x92b   :  { %5434 = vmatpush3.msra.mxu1 %v12679_v46 }
 0x92c   :  { %5435 = vmatprep.subr.mxu1 %v11841_v59 }
 0x92d   :  { %5436 = vmatpush3.msra.mxu1 %v12680_v39 }
 0x92e   :  { %5437 = vmatprep.subr.mxu1 %v11841_v59 }
 0x92f   :  { %5438 = vmatpush3.msra.mxu1 %v12681_v27 }
 0x930   :  { %5439 = vmatprep.subr.mxu1 %v11841_v59 }
 0x931   :  { %5440 = vmatpush3.msra.mxu1 %v12682_v55 }
 0x932   :  { %5441 = vmatprep.subr.mxu1 %v11841_v59 }
 0x933   :  { %5442 = vmatpush3.msra.mxu1 %v12683_v17 }
 0x934   :  { %5443 = vmatprep.subr.mxu1 %v11841_v59 }
 0x935   :  { %5444 = vmatpush3.msra.mxu1 %v12684_v24 }
 0x936   :  { %5445 = vmatprep.subr.mxu1 %v11841_v59 }
 0x937   :  { %5446 = vmatpush3.msra.mxu1 %v12685_v42 }
 0x938   :  { %5447 = vmatprep.subr.mxu1 %v11841_v59 }
 0x939   :  { %5448 = vmatpush3.msra.mxu1 %v12686_v45 }
 0x93a   :  { %5449 = vmatprep.subr.mxu1 %v11841_v59 }
 0x93b   :  { %5450 = vmatpush3.msra.mxu1 %v12687_v21 }
 0x978   :  { %v3923_v52 = vpop.f32.mrf.mxu0 }
 0x979   :  { %v3927_v58 = vadd.f32 %v3923_v52, %v3856_v48 }
 0x97a   :  { %v5348_v5 = vpop.f32.mrf.mxu0 }
 0x97b   :  { %3928 = vst [vmem:[#allocation2 + $0xc] sm:$0x3] %v3927_v58 }
 0x998   :  { %v4070_v57 = vpop.f32.mrf.mxu0 }
 0x999   :  { %v3996_v0 = vpop.f32.mrf.mxu1 }
 0x99a   :  { %v4000_v37 = vadd.f32 %v3996_v0, %v3929_v61  ;;  %v4072_v25 = vpop.f32.mrf.mxu0 }
 0x99b   :  { %v5383_v15 = vpop.f32.mrf.mxu1  ;;  %v4150_v1 = vcombine.low %v4070_v57, %v4072_v25 }
 0x99c   :  { %4001 = vst [vmem:[#allocation2 + $0x2] sm:$0x3] %v4000_v37 }
 0x99d   :  { %v4158_v59 = vrot.slane %v4150_v1, %v12688_v19 }
 0x9b9   :  { %v4141_v7 = vpop.f32.mrf.mxu1 }
 0x9ba   :  { %v4236_v31 = vpop.f32.mrf.mxu0 }
 0x9bb   :  { %v4143_v34 = vpop.f32.mrf.mxu1 }
 0x9bc   :  { %v4151_v4 = vcombine.low %v4141_v7, %v4143_v34  ;;  %v4238_v56 = vpop.f32.mrf.mxu0  ;;  %v4397_v7 = vld [vmem:[#allocation2 + $0xe] sm:$0x3] }
 0x9bd   :  { %v4316_v35 = vcombine.low %v4236_v31, %v4238_v56 }
 0x9be   :  { %v4165_v22 = vrot.slane %v4151_v4, %v12688_v19 }
 0x9bf   :  { %v4324_v49 = vrot.slane %v4316_v35, %v12688_v19 }
 0x9c0   :  { %v4166_v60 = vcombine.low %v4158_v59, %v4165_v22 }
 0x9c2   :  { %v4168_v29 = vadd.f32 %v4615_v38, %v4166_v60 }
 0x9c4   :  { %v4616_v30 = vmul.f32 -1.442695, %v4168_v29  ;;  %v4342_v62 = vrot.slane %v4168_v29, 2  ;;  %v4353_v53 = vrot.slane %v4168_v29, 6  ;;  %v4350_v43 = vrot.slane %v4168_v29, 4 }
 0x9c6   :  { %5684 = vpow2.f32 %v4616_v30  ;;  %v4617_v28 = vmul.f32 -1.442695, %v4342_v62  ;;  %v4618_v26 = vmul.f32 -1.442695, %v4353_v53 }
 0x9c8   :  { %5686 = vpow2.f32 %v4617_v28 }
 0x9c9   :  { %5688 = vpow2.f32 %v4618_v26 }
 0x9d3   :  { %v5685_v41 = vpop.eup %5684 }
 0x9d4   :  { %v4338_v14 = vadd.f32 1.0, %v5685_v41 }
 0x9d5   :  { %v5687_v2 = vpop.eup %5686 }
 0x9d6   :  { %5690 = vrcp.f32 %v4338_v14  ;;  %v4347_v10 = vadd.f32 1.0, %v5687_v2  ;;  %v5689_v20 = vpop.eup %5688 }
 0x9d7   :  { %5692 = vtanh.f32 %v4350_v43  ;;  %v4358_v9 = vadd.f32 1.0, %v5689_v20 }
 0x9d8   :  { %5694 = vrcp.f32 %v4347_v10 }
 0x9da   :  { %v4307_v33 = vpop.f32.mrf.mxu1 }
 0x9dc   :  { %v4309_v50 = vpop.f32.mrf.mxu1 }
 0x9dd   :  { %v4317_v11 = vcombine.low %v4307_v33, %v4309_v50 }
 0x9df   :  { %v4331_v36 = vrot.slane %v4317_v11, %v12688_v19  ;;  %v4470_v19 = vld [vmem:[#allocation2] sm:$0x3] }
 0x9e1   :  { %v4332_v12 = vcombine.low %v4324_v49, %v4331_v36 }
 0x9e3   :  { %v5691_v63 = vpop.eup %5690  ;;  %v4334_v16 = vadd.f32 %v4332_v12, %v4169_v47 }
 0x9e4   :  { %v5693_v3 = vpop.eup %5692 }
 0x9e5   :  { %v5695_v13 = vpop.eup %5694  ;;  %v4619_v44 = vmul.f32 -1.442695, %v4334_v16  ;;  %v4373_v40 = vrot.slane %v4334_v16, 2  ;;  %v4362_v23 = vmul.f32 %v5693_v3, %v5691_v63  ;;  %v4384_v51 = vrot.slane %v4334_v16, 6 }
 0x9e6   :  { %v4361_v18 = vmul.f32 %v5695_v13, %v11052_v32  ;;  %v4381_v27 = vrot.slane %v4334_v16, 4 }
 0x9e7   :  { %5696 = vpow2.f32 %v4619_v44  ;;  %v4620_v8 = vmul.f32 -1.442695, %v4373_v40  ;;  %v4621_v46 = vmul.f32 -1.442695, %v4384_v51 }
 0x9e8   :  { %v4363_v6 = vadd.f32 %v4362_v23, %v4361_v18 }
 0x9e9   :  { %5698 = vpow2.f32 %v4620_v8 }
 0x9ea   :  { %5700 = vrcp.f32 %v4358_v9 }
 0x9eb   :  { %5702 = vtanh.f32 %v4363_v6 }
 0x9ec   :  { %5704 = vpow2.f32 %v4621_v46 }
 0x9f4   :  { %v5697_v39 = vpop.eup %5696 }
 0x9f5   :  { %v4369_v55 = vadd.f32 1.0, %v5697_v39 }
 0x9f6   :  { %v5699_v17 = vpop.eup %5698 }
 0x9f7   :  { %v5701_v24 = vpop.eup %5700  ;;  %5706 = vrcp.f32 %v4369_v55  ;;  %v4378_v42 = vadd.f32 1.0, %v5699_v17 }
 0x9f8   :  { %v5703_v45 = vpop.eup %5702  ;;  %5708 = vtanh.f32 %v4381_v27 }
 0x9f9   :  { %5710 = vrcp.f32 %v4378_v42  ;;  %v4365_v32 = vmul.f32 %v5703_v45, %v5701_v24  ;;  %v5705_v21 = vpop.eup %5704 }
 0x9fa   :  { %v4389_v5 = vadd.f32 1.0, %v5705_v21 }
 0x9fb   :  { %5417 = vmatmul.mubr.f32.vlgmr.msra.gmra.mxu0 %v4365_v32 }
 0x9fc   :  { %5712 = vrcp.f32 %v4389_v5 }
 0xa04   :  { %v5707_v48 = vpop.eup %5706 }
 0xa05   :  { %v5709_v52 = vpop.eup %5708 }
 0xa06   :  { %v5711_v58 = vpop.eup %5710  ;;  %v4393_v0 = vmul.f32 %v5709_v52, %v5707_v48 }
 0xa07   :  { %v4392_v61 = vmul.f32 %v5711_v58, %v11074_v54 }
 0xa09   :  { %v4394_v37 = vadd.f32 %v4393_v0, %v4392_v61  ;;  %v5713_v15 = vpop.eup %5712 }
 0xa0b   :  { %5714 = vtanh.f32 %v4394_v37 }
 0xa18   :  { %v5715_v57 = vpop.eup %5714 }
 0xa19   :  { %v4396_v25 = vmul.f32 %v5715_v57, %v5713_v15 }
 0xa1b   :  { %5452 = vmatmul.mubr.f32.vlgmr.msra.gmra.mxu1 %v4396_v25 }
 0xabb   :  { %v4464_v1 = vpop.f32.mrf.mxu0 }
 0xabc   :  { %v4468_v34 = vadd.f32 %v4464_v1, %v4397_v7 }
 0xabd   :  { %v5418_v4 = vpop.f32.mrf.mxu0 }
 0xabe   :  { %4469 = vst [vmem:[#allocation2 + $0xe] sm:$0x3] %v4468_v34 }
 0xadb   :  { %v4537_v59 = vpop.f32.mrf.mxu1 }
 0xadc   :  { %v4541_v22 = vadd.f32 %v4537_v59, %v4470_v19 }
 0xadd   :  { %v5453_v54 = vpop.f32.mrf.mxu1 }
 0xade   :  { %4542 = vst [vmem:[#allocation2] sm:$0x3] %v4541_v22 }
 0xadf   :  { %6207 = shalt.err (!%p6204_p4)
}
 0xae0   :  { %s6222_s22 = smov 32   ;;  %s6223_s23 = smov 2  }
 0xae1   :  { %4554 = dma.vmem_to_hbm [thread:$0]  %s4549_s20, 256, %s11289_s7, [#allocation3], %s6222_s22, %s6222_s22, %s6223_s23  }
 0xae2   :  { %6216 = dma.done.wait [#allocation3], 256  }
 0xae3   :  { %6217 = vsyncadd [#allocation3], 4294967040 }
 0xae4   :  { %4558 = vsyncpa [#allocation3], 1 }

</bundles_post_ra>
